<compile_context>
chip_gen: v5e
topology: v5e:2x2
jax: 0.10.0
libtpu: 0.0.40
codegen_flags: <defaults>
</compile_context>

<pallas_src>
import numpy as np
import jax
import jax.numpy as jnp
from jax.experimental import pallas as pl
from jax.experimental.pallas import tpu as pltpu

KH = KW = 3          # kernel_size = 3, dilation_rate = 1 branch of convBlock
EPS = 1e-5           # PyTorch BatchNorm2d default eps
LANE = 128
DOT_DTYPE = jnp.bfloat16   # MXU operand dtype (f32 accumulation)


def _round_up(x, m):
    return ((x + m - 1) // m) * m


def _zero_halo(pad_ref, H, W):
    """Zero only the 1-pixel halo of a (H+2, Wp, C) padded scratch.

    The interior is fully rewritten every grid step, so only the border needs
    clearing (done every step so it is correct under megacore grid sharding).
    """
    Wp = pad_ref.shape[1]
    C = pad_ref.shape[2]
    zrow = jnp.zeros((1, Wp, C), DOT_DTYPE)
    zcol = jnp.zeros((H, 1, C), DOT_DTYPE)
    pad_ref[pl.ds(0, 1), :, :] = zrow                # top halo row
    pad_ref[pl.ds(H + 1, 1), :, :] = zrow            # bottom halo row
    pad_ref[pl.ds(1, H), pl.ds(0, 1), :] = zcol      # left halo column
    pad_ref[pl.ds(1, H), pl.ds(W + 1, 1), :] = zcol  # right halo column


def _conv3x3(pad_ref, w_ref, acc_ref, H, W):
    """acc = 3x3 'same' conv over the zero-padded scratch (bf16 MXU, f32 acc).

    The first tap assigns the accumulator (no separate zero-init pass); the
    remaining 8 taps accumulate into the same VMEM scratch.
    """
    Cin = pad_ref.shape[-1]
    tap = 0
    for kh in range(KH):
        for kw in range(KW):
            patch = pad_ref[pl.ds(kh, H), pl.ds(kw, W), :].reshape(H * W, Cin)
            d = jnp.dot(patch, w_ref[tap], preferred_element_type=jnp.float32)
            if tap == 0:
                acc_ref[...] = d
            else:
                acc_ref[...] += d
            tap += 1


def _conv_block_kernel(x_ref,
                       s1_ref, b1_ref, w1_ref,
                       s2_ref, b2_ref, w2_ref,
                       s3_ref, b3_ref, w3_ref, cb3_ref,
                       out_ref,
                       pad1, pad2, acc):
    # x_ref:  (1, H, W, Cin_p)   one batch element per grid step (f32)
    # wX_ref: (9, Cin_p, Cmid_p) 3x3 conv taps, HWIO-flattened, bf16
    # w3_ref: (Cmid_p, Cout_p)   1x1 conv weight, bf16
    # sX/bX:  (1, C_p)           folded BatchNorm scale / bias (f32);
    #                            b2/b3 already absorb the previous conv bias.
    # cb3:    (1, Cout_p)        final 1x1 conv bias (f32)
    _, H, W, _ = x_ref.shape
    Cout = w3_ref.shape[1]

    # ---- BN1 + ReLU (f32) -> zero-padded bf16 scratch -----------------------
    t1 = jnp.maximum(x_ref[0] * s1_ref[...] + b1_ref[...], 0.0)
    _zero_halo(pad1, H, W)
    pad1[pl.ds(1, H), pl.ds(1, W), :] = t1.astype(DOT_DTYPE)

    # ---- conv1: 3x3, stride 1, pad 1 (bias folded into BN2) -----------------
    _conv3x3(pad1, w1_ref, acc, H, W)

    # ---- BN2 + ReLU (f32) -> zero-padded bf16 scratch ------------------------
    t2 = jnp.maximum(acc[...] * s2_ref[...] + b2_ref[...], 0.0)
    _zero_halo(pad2, H, W)
    pad2[pl.ds(1, H), pl.ds(1, W), :] = t2.astype(DOT_DTYPE).reshape(
        H, W, pad2.shape[-1])

    # ---- conv2: 3x3, stride 1, pad 1 (bias folded into BN3, reuses acc) ------
    _conv3x3(pad2, w2_ref, acc, H, W)

    # ---- BN3 + ReLU + conv3 (1x1) --------------------------------------------
    t3 = jnp.maximum(acc[...] * s3_ref[...] + b3_ref[...], 0.0)
    y3 = jnp.dot(t3.astype(DOT_DTYPE), w3_ref[...],
                 preferred_element_type=jnp.float32) + cb3_ref[...]
    out_ref[0] = y3.reshape(H, W, Cout).astype(out_ref.dtype)


def init_params(key, num_in, num_out):
    cmid = num_out // 2
    ks = jax.random.split(key, 9)

    def bn_params(k, c):
        k1, k2, k3, k4 = jax.random.split(k, 4)
        return {"gamma": jax.random.uniform(k1, (c,), jnp.float32, 0.5, 1.5),
                "beta":  jax.random.normal(k2, (c,), jnp.float32) * 0.1,
                "mean":  jax.random.normal(k3, (c,), jnp.float32) * 0.1,
                "var":   jax.random.uniform(k4, (c,), jnp.float32, 0.5, 1.5)}

    return {
        "bn1": bn_params(ks[0], num_in),
        "w1":  jax.random.normal(ks[1], (cmid, num_in, 3, 3), jnp.float32) * 0.2,
        "cb1": jax.random.normal(ks[2], (cmid,), jnp.float32) * 0.1,
        "bn2": bn_params(ks[3], cmid),
        "w2":  jax.random.normal(ks[4], (cmid, cmid, 3, 3), jnp.float32) * 0.2,
        "cb2": jax.random.normal(ks[5], (cmid,), jnp.float32) * 0.1,
        "bn3": bn_params(ks[6], cmid),
        "w3":  jax.random.normal(ks[7], (num_out, cmid, 1, 1), jnp.float32) * 0.2,
        "cb3": jax.random.normal(ks[8], (num_out,), jnp.float32) * 0.1,
    }


def _fold_bn(p):
    scale = p["gamma"] / jnp.sqrt(p["var"] + EPS)
    bias = p["beta"] - p["mean"] * scale
    return scale, bias


def _pad_last(a, target):
    pads = [(0, 0)] * (a.ndim - 1) + [(0, target - a.shape[-1])]
    return jnp.pad(a, pads)


def conv_block_forward(x_nchw, params):
    x = jnp.transpose(x_nchw, (0, 2, 3, 1)).astype(jnp.float32)   # NCHW -> NHWC
    N, H, W, cin = x.shape
    cmid = params["w1"].shape[0]
    cout = params["w3"].shape[0]

    # Lane-dense layout: pad every channel axis to a multiple of 128.
    cpi = _round_up(cin, LANE)
    cpm = _round_up(cmid, LANE)
    cpo = _round_up(cout, LANE)

    xp = _pad_last(x, cpi)

    s1, b1 = _fold_bn(params["bn1"])
    s2, b2 = _fold_bn(params["bn2"])
    s3, b3 = _fold_bn(params["bn3"])
    # Fold conv1/conv2 biases into the following BN bias:
    #   BN(y + cb) = s*y + (b + s*cb)
    b2 = b2 + s2 * params["cb1"]
    b3 = b3 + s3 * params["cb2"]

    s1 = _pad_last(s1.reshape(1, -1), cpi); b1 = _pad_last(b1.reshape(1, -1), cpi)
    s2 = _pad_last(s2.reshape(1, -1), cpm); b2 = _pad_last(b2.reshape(1, -1), cpm)
    s3 = _pad_last(s3.reshape(1, -1), cpm); b3 = _pad_last(b3.reshape(1, -1), cpm)
    cb3 = _pad_last(params["cb3"].reshape(1, -1), cpo)

    def taps(w, ci_p, co_p):
        # PyTorch (out, in, kh, kw) -> (kh*kw, in, out), zero-padded, bf16.
        t = jnp.transpose(w, (2, 3, 1, 0)).reshape(KH * KW, w.shape[1], w.shape[0])
        t = jnp.pad(t, ((0, 0), (0, ci_p - t.shape[1]), (0, co_p - t.shape[2])))
        return t.astype(DOT_DTYPE)

    w1 = taps(params["w1"], cpi, cpm)
    w2 = taps(params["w2"], cpm, cpm)
    w3 = jnp.pad(jnp.transpose(params["w3"][:, :, 0, 0], (1, 0)),
                 ((0, cpm - cmid), (0, cpo - cout))).astype(DOT_DTYPE)

    wp = _round_up(W + 2, 8)   # sublane-aligned padded-scratch width

    def full(shape):
        return pl.BlockSpec(shape, lambda n, _s=len(shape): (0,) * _s)

    out_nhwc = pl.pallas_call(
        _conv_block_kernel,
        out_shape=jax.ShapeDtypeStruct((N, H, W, cpo), jnp.float32),
        grid=(N,),
        in_specs=[
            pl.BlockSpec((1, H, W, cpi), lambda n: (n, 0, 0, 0)),
            full((1, cpi)), full((1, cpi)),
            full((KH * KW, cpi, cpm)),
            full((1, cpm)), full((1, cpm)),
            full((KH * KW, cpm, cpm)),
            full((1, cpm)), full((1, cpm)),
            full((cpm, cpo)), full((1, cpo)),
        ],
        out_specs=pl.BlockSpec((1, H, W, cpo), lambda n: (n, 0, 0, 0)),
        scratch_shapes=[
            pltpu.VMEM((H + 2, wp, cpi), DOT_DTYPE),   # zero-padded conv1 input
            pltpu.VMEM((H + 2, wp, cpm), DOT_DTYPE),   # zero-padded conv2 input
            pltpu.VMEM((H * W, cpm), jnp.float32),     # shared conv accumulator
        ],
        compiler_params=pltpu.CompilerParams(
            dimension_semantics=("parallel",),
            vmem_limit_bytes=32 * 1024 * 1024),
    )(xp, s1, b1, w1, s2, b2, w2, s3, b3, w3, cb3)

    return jnp.transpose(out_nhwc[..., :cout], (0, 3, 1, 2))   # NHWC -> NCHW


def reference_forward(x_nchw, params):
    """Pure-JAX/XLA reference matching the PyTorch forward (eval-mode BN, f32)."""
    def bn(x, p):
        scale = p["gamma"] / jnp.sqrt(p["var"] + EPS)
        bias = p["beta"] - p["mean"] * scale
        return x * scale[None, :, None, None] + bias[None, :, None, None]

    def conv(x, w, b, pad):
        y = jax.lax.conv_general_dilated(
            x, w, window_strides=(1, 1), padding=[(pad, pad), (pad, pad)],
            dimension_numbers=("NCHW", "OIHW", "NCHW"))
        return y + b[None, :, None, None]

    t = jax.nn.relu(bn(x_nchw, params["bn1"]))
    t = conv(t, params["w1"], params["cb1"], 1)
    t = jax.nn.relu(bn(t, params["bn2"]))
    t = conv(t, params["w2"], params["cb2"], 1)
    t = jax.nn.relu(bn(t, params["bn3"]))
    t = conv(t, params["w3"], params["cb3"], 0)
    return t


if __name__ == "__main__":
    num_in, num_out = 4, 8
    N, H, W = 2, 16, 16

    key = jax.random.PRNGKey(0)
    kx, kp = jax.random.split(key)
    x = jax.random.normal(kx, (N, num_in, H, W), jnp.float32)
    params = init_params(kp, num_in, num_out)

    out = conv_block_forward(x, params)
    jax.block_until_ready(out)

    ref = reference_forward(x, params)
    # bf16 MXU operands with f32 accumulation -> loosened tolerance vs f32 ref.
    np.testing.assert_allclose(np.asarray(out), np.asarray(ref),
                               rtol=5e-2, atol=1e-1)
    print("KERNEL_OK")
</pallas_src>

<mosaic_0001>
module attributes {stable_mosaic.version = 11 : i64} {
  func.func @_conv_block_kernel(%arg0: i32, %arg1: memref<1x16x16x128xf32, #tpu.memory_space<vmem>>, %arg2: memref<1x128xf32, #tpu.memory_space<vmem>>, %arg3: memref<1x128xf32, #tpu.memory_space<vmem>>, %arg4: memref<9x128x128xbf16, #tpu.memory_space<vmem>>, %arg5: memref<1x128xf32, #tpu.memory_space<vmem>>, %arg6: memref<1x128xf32, #tpu.memory_space<vmem>>, %arg7: memref<9x128x128xbf16, #tpu.memory_space<vmem>>, %arg8: memref<1x128xf32, #tpu.memory_space<vmem>>, %arg9: memref<1x128xf32, #tpu.memory_space<vmem>>, %arg10: memref<128x128xbf16, #tpu.memory_space<vmem>>, %arg11: memref<1x128xf32, #tpu.memory_space<vmem>>, %arg12: memref<1x16x16x128xf32, #tpu.memory_space<vmem>>, %arg13: memref<18x24x128xbf16, #tpu.memory_space<vmem>>, %arg14: memref<18x24x128xbf16, #tpu.memory_space<vmem>>, %arg15: memref<256x128xf32, #tpu.memory_space<vmem>>) attributes {dimension_semantics = [#tpu.dimension_semantics<parallel>], iteration_bounds = array<i64: 2>, scalar_prefetch = 0 : i64, scratch_operands = 3 : i64, tpu.core_type = #tpu.core_type<tc>, window_params = [{transform_indices = @transform_0, window_bounds = array<i64: 1, 16, 16, 128>}, {pipeline_mode = #tpu.pipeline_mode<synchronous>, transform_indices = @transform_1, window_bounds = array<i64: 1, 128>}, {pipeline_mode = #tpu.pipeline_mode<synchronous>, transform_indices = @transform_2, window_bounds = array<i64: 1, 128>}, {pipeline_mode = #tpu.pipeline_mode<synchronous>, transform_indices = @transform_3, window_bounds = array<i64: 9, 128, 128>}, {pipeline_mode = #tpu.pipeline_mode<synchronous>, transform_indices = @transform_4, window_bounds = array<i64: 1, 128>}, {pipeline_mode = #tpu.pipeline_mode<synchronous>, transform_indices = @transform_5, window_bounds = array<i64: 1, 128>}, {pipeline_mode = #tpu.pipeline_mode<synchronous>, transform_indices = @transform_6, window_bounds = array<i64: 9, 128, 128>}, {pipeline_mode = #tpu.pipeline_mode<synchronous>, transform_indices = @transform_7, window_bounds = array<i64: 1, 128>}, {pipeline_mode = #tpu.pipeline_mode<synchronous>, transform_indices = @transform_8, window_bounds = array<i64: 1, 128>}, {pipeline_mode = #tpu.pipeline_mode<synchronous>, transform_indices = @transform_9, window_bounds = array<i64: 128, 128>}, {pipeline_mode = #tpu.pipeline_mode<synchronous>, transform_indices = @transform_10, window_bounds = array<i64: 1, 128>}, {transform_indices = @transform_11, window_bounds = array<i64: 1, 16, 16, 128>}]} {
    %c0 = arith.constant 0 : index
    %c0_0 = arith.constant 0 : index
    %c0_1 = arith.constant 0 : index
    %c0_2 = arith.constant 0 : index
    %0 = vector.load %arg1[%c0, %c0_0, %c0_1, %c0_2] : memref<1x16x16x128xf32, #tpu.memory_space<vmem>>, vector<1x16x16x128xf32>
    %1 = vector.shape_cast %0 : vector<1x16x16x128xf32> to vector<16x16x128xf32>
    %c0_3 = arith.constant 0 : index
    %c0_4 = arith.constant 0 : index
    %2 = vector.load %arg2[%c0_3, %c0_4] : memref<1x128xf32, #tpu.memory_space<vmem>>, vector<1x128xf32>
    %3 = vector.shape_cast %2 : vector<1x128xf32> to vector<1x1x128xf32>
    %4 = vector.broadcast %3 : vector<1x1x128xf32> to vector<16x16x128xf32>
    %5 = arith.mulf %1, %4 : vector<16x16x128xf32>
    %c0_5 = arith.constant 0 : index
    %c0_6 = arith.constant 0 : index
    %6 = vector.load %arg3[%c0_5, %c0_6] : memref<1x128xf32, #tpu.memory_space<vmem>>, vector<1x128xf32>
    %7 = vector.shape_cast %6 : vector<1x128xf32> to vector<1x1x128xf32>
    %8 = vector.broadcast %7 : vector<1x1x128xf32> to vector<16x16x128xf32>
    %9 = arith.addf %5, %8 : vector<16x16x128xf32>
    %cst = arith.constant 0.000000e+00 : f32
    %10 = vector.broadcast %cst : f32 to vector<16x16x128xf32>
    %11 = arith.maximumf %9, %10 : vector<16x16x128xf32>
    %cst_7 = arith.constant 0.000000e+00 : bf16
    %12 = vector.broadcast %cst_7 : bf16 to vector<1x24x128xbf16>
    %cst_8 = arith.constant 0.000000e+00 : bf16
    %13 = vector.broadcast %cst_8 : bf16 to vector<16x1x128xbf16>
    %c0_9 = arith.constant 0 : index
    %c0_10 = arith.constant 0 : index
    %c0_11 = arith.constant 0 : index
    %14 = vector.load %arg13[%c0_9, %c0_10, %c0_11] : memref<18x24x128xbf16, #tpu.memory_space<vmem>>, vector<1x24x128xbf16>
    tpu.vector_store %arg13[%c0_9, %c0_10, %c0_11], %12 {strides = array<i32>} : memref<18x24x128xbf16, #tpu.memory_space<vmem>>, vector<1x24x128xbf16>,
    %c17 = arith.constant 17 : index
    %c0_12 = arith.constant 0 : index
    %c0_13 = arith.constant 0 : index
    %15 = vector.load %arg13[%c17, %c0_12, %c0_13] : memref<18x24x128xbf16, #tpu.memory_space<vmem>>, vector<1x24x128xbf16>
    tpu.vector_store %arg13[%c17, %c0_12, %c0_13], %12 {strides = array<i32>} : memref<18x24x128xbf16, #tpu.memory_space<vmem>>, vector<1x24x128xbf16>,
    %c1 = arith.constant 1 : index
    %c0_14 = arith.constant 0 : index
    %c0_15 = arith.constant 0 : index
    %16 = vector.load %arg13[%c1, %c0_14, %c0_15] : memref<18x24x128xbf16, #tpu.memory_space<vmem>>, vector<16x1x128xbf16>
    tpu.vector_store %arg13[%c1, %c0_14, %c0_15], %13 {strides = array<i32>} : memref<18x24x128xbf16, #tpu.memory_space<vmem>>, vector<16x1x128xbf16>,
    %c1_16 = arith.constant 1 : index
    %c17_17 = arith.constant 17 : index
    %c0_18 = arith.constant 0 : index
    %17 = vector.load %arg13[%c1_16, %c17_17, %c0_18] : memref<18x24x128xbf16, #tpu.memory_space<vmem>>, vector<16x1x128xbf16>
    tpu.vector_store %arg13[%c1_16, %c17_17, %c0_18], %13 {strides = array<i32>} : memref<18x24x128xbf16, #tpu.memory_space<vmem>>, vector<16x1x128xbf16>,
    %18 = arith.truncf %11 : vector<16x16x128xf32> to vector<16x16x128xbf16>
    %c1_19 = arith.constant 1 : index
    %c1_20 = arith.constant 1 : index
    %c0_21 = arith.constant 0 : index
    %19 = vector.load %arg13[%c1_19, %c1_20, %c0_21] : memref<18x24x128xbf16, #tpu.memory_space<vmem>>, vector<16x16x128xbf16>
    tpu.vector_store %arg13[%c1_19, %c1_20, %c0_21], %18 {strides = array<i32>} : memref<18x24x128xbf16, #tpu.memory_space<vmem>>, vector<16x16x128xbf16>,
    %c0_22 = arith.constant 0 : index
    %c0_23 = arith.constant 0 : index
    %c0_24 = arith.constant 0 : index
    %20 = vector.load %arg13[%c0_22, %c0_23, %c0_24] : memref<18x24x128xbf16, #tpu.memory_space<vmem>>, vector<16x16x128xbf16>
    %21 = vector.shape_cast %20 : vector<16x16x128xbf16> to vector<256x128xbf16>
    %c0_25 = arith.constant 0 : index
    %c0_26 = arith.constant 0 : index
    %c0_27 = arith.constant 0 : index
    %22 = vector.load %arg4[%c0_25, %c0_26, %c0_27] : memref<9x128x128xbf16, #tpu.memory_space<vmem>>, vector<1x128x128xbf16>
    %23 = vector.shape_cast %22 : vector<1x128x128xbf16> to vector<128x128xbf16>
    %cst_28 = arith.constant dense<0.000000e+00> : vector<256x128xf32>
    %24 = tpu.matmul %21, %23, %cst_28 {dimension_numbers = #tpu.dot_dimension_numbers<[1], [0], [0], [1], [0, 0, 1, 1], [], []>} : vector<256x128xbf16>, vector<128x128xbf16>, vector<256x128xf32> -> vector<256x128xf32>
    %c0_29 = arith.constant 0 : index
    %c0_30 = arith.constant 0 : index
    %25 = vector.load %arg15[%c0_29, %c0_30] : memref<256x128xf32, #tpu.memory_space<vmem>>, vector<256x128xf32>
    tpu.vector_store %arg15[%c0_29, %c0_30], %24 {strides = array<i32>} : memref<256x128xf32, #tpu.memory_space<vmem>>, vector<256x128xf32>,
    %c0_31 = arith.constant 0 : index
    %c1_32 = arith.constant 1 : index
    %c0_33 = arith.constant 0 : index
    %26 = vector.load %arg13[%c0_31, %c1_32, %c0_33] : memref<18x24x128xbf16, #tpu.memory_space<vmem>>, vector<16x16x128xbf16>
    %27 = vector.shape_cast %26 : vector<16x16x128xbf16> to vector<256x128xbf16>
    %c1_34 = arith.constant 1 : index
    %c0_35 = arith.constant 0 : index
    %c0_36 = arith.constant 0 : index
    %28 = vector.load %arg4[%c1_34, %c0_35, %c0_36] : memref<9x128x128xbf16, #tpu.memory_space<vmem>>, vector<1x128x128xbf16>
    %29 = vector.shape_cast %28 : vector<1x128x128xbf16> to vector<128x128xbf16>
    %cst_37 = arith.constant dense<0.000000e+00> : vector<256x128xf32>
    %30 = tpu.matmul %27, %29, %cst_37 {dimension_numbers = #tpu.dot_dimension_numbers<[1], [0], [0], [1], [0, 0, 1, 1], [], []>} : vector<256x128xbf16>, vector<128x128xbf16>, vector<256x128xf32> -> vector<256x128xf32>
    %c0_38 = arith.constant 0 : index
    %c0_39 = arith.constant 0 : index
    %31 = vector.load %arg15[%c0_38, %c0_39] : memref<256x128xf32, #tpu.memory_space<vmem>>, vector<256x128xf32>
    %32 = arith.addf %31, %30 : vector<256x128xf32>
    %c0_40 = arith.constant 0 : index
    %c0_41 = arith.constant 0 : index
    %33 = vector.load %arg15[%c0_40, %c0_41] : memref<256x128xf32, #tpu.memory_space<vmem>>, vector<256x128xf32>
    tpu.vector_store %arg15[%c0_40, %c0_41], %32 {strides = array<i32>} : memref<256x128xf32, #tpu.memory_space<vmem>>, vector<256x128xf32>,
    %c0_42 = arith.constant 0 : index
    %c2 = arith.constant 2 : index
    %c0_43 = arith.constant 0 : index
    %34 = vector.load %arg13[%c0_42, %c2, %c0_43] : memref<18x24x128xbf16, #tpu.memory_space<vmem>>, vector<16x16x128xbf16>
    %35 = vector.shape_cast %34 : vector<16x16x128xbf16> to vector<256x128xbf16>
    %c2_44 = arith.constant 2 : index
    %c0_45 = arith.constant 0 : index
    %c0_46 = arith.constant 0 : index
    %36 = vector.load %arg4[%c2_44, %c0_45, %c0_46] : memref<9x128x128xbf16, #tpu.memory_space<vmem>>, vector<1x128x128xbf16>
    %37 = vector.shape_cast %36 : vector<1x128x128xbf16> to vector<128x128xbf16>
    %cst_47 = arith.constant dense<0.000000e+00> : vector<256x128xf32>
    %38 = tpu.matmul %35, %37, %cst_47 {dimension_numbers = #tpu.dot_dimension_numbers<[1], [0], [0], [1], [0, 0, 1, 1], [], []>} : vector<256x128xbf16>, vector<128x128xbf16>, vector<256x128xf32> -> vector<256x128xf32>
    %c0_48 = arith.constant 0 : index
    %c0_49 = arith.constant 0 : index
    %39 = vector.load %arg15[%c0_48, %c0_49] : memref<256x128xf32, #tpu.memory_space<vmem>>, vector<256x128xf32>
    %40 = arith.addf %39, %38 : vector<256x128xf32>
    %c0_50 = arith.constant 0 : index
    %c0_51 = arith.constant 0 : index
    %41 = vector.load %arg15[%c0_50, %c0_51] : memref<256x128xf32, #tpu.memory_space<vmem>>, vector<256x128xf32>
    tpu.vector_store %arg15[%c0_50, %c0_51], %40 {strides = array<i32>} : memref<256x128xf32, #tpu.memory_space<vmem>>, vector<256x128xf32>,
    %c1_52 = arith.constant 1 : index
    %c0_53 = arith.constant 0 : index
    %c0_54 = arith.constant 0 : index
    %42 = vector.load %arg13[%c1_52, %c0_53, %c0_54] : memref<18x24x128xbf16, #tpu.memory_space<vmem>>, vector<16x16x128xbf16>
    %43 = vector.shape_cast %42 : vector<16x16x128xbf16> to vector<256x128xbf16>
    %c3 = arith.constant 3 : index
    %c0_55 = arith.constant 0 : index
    %c0_56 = arith.constant 0 : index
    %44 = vector.load %arg4[%c3, %c0_55, %c0_56] : memref<9x128x128xbf16, #tpu.memory_space<vmem>>, vector<1x128x128xbf16>
    %45 = vector.shape_cast %44 : vector<1x128x128xbf16> to vector<128x128xbf16>
    %cst_57 = arith.constant dense<0.000000e+00> : vector<256x128xf32>
    %46 = tpu.matmul %43, %45, %cst_57 {dimension_numbers = #tpu.dot_dimension_numbers<[1], [0], [0], [1], [0, 0, 1, 1], [], []>} : vector<256x128xbf16>, vector<128x128xbf16>, vector<256x128xf32> -> vector<256x128xf32>
    %c0_58 = arith.constant 0 : index
    %c0_59 = arith.constant 0 : index
    %47 = vector.load %arg15[%c0_58, %c0_59] : memref<256x128xf32, #tpu.memory_space<vmem>>, vector<256x128xf32>
    %48 = arith.addf %47, %46 : vector<256x128xf32>
    %c0_60 = arith.constant 0 : index
    %c0_61 = arith.constant 0 : index
    %49 = vector.load %arg15[%c0_60, %c0_61] : memref<256x128xf32, #tpu.memory_space<vmem>>, vector<256x128xf32>
    tpu.vector_store %arg15[%c0_60, %c0_61], %48 {strides = array<i32>} : memref<256x128xf32, #tpu.memory_space<vmem>>, vector<256x128xf32>,
    %c1_62 = arith.constant 1 : index
    %c1_63 = arith.constant 1 : index
    %c0_64 = arith.constant 0 : index
    %50 = vector.load %arg13[%c1_62, %c1_63, %c0_64] : memref<18x24x128xbf16, #tpu.memory_space<vmem>>, vector<16x16x128xbf16>
    %51 = vector.shape_cast %50 : vector<16x16x128xbf16> to vector<256x128xbf16>
    %c4 = arith.constant 4 : index
    %c0_65 = arith.constant 0 : index
    %c0_66 = arith.constant 0 : index
    %52 = vector.load %arg4[%c4, %c0_65, %c0_66] : memref<9x128x128xbf16, #tpu.memory_space<vmem>>, vector<1x128x128xbf16>
    %53 = vector.shape_cast %52 : vector<1x128x128xbf16> to vector<128x128xbf16>
    %cst_67 = arith.constant dense<0.000000e+00> : vector<256x128xf32>
    %54 = tpu.matmul %51, %53, %cst_67 {dimension_numbers = #tpu.dot_dimension_numbers<[1], [0], [0], [1], [0, 0, 1, 1], [], []>} : vector<256x128xbf16>, vector<128x128xbf16>, vector<256x128xf32> -> vector<256x128xf32>
    %c0_68 = arith.constant 0 : index
    %c0_69 = arith.constant 0 : index
    %55 = vector.load %arg15[%c0_68, %c0_69] : memref<256x128xf32, #tpu.memory_space<vmem>>, vector<256x128xf32>
    %56 = arith.addf %55, %54 : vector<256x128xf32>
    %c0_70 = arith.constant 0 : index
    %c0_71 = arith.constant 0 : index
    %57 = vector.load %arg15[%c0_70, %c0_71] : memref<256x128xf32, #tpu.memory_space<vmem>>, vector<256x128xf32>
    tpu.vector_store %arg15[%c0_70, %c0_71], %56 {strides = array<i32>} : memref<256x128xf32, #tpu.memory_space<vmem>>, vector<256x128xf32>,
    %c1_72 = arith.constant 1 : index
    %c2_73 = arith.constant 2 : index
    %c0_74 = arith.constant 0 : index
    %58 = vector.load %arg13[%c1_72, %c2_73, %c0_74] : memref<18x24x128xbf16, #tpu.memory_space<vmem>>, vector<16x16x128xbf16>
    %59 = vector.shape_cast %58 : vector<16x16x128xbf16> to vector<256x128xbf16>
    %c5 = arith.constant 5 : index
    %c0_75 = arith.constant 0 : index
    %c0_76 = arith.constant 0 : index
    %60 = vector.load %arg4[%c5, %c0_75, %c0_76] : memref<9x128x128xbf16, #tpu.memory_space<vmem>>, vector<1x128x128xbf16>
    %61 = vector.shape_cast %60 : vector<1x128x128xbf16> to vector<128x128xbf16>
    %cst_77 = arith.constant dense<0.000000e+00> : vector<256x128xf32>
    %62 = tpu.matmul %59, %61, %cst_77 {dimension_numbers = #tpu.dot_dimension_numbers<[1], [0], [0], [1], [0, 0, 1, 1], [], []>} : vector<256x128xbf16>, vector<128x128xbf16>, vector<256x128xf32> -> vector<256x128xf32>
    %c0_78 = arith.constant 0 : index
    %c0_79 = arith.constant 0 : index
    %63 = vector.load %arg15[%c0_78, %c0_79] : memref<256x128xf32, #tpu.memory_space<vmem>>, vector<256x128xf32>
    %64 = arith.addf %63, %62 : vector<256x128xf32>
    %c0_80 = arith.constant 0 : index
    %c0_81 = arith.constant 0 : index
    %65 = vector.load %arg15[%c0_80, %c0_81] : memref<256x128xf32, #tpu.memory_space<vmem>>, vector<256x128xf32>
    tpu.vector_store %arg15[%c0_80, %c0_81], %64 {strides = array<i32>} : memref<256x128xf32, #tpu.memory_space<vmem>>, vector<256x128xf32>,
    %c2_82 = arith.constant 2 : index
    %c0_83 = arith.constant 0 : index
    %c0_84 = arith.constant 0 : index
    %66 = vector.load %arg13[%c2_82, %c0_83, %c0_84] : memref<18x24x128xbf16, #tpu.memory_space<vmem>>, vector<16x16x128xbf16>
    %67 = vector.shape_cast %66 : vector<16x16x128xbf16> to vector<256x128xbf16>
    %c6 = arith.constant 6 : index
    %c0_85 = arith.constant 0 : index
    %c0_86 = arith.constant 0 : index
    %68 = vector.load %arg4[%c6, %c0_85, %c0_86] : memref<9x128x128xbf16, #tpu.memory_space<vmem>>, vector<1x128x128xbf16>
    %69 = vector.shape_cast %68 : vector<1x128x128xbf16> to vector<128x128xbf16>
    %cst_87 = arith.constant dense<0.000000e+00> : vector<256x128xf32>
    %70 = tpu.matmul %67, %69, %cst_87 {dimension_numbers = #tpu.dot_dimension_numbers<[1], [0], [0], [1], [0, 0, 1, 1], [], []>} : vector<256x128xbf16>, vector<128x128xbf16>, vector<256x128xf32> -> vector<256x128xf32>
    %c0_88 = arith.constant 0 : index
    %c0_89 = arith.constant 0 : index
    %71 = vector.load %arg15[%c0_88, %c0_89] : memref<256x128xf32, #tpu.memory_space<vmem>>, vector<256x128xf32>
    %72 = arith.addf %71, %70 : vector<256x128xf32>
    %c0_90 = arith.constant 0 : index
    %c0_91 = arith.constant 0 : index
    %73 = vector.load %arg15[%c0_90, %c0_91] : memref<256x128xf32, #tpu.memory_space<vmem>>, vector<256x128xf32>
    tpu.vector_store %arg15[%c0_90, %c0_91], %72 {strides = array<i32>} : memref<256x128xf32, #tpu.memory_space<vmem>>, vector<256x128xf32>,
    %c2_92 = arith.constant 2 : index
    %c1_93 = arith.constant 1 : index
    %c0_94 = arith.constant 0 : index
    %74 = vector.load %arg13[%c2_92, %c1_93, %c0_94] : memref<18x24x128xbf16, #tpu.memory_space<vmem>>, vector<16x16x128xbf16>
    %75 = vector.shape_cast %74 : vector<16x16x128xbf16> to vector<256x128xbf16>
    %c7 = arith.constant 7 : index
    %c0_95 = arith.constant 0 : index
    %c0_96 = arith.constant 0 : index
    %76 = vector.load %arg4[%c7, %c0_95, %c0_96] : memref<9x128x128xbf16, #tpu.memory_space<vmem>>, vector<1x128x128xbf16>
    %77 = vector.shape_cast %76 : vector<1x128x128xbf16> to vector<128x128xbf16>
    %cst_97 = arith.constant dense<0.000000e+00> : vector<256x128xf32>
    %78 = tpu.matmul %75, %77, %cst_97 {dimension_numbers = #tpu.dot_dimension_numbers<[1], [0], [0], [1], [0, 0, 1, 1], [], []>} : vector<256x128xbf16>, vector<128x128xbf16>, vector<256x128xf32> -> vector<256x128xf32>
    %c0_98 = arith.constant 0 : index
    %c0_99 = arith.constant 0 : index
    %79 = vector.load %arg15[%c0_98, %c0_99] : memref<256x128xf32, #tpu.memory_space<vmem>>, vector<256x128xf32>
    %80 = arith.addf %79, %78 : vector<256x128xf32>
    %c0_100 = arith.constant 0 : index
    %c0_101 = arith.constant 0 : index
    %81 = vector.load %arg15[%c0_100, %c0_101] : memref<256x128xf32, #tpu.memory_space<vmem>>, vector<256x128xf32>
    tpu.vector_store %arg15[%c0_100, %c0_101], %80 {strides = array<i32>} : memref<256x128xf32, #tpu.memory_space<vmem>>, vector<256x128xf32>,
    %c2_102 = arith.constant 2 : index
    %c2_103 = arith.constant 2 : index
    %c0_104 = arith.constant 0 : index
    %82 = vector.load %arg13[%c2_102, %c2_103, %c0_104] : memref<18x24x128xbf16, #tpu.memory_space<vmem>>, vector<16x16x128xbf16>
    %83 = vector.shape_cast %82 : vector<16x16x128xbf16> to vector<256x128xbf16>
    %c8 = arith.constant 8 : index
    %c0_105 = arith.constant 0 : index
    %c0_106 = arith.constant 0 : index
    %84 = vector.load %arg4[%c8, %c0_105, %c0_106] : memref<9x128x128xbf16, #tpu.memory_space<vmem>>, vector<1x128x128xbf16>
    %85 = vector.shape_cast %84 : vector<1x128x128xbf16> to vector<128x128xbf16>
    %cst_107 = arith.constant dense<0.000000e+00> : vector<256x128xf32>
    %86 = tpu.matmul %83, %85, %cst_107 {dimension_numbers = #tpu.dot_dimension_numbers<[1], [0], [0], [1], [0, 0, 1, 1], [], []>} : vector<256x128xbf16>, vector<128x128xbf16>, vector<256x128xf32> -> vector<256x128xf32>
    %c0_108 = arith.constant 0 : index
    %c0_109 = arith.constant 0 : index
    %87 = vector.load %arg15[%c0_108, %c0_109] : memref<256x128xf32, #tpu.memory_space<vmem>>, vector<256x128xf32>
    %88 = arith.addf %87, %86 : vector<256x128xf32>
    %c0_110 = arith.constant 0 : index
    %c0_111 = arith.constant 0 : index
    %89 = vector.load %arg15[%c0_110, %c0_111] : memref<256x128xf32, #tpu.memory_space<vmem>>, vector<256x128xf32>
    tpu.vector_store %arg15[%c0_110, %c0_111], %88 {strides = array<i32>} : memref<256x128xf32, #tpu.memory_space<vmem>>, vector<256x128xf32>,
    %c0_112 = arith.constant 0 : index
    %c0_113 = arith.constant 0 : index
    %90 = vector.load %arg15[%c0_112, %c0_113] : memref<256x128xf32, #tpu.memory_space<vmem>>, vector<256x128xf32>
    %c0_114 = arith.constant 0 : index
    %c0_115 = arith.constant 0 : index
    %91 = vector.load %arg5[%c0_114, %c0_115] : memref<1x128xf32, #tpu.memory_space<vmem>>, vector<1x128xf32>
    %92 = vector.broadcast %91 : vector<1x128xf32> to vector<256x128xf32>
    %93 = arith.mulf %90, %92 : vector<256x128xf32>
    %c0_116 = arith.constant 0 : index
    %c0_117 = arith.constant 0 : index
    %94 = vector.load %arg6[%c0_116, %c0_117] : memref<1x128xf32, #tpu.memory_space<vmem>>, vector<1x128xf32>
    %95 = vector.broadcast %94 : vector<1x128xf32> to vector<256x128xf32>
    %96 = arith.addf %93, %95 : vector<256x128xf32>
    %cst_118 = arith.constant 0.000000e+00 : f32
    %97 = vector.broadcast %cst_118 : f32 to vector<256x128xf32>
    %98 = arith.maximumf %96, %97 : vector<256x128xf32>
    %cst_119 = arith.constant 0.000000e+00 : bf16
    %99 = vector.broadcast %cst_119 : bf16 to vector<1x24x128xbf16>
    %cst_120 = arith.constant 0.000000e+00 : bf16
    %100 = vector.broadcast %cst_120 : bf16 to vector<16x1x128xbf16>
    %c0_121 = arith.constant 0 : index
    %c0_122 = arith.constant 0 : index
    %c0_123 = arith.constant 0 : index
    %101 = vector.load %arg14[%c0_121, %c0_122, %c0_123] : memref<18x24x128xbf16, #tpu.memory_space<vmem>>, vector<1x24x128xbf16>
    tpu.vector_store %arg14[%c0_121, %c0_122, %c0_123], %99 {strides = array<i32>} : memref<18x24x128xbf16, #tpu.memory_space<vmem>>, vector<1x24x128xbf16>,
    %c17_124 = arith.constant 17 : index
    %c0_125 = arith.constant 0 : index
    %c0_126 = arith.constant 0 : index
    %102 = vector.load %arg14[%c17_124, %c0_125, %c0_126] : memref<18x24x128xbf16, #tpu.memory_space<vmem>>, vector<1x24x128xbf16>
    tpu.vector_store %arg14[%c17_124, %c0_125, %c0_126], %99 {strides = array<i32>} : memref<18x24x128xbf16, #tpu.memory_space<vmem>>, vector<1x24x128xbf16>,
    %c1_127 = arith.constant 1 : index
    %c0_128 = arith.constant 0 : index
    %c0_129 = arith.constant 0 : index
    %103 = vector.load %arg14[%c1_127, %c0_128, %c0_129] : memref<18x24x128xbf16, #tpu.memory_space<vmem>>, vector<16x1x128xbf16>
    tpu.vector_store %arg14[%c1_127, %c0_128, %c0_129], %100 {strides = array<i32>} : memref<18x24x128xbf16, #tpu.memory_space<vmem>>, vector<16x1x128xbf16>,
    %c1_130 = arith.constant 1 : index
    %c17_131 = arith.constant 17 : index
    %c0_132 = arith.constant 0 : index
    %104 = vector.load %arg14[%c1_130, %c17_131, %c0_132] : memref<18x24x128xbf16, #tpu.memory_space<vmem>>, vector<16x1x128xbf16>
    tpu.vector_store %arg14[%c1_130, %c17_131, %c0_132], %100 {strides = array<i32>} : memref<18x24x128xbf16, #tpu.memory_space<vmem>>, vector<16x1x128xbf16>,
    %105 = arith.truncf %98 : vector<256x128xf32> to vector<256x128xbf16>
    %106 = vector.shape_cast %105 : vector<256x128xbf16> to vector<16x16x128xbf16>
    %c1_133 = arith.constant 1 : index
    %c1_134 = arith.constant 1 : index
    %c0_135 = arith.constant 0 : index
    %107 = vector.load %arg14[%c1_133, %c1_134, %c0_135] : memref<18x24x128xbf16, #tpu.memory_space<vmem>>, vector<16x16x128xbf16>
    tpu.vector_store %arg14[%c1_133, %c1_134, %c0_135], %106 {strides = array<i32>} : memref<18x24x128xbf16, #tpu.memory_space<vmem>>, vector<16x16x128xbf16>,
    %c0_136 = arith.constant 0 : index
    %c0_137 = arith.constant 0 : index
    %c0_138 = arith.constant 0 : index
    %108 = vector.load %arg14[%c0_136, %c0_137, %c0_138] : memref<18x24x128xbf16, #tpu.memory_space<vmem>>, vector<16x16x128xbf16>
    %109 = vector.shape_cast %108 : vector<16x16x128xbf16> to vector<256x128xbf16>
    %c0_139 = arith.constant 0 : index
    %c0_140 = arith.constant 0 : index
    %c0_141 = arith.constant 0 : index
    %110 = vector.load %arg7[%c0_139, %c0_140, %c0_141] : memref<9x128x128xbf16, #tpu.memory_space<vmem>>, vector<1x128x128xbf16>
    %111 = vector.shape_cast %110 : vector<1x128x128xbf16> to vector<128x128xbf16>
    %cst_142 = arith.constant dense<0.000000e+00> : vector<256x128xf32>
    %112 = tpu.matmul %109, %111, %cst_142 {dimension_numbers = #tpu.dot_dimension_numbers<[1], [0], [0], [1], [0, 0, 1, 1], [], []>} : vector<256x128xbf16>, vector<128x128xbf16>, vector<256x128xf32> -> vector<256x128xf32>
    %c0_143 = arith.constant 0 : index
    %c0_144 = arith.constant 0 : index
    %113 = vector.load %arg15[%c0_143, %c0_144] : memref<256x128xf32, #tpu.memory_space<vmem>>, vector<256x128xf32>
    tpu.vector_store %arg15[%c0_143, %c0_144], %112 {strides = array<i32>} : memref<256x128xf32, #tpu.memory_space<vmem>>, vector<256x128xf32>,
    %c0_145 = arith.constant 0 : index
    %c1_146 = arith.constant 1 : index
    %c0_147 = arith.constant 0 : index
    %114 = vector.load %arg14[%c0_145, %c1_146, %c0_147] : memref<18x24x128xbf16, #tpu.memory_space<vmem>>, vector<16x16x128xbf16>
    %115 = vector.shape_cast %114 : vector<16x16x128xbf16> to vector<256x128xbf16>
    %c1_148 = arith.constant 1 : index
    %c0_149 = arith.constant 0 : index
    %c0_150 = arith.constant 0 : index
    %116 = vector.load %arg7[%c1_148, %c0_149, %c0_150] : memref<9x128x128xbf16, #tpu.memory_space<vmem>>, vector<1x128x128xbf16>
    %117 = vector.shape_cast %116 : vector<1x128x128xbf16> to vector<128x128xbf16>
    %cst_151 = arith.constant dense<0.000000e+00> : vector<256x128xf32>
    %118 = tpu.matmul %115, %117, %cst_151 {dimension_numbers = #tpu.dot_dimension_numbers<[1], [0], [0], [1], [0, 0, 1, 1], [], []>} : vector<256x128xbf16>, vector<128x128xbf16>, vector<256x128xf32> -> vector<256x128xf32>
    %c0_152 = arith.constant 0 : index
    %c0_153 = arith.constant 0 : index
    %119 = vector.load %arg15[%c0_152, %c0_153] : memref<256x128xf32, #tpu.memory_space<vmem>>, vector<256x128xf32>
    %120 = arith.addf %119, %118 : vector<256x128xf32>
    %c0_154 = arith.constant 0 : index
    %c0_155 = arith.constant 0 : index
    %121 = vector.load %arg15[%c0_154, %c0_155] : memref<256x128xf32, #tpu.memory_space<vmem>>, vector<256x128xf32>
    tpu.vector_store %arg15[%c0_154, %c0_155], %120 {strides = array<i32>} : memref<256x128xf32, #tpu.memory_space<vmem>>, vector<256x128xf32>,
    %c0_156 = arith.constant 0 : index
    %c2_157 = arith.constant 2 : index
    %c0_158 = arith.constant 0 : index
    %122 = vector.load %arg14[%c0_156, %c2_157, %c0_158] : memref<18x24x128xbf16, #tpu.memory_space<vmem>>, vector<16x16x128xbf16>
    %123 = vector.shape_cast %122 : vector<16x16x128xbf16> to vector<256x128xbf16>
    %c2_159 = arith.constant 2 : index
    %c0_160 = arith.constant 0 : index
    %c0_161 = arith.constant 0 : index
    %124 = vector.load %arg7[%c2_159, %c0_160, %c0_161] : memref<9x128x128xbf16, #tpu.memory_space<vmem>>, vector<1x128x128xbf16>
    %125 = vector.shape_cast %124 : vector<1x128x128xbf16> to vector<128x128xbf16>
    %cst_162 = arith.constant dense<0.000000e+00> : vector<256x128xf32>
    %126 = tpu.matmul %123, %125, %cst_162 {dimension_numbers = #tpu.dot_dimension_numbers<[1], [0], [0], [1], [0, 0, 1, 1], [], []>} : vector<256x128xbf16>, vector<128x128xbf16>, vector<256x128xf32> -> vector<256x128xf32>
    %c0_163 = arith.constant 0 : index
    %c0_164 = arith.constant 0 : index
    %127 = vector.load %arg15[%c0_163, %c0_164] : memref<256x128xf32, #tpu.memory_space<vmem>>, vector<256x128xf32>
    %128 = arith.addf %127, %126 : vector<256x128xf32>
    %c0_165 = arith.constant 0 : index
    %c0_166 = arith.constant 0 : index
    %129 = vector.load %arg15[%c0_165, %c0_166] : memref<256x128xf32, #tpu.memory_space<vmem>>, vector<256x128xf32>
    tpu.vector_store %arg15[%c0_165, %c0_166], %128 {strides = array<i32>} : memref<256x128xf32, #tpu.memory_space<vmem>>, vector<256x128xf32>,
    %c1_167 = arith.constant 1 : index
    %c0_168 = arith.constant 0 : index
    %c0_169 = arith.constant 0 : index
    %130 = vector.load %arg14[%c1_167, %c0_168, %c0_169] : memref<18x24x128xbf16, #tpu.memory_space<vmem>>, vector<16x16x128xbf16>
    %131 = vector.shape_cast %130 : vector<16x16x128xbf16> to vector<256x128xbf16>
    %c3_170 = arith.constant 3 : index
    %c0_171 = arith.constant 0 : index
    %c0_172 = arith.constant 0 : index
    %132 = vector.load %arg7[%c3_170, %c0_171, %c0_172] : memref<9x128x128xbf16, #tpu.memory_space<vmem>>, vector<1x128x128xbf16>
    %133 = vector.shape_cast %132 : vector<1x128x128xbf16> to vector<128x128xbf16>
    %cst_173 = arith.constant dense<0.000000e+00> : vector<256x128xf32>
    %134 = tpu.matmul %131, %133, %cst_173 {dimension_numbers = #tpu.dot_dimension_numbers<[1], [0], [0], [1], [0, 0, 1, 1], [], []>} : vector<256x128xbf16>, vector<128x128xbf16>, vector<256x128xf32> -> vector<256x128xf32>
    %c0_174 = arith.constant 0 : index
    %c0_175 = arith.constant 0 : index
    %135 = vector.load %arg15[%c0_174, %c0_175] : memref<256x128xf32, #tpu.memory_space<vmem>>, vector<256x128xf32>
    %136 = arith.addf %135, %134 : vector<256x128xf32>
    %c0_176 = arith.constant 0 : index
    %c0_177 = arith.constant 0 : index
    %137 = vector.load %arg15[%c0_176, %c0_177] : memref<256x128xf32, #tpu.memory_space<vmem>>, vector<256x128xf32>
    tpu.vector_store %arg15[%c0_176, %c0_177], %136 {strides = array<i32>} : memref<256x128xf32, #tpu.memory_space<vmem>>, vector<256x128xf32>,
    %c1_178 = arith.constant 1 : index
    %c1_179 = arith.constant 1 : index
    %c0_180 = arith.constant 0 : index
    %138 = vector.load %arg14[%c1_178, %c1_179, %c0_180] : memref<18x24x128xbf16, #tpu.memory_space<vmem>>, vector<16x16x128xbf16>
    %139 = vector.shape_cast %138 : vector<16x16x128xbf16> to vector<256x128xbf16>
    %c4_181 = arith.constant 4 : index
    %c0_182 = arith.constant 0 : index
    %c0_183 = arith.constant 0 : index
    %140 = vector.load %arg7[%c4_181, %c0_182, %c0_183] : memref<9x128x128xbf16, #tpu.memory_space<vmem>>, vector<1x128x128xbf16>
    %141 = vector.shape_cast %140 : vector<1x128x128xbf16> to vector<128x128xbf16>
    %cst_184 = arith.constant dense<0.000000e+00> : vector<256x128xf32>
    %142 = tpu.matmul %139, %141, %cst_184 {dimension_numbers = #tpu.dot_dimension_numbers<[1], [0], [0], [1], [0, 0, 1, 1], [], []>} : vector<256x128xbf16>, vector<128x128xbf16>, vector<256x128xf32> -> vector<256x128xf32>
    %c0_185 = arith.constant 0 : index
    %c0_186 = arith.constant 0 : index
    %143 = vector.load %arg15[%c0_185, %c0_186] : memref<256x128xf32, #tpu.memory_space<vmem>>, vector<256x128xf32>
    %144 = arith.addf %143, %142 : vector<256x128xf32>
    %c0_187 = arith.constant 0 : index
    %c0_188 = arith.constant 0 : index
    %145 = vector.load %arg15[%c0_187, %c0_188] : memref<256x128xf32, #tpu.memory_space<vmem>>, vector<256x128xf32>
    tpu.vector_store %arg15[%c0_187, %c0_188], %144 {strides = array<i32>} : memref<256x128xf32, #tpu.memory_space<vmem>>, vector<256x128xf32>,
    %c1_189 = arith.constant 1 : index
    %c2_190 = arith.constant 2 : index
    %c0_191 = arith.constant 0 : index
    %146 = vector.load %arg14[%c1_189, %c2_190, %c0_191] : memref<18x24x128xbf16, #tpu.memory_space<vmem>>, vector<16x16x128xbf16>
    %147 = vector.shape_cast %146 : vector<16x16x128xbf16> to vector<256x128xbf16>
    %c5_192 = arith.constant 5 : index
    %c0_193 = arith.constant 0 : index
    %c0_194 = arith.constant 0 : index
    %148 = vector.load %arg7[%c5_192, %c0_193, %c0_194] : memref<9x128x128xbf16, #tpu.memory_space<vmem>>, vector<1x128x128xbf16>
    %149 = vector.shape_cast %148 : vector<1x128x128xbf16> to vector<128x128xbf16>
    %cst_195 = arith.constant dense<0.000000e+00> : vector<256x128xf32>
    %150 = tpu.matmul %147, %149, %cst_195 {dimension_numbers = #tpu.dot_dimension_numbers<[1], [0], [0], [1], [0, 0, 1, 1], [], []>} : vector<256x128xbf16>, vector<128x128xbf16>, vector<256x128xf32> -> vector<256x128xf32>
    %c0_196 = arith.constant 0 : index
    %c0_197 = arith.constant 0 : index
    %151 = vector.load %arg15[%c0_196, %c0_197] : memref<256x128xf32, #tpu.memory_space<vmem>>, vector<256x128xf32>
    %152 = arith.addf %151, %150 : vector<256x128xf32>
    %c0_198 = arith.constant 0 : index
    %c0_199 = arith.constant 0 : index
    %153 = vector.load %arg15[%c0_198, %c0_199] : memref<256x128xf32, #tpu.memory_space<vmem>>, vector<256x128xf32>
    tpu.vector_store %arg15[%c0_198, %c0_199], %152 {strides = array<i32>} : memref<256x128xf32, #tpu.memory_space<vmem>>, vector<256x128xf32>,
    %c2_200 = arith.constant 2 : index
    %c0_201 = arith.constant 0 : index
    %c0_202 = arith.constant 0 : index
    %154 = vector.load %arg14[%c2_200, %c0_201, %c0_202] : memref<18x24x128xbf16, #tpu.memory_space<vmem>>, vector<16x16x128xbf16>
    %155 = vector.shape_cast %154 : vector<16x16x128xbf16> to vector<256x128xbf16>
    %c6_203 = arith.constant 6 : index
    %c0_204 = arith.constant 0 : index
    %c0_205 = arith.constant 0 : index
    %156 = vector.load %arg7[%c6_203, %c0_204, %c0_205] : memref<9x128x128xbf16, #tpu.memory_space<vmem>>, vector<1x128x128xbf16>
    %157 = vector.shape_cast %156 : vector<1x128x128xbf16> to vector<128x128xbf16>
    %cst_206 = arith.constant dense<0.000000e+00> : vector<256x128xf32>
    %158 = tpu.matmul %155, %157, %cst_206 {dimension_numbers = #tpu.dot_dimension_numbers<[1], [0], [0], [1], [0, 0, 1, 1], [], []>} : vector<256x128xbf16>, vector<128x128xbf16>, vector<256x128xf32> -> vector<256x128xf32>
    %c0_207 = arith.constant 0 : index
    %c0_208 = arith.constant 0 : index
    %159 = vector.load %arg15[%c0_207, %c0_208] : memref<256x128xf32, #tpu.memory_space<vmem>>, vector<256x128xf32>
    %160 = arith.addf %159, %158 : vector<256x128xf32>
    %c0_209 = arith.constant 0 : index
    %c0_210 = arith.constant 0 : index
    %161 = vector.load %arg15[%c0_209, %c0_210] : memref<256x128xf32, #tpu.memory_space<vmem>>, vector<256x128xf32>
    tpu.vector_store %arg15[%c0_209, %c0_210], %160 {strides = array<i32>} : memref<256x128xf32, #tpu.memory_space<vmem>>, vector<256x128xf32>,
    %c2_211 = arith.constant 2 : index
    %c1_212 = arith.constant 1 : index
    %c0_213 = arith.constant 0 : index
    %162 = vector.load %arg14[%c2_211, %c1_212, %c0_213] : memref<18x24x128xbf16, #tpu.memory_space<vmem>>, vector<16x16x128xbf16>
    %163 = vector.shape_cast %162 : vector<16x16x128xbf16> to vector<256x128xbf16>
    %c7_214 = arith.constant 7 : index
    %c0_215 = arith.constant 0 : index
    %c0_216 = arith.constant 0 : index
    %164 = vector.load %arg7[%c7_214, %c0_215, %c0_216] : memref<9x128x128xbf16, #tpu.memory_space<vmem>>, vector<1x128x128xbf16>
    %165 = vector.shape_cast %164 : vector<1x128x128xbf16> to vector<128x128xbf16>
    %cst_217 = arith.constant dense<0.000000e+00> : vector<256x128xf32>
    %166 = tpu.matmul %163, %165, %cst_217 {dimension_numbers = #tpu.dot_dimension_numbers<[1], [0], [0], [1], [0, 0, 1, 1], [], []>} : vector<256x128xbf16>, vector<128x128xbf16>, vector<256x128xf32> -> vector<256x128xf32>
    %c0_218 = arith.constant 0 : index
    %c0_219 = arith.constant 0 : index
    %167 = vector.load %arg15[%c0_218, %c0_219] : memref<256x128xf32, #tpu.memory_space<vmem>>, vector<256x128xf32>
    %168 = arith.addf %167, %166 : vector<256x128xf32>
    %c0_220 = arith.constant 0 : index
    %c0_221 = arith.constant 0 : index
    %169 = vector.load %arg15[%c0_220, %c0_221] : memref<256x128xf32, #tpu.memory_space<vmem>>, vector<256x128xf32>
    tpu.vector_store %arg15[%c0_220, %c0_221], %168 {strides = array<i32>} : memref<256x128xf32, #tpu.memory_space<vmem>>, vector<256x128xf32>,
    %c2_222 = arith.constant 2 : index
    %c2_223 = arith.constant 2 : index
    %c0_224 = arith.constant 0 : index
    %170 = vector.load %arg14[%c2_222, %c2_223, %c0_224] : memref<18x24x128xbf16, #tpu.memory_space<vmem>>, vector<16x16x128xbf16>
    %171 = vector.shape_cast %170 : vector<16x16x128xbf16> to vector<256x128xbf16>
    %c8_225 = arith.constant 8 : index
    %c0_226 = arith.constant 0 : index
    %c0_227 = arith.constant 0 : index
    %172 = vector.load %arg7[%c8_225, %c0_226, %c0_227] : memref<9x128x128xbf16, #tpu.memory_space<vmem>>, vector<1x128x128xbf16>
    %173 = vector.shape_cast %172 : vector<1x128x128xbf16> to vector<128x128xbf16>
    %cst_228 = arith.constant dense<0.000000e+00> : vector<256x128xf32>
    %174 = tpu.matmul %171, %173, %cst_228 {dimension_numbers = #tpu.dot_dimension_numbers<[1], [0], [0], [1], [0, 0, 1, 1], [], []>} : vector<256x128xbf16>, vector<128x128xbf16>, vector<256x128xf32> -> vector<256x128xf32>
    %c0_229 = arith.constant 0 : index
    %c0_230 = arith.constant 0 : index
    %175 = vector.load %arg15[%c0_229, %c0_230] : memref<256x128xf32, #tpu.memory_space<vmem>>, vector<256x128xf32>
    %176 = arith.addf %175, %174 : vector<256x128xf32>
    %c0_231 = arith.constant 0 : index
    %c0_232 = arith.constant 0 : index
    %177 = vector.load %arg15[%c0_231, %c0_232] : memref<256x128xf32, #tpu.memory_space<vmem>>, vector<256x128xf32>
    tpu.vector_store %arg15[%c0_231, %c0_232], %176 {strides = array<i32>} : memref<256x128xf32, #tpu.memory_space<vmem>>, vector<256x128xf32>,
    %c0_233 = arith.constant 0 : index
    %c0_234 = arith.constant 0 : index
    %178 = vector.load %arg15[%c0_233, %c0_234] : memref<256x128xf32, #tpu.memory_space<vmem>>, vector<256x128xf32>
    %c0_235 = arith.constant 0 : index
    %c0_236 = arith.constant 0 : index
    %179 = vector.load %arg8[%c0_235, %c0_236] : memref<1x128xf32, #tpu.memory_space<vmem>>, vector<1x128xf32>
    %180 = vector.broadcast %179 : vector<1x128xf32> to vector<256x128xf32>
    %181 = arith.mulf %178, %180 : vector<256x128xf32>
    %c0_237 = arith.constant 0 : index
    %c0_238 = arith.constant 0 : index
    %182 = vector.load %arg9[%c0_237, %c0_238] : memref<1x128xf32, #tpu.memory_space<vmem>>, vector<1x128xf32>
    %183 = vector.broadcast %182 : vector<1x128xf32> to vector<256x128xf32>
    %184 = arith.addf %181, %183 : vector<256x128xf32>
    %cst_239 = arith.constant 0.000000e+00 : f32
    %185 = vector.broadcast %cst_239 : f32 to vector<256x128xf32>
    %186 = arith.maximumf %184, %185 : vector<256x128xf32>
    %187 = arith.truncf %186 : vector<256x128xf32> to vector<256x128xbf16>
    %c0_240 = arith.constant 0 : index
    %c0_241 = arith.constant 0 : index
    %188 = vector.load %arg10[%c0_240, %c0_241] : memref<128x128xbf16, #tpu.memory_space<vmem>>, vector<128x128xbf16>
    %cst_242 = arith.constant dense<0.000000e+00> : vector<256x128xf32>
    %189 = tpu.matmul %187, %188, %cst_242 {dimension_numbers = #tpu.dot_dimension_numbers<[1], [0], [0], [1], [0, 0, 1, 1], [], []>} : vector<256x128xbf16>, vector<128x128xbf16>, vector<256x128xf32> -> vector<256x128xf32>
    %c0_243 = arith.constant 0 : index
    %c0_244 = arith.constant 0 : index
    %190 = vector.load %arg11[%c0_243, %c0_244] : memref<1x128xf32, #tpu.memory_space<vmem>>, vector<1x128xf32>
    %191 = vector.broadcast %190 : vector<1x128xf32> to vector<256x128xf32>
    %192 = arith.addf %189, %191 : vector<256x128xf32>
    %193 = vector.shape_cast %192 : vector<256x128xf32> to vector<16x16x128xf32>
    %c0_245 = arith.constant 0 : index
    %c0_246 = arith.constant 0 : index
    %c0_247 = arith.constant 0 : index
    %c0_248 = arith.constant 0 : index
    %194 = vector.load %arg12[%c0_245, %c0_246, %c0_247, %c0_248] : memref<1x16x16x128xf32, #tpu.memory_space<vmem>>, vector<1x16x16x128xf32>
    %195 = vector.shape_cast %194 : vector<1x16x16x128xf32> to vector<16x16x128xf32>
    %196 = vector.shape_cast %193 : vector<16x16x128xf32> to vector<1x16x16x128xf32>
    tpu.vector_store %arg12[%c0_245, %c0_246, %c0_247, %c0_248], %196 {strides = array<i32>} : memref<1x16x16x128xf32, #tpu.memory_space<vmem>>, vector<1x16x16x128xf32>,
    return
  }
  func.func @transform_0(%arg0: i32) -> (i32, i32, i32, i32) {
    %c0_i32 = arith.constant 0 : i32
    %c0_i32_0 = arith.constant 0 : i32
    %c0_i32_1 = arith.constant 0 : i32
    %c0_i32_2 = arith.constant 0 : i32
    return %arg0, %c0_i32, %c0_i32_0, %c0_i32_1 : i32, i32, i32, i32
  }
  func.func @transform_1(%arg0: i32) -> (i32, i32) {
    %c0_i32 = arith.constant 0 : i32
    %c0_i32_0 = arith.constant 0 : i32
    %c0_i32_1 = arith.constant 0 : i32
    return %c0_i32, %c0_i32_0 : i32, i32
  }
  func.func @transform_2(%arg0: i32) -> (i32, i32) {
    %c0_i32 = arith.constant 0 : i32
    %c0_i32_0 = arith.constant 0 : i32
    %c0_i32_1 = arith.constant 0 : i32
    return %c0_i32, %c0_i32_0 : i32, i32
  }
  func.func @transform_3(%arg0: i32) -> (i32, i32, i32) {
    %c0_i32 = arith.constant 0 : i32
    %c0_i32_0 = arith.constant 0 : i32
    %c0_i32_1 = arith.constant 0 : i32
    %c0_i32_2 = arith.constant 0 : i32
    return %c0_i32, %c0_i32_0, %c0_i32_1 : i32, i32, i32
  }
  func.func @transform_4(%arg0: i32) -> (i32, i32) {
    %c0_i32 = arith.constant 0 : i32
    %c0_i32_0 = arith.constant 0 : i32
    %c0_i32_1 = arith.constant 0 : i32
    return %c0_i32, %c0_i32_0 : i32, i32
  }
  func.func @transform_5(%arg0: i32) -> (i32, i32) {
    %c0_i32 = arith.constant 0 : i32
    %c0_i32_0 = arith.constant 0 : i32
    %c0_i32_1 = arith.constant 0 : i32
    return %c0_i32, %c0_i32_0 : i32, i32
  }
  func.func @transform_6(%arg0: i32) -> (i32, i32, i32) {
    %c0_i32 = arith.constant 0 : i32
    %c0_i32_0 = arith.constant 0 : i32
    %c0_i32_1 = arith.constant 0 : i32
    %c0_i32_2 = arith.constant 0 : i32
    return %c0_i32, %c0_i32_0, %c0_i32_1 : i32, i32, i32
  }
  func.func @transform_7(%arg0: i32) -> (i32, i32) {
    %c0_i32 = arith.constant 0 : i32
    %c0_i32_0 = arith.constant 0 : i32
    %c0_i32_1 = arith.constant 0 : i32
    return %c0_i32, %c0_i32_0 : i32, i32
  }
  func.func @transform_8(%arg0: i32) -> (i32, i32) {
    %c0_i32 = arith.constant 0 : i32
    %c0_i32_0 = arith.constant 0 : i32
    %c0_i32_1 = arith.constant 0 : i32
    return %c0_i32, %c0_i32_0 : i32, i32
  }
  func.func @transform_9(%arg0: i32) -> (i32, i32) {
    %c0_i32 = arith.constant 0 : i32
    %c0_i32_0 = arith.constant 0 : i32
    %c0_i32_1 = arith.constant 0 : i32
    return %c0_i32, %c0_i32_0 : i32, i32
  }
  func.func @transform_10(%arg0: i32) -> (i32, i32) {
    %c0_i32 = arith.constant 0 : i32
    %c0_i32_0 = arith.constant 0 : i32
    %c0_i32_1 = arith.constant 0 : i32
    return %c0_i32, %c0_i32_0 : i32, i32
  }
  func.func @transform_11(%arg0: i32) -> (i32, i32, i32, i32) {
    %c0_i32 = arith.constant 0 : i32
    %c0_i32_0 = arith.constant 0 : i32
    %c0_i32_1 = arith.constant 0 : i32
    %c0_i32_2 = arith.constant 0 : i32
    return %arg0, %c0_i32, %c0_i32_0, %c0_i32_1 : i32, i32, i32, i32
  }
}

</mosaic_0001>

<bundles_post_ra>
// kernel: tpu_custom_call.1
= control target key start
LH: loop header
LB: loop body
LE: loop exit
PB: predicated region body
PF: predicated region fallthrough
CT: control target
= control target key end

     0   :  { %s17392_s0 = inlined_call_operand.hbm [shape: f32[2,16,16,128], index: 0, kind: input, shape index: {}]   ;;  %s17393_s1 = inlined_call_operand.hbm [shape: f32[1,128], index: 1, kind: input, shape index: {}]   ;;  %s17394_s2 = inlined_call_operand.vmem [shape: f32[1,128], index: 2, kind: input, shape index: {}]   ;;  %s17395_s3 = inlined_call_operand.hbm [shape: bf16[9,128,128], index: 3, kind: input, shape index: {}]   ;;  %s17396_s4 = inlined_call_operand.vmem [shape: f32[1,128], index: 4, kind: input, shape index: {}]   ;;  %s17397_s5 = inlined_call_operand.vmem [shape: f32[1,128], index: 5, kind: input, shape index: {}]   ;;  %s17398_s6 = inlined_call_operand.hbm [shape: bf16[9,128,128], index: 6, kind: input, shape index: {}]   ;;  %s17399_s7 = inlined_call_operand.vmem [shape: f32[1,128], index: 7, kind: input, shape index: {}]   ;;  %s17400_s8 = inlined_call_operand.vmem [shape: f32[1,128], index: 8, kind: input, shape index: {}]   ;;  %s17401_s9 = inlined_call_operand.hbm [shape: bf16[128,128], index: 9, kind: input, shape index: {}]   ;;  %s17402_s10 = inlined_call_operand.vmem [shape: f32[1,128], index: 10, kind: input, shape index: {}]   ;;  %s17403_s11 = inlined_call_operand.hbm [shape: f32[2,16,16,128], index: 11, kind: output, shape index: {}]  }
   0x1   :  { %17404 = sst [smem:[#allocation48_spill]] %s17393_s1 }
   0x2   :  { %17405 = sst [smem:[#allocation49_spill]] %s17395_s3 }
   0x3   :  { %17406 = sst [smem:[#allocation50_spill]] %s17398_s6 }
   0x4   :  { %17407 = sst [smem:[#allocation51_spill]] %s17401_s9 }
   0x5   :  { %16 = vsyncpa [#allocation6], 0 }
   0x6   :  { %18 = vsyncpa [#allocation6 + $0x1], 0 }
   0x7   :  { %19 = vsyncpa [#allocation9], 0 }
   0x8   :  { %20 = vsyncpa [#allocation12], 0 }
   0x9   :  { %21 = vsyncpa [#allocation7], 0 }
   0xa   :  { %23 = vsyncpa [#allocation7 + $0x1], 0  ;;  %s13901_s17 = smov 0   ;;  %s13903_s18 = smov 0  }
   0xb   :  { %s13905_s19 = smov 0   ;;  %s13907_s20 = smov 0  }
   0xc LB: > { %s13922_s21 = sadd.s32 4294967295, %s13828_s20   ;;  %s12111_s22 = sadd.s32 4294967294, %s13828_s20   ;;  %s13828_s20 = sphi %s13907_s20, %s17579_s20   ;;  %s13824_s19 = sphi %s13905_s19, %s17578_s19   ;;  %s13820_s18 = sphi %s13903_s18, %s17577_s18   ;;  %s13816_s17 = sphi %s13901_s17, %s17576_s17  }
   0xd   : > { %p49_p0 = scmp.ne.s32.totalorder %s13820_s18, %s13816_s17  ;;  %p50_p1 = scmp.eq.s32.totalorder %s13922_s21, 0 }
   0xe   : > { %p283_p2 = scmp.eq.s32.totalorder %s13922_s21, 1  ;;  %p289_p3 = scmp.eq.s32.totalorder %s12111_s22, 1 }
   0xf   : > { %p13931_p4 = por %p50_p1, %p49_p0  ;;  %p12112_p5 = scmp.ge.s32.totalorder %s13828_s20, 1 }
  0x10   : > { %p13936_p6 = por %p289_p3, %p49_p0  ;;  %p296_p7 = scmp.lt.s32.totalorder %s13828_s20, 3 }
  0x11   : > { %s17410_s1 = sld [smem:[#allocation48_spill]]  ;;  %s13830_s29 = smov [#allocation8]  }
  0x12   : > { %p13944_p8 = pnand %p12112_p5, %p296_p7  ;;  %s310_s30 = sshll.u32 %s13830_s29, 4  ;;  %s311_s30 = int_to_ptr.vmem [resolvable:$true] %s310_s30 }
  0x13   : > { %s17413_s6 = sld [smem:[#allocation50_spill]]  ;;  %s13831_s16 = smov [#allocation11]  }
  0x14   : > { %p13515_p10 = pneg %p13944_p8  ;;  %s344_s22 = sshll.u32 %s13831_s16, 4  ;;  %s345_s22 = int_to_ptr.vmem [resolvable:$true] %s344_s22 }
  0x15   : > { %s17414_s3 = sld [smem:[#allocation49_spill]]  ;;  %s13832_s13 = smov 64  }
  0x16   : > { %p13953_p11 = pnand %p13515_p10, %p50_p1  ;;  %s13833_s14 = smov 4  }
  0x17   : > { %s308_s27 = sshll.u32 %s17410_s1, 4  ;;  %s17415_s9 = sld [smem:[#allocation51_spill]]  ;;  %s309_s27 = int_to_ptr.hbm [resolvable:$true] %s308_s27 }
  0x18   : > { %13518 = dma.hbm_to_vmem [thread:$0]  (!%p13953_p11), %s309_s27, 16, %s311_s30, [#allocation9]  }
  0x19   : > { %s342_s15 = sshll.u32 %s17413_s6, 4  ;;  %s13834_s16 = smov [#allocation10]   ;;  %s343_s15 = int_to_ptr.hbm [resolvable:$true] %s342_s15 }
  0x1a   : > { %13524 = dma.hbm_to_vmem [thread:$0]  (!%p13953_p11), %s343_s15, 9216, %s345_s22, [#allocation12], %s13832_s13, %s13832_s13, %s13833_s14  }
  0x1b   : > { %s322_s29 = sshll.u32 %s17414_s3, 4  ;;  %s324_s25 = sshll.u32 %s13834_s16, 4  ;;  %s323_s29 = int_to_ptr.hbm [resolvable:$true] %s322_s29  ;;  %s325_s25 = int_to_ptr.vmem [resolvable:$true] %s324_s25 }
  0x1c   : > { %13521 = dma.hbm_to_vmem [thread:$0]  (!%p13953_p11), %s323_s29, 9216, %s325_s25, [#allocation9], %s13832_s13, %s13832_s13, %s13833_s14  }
  0x1d   : > { %s362_s30 = sshll.u32 %s17415_s9, 4  ;;  %s13835_s26 = smov [#allocation13]   ;;  %s363_s30 = int_to_ptr.hbm [resolvable:$true] %s362_s30 }
  0x1e   : > { %s364_s3 = sshll.u32 %s13835_s26, 4  ;;  %s13975_s15 = sadd.s32 1, %s13828_s20   ;;  %s365_s3 = int_to_ptr.vmem [resolvable:$true] %s364_s3 }
  0x1f   : > { %13527 = dma.hbm_to_vmem [thread:$0]  (!%p13953_p11), %s363_s30, 1024, %s365_s3, [#allocation12], %s13832_s13, %s13832_s13, %s13833_s14  }
  0x20   : > { %s36_s1 = sadd.s32 1, %s13824_s19  ;;  %s33_s22 = ssub.s32 %s13828_s20, %s13975_s15 }
  0x21   : > { %p43_p12 = scmp.ne.s32.totalorder %s13824_s19, %s13820_s18  ;;  %p34_p13 = scmp.eq.s32.totalorder %s33_s22, 0 }
  0x22   : > { %p44_p0 = scmp.eq.s32.totalorder %s13828_s20, 0  ;;  %p13540_p5 = scmp.lt.s32.totalorder %s13828_s20, 2 }
  0x23   : > { %p13985_p3 = por %p283_p2, %p43_p12  ;;  %s381_s16 = sand.u32 1, %s13824_s19  }
  0x24   : > { %s13991_s29 = scalar_select %p34_p13, %s13824_s19, %s36_s1  }
  0x25   : > { %p45_p7 = por %p44_p0, %p43_p12  ;;  %s12118_s12 = sshll.u32 %s381_s16, 8 }
  0x26   : > { %17417 = sst [smem:[#allocation19_spill]] %s13991_s29  ;;  %s13221_s3 = sshll.u32 %s13828_s20, 8 }
  0x27   : > { %s390_s30 = scalar_lea.hbm %s17392_s0, %s13221_s3  ;;  %s385_s25 = scalar_lea.vmem [#allocation5], %s12118_s12 }
  0x28   : > { %s393_s26 = sshll.u32 %s385_s25, 4  ;;  %s391_s22 = sshll.u32 %s390_s30, 4  ;;  %s394_s26 = int_to_ptr.vmem [resolvable:$true] %s393_s26  ;;  %s392_s22 = int_to_ptr.hbm [resolvable:$true] %s391_s22 }
  0x29   : > { %p13998_p2 = pnand %p13540_p5, %p45_p7  ;;  %s382_s1 = scalar_lea.sflag [#allocation6], %s381_s16 }
  0x2a   : > { %s13724_s9 = sshra.s32 %s392_s22, 4  ;;  %s13731_s13 = scalar_lea.hbm %s17392_s0, 512  ;;  %s13725_s9 = int_to_ptr.hbm [resolvable:$true] %s13724_s9 }
  0x2b   : > { %s13726_s29 = scalar_lea.hbm %s13725_s9, 256  ;;  %p13728_p11 = pneg %p13998_p2 }
  0x2c   : > { %p13727_p10 = scmp.ne.s32.totalorder %s13725_s9, %s13726_s29  ;;  %p13732_p0 = scmp.lt.s32.totalorder %s13725_s9, %s17392_s0 }
  0x2d   : > { %p13733_p5 = scmp.lt.s32.totalorder %s13731_s13, %s13726_s29 }
  0x2e   : > { %p13729_p12 = pnand %p13728_p11, %p13727_p10 }
  0x2f   : > { %p13734_p7 = por %p13733_p5, %p13732_p0 }
  0x30   : > { %p13730_p13 = pneg %p13729_p12 }
  0x32   : > { %p13735_p9 = pnand %p13734_p7, %p13730_p13 }
  0x34   : > { %13738 = shalt.err (!%p13735_p9)
}
  0x35   : > { %s13836_s16 = smov 128   ;;  %s13837_s25 = smov 8  }
  0x36   : > { %13531 = dma.hbm_to_vmem [thread:$0]  (!%p13998_p2), %s392_s22, 4096, %s394_s26, %s382_s1, %s13836_s16, %s13836_s16, %s13837_s25  }
  0x37   : > { %405 = sbr.rel (%p13944_p8) target bundleno = 1767 (0x6e7), region = 64 }
  0x3c   : > { %s14015_s3 = sand.u32 1, %s13820_s18  }
  0x3d   : > { %s12122_s9 = sshll.u32 %s14015_s3, 8  ;;  %s408_s29 = scalar_lea.sflag [#allocation6], %s14015_s3 }
  0x3e   : > { %s14021_s12 = scalar_lea.vmem [#allocation5], %s12122_s9 }
  0x3f   : > { %13799 = dma.done.wait (%p13931_p4), %s408_s29, 4096  }
  0x40   : > { %13801 = vsyncadd (%p13931_p4), %s408_s29, 4294963200 }
  0x41   : > { %13803 = dma.done.wait (%p50_p1), [#allocation9], 9232  }
  0x42   : > { %13805 = vsyncadd (%p50_p1), [#allocation9], 4294958064 }
  0x43   : > { %13807 = dma.done.wait (%p50_p1), [#allocation12], 10240  }
  0x44   : > { %13809 = vsyncadd (%p50_p1), [#allocation12], 4294957056  ;;  %v13838_v0 = vmov 0   ;;  %v13245_v1 = vld [vmem:[#allocation10 + $0x38] sm:$0xff]  ;;  %v13244_v4 = vld [vmem:[#allocation10 + $0x30] sm:$0xff]  ;;  %vm616_vm0 = vcmask 1040384  }
  0x45   : > { %608 = vst [vmem:[#allocation2] sm:$0xf] %v13838_v0  ;;  %v14035_v2 = vld [vmem:[#allocation10 + $0x78] sm:$0xff]  ;;  %1377 = vmatpush.bf16.msra.mxu0 %v13245_v1  ;;  %13471 = vmatpush.bf16.msra.mxu3 %v13245_v1  ;;  %v14041_v5 = vld [vmem:[#allocation10 + $0x70] sm:$0xff]  ;;  %vm617_vm1 = vsmask.f32 256 }
  0x46   : > { %609 = vst [vmem:[#allocation2 + $0x4] sm:$0xf] %v13838_v0  ;;  %v14037_v3 = vld [vmem:[#allocation10 + $0xb8] sm:$0xff]  ;;  %2062 = vmatpush.bf16.msra.mxu1 %v14035_v2  ;;  %v14043_v6 = vld [vmem:[#allocation10 + $0xb0] sm:$0xff]  ;;  %vm667_vm2 = vsmask.f32 7938  ;;  %vm14047_vm3 = vmand %vm616_vm0, %vm617_vm1 }
  0x47   : > { %610 = vst [vmem:[#allocation2 + $0x8] sm:$0xf] %v13838_v0  ;;  %2587 = vmatpush.bf16.msra.mxu2 %v14037_v3  ;;  %v13243_v7 = vld [vmem:[#allocation10 + $0x28] sm:$0xff]  ;;  %vm14059_vm4 = vmand %vm616_vm0, %vm667_vm2  ;;  %vm1546_vm5 = vsmask.f32 3328  ;;  %v13242_v12 = vld [vmem:[#allocation10 + $0x20] sm:$0xff] }
  0x48   : > { %612 = vst [vmem:[#allocation2 + $0xcc] sm:$0xf] %v13838_v0  ;;  %v14053_v9 = vld [vmem:[#allocation10 + $0x68] sm:$0xff]  ;;  %vm1547_vm6 = vsmask.f32 7440  ;;  %v495_v14 = vld [vmem:[%s14021_s12 + $0xb8] sm:$0xff] }
  0x49   : > { %613 = vst [vmem:[#allocation2 + $0xd0] sm:$0xf] %v13838_v0  ;;  %1378 = vmatpush.bf16.msra.mxu0 %v13244_v4  ;;  %13472 = vmatpush.bf16.msra.mxu3 %v13244_v4  ;;  %v14055_v10 = vld [vmem:[#allocation10 + $0xa8] sm:$0xff]  ;;  %vm749_vm7 = vsmask.f32 4368  ;;  %vm2343_vm8 = vcmask 1042432   ;;  %vm14102_vm12 = vmor %vm1546_vm5, %vm1547_vm6 }
  0x4a   : > { %614 = vst [vmem:[#allocation2 + $0xd4] sm:$0xf] %v13838_v0  ;;  %2063 = vmatpush.bf16.msra.mxu1 %v14041_v5  ;;  %v494_v13 = vld [vmem:[%s14021_s12 + $0xb0] sm:$0xff]  ;;  %vm2344_vm9 = vcmask 1046532   ;;  %v14065_v15 = vld [vmem:[#allocation10 + $0x60] sm:$0xff]  ;;  %vm1071_vm10 = vcmask 1043456   ;;  %vm14118_vm13 = vmor %vm617_vm1, %vm749_vm7 }
  0x4b   : > { %6201 = vst [vmem:[#allocation3] sm:$0xf] %v13838_v0  ;;  %2588 = vmatpush.bf16.msra.mxu2 %v14043_v6  ;;  %v14067_v16 = vld [vmem:[#allocation10 + $0xa0] sm:$0xff]  ;;  %v14069_v17 = vld [vmem:[#allocation8] ss:$0 sm:$0xff]  ;;  %vm14094_vm11 = vmor %vm2343_vm8, %vm2344_vm9  ;;  %s17248_s29 = scalar_lea.vmem [#allocation14], %s12122_s9 }
  0x4c   : > { %6202 = vst [vmem:[#allocation3 + $0x4] sm:$0xf] %v13838_v0  ;;  %v14074_v18 = vld [vmem:[%s17394_s2] ss:$0 sm:$0xff]  ;;  %v652_v19 = vld [vmem:[#allocation2 + $0x90] sm:$0x1]  ;;  %v530_v21 = vmul.f32 %v14069_v17, %v494_v13  ;;  %v531_v22 = vmul.f32 %v14069_v17, %v495_v14  ;;  %vm14124_vm14 = vmand %vm1071_vm10, %vm667_vm2 }
  0x4d   : > { %6203 = vst [vmem:[#allocation3 + $0x8] sm:$0xf] %v13838_v0  ;;  %1379 = vmatpush.bf16.msra.mxu0 %v13243_v7  ;;  %13473 = vmatpush.bf16.msra.mxu3 %v13243_v7  ;;  %v702_v20 = vld [vmem:[#allocation2 + $0x98] sm:$0x1]  ;;  %v653_v23 = vsel %vm14047_vm3, 0, %v652_v19  ;;  %v13241_v27 = vld [vmem:[#allocation10 + $0x18] sm:$0xff] }
  0x4e   : > { %6205 = vst [vmem:[#allocation3 + $0xcc] sm:$0xf] %v13838_v0  ;;  %2064 = vmatpush.bf16.msra.mxu1 %v14053_v9  ;;  %v703_v24 = vsel %vm14059_vm4, 0, %v702_v20  ;;  %v1498_v25 = vld [vmem:[#allocation2] sm:$0xf]  ;;  %v14084_v31 = vld [vmem:[#allocation10 + $0x58] sm:$0xff]  ;;  %v566_v33 = vadd.f32 %v14074_v18, %v530_v21  ;;  %v567_v34 = vadd.f32 %v14074_v18, %v531_v22 }
  0x4f   : > { %6206 = vst [vmem:[#allocation3 + $0xd0] sm:$0xf] %v13838_v0  ;;  %2589 = vmatpush.bf16.msra.mxu2 %v14055_v10  ;;  %v1499_v26 = vld [vmem:[#allocation2 + $0x4] sm:$0xf]  ;;  %v1500_v28 = vld [vmem:[#allocation2 + $0x8] sm:$0x1] }
  0x50   : > { %6207 = vst [vmem:[#allocation3 + $0xd4] sm:$0xf] %v13838_v0  ;;  %v1550_v29 = vshrl.u32 %v1498_v25, 16  ;;  %v1553_v30 = vshll.u32 %v1498_v25, 16  ;;  %v14086_v32 = vld [vmem:[#allocation10 + $0x98] sm:$0xff]  ;;  %v1559_v35 = vshll.u32 %v1499_v26, 16 }
  0x51   : > { %654 = vst [vmem:[#allocation2 + $0x90] sm:$0x1] %v653_v23  ;;  %v1563_v36 = vshrl.u32 %v1499_v26, 16  ;;  %v2247_v37 = vld [vmem:[#allocation2] sm:$0xe]  ;;  %1380 = vmatpush.bf16.msra.mxu0 %v13242_v12  ;;  %13474 = vmatpush.bf16.msra.mxu3 %v13242_v12  ;;  %v1569_v40 = vshll.u32 %v1500_v28, 16 }
  0x52   : > { %704 = vst [vmem:[#allocation2 + $0x98] sm:$0x1] %v703_v24  ;;  %v1552_v38 = vrot.slane %v1550_v29, 4  ;;  %v1555_v39 = vrot.slane %v1553_v30, 5  ;;  %v2248_v41 = vld [vmem:[#allocation2 + $0x4] sm:$0xf]  ;;  %2065 = vmatpush.bf16.msra.mxu1 %v14065_v15 }
  0x53   : > { %v12256_v42 = vrot.slane %v2247_v37, 9  ;;  %2590 = vmatpush.bf16.msra.mxu2 %v14067_v16  ;;  %v598_v43 = vmax.f32 %v566_v33, 0.0  ;;  %v599_v44 = vmax.f32 %v567_v34, 0.0  ;;  %v1561_v45 = vrot.slane %v1559_v35, 5  ;;  %v2249_v47 = vld [vmem:[#allocation2 + $0x8] sm:$0x1] }
  0x54   : > { %v1565_v46 = vrot.slane %v1563_v36, 4  ;;  %v1556_v49 = vor.u32 %v1555_v39, %v1552_v38  ;;  %v1571_v50 = vrot.slane %v1569_v40, 5  ;;  %v2348_v51 = vrot.slane %v2248_v41, 5  ;;  %v472_v53 = vld [vmem:[%s14021_s12] sm:$0xff]  ;;  %v473_v54 = vld [vmem:[%s14021_s12 + $0x8] sm:$0xff]  ;;  %v13240_v60 = vld [vmem:[#allocation10 + $0x10] sm:$0xff] }
  0x55   : > { %v2351_v52 = vrot.slane %v2249_v47, 5  ;;  %v739_v55 = vpack.c.bf16 %v598_v43, %v598_v43  ;;  %v740_v56 = vpack.c.bf16 %v599_v44, %v599_v44  ;;  %v508_v59 = vmul.f32 %v14069_v17, %v472_v53  ;;  %1381 = vmatpush.bf16.msra.mxu0 %v13241_v27  ;;  %13475 = vmatpush.bf16.msra.mxu3 %v13241_v27  ;;  %v14107_v61 = vld [vmem:[#allocation10 + $0x50] sm:$0xff]  ;;  %v619_v20 = vld [vmem:[#allocation2 + $0xc] sm:$0x1]  ;;  %v13239_v21 = vld [vmem:[#allocation10 + $0x8] sm:$0xff]  ;;  %s13470_s9 = sshll.u32 %s13922_s21, 8 }
  0x56   : > { %v1566_v58 = vor.u32 %v1565_v46, %v1561_v45  ;;  %v14109_v62 = vld [vmem:[#allocation10 + $0x90] sm:$0xff]  ;;  %v1557_v63 = vrot.slane %v1556_v49, 4  ;;  %v2349_v0 = vsel %vm14094_vm11, %v12256_v42, %v2348_v51  ;;  %v2350_v1 = vrot.slane %v2348_v51, 4  ;;  %2066 = vmatpush.bf16.msra.mxu1 %v14084_v31  ;;  %v14132_v27 = vld [vmem:[#allocation10 + $0x48] sm:$0xff]  ;;  %v496_v35 = vld [vmem:[%s14021_s12 + $0xc0] sm:$0xff]  ;;  %s11996_s23 = scalar_lea.hbm %s17403_s11, %s13470_s9  ;;  %s11997_s28 = sshll.u32 %s17248_s29, 4  ;;  %s11998_s28 = int_to_ptr.vmem [resolvable:$true] %s11997_s28 }
  0x57   : > { %v509_v4 = vmul.f32 %v14069_v17, %v473_v54  ;;  %2591 = vmatpush.bf16.msra.mxu2 %v14086_v32  ;;  %v939_v12 = vshrl.u32 %v739_v55, 16  ;;  %v942_v13 = vshll.u32 %v739_v55, 16  ;;  %v947_v14 = vshrl.u32 %v740_v56, 16  ;;  %v14134_v28 = vld [vmem:[#allocation10 + $0x88] sm:$0xff]  ;;  %v669_v49 = vld [vmem:[#allocation2 + $0x14] sm:$0x1] }
  0x58   : > { %v950_v19 = vshll.u32 %v740_v56, 16  ;;  %v1562_v23 = vsel %vm14102_vm12, %v1557_v63, %v1561_v45  ;;  %v1567_v24 = vrot.slane %v1566_v58, 4  ;;  %v2352_v25 = vsel %vm14094_vm11, %v2350_v1, %v2351_v52  ;;  %v1150_v36 = vld [vmem:[#allocation2 + $0x90] sm:$0xf]  ;;  %v497_v42 = vld [vmem:[%s14021_s12 + $0xc8] sm:$0xff]  ;;  %s11999_s26 = sshll.u32 %s11996_s23, 4  ;;  %s12000_s26 = int_to_ptr.hbm [resolvable:$true] %s11999_s26 }
  0x59   : > { %v2475_v26 = vunpack.c.l.b16 %v2349_v0  ;;  %v941_v29 = vrot.slane %v939_v12, 7  ;;  %v949_v30 = vrot.slane %v947_v14, 7  ;;  %v14136_v33 = vunpack.c.l.b16 %v1562_v23  ;;  %1382 = vmatpush.bf16.msra.mxu0 %v13240_v60  ;;  %13476 = vmatpush.bf16.msra.mxu3 %v13240_v60  ;;  %v1154_v37 = vld [vmem:[#allocation2 + $0x98] sm:$0x1]  ;;  %v655_v43 = vld [vmem:[#allocation2 + $0x9c] sm:$0x1] }
  0x5a   : > { %v2476_v34 = vunpack.c.l.b16 %v2352_v25  ;;  %v1572_v38 = vsel %vm14102_vm12, %v1567_v24, %v1571_v50  ;;  %v544_v39 = vadd.f32 %v14074_v18, %v508_v59  ;;  %v545_v40 = vadd.f32 %v14074_v18, %v509_v4  ;;  %2067 = vmatpush.bf16.msra.mxu1 %v14107_v61  ;;  %v13238_v50 = vld [vmem:[#allocation10] sm:$0xff]  ;;  %v13293_v1 = vld [vmem:[#allocation10 + $0x138] sm:$0xff]  ;;  %v498_v24 = vld [vmem:[%s14021_s12 + $0xd0] sm:$0xff]  ;;  %s11985_s22 = scalar_lea.sflag [#allocation7], %s14015_s3  ;;  %s13768_s1 = sshra.s32 %s12000_s26, 4  ;;  %s13769_s1 = int_to_ptr.hbm [resolvable:$true] %s13768_s1 }
  0x5b   : > { %v620_v41 = vsel %vm14047_vm3, 0, %v619_v20  ;;  %2592 = vmatpush.bf16.msra.mxu2 %v14109_v62  ;;  %v944_v44 = vor.u32 %v942_v13, %v941_v29  ;;  %v945_v45 = vrot.slane %v941_v29, 4  ;;  %v952_v46 = vor.u32 %v950_v19, %v949_v30  ;;  %v14152_v55 = vld [vmem:[#allocation10 + $0x40] sm:$0xff]  ;;  %v474_v13 = vld [vmem:[%s14021_s12 + $0x10] sm:$0xff]  ;;  %v475_v14 = vld [vmem:[%s14021_s12 + $0x18] sm:$0xff]  ;;  %s13770_s21 = scalar_lea.hbm %s13769_s1, 256  ;;  %p13775_p9 = scmp.lt.s32.totalorder %s13769_s1, %s17403_s11 }
  0x5c   : > { %v954_v47 = vrot.slane %v949_v30, 4  ;;  %621 = vst [vmem:[#allocation2 + $0xc] sm:$0x1] %v620_v41  ;;  %v14148_v51 = vunpack.c.l.b16 %v1572_v38  ;;  %v14150_v52 = vpack.c.b16 %v2476_v34, %v2475_v26  ;;  %v576_v53 = vmax.f32 %v544_v39, 0.0  ;;  %v14154_v56 = vld [vmem:[#allocation10 + $0x80] sm:$0xff]  ;;  %v499_v25 = vld [vmem:[%s14021_s12 + $0xd8] sm:$0xff]  ;;  %p13771_p1 = scmp.ne.s32.totalorder %s13769_s1, %s13770_s21 }
  0x5d   : > { %v577_v54 = vmax.f32 %v545_v40, 0.0  ;;  %v953_v58 = vsel %vm14118_vm13, %v945_v45, %v952_v46  ;;  %v1151_v59 = vsel %vm14124_vm14, %v944_v44, %v1150_v36  ;;  %v532_v63 = vmul.f32 %v14069_v17, %v496_v35  ;;  %1383 = vmatpush.bf16.msra.mxu0 %v13239_v21  ;;  %13477 = vmatpush.bf16.msra.mxu3 %v13239_v21  ;;  %v13222_v34 = vld [vmem:[#allocation2] sm:$0xff]  ;;  %s13774_s30 = scalar_lea.hbm %s17403_s11, 512 }
  0x5e   : > { %v1155_v60 = vsel %vm14047_vm3, %v954_v47, %v1154_v37  ;;  %1152 = vst [vmem:[#allocation2 + $0x90] sm:$0xf] %v1151_v59  ;;  %v1982_v0 = vpack.c.b16 %v14148_v51, %v14136_v33  ;;  %v717_v4 = vpack.c.bf16 %v576_v53, %v576_v53  ;;  %2068 = vmatpush.bf16.msra.mxu1 %v14132_v27  ;;  %v656_v21 = vsel %vm14047_vm3, 0, %v655_v43  ;;  %p13772_p4 = pnand %p13771_p1, %p13985_p3  ;;  %p13776_p2 = scmp.lt.s32.totalorder %s13774_s30, %s13770_s21 }
  0x5f   : > { %v718_v12 = vpack.c.bf16 %v577_v54, %v577_v54  ;;  %2593 = vmatpush.bf16.msra.mxu2 %v14134_v28  ;;  %1153 = vst [vmem:[#allocation2 + $0x94] sm:$0xf] %v953_v58  ;;  %v533_v19 = vmul.f32 %v14069_v17, %v497_v42  ;;  %v568_v20 = vadd.f32 %v14074_v18, %v532_v63  ;;  %v670_v23 = vsel %vm14059_vm4, 0, %v669_v49  ;;  %v622_v49 = vld [vmem:[#allocation2 + $0x18] sm:$0x1] }
  0x60   : > { %1156 = vst [vmem:[#allocation2 + $0x98] sm:$0x1] %v1155_v60  ;;  %v752_v26 = vshrl.u32 %v717_v4, 16  ;;  %v755_v29 = vshll.u32 %v717_v4, 16  ;;  %v510_v37 = vmul.f32 %v14069_v17, %v474_v13  ;;  %v511_v38 = vmul.f32 %v14069_v17, %v475_v14  ;;  %v658_v4 = vld [vmem:[#allocation2 + $0xa8] sm:$0x1]  ;;  %p13773_p8 = pneg %p13772_p4  ;;  %p13777_p10 = por %p13776_p2, %p13775_p9 }
  0x61   : > { %v760_v30 = vshrl.u32 %v718_v12, 16  ;;  %v763_v33 = vshll.u32 %v718_v12, 16  ;;  %v569_v35 = vadd.f32 %v14074_v18, %v533_v19  ;;  %v600_v36 = vmax.f32 %v568_v20, 0.0  ;;  %657 = vst [vmem:[#allocation2 + $0x9c] sm:$0x1] %v656_v21  ;;  %1384 = vmatpush.bf16.msra.mxu0 %v13238_v50  ;;  %13478 = vmatpush.bf16.msra.mxu3 %v13238_v50  ;;  %v476_v19 = vld [vmem:[%s14021_s12 + $0x20] sm:$0xff] }
  0x62   : > { %v754_v39 = vrot.slane %v752_v26, 7  ;;  %671 = vst [vmem:[#allocation2 + $0x14] sm:$0x1] %v670_v23  ;;  %v534_v41 = vmul.f32 %v14069_v17, %v498_v24  ;;  %v535_v42 = vmul.f32 %v14069_v17, %v499_v25  ;;  %2069 = vmatpush.bf16.msra.mxu1 %v14152_v55  ;;  %v546_v46 = vadd.f32 %v14074_v18, %v510_v37  ;;  %p13778_p11 = pnand %p13777_p10, %p13773_p8 }
  0x63   : > { %v762_v40 = vrot.slane %v760_v30, 7  ;;  %2594 = vmatpush.bf16.msra.mxu2 %v14154_v56  ;;  %v1073_v43 = vld [vmem:[#allocation2 + $0xc] sm:$0xf]  ;;  %v601_v44 = vmax.f32 %v569_v35, 0.0  ;;  %v741_v45 = vpack.c.bf16 %v600_v36, %v600_v36  ;;  %v547_v47 = vadd.f32 %v14074_v18, %v511_v38  ;;  %v14199_v30 = vld [vmem:[#allocation2 + $0x20] sm:$0x1] }
  0x64   : > { %v757_v50 = vor.u32 %v755_v29, %v754_v39  ;;  %v758_v51 = vrot.slane %v754_v39, 4  ;;  %1385 = vmatmul.bf16.vlgmr.msra.gmra.mxu0 %v13222_v34  ;;  %v578_v63 = vmax.f32 %v546_v46, 0.0  ;;  %v623_v14 = vsel %vm14047_vm3, 0, %v622_v49 }
  0x65   : > { %13479 = vmatpush.bf16.msrb.mxu3 %v14035_v2  ;;  %3711 = vmatpush.bf16.msrb.mxu0 %v13293_v1  ;;  %v765_v53 = vor.u32 %v763_v33, %v762_v40  ;;  %v767_v54 = vrot.slane %v762_v40, 4  ;;  %v742_v58 = vpack.c.bf16 %v601_v44, %v601_v44  ;;  %v956_v59 = vshrl.u32 %v741_v45, 16  ;;  %624 = vst [vmem:[#allocation2 + $0x18] sm:$0x1] %v623_v14 }
  0x66   : > { %v959_v60 = vshll.u32 %v741_v45, 16  ;;  %v13234_v12 = vld [vmem:[#allocation2 + $0x90] sm:$0xff]  ;;  %2070 = vmatmul.bf16.vlgmr.msra.gmra.mxu1 %v1982_v0  ;;  %2595 = vmatmul.bf16.vlgmr.msra.gmra.mxu2 %v14150_v52  ;;  %v1074_v2 = vsel %vm14124_vm14, %v757_v50, %v1073_v43  ;;  %v579_v1 = vmax.f32 %v547_v47, 0.0  ;;  %v719_v24 = vpack.c.bf16 %v578_v63, %v578_v63 }
  0x67   : > { %v766_v13 = vsel %vm14118_vm13, %v758_v51, %v765_v53  ;;  %1075 = vst [vmem:[#allocation2 + $0xc] sm:$0xf] %v1074_v2  ;;  %v958_v20 = vrot.slane %v956_v59, 7  ;;  %v964_v21 = vshrl.u32 %v742_v58, 16  ;;  %v967_v23 = vshll.u32 %v742_v58, 16  ;;  %1445 = vmatmul.bf16.vlgmr.msra.gmra.mxu3 %v13234_v12 }
  0x68   : > { %1076 = vst [vmem:[#allocation2 + $0x10] sm:$0xf] %v766_v13  ;;  %v1157_v0 = vld [vmem:[#allocation2 + $0x9c] sm:$0xf]  ;;  %v720_v52 = vpack.c.bf16 %v579_v1, %v579_v1  ;;  %v570_v25 = vadd.f32 %v14074_v18, %v534_v41  ;;  %v571_v26 = vadd.f32 %v14074_v18, %v535_v42  ;;  %v659_v29 = vsel %vm14047_vm3, 0, %v658_v4 }
  0x69   : > { %13480 = vmatpush.bf16.msrb.mxu3 %v14041_v5  ;;  %v961_v33 = vor.u32 %v959_v60, %v958_v20  ;;  %v962_v34 = vrot.slane %v958_v20, 4  ;;  %v14202_v35 = vrot.slane %v964_v21, 7  ;;  %v1077_v36 = vld [vmem:[#allocation2 + $0x14] sm:$0x1]  ;;  %v512_v37 = vmul.f32 %v14069_v17, %v476_v19  ;;  %660 = vst [vmem:[#allocation2 + $0xa8] sm:$0x1] %v659_v29 }
  0x6a   : > { %v1078_v38 = vsel %vm14047_vm3, %v767_v54, %v1077_v36  ;;  %v769_v39 = vshrl.u32 %v719_v24, 16  ;;  %v772_v40 = vshll.u32 %v719_v24, 16  ;;  %v777_v41 = vshrl.u32 %v720_v52, 16  ;;  %v477_v42 = vld [vmem:[%s14021_s12 + $0x28] sm:$0xff] }
  0x6b   : > { %v969_v43 = vor.u32 %v967_v23, %v14202_v35  ;;  %v1158_v5 = vsel %vm14124_vm14, %v961_v33, %v1157_v0  ;;  %1079 = vst [vmem:[#allocation2 + $0x14] sm:$0x1] %v1078_v38  ;;  %v780_v44 = vshll.u32 %v720_v52, 16  ;;  %v602_v47 = vmax.f32 %v570_v25, 0.0 }
  0x6c   : > { %1159 = vst [vmem:[#allocation2 + $0x9c] sm:$0xf] %v1158_v5  ;;  %v771_v45 = vrot.slane %v769_v39, 7  ;;  %v14211_v46 = vrot.slane %v777_v41, 7  ;;  %v603_v49 = vmax.f32 %v571_v26, 0.0  ;;  %v971_v51 = vrot.slane %v14202_v35, 4 }
  0x6d   : > { %v970_v50 = vsel %vm14118_vm13, %v962_v34, %v969_v43  ;;  %13481 = vmatpush.bf16.msrb.mxu3 %v14053_v9  ;;  %v673_v53 = vsel %vm14059_vm4, 0, %v14199_v30  ;;  %v513_v54 = vmul.f32 %v14069_v17, %v477_v42  ;;  %v743_v4 = vpack.c.bf16 %v602_v47, %v602_v47  ;;  %v1080_v29 = vld [vmem:[#allocation2 + $0x18] sm:$0xf]  ;;  %v13292_v47 = vld [vmem:[#allocation10 + $0x130] sm:$0xff] }
  0x6e   : > { %1160 = vst [vmem:[#allocation2 + $0xa0] sm:$0xf] %v970_v50  ;;  %v1501_v58 = vld [vmem:[#allocation2 + $0xc] sm:$0xf]  ;;  %v774_v60 = vor.u32 %v772_v40, %v771_v45  ;;  %v782_v63 = vor.u32 %v780_v44, %v14211_v46  ;;  %v14223_v12 = vadd.f32 %v14074_v18, %v512_v37  ;;  %v744_v14 = vpack.c.bf16 %v603_v49, %v603_v49 }
  0x6f   : > { %v2250_v59 = vld [vmem:[#allocation2 + $0xc] sm:$0xe]  ;;  %v1502_v13 = vld [vmem:[#allocation2 + $0x10] sm:$0xf]  ;;  %v1574_v2 = vshrl.u32 %v1501_v58, 16  ;;  %v1577_v1 = vshll.u32 %v1501_v58, 16  ;;  %v549_v0 = vadd.f32 %v14074_v18, %v513_v54  ;;  %3712 = vmatpush.bf16.msrb.mxu0 %v13292_v47 }
  0x70   : > { %v12257_v9 = vrot.slane %v2250_v59, 9  ;;  %v13223_v19 = vld [vmem:[#allocation2 + $0xc] sm:$0xff]  ;;  %v1583_v20 = vshll.u32 %v1502_v13, 16  ;;  %v1587_v21 = vshrl.u32 %v1502_v13, 16  ;;  %v775_v24 = vrot.slane %v771_v45, 4 }
  0x71   : > { %v2251_v23 = vld [vmem:[#allocation2 + $0x10] sm:$0xf]  ;;  %v1576_v52 = vrot.slane %v1574_v2, 4  ;;  %v1579_v25 = vrot.slane %v1577_v1, 5  ;;  %13482 = vmatpush.bf16.msrb.mxu3 %v14065_v15  ;;  %v973_v30 = vshrl.u32 %v743_v4, 16  ;;  %v1081_v39 = vsel %vm14124_vm14, %v774_v60, %v1080_v29 }
  0x72   : > { %v2355_v26 = vrot.slane %v2251_v23, 5  ;;  %v1503_v33 = vld [vmem:[#allocation2 + $0x14] sm:$0x1]  ;;  %v1585_v34 = vrot.slane %v1583_v20, 5  ;;  %v1589_v36 = vrot.slane %v1587_v21, 4  ;;  %v783_v38 = vsel %vm14118_vm13, %v775_v24, %v782_v63 }
  0x73   : > { %v2252_v37 = vld [vmem:[#allocation2 + $0x14] sm:$0x1]  ;;  %v1580_v40 = vor.u32 %v1579_v25, %v1576_v52  ;;  %v1593_v41 = vshll.u32 %v1503_v33, 16  ;;  %1082 = vst [vmem:[#allocation2 + $0x18] sm:$0xf] %v1081_v39  ;;  %v975_v45 = vrot.slane %v973_v30, 7 }
  0x74   : > { %v2356_v42 = vsel %vm14094_vm11, %v12257_v9, %v2355_v26  ;;  %v2357_v43 = vrot.slane %v2355_v26, 4  ;;  %v1590_v15 = vor.u32 %v1589_v36, %v1585_v34  ;;  %v2358_v5 = vrot.slane %v2252_v37, 5  ;;  %1083 = vst [vmem:[#allocation2 + $0x1c] sm:$0xf] %v783_v38  ;;  %1390 = vmatmul.bf16.gmra.mxu0 %v13223_v19  ;;  %v625_v21 = vld [vmem:[#allocation2 + $0x24] sm:$0x1] }
  0x75   : > { %v2477_v44 = vunpack.c.l.b16 %v2356_v42  ;;  %v13235_v49 = vld [vmem:[#allocation2 + $0x9c] sm:$0xff]  ;;  %v1581_v50 = vrot.slane %v1580_v40, 4  ;;  %v1595_v54 = vrot.slane %v1593_v41, 5  ;;  %v976_v58 = vshll.u32 %v743_v4, 16  ;;  %13483 = vmatpush.bf16.msrb.mxu3 %v14084_v31  ;;  %674 = vst [vmem:[#allocation2 + $0x20] sm:$0x1] %v673_v53 }
  0x76   : > { %v981_v59 = vshrl.u32 %v744_v14, 16  ;;  %v1591_v60 = vrot.slane %v1590_v15, 4  ;;  %v2359_v63 = vsel %vm14094_vm11, %v2357_v43, %v2358_v5  ;;  %v979_v13 = vrot.slane %v975_v45, 4  ;;  %v1164_v4 = vld [vmem:[#allocation2 + $0xa8] sm:$0xf]  ;;  %v500_v53 = vld [vmem:[%s14021_s12 + $0xe0] sm:$0xff] }
  0x77   : > { %v984_v2 = vshll.u32 %v744_v14, 16  ;;  %v1586_v1 = vsel %vm14102_vm12, %v1581_v50, %v1585_v34  ;;  %v2478_v9 = vunpack.c.l.b16 %v2359_v63  ;;  %v978_v19 = vor.u32 %v976_v58, %v975_v45  ;;  %1450 = vmatmul.bf16.gmra.mxu3 %v13235_v49 }
  0x78   : > { %v14238_v20 = vrot.slane %v981_v59, 7  ;;  %v1596_v31 = vsel %vm14102_vm12, %v1591_v60, %v1595_v54  ;;  %v1952_v23 = vunpack.c.l.b16 %v1586_v1  ;;  %v580_v24 = vmax.f32 %v14223_v12, 0.0 }
  0x79   : > { %v581_v14 = vmax.f32 %v549_v0, 0.0  ;;  %v1953_v52 = vunpack.c.l.b16 %v1596_v31  ;;  %v2508_v25 = vpack.c.b16 %v2478_v9, %v2477_v44  ;;  %v784_v26 = vrot.slane %v14211_v46, 4  ;;  %13484 = vmatpush.bf16.msrb.mxu3 %v14107_v61  ;;  %v501_v0 = vld [vmem:[%s14021_s12 + $0xe8] sm:$0xff]  ;;  %v675_v31 = vld [vmem:[#allocation2 + $0x2c] sm:$0x1] }
  0x7a   : > { %v986_v29 = vor.u32 %v984_v2, %v14238_v20  ;;  %v1165_v30 = vsel %vm14124_vm14, %v978_v19, %v1164_v4  ;;  %v1504_v33 = vld [vmem:[#allocation2 + $0x18] sm:$0xf]  ;;  %v626_v36 = vsel %vm14047_vm3, 0, %v625_v21  ;;  %v721_v37 = vpack.c.bf16 %v580_v24, %v580_v24 }
  0x7b   : > { %v2253_v34 = vld [vmem:[#allocation2 + $0x18] sm:$0xe]  ;;  %v722_v12 = vpack.c.bf16 %v581_v14, %v581_v14  ;;  %v1983_v38 = vpack.c.b16 %v1953_v52, %v1952_v23  ;;  %2600 = vmatmul.bf16.gmra.mxu2 %v2508_v25  ;;  %1166 = vst [vmem:[#allocation2 + $0xa8] sm:$0xf] %v1165_v30  ;;  %v1505_v39 = vld [vmem:[#allocation2 + $0x1c] sm:$0xf]  ;;  %v536_v61 = vmul.f32 %v14069_v17, %v500_v53 }
  0x7c   : > { %v987_v46 = vsel %vm14118_vm13, %v979_v13, %v986_v29  ;;  %v1598_v40 = vshrl.u32 %v1504_v33, 16  ;;  %v1601_v41 = vshll.u32 %v1504_v33, 16  ;;  %v1607_v42 = vshll.u32 %v1505_v39, 16  ;;  %v1084_v5 = vld [vmem:[#allocation2 + $0x20] sm:$0x1]  ;;  %v13224_v23 = vld [vmem:[#allocation2 + $0x18] sm:$0xff] }
  0x7d   : > { %1167 = vst [vmem:[#allocation2 + $0xac] sm:$0xf] %v987_v46  ;;  %v1611_v43 = vshrl.u32 %v1505_v39, 16  ;;  %v12258_v15 = vrot.slane %v2253_v34, 9  ;;  %2075 = vmatmul.bf16.gmra.mxu1 %v1983_v38  ;;  %v2254_v45 = vld [vmem:[#allocation2 + $0x1c] sm:$0xf]  ;;  %v537_v49 = vmul.f32 %v14069_v17, %v501_v0  ;;  %v572_v50 = vadd.f32 %v14074_v18, %v536_v61  ;;  %13485 = vmatpush.bf16.msrb.mxu3 %v14132_v27 }
  0x7e   : > { %v1600_v44 = vrot.slane %v1598_v40, 4  ;;  %v786_v47 = vshrl.u32 %v721_v37, 16  ;;  %v1085_v54 = vsel %vm14047_vm3, %v784_v26, %v1084_v5  ;;  %v1603_v58 = vrot.slane %v1601_v41, 5  ;;  %627 = vst [vmem:[#allocation2 + $0x24] sm:$0x1] %v626_v36  ;;  %v13291_v25 = vld [vmem:[#allocation10 + $0x128] sm:$0xff] }
  0x7f   : > { %v1609_v59 = vrot.slane %v1607_v42, 5  ;;  %v1613_v60 = vrot.slane %v1611_v43, 4  ;;  %1086 = vst [vmem:[#allocation2 + $0x20] sm:$0x1] %v1085_v54  ;;  %v2362_v63 = vrot.slane %v2254_v45, 5  ;;  %v789_v2 = vshll.u32 %v721_v37, 16  ;;  %3713 = vmatpush.bf16.msrb.mxu0 %v13291_v25 }
  0x80   : > { %v788_v13 = vrot.slane %v786_v47, 7  ;;  %v794_v1 = vshrl.u32 %v722_v12, 16  ;;  %v1604_v9 = vor.u32 %v1603_v58, %v1600_v44  ;;  %v797_v4 = vshll.u32 %v722_v12, 16  ;;  %v661_v27 = vld [vmem:[#allocation2 + $0xb4] sm:$0x1]  ;;  %v478_v26 = vld [vmem:[%s14021_s12 + $0x30] sm:$0xff] }
  0x81   : > { %v1614_v19 = vor.u32 %v1613_v60, %v1609_v59  ;;  %v573_v21 = vadd.f32 %v14074_v18, %v537_v49  ;;  %v14263_v24 = vsel %vm14094_vm11, %v12258_v15, %v2362_v63  ;;  %v2364_v14 = vrot.slane %v2362_v63, 4  ;;  %13486 = vmatpush.bf16.msrb.mxu3 %v14152_v55  ;;  %v479_v36 = vld [vmem:[%s14021_s12 + $0x38] sm:$0xff]  ;;  %v628_v55 = vld [vmem:[#allocation2 + $0x30] sm:$0x1]  ;;  %v678_v44 = vld [vmem:[#allocation2 + $0x38] sm:$0x1] }
  0x82   : > { %v791_v53 = vor.u32 %v789_v2, %v788_v13  ;;  %v792_v52 = vrot.slane %v788_v13, 4  ;;  %v1605_v29 = vrot.slane %v1604_v9, 4  ;;  %v2479_v33 = vunpack.c.l.b16 %v14263_v24  ;;  %v14292_v2 = vld [vmem:[#allocation2 + $0x90] sm:$0xf] }
  0x83   : > { %v1615_v30 = vrot.slane %v1614_v19, 4  ;;  %v14268_v34 = vrot.slane %v794_v1, 7  ;;  %v604_v37 = vmax.f32 %v572_v50, 0.0  ;;  %v605_v12 = vmax.f32 %v573_v21, 0.0 }
  0x84   : > { %v662_v0 = vsel %vm14047_vm3, 0, %v661_v27  ;;  %v676_v38 = vsel %vm14059_vm4, 0, %v675_v31  ;;  %v13236_v46 = vld [vmem:[#allocation2 + $0xa8] sm:$0xff]  ;;  %v1610_v39 = vsel %vm14102_vm12, %v1605_v29, %v1609_v59  ;;  %1395 = vmatmul.bf16.gmra.mxu0 %v13224_v23  ;;  %v515_v5 = vmul.f32 %v14069_v17, %v479_v36 }
  0x85   : > { %13487 = vmatpush.bf16.msra.mxu3 %v14037_v3  ;;  %v799_v40 = vor.u32 %v797_v4, %v14268_v34  ;;  %v801_v61 = vrot.slane %v14268_v34, 4  ;;  %663 = vst [vmem:[#allocation2 + $0xb4] sm:$0x1] %v662_v0  ;;  %v514_v3 = vmul.f32 %v14069_v17, %v478_v26  ;;  %v14281_v41 = vunpack.c.l.b16 %v1610_v39  ;;  %v1087_v42 = vld [vmem:[#allocation2 + $0x24] sm:$0xf] }
  0x86   : > { %v745_v43 = vpack.c.bf16 %v604_v37, %v604_v37  ;;  %v746_v15 = vpack.c.bf16 %v605_v12, %v605_v12  ;;  %677 = vst [vmem:[#allocation2 + $0x2c] sm:$0x1] %v676_v38  ;;  %v1506_v45 = vld [vmem:[#allocation2 + $0x20] sm:$0x1]  ;;  %v1088_v50 = vsel %vm14124_vm14, %v791_v53, %v1087_v42  ;;  %v629_v58 = vsel %vm14047_vm3, 0, %v628_v55  ;;  %v480_v55 = vld [vmem:[%s14021_s12 + $0x40] sm:$0xff] }
  0x87   : > { %v2255_v47 = vld [vmem:[#allocation2 + $0x20] sm:$0x1]  ;;  %v800_v49 = vsel %vm14118_vm13, %v792_v52, %v799_v40  ;;  %v550_v54 = vadd.f32 %v14074_v18, %v514_v3  ;;  %v1617_v59 = vshll.u32 %v1506_v45, 16  ;;  %1089 = vst [vmem:[#allocation2 + $0x24] sm:$0xf] %v1088_v50  ;;  %1455 = vmatmul.bf16.gmra.mxu3 %v13236_v46  ;;  %v551_v19 = vadd.f32 %v14074_v18, %v515_v5  ;;  %v481_v46 = vld [vmem:[%s14021_s12 + $0x48] sm:$0xff] }
  0x88   : > { %v2365_v60 = vrot.slane %v2255_v47, 5  ;;  %v990_v63 = vshrl.u32 %v745_v43, 16  ;;  %v993_v13 = vshll.u32 %v745_v43, 16  ;;  %1090 = vst [vmem:[#allocation2 + $0x28] sm:$0xf] %v800_v49  ;;  %v998_v1 = vshrl.u32 %v746_v15, 16 }
  0x89   : > { %13488 = vmatpush.bf16.msra.mxu3 %v14043_v6  ;;  %v1001_v9 = vshll.u32 %v746_v15, 16  ;;  %v582_v4 = vmax.f32 %v550_v54, 0.0  ;;  %v1619_v21 = vrot.slane %v1617_v59, 5  ;;  %630 = vst [vmem:[#allocation2 + $0x30] sm:$0x1] %v629_v58  ;;  %v679_v6 = vsel %vm14059_vm4, 0, %v678_v44 }
  0x8a   : > { %v2366_v27 = vsel %vm14094_vm11, %v2364_v14, %v2365_v60  ;;  %v992_v31 = vrot.slane %v990_v63, 7  ;;  %v14299_v24 = vrot.slane %v998_v1, 7  ;;  %v583_v53 = vmax.f32 %v551_v19, 0.0  ;;  %680 = vst [vmem:[#allocation2 + $0x38] sm:$0x1] %v679_v6 }
  0x8b   : > { %v2480_v23 = vunpack.c.l.b16 %v2366_v27  ;;  %v723_v52 = vpack.c.bf16 %v582_v4, %v582_v4  ;;  %v988_v25 = vrot.slane %v14238_v20, 4  ;;  %v1620_v14 = vsel %vm14102_vm12, %v1615_v30, %v1619_v21 }
  0x8c   : > { %v995_v26 = vor.u32 %v993_v13, %v992_v31  ;;  %v996_v29 = vrot.slane %v992_v31, 4  ;;  %v1171_v34 = vld [vmem:[#allocation2 + $0xb4] sm:$0xf]  ;;  %v1955_v36 = vunpack.c.l.b16 %v1620_v14  ;;  %v1003_v12 = vor.u32 %v1001_v9, %v14299_v24 }
  0x8d   : > { %13489 = vmatpush.bf16.msra.mxu3 %v14055_v10  ;;  %v2509_v37 = vpack.c.b16 %v2480_v23, %v2479_v33  ;;  %v1091_v0 = vld [vmem:[#allocation2 + $0x2c] sm:$0x1]  ;;  %v1838_v38 = vshrl.u32 %v14292_v2, 16  ;;  %v724_v40 = vpack.c.bf16 %v583_v53, %v583_v53  ;;  %v803_v30 = vshrl.u32 %v723_v52, 16 }
  0x8e   : > { %v1172_v10 = vsel %vm14124_vm14, %v995_v26, %v1171_v34  ;;  %v1092_v39 = vsel %vm14047_vm3, %v801_v61, %v1091_v0  ;;  %v1984_v3 = vpack.c.b16 %v1955_v36, %v14281_v41  ;;  %v1004_v33 = vsel %vm14118_vm13, %v996_v29, %v1003_v12  ;;  %v1507_v42 = vld [vmem:[#allocation2 + $0x24] sm:$0xf] }
  0x8f   : > { %2605 = vmatmul.bf16.gmra.mxu2 %v2509_v37  ;;  %1173 = vst [vmem:[#allocation2 + $0xb4] sm:$0xf] %v1172_v10  ;;  %v2256_v43 = vld [vmem:[#allocation2 + $0x24] sm:$0xe]  ;;  %v1508_v5 = vld [vmem:[#allocation2 + $0x28] sm:$0xf]  ;;  %v516_v45 = vmul.f32 %v14069_v17, %v480_v55  ;;  %v517_v61 = vmul.f32 %v14069_v17, %v481_v46 }
  0x90   : > { %v13225_v15 = vld [vmem:[#allocation2 + $0x24] sm:$0xff]  ;;  %1174 = vst [vmem:[#allocation2 + $0xb8] sm:$0xf] %v1004_v33  ;;  %v1622_v44 = vshrl.u32 %v1507_v42, 16  ;;  %2080 = vmatmul.bf16.gmra.mxu1 %v1984_v3  ;;  %v1625_v41 = vshll.u32 %v1507_v42, 16  ;;  %v1631_v47 = vshll.u32 %v1508_v5, 16 }
  0x91   : > { %13490 = vmatpush.bf16.msra.mxu3 %v14067_v16  ;;  %1093 = vst [vmem:[#allocation2 + $0x2c] sm:$0x1] %v1092_v39  ;;  %v1635_v49 = vshrl.u32 %v1508_v5, 16  ;;  %v12259_v50 = vrot.slane %v2256_v43, 9  ;;  %v2257_v58 = vld [vmem:[#allocation2 + $0x28] sm:$0xf]  ;;  %v552_v46 = vadd.f32 %v14074_v18, %v516_v45 }
  0x92   : > { %v1624_v54 = vrot.slane %v1622_v44, 4  ;;  %v805_v59 = vrot.slane %v803_v30, 7  ;;  %v806_v60 = vshll.u32 %v723_v52, 16  ;;  %v811_v63 = vshrl.u32 %v724_v40, 16  ;;  %v1094_v19 = vld [vmem:[#allocation2 + $0x30] sm:$0xf] }
  0x93   : > { %v1627_v16 = vrot.slane %v1625_v41, 5  ;;  %v1633_v13 = vrot.slane %v1631_v47, 5  ;;  %v1637_v1 = vrot.slane %v1635_v49, 4  ;;  %v2369_v9 = vrot.slane %v2257_v58, 5  ;;  %v1098_v14 = vld [vmem:[#allocation2 + $0x38] sm:$0x1] }
  0x94   : > { %v808_v4 = vor.u32 %v806_v60, %v805_v59  ;;  %v809_v17 = vrot.slane %v805_v59, 4  ;;  %v813_v21 = vrot.slane %v811_v63, 7  ;;  %v814_v27 = vshll.u32 %v724_v40, 16  ;;  %v1535_v52 = vld [vmem:[#allocation2 + $0x94] sm:$0xf]  ;;  %1400 = vmatmul.bf16.gmra.mxu0 %v13225_v15 }
  0x95   : > { %13491 = vmatpush.bf16.msra.mxu3 %v14086_v32  ;;  %v1628_v31 = vor.u32 %v1627_v16, %v1624_v54  ;;  %v1638_v6 = vor.u32 %v1637_v1, %v1633_v13  ;;  %v2370_v23 = vsel %vm14094_vm11, %v12259_v50, %v2369_v9  ;;  %v2371_v53 = vrot.slane %v2369_v9, 4  ;;  %v1536_v32 = vld [vmem:[#allocation2 + $0x98] sm:$0x1]  ;;  %v631_v42 = vld [vmem:[#allocation2 + $0x3c] sm:$0x1] }
  0x96   : > { %v2481_v26 = vunpack.c.l.b16 %v2370_v23  ;;  %v816_v29 = vor.u32 %v814_v27, %v813_v21  ;;  %v818_v34 = vrot.slane %v813_v21, 4  ;;  %v1095_v36 = vsel %vm14124_vm14, %v808_v4, %v1094_v19 }
  0x97   : > { %v13237_v37 = vld [vmem:[#allocation2 + $0xb4] sm:$0xff]  ;;  %v1629_v12 = vrot.slane %v1628_v31, 4  ;;  %v1639_v0 = vrot.slane %v1638_v6, 4  ;;  %1096 = vst [vmem:[#allocation2 + $0x30] sm:$0xf] %v1095_v36  ;;  %v1840_v55 = vrot.slane %v1838_v38, 4  ;;  %v553_v50 = vadd.f32 %v14074_v18, %v517_v61 }
  0x98   : > { %v1509_v10 = vld [vmem:[#allocation2 + $0x2c] sm:$0x1]  ;;  %v817_v40 = vsel %vm14118_vm13, %v809_v17, %v816_v29  ;;  %v1099_v30 = vsel %vm14047_vm3, %v818_v34, %v1098_v14  ;;  %v1841_v3 = vshll.u32 %v14292_v2, 16  ;;  %v1847_v33 = vshll.u32 %v1535_v52, 16  ;;  %1460 = vmatmul.bf16.gmra.mxu3 %v13237_v37 }
  0x99   : > { %13492 = vmatpush.bf16.msra.mxu3 %v14109_v62  ;;  %v2258_v39 = vld [vmem:[#allocation2 + $0x2c] sm:$0x1]  ;;  %v1634_v38 = vsel %vm14102_vm12, %v1629_v12, %v1633_v13  ;;  %v1641_v43 = vshll.u32 %v1509_v10, 16  ;;  %1097 = vst [vmem:[#allocation2 + $0x34] sm:$0xf] %v817_v40  ;;  %v1851_v62 = vshrl.u32 %v1535_v52, 16 }
  0x9a   : > { %v2372_v15 = vrot.slane %v2258_v39, 5  ;;  %v1956_v5 = vunpack.c.l.b16 %v1634_v38  ;;  %1100 = vst [vmem:[#allocation2 + $0x38] sm:$0x1] %v1099_v30  ;;  %v1843_v44 = vrot.slane %v1841_v3, 5  ;;  %v1849_v45 = vrot.slane %v1847_v33, 5 }
  0x9b   : > { %v1857_v41 = vshll.u32 %v1536_v32, 16  ;;  %v1643_v47 = vrot.slane %v1641_v43, 5  ;;  %v1853_v2 = vrot.slane %v1851_v62, 4  ;;  %v584_v60 = vmax.f32 %v552_v46, 0.0 }
  0x9c   : > { %v2373_v49 = vsel %vm14094_vm11, %v2371_v53, %v2372_v15  ;;  %v1844_v58 = vor.u32 %v1843_v44, %v1840_v55  ;;  %v585_v13 = vmax.f32 %v553_v50, 0.0  ;;  %v632_v1 = vsel %vm14047_vm3, 0, %v631_v42  ;;  %v705_v50 = vld [vmem:[#allocation2 + $0xa4] sm:$0x1] }
  0x9d   : > { %13493 = vmatpush.bf16.msra.mxu3 %v14134_v28  ;;  %v2482_v54 = vunpack.c.l.b16 %v2373_v49  ;;  %v1859_v59 = vrot.slane %v1857_v41, 5  ;;  %v1644_v63 = vsel %vm14102_vm12, %v1639_v0, %v1643_v47  ;;  %v1854_v16 = vor.u32 %v1853_v2, %v1849_v45  ;;  %633 = vst [vmem:[#allocation2 + $0x3c] sm:$0x1] %v632_v1  ;;  %v483_v1 = vld [vmem:[%s14021_s12 + $0x58] sm:$0xff] }
  0x9e   : > { %v1957_v9 = vunpack.c.l.b16 %v1644_v63  ;;  %v1510_v4 = vld [vmem:[#allocation2 + $0x30] sm:$0xf]  ;;  %v1845_v17 = vrot.slane %v1844_v58, 4  ;;  %v725_v18 = vpack.c.bf16 %v584_v60, %v584_v60  ;;  %v726_v52 = vpack.c.bf16 %v585_v13, %v585_v13  ;;  %v482_v13 = vld [vmem:[%s14021_s12 + $0x50] sm:$0xff] }
  0x9f   : > { %v2510_v19 = vpack.c.b16 %v2482_v54, %v2481_v26  ;;  %v2259_v21 = vld [vmem:[#allocation2 + $0x30] sm:$0xe]  ;;  %v1646_v61 = vshrl.u32 %v1510_v4, 16  ;;  %v1649_v28 = vshll.u32 %v1510_v4, 16  ;;  %v1855_v27 = vrot.slane %v1854_v16, 4 }
  0xa0   : > { %v12260_v31 = vrot.slane %v2259_v21, 9  ;;  %v1985_v6 = vpack.c.b16 %v1957_v9, %v1956_v5  ;;  %v1511_v23 = vld [vmem:[#allocation2 + $0x34] sm:$0xf]  ;;  %v1850_v53 = vsel %vm14102_vm12, %v1845_v17, %v1849_v45  ;;  %v820_v26 = vshrl.u32 %v725_v18, 16  ;;  %v681_v45 = vld [vmem:[#allocation2 + $0x44] sm:$0x1] }
  0xa1   : > { %13494 = vmatpush.bf16.msra.mxu3 %v14154_v56  ;;  %2610 = vmatmul.bf16.gmra.mxu2 %v2510_v19  ;;  %v2260_v14 = vld [vmem:[#allocation2 + $0x34] sm:$0xf]  ;;  %v1512_v29 = vld [vmem:[#allocation2 + $0x38] sm:$0x1]  ;;  %v1648_v34 = vrot.slane %v1646_v61, 4  ;;  %v1651_v36 = vrot.slane %v1649_v28, 5  ;;  %v1860_v56 = vsel %vm14102_vm12, %v1855_v27, %v1859_v59  ;;  %v1974_v55 = vunpack.c.l.b16 %v1850_v53 }
  0xa2   : > { %v1655_v32 = vshll.u32 %v1511_v23, 16  ;;  %v1659_v37 = vshrl.u32 %v1511_v23, 16  ;;  %2085 = vmatmul.bf16.gmra.mxu1 %v1985_v6  ;;  %v13226_v12 = vld [vmem:[#allocation2 + $0x30] sm:$0xff]  ;;  %v1665_v0 = vshll.u32 %v1512_v29, 16  ;;  %v2261_v46 = vld [vmem:[#allocation2 + $0x38] sm:$0x1]  ;;  %v1975_v3 = vunpack.c.l.b16 %v1860_v56 }
  0xa3   : > { %v2376_v10 = vrot.slane %v2260_v14, 5  ;;  %v1652_v39 = vor.u32 %v1651_v36, %v1648_v34  ;;  %v2379_v43 = vrot.slane %v2261_v46, 5  ;;  %v822_v47 = vrot.slane %v820_v26, 7  ;;  %v13290_v54 = vld [vmem:[#allocation10 + $0x120] sm:$0xff]  ;;  %v1537_v21 = vld [vmem:[#allocation2 + $0x9c] sm:$0xf] }
  0xa4   : > { %v1657_v40 = vrot.slane %v1655_v32, 5  ;;  %v1661_v30 = vrot.slane %v1659_v37, 4  ;;  %v1667_v33 = vrot.slane %v1665_v0, 5  ;;  %v1994_v5 = vpack.c.b16 %v1975_v3, %v1974_v55  ;;  %1405 = vmatmul.bf16.gmra.mxu0 %v13226_v12  ;;  %v1101_v16 = vld [vmem:[#allocation2 + $0x3c] sm:$0xf] }
  0xa5   : > { %v2377_v42 = vsel %vm14094_vm11, %v12260_v31, %v2376_v10  ;;  %v2378_v38 = vrot.slane %v2376_v10, 4  ;;  %v1653_v15 = vrot.slane %v1652_v39, 4  ;;  %v823_v49 = vshll.u32 %v725_v18, 16  ;;  %v1538_v61 = vld [vmem:[#allocation2 + $0xa0] sm:$0xf]  ;;  %3714 = vmatpush.bf16.msrb.mxu0 %v13290_v54 }
  0xa6   : > { %v1662_v62 = vor.u32 %v1661_v30, %v1657_v40  ;;  %v2483_v44 = vunpack.c.l.b16 %v2377_v42  ;;  %v828_v2 = vshrl.u32 %v726_v52, 16  ;;  %v831_v63 = vshll.u32 %v726_v52, 16  ;;  %v634_v6 = vld [vmem:[#allocation2 + $0x48] sm:$0x1]  ;;  %v684_v23 = vld [vmem:[#allocation2 + $0x50] sm:$0x1] }
  0xa7   : > { %v2380_v41 = vsel %vm14094_vm11, %v2378_v38, %v2379_v43  ;;  %v1658_v58 = vsel %vm14102_vm12, %v1653_v15, %v1657_v40  ;;  %v825_v19 = vor.u32 %v823_v49, %v822_v47  ;;  %v826_v4 = vrot.slane %v822_v47, 4  ;;  %v708_v29 = vld [vmem:[#allocation2 + $0xb0] sm:$0x1]  ;;  %v14368_v10 = vld [vmem:[#allocation2 + $0xa8] sm:$0xf] }
  0xa8   : > { %v1663_v59 = vrot.slane %v1662_v62, 4  ;;  %v2484_v60 = vunpack.c.l.b16 %v2380_v41  ;;  %v1958_v9 = vunpack.c.l.b16 %v1658_v58  ;;  %v830_v17 = vrot.slane %v828_v2, 7  ;;  %2130 = vmatmul.bf16.vlgmr.msrb.gmra.mxu3 %v1994_v5  ;;  %v14364_v56 = vld [vmem:[#allocation8] ss:$0 sm:$0xff]  ;;  %v14370_v39 = vld [vmem:[#allocation2 + $0xac] sm:$0xf] }
  0xa9   : > { %v682_v27 = vsel %vm14059_vm4, 0, %v681_v45  ;;  %v706_v31 = vsel %vm14059_vm4, 0, %v705_v50  ;;  %v1102_v26 = vsel %vm14124_vm14, %v825_v19, %v1101_v16  ;;  %v1862_v34 = vshrl.u32 %v1537_v21, 16  ;;  %v14375_v42 = vld [vmem:[%s17394_s2] ss:$0 sm:$0xff]  ;;  %v484_v5 = vld [vmem:[%s14021_s12 + $0x60] sm:$0xff] }
  0xaa   : > { %v1668_v18 = vsel %vm14102_vm12, %v1663_v59, %v1667_v33  ;;  %v2511_v28 = vpack.c.b16 %v2484_v60, %v2483_v44  ;;  %v833_v14 = vor.u32 %v831_v63, %v830_v17  ;;  %v835_v52 = vrot.slane %v830_v17, 4  ;;  %683 = vst [vmem:[#allocation2 + $0x44] sm:$0x1] %v682_v27  ;;  %v485_v44 = vld [vmem:[%s14021_s12 + $0x68] sm:$0xff] }
  0xab   : > { %v1959_v53 = vunpack.c.l.b16 %v1668_v18  ;;  %1103 = vst [vmem:[#allocation2 + $0x3c] sm:$0xf] %v1102_v26  ;;  %v1865_v36 = vshll.u32 %v1537_v21, 16  ;;  %v1871_v32 = vshll.u32 %v1538_v61, 16  ;;  %v1875_v37 = vshrl.u32 %v1538_v61, 16 }
  0xac   : > { %v834_v0 = vsel %vm14118_vm13, %v826_v4, %v833_v14  ;;  %707 = vst [vmem:[#allocation2 + $0xa4] sm:$0x1] %v706_v31  ;;  %v518_v55 = vmul.f32 %v14364_v56, %v482_v13  ;;  %v519_v46 = vmul.f32 %v14364_v56, %v483_v1  ;;  %v1864_v40 = vrot.slane %v1862_v34, 4 }
  0xad   : > { %v1986_v12 = vpack.c.b16 %v1959_v53, %v1958_v9  ;;  %1104 = vst [vmem:[#allocation2 + $0x40] sm:$0xf] %v834_v0  ;;  %v1867_v30 = vrot.slane %v1865_v36, 5  ;;  %v1873_v3 = vrot.slane %v1871_v32, 5  ;;  %v1877_v33 = vrot.slane %v1875_v37, 4 }
  0xae   : > { %v554_v38 = vadd.f32 %v14375_v42, %v518_v55  ;;  %v555_v43 = vadd.f32 %v14375_v42, %v519_v46  ;;  %v635_v15 = vsel %vm14047_vm3, 0, %v634_v6  ;;  %v685_v62 = vsel %vm14059_vm4, 0, %v684_v23 }
  0xaf   : > { %v1868_v45 = vor.u32 %v1867_v30, %v1864_v40  ;;  %v1878_v41 = vor.u32 %v1877_v33, %v1873_v3  ;;  %636 = vst [vmem:[#allocation2 + $0x48] sm:$0x1] %v635_v15  ;;  %v709_v47 = vsel %vm14059_vm4, 0, %v708_v29  ;;  %v1886_v49 = vshrl.u32 %v14368_v10, 16 }
  0xb0   : > { %v586_v2 = vmax.f32 %v554_v38, 0.0  ;;  %v587_v50 = vmax.f32 %v555_v43, 0.0  ;;  %686 = vst [vmem:[#allocation2 + $0x50] sm:$0x1] %v685_v62  ;;  %v1889_v54 = vshll.u32 %v14368_v10, 16  ;;  %v1895_v58 = vshll.u32 %v14370_v39, 16 }
  0xb1   : > { %2615 = vmatmul.bf16.gmra.mxu2 %v2511_v28  ;;  %v1105_v59 = vld [vmem:[#allocation2 + $0x44] sm:$0x1]  ;;  %v1869_v60 = vrot.slane %v1868_v45, 4  ;;  %v14390_v63 = vrot.slane %v1878_v41, 4  ;;  %710 = vst [vmem:[#allocation2 + $0xb0] sm:$0x1] %v709_v47  ;;  %v520_v16 = vmul.f32 %v14364_v56, %v484_v5  ;;  %v521_v13 = vmul.f32 %v14364_v56, %v485_v44 }
  0xb2   : > { %2090 = vmatmul.bf16.gmra.mxu1 %v1986_v12  ;;  %v1106_v1 = vsel %vm14047_vm3, %v835_v52, %v1105_v59  ;;  %v1513_v9 = vld [vmem:[#allocation2 + $0x3c] sm:$0xf]  ;;  %v727_v4 = vpack.c.bf16 %v586_v2, %v586_v2  ;;  %v728_v17 = vpack.c.bf16 %v587_v50, %v587_v50  ;;  %v14396_v21 = vrot.slane %v1886_v49, 4 }
  0xb3   : > { %v2262_v19 = vld [vmem:[#allocation2 + $0x3c] sm:$0xe]  ;;  %1107 = vst [vmem:[#allocation2 + $0x44] sm:$0x1] %v1106_v1  ;;  %v1670_v61 = vshrl.u32 %v1513_v9, 16  ;;  %v1673_v18 = vshll.u32 %v1513_v9, 16  ;;  %v1874_v27 = vsel %vm14102_vm12, %v1869_v60, %v1873_v3  ;;  %v14401_v31 = vadd.f32 %v14375_v42, %v520_v16 }
  0xb4   : > { %v1161_v28 = vld [vmem:[#allocation2 + $0xa4] sm:$0x1]  ;;  %v13227_v6 = vld [vmem:[#allocation2 + $0x3c] sm:$0xff]  ;;  %v14407_v14 = vunpack.c.l.b16 %v1874_v27  ;;  %v12261_v26 = vrot.slane %v2262_v19, 9  ;;  %v14410_v29 = vadd.f32 %v14375_v42, %v521_v13  ;;  %v837_v0 = vshrl.u32 %v727_v4, 16  ;;  %v13289_v3 = vld [vmem:[#allocation10 + $0x118] sm:$0xff] }
  0xb5   : > { %v1514_v23 = vld [vmem:[#allocation2 + $0x40] sm:$0xf]  ;;  %v1162_v53 = vsel %vm14047_vm3, %v971_v51, %v1161_v28  ;;  %v1672_v34 = vrot.slane %v1670_v61, 4  ;;  %v1675_v36 = vrot.slane %v1673_v18, 5  ;;  %1410 = vmatmul.bf16.gmra.mxu0 %v13227_v6  ;;  %v840_v55 = vshll.u32 %v727_v4, 16 }
  0xb6   : > { %v2263_v52 = vld [vmem:[#allocation2 + $0x40] sm:$0xf]  ;;  %v1679_v32 = vshll.u32 %v1514_v23, 16  ;;  %v1683_v37 = vshrl.u32 %v1514_v23, 16  ;;  %1163 = vst [vmem:[#allocation2 + $0xa4] sm:$0x1] %v1162_v53  ;;  %3715 = vmatpush.bf16.msrb.mxu0 %v13289_v3 }
  0xb7   : > { %v2383_v12 = vrot.slane %v2263_v52, 5  ;;  %v845_v35 = vshrl.u32 %v728_v17, 16  ;;  %v1676_v46 = vor.u32 %v1675_v36, %v1672_v34  ;;  %v848_v30 = vshll.u32 %v728_v17, 16  ;;  %v1108_v41 = vld [vmem:[#allocation2 + $0x48] sm:$0xf] }
  0xb8   : > { %v1681_v40 = vrot.slane %v1679_v32, 5  ;;  %v1685_v51 = vrot.slane %v1683_v37, 4  ;;  %v839_v43 = vrot.slane %v837_v0, 7  ;;  %v1168_v62 = vld [vmem:[#allocation2 + $0xb0] sm:$0x1]  ;;  %v1891_v53 = vrot.slane %v1889_v54, 5 }
  0xb9   : > { %v2384_v33 = vsel %vm14094_vm11, %v12261_v26, %v2383_v12  ;;  %v2385_v38 = vrot.slane %v2383_v12, 4  ;;  %v847_v15 = vrot.slane %v845_v35, 7  ;;  %v1677_v5 = vrot.slane %v1676_v46, 4  ;;  %v1112_v47 = vld [vmem:[#allocation2 + $0x50] sm:$0x1] }
  0xba   : > { %v1686_v44 = vor.u32 %v1685_v51, %v1681_v40  ;;  %v2485_v45 = vunpack.c.l.b16 %v2384_v33  ;;  %v1169_v49 = vsel %vm14047_vm3, %v988_v25, %v1168_v62  ;;  %v1515_v2 = vld [vmem:[#allocation2 + $0x44] sm:$0x1]  ;;  %v842_v59 = vor.u32 %v840_v55, %v839_v43  ;;  %v637_v28 = vld [vmem:[#allocation2 + $0x54] sm:$0x1]  ;;  %v687_v10 = vld [vmem:[#allocation2 + $0x5c] sm:$0x1] }
  0xbb   : > { %v2264_v50 = vld [vmem:[#allocation2 + $0x44] sm:$0x1]  ;;  %v843_v60 = vrot.slane %v839_v43, 4  ;;  %v850_v16 = vor.u32 %v848_v30, %v847_v15  ;;  %v852_v13 = vrot.slane %v847_v15, 4  ;;  %v1682_v1 = vsel %vm14102_vm12, %v1677_v5, %v1681_v40  ;;  %1170 = vst [vmem:[#allocation2 + $0xb0] sm:$0x1] %v1169_v49 }
  0xbc   : > { %v1687_v9 = vrot.slane %v1686_v44, 4  ;;  %v1689_v19 = vshll.u32 %v1515_v2, 16  ;;  %v2386_v4 = vrot.slane %v2264_v50, 5  ;;  %v1960_v17 = vunpack.c.l.b16 %v1682_v1  ;;  %v486_v33 = vld [vmem:[%s14021_s12 + $0x70] sm:$0xff]  ;;  %v487_v62 = vld [vmem:[%s14021_s12 + $0x78] sm:$0xff] }
  0xbd   : > { %v1539_v61 = vld [vmem:[#allocation2 + $0xa4] sm:$0x1]  ;;  %v851_v20 = vsel %vm14118_vm13, %v843_v60, %v850_v16  ;;  %v1109_v25 = vsel %vm14124_vm14, %v842_v59, %v1108_v41  ;;  %v1113_v18 = vsel %vm14047_vm3, %v852_v13, %v1112_v47  ;;  %v1897_v26 = vrot.slane %v1895_v58, 5 }
  0xbe   : > { %v1691_v27 = vrot.slane %v1689_v19, 5  ;;  %v1881_v6 = vshll.u32 %v1539_v61, 16  ;;  %v2387_v23 = vsel %vm14094_vm11, %v2385_v38, %v2386_v4  ;;  %1110 = vst [vmem:[#allocation2 + $0x48] sm:$0xf] %v1109_v25  ;;  %v1899_v34 = vshrl.u32 %v14370_v39, 16 }
  0xbf   : > { %v2486_v52 = vunpack.c.l.b16 %v2387_v23  ;;  %1111 = vst [vmem:[#allocation2 + $0x4c] sm:$0xf] %v851_v20  ;;  %v588_v36 = vmax.f32 %v14401_v31, 0.0  ;;  %v1892_v12 = vor.u32 %v1891_v53, %v14396_v21  ;;  %v589_v0 = vmax.f32 %v14410_v29, 0.0 }
  0xc0   : > { %v1692_v32 = vsel %vm14102_vm12, %v1687_v9, %v1691_v27  ;;  %v1883_v37 = vrot.slane %v1881_v6, 5  ;;  %1114 = vst [vmem:[#allocation2 + $0x50] sm:$0x1] %v1113_v18  ;;  %v1901_v35 = vrot.slane %v1899_v34, 4  ;;  %v638_v58 = vsel %vm14047_vm3, 0, %v637_v28 }
  0xc1   : > { %v1961_v54 = vunpack.c.l.b16 %v1692_v32  ;;  %v2512_v55 = vpack.c.b16 %v2486_v52, %v2485_v45  ;;  %v1893_v31 = vrot.slane %v1892_v12, 4  ;;  %639 = vst [vmem:[#allocation2 + $0x54] sm:$0x1] %v638_v58  ;;  %v729_v46 = vpack.c.bf16 %v588_v36, %v588_v36 }
  0xc2   : > { %v1884_v39 = vsel %vm14102_vm12, %v14390_v63, %v1883_v37  ;;  %v14443_v40 = vpack.c.bf16 %v589_v0, %v589_v0  ;;  %v1542_v51 = vld [vmem:[#allocation2 + $0xb0] sm:$0x1]  ;;  %v1902_v30 = vor.u32 %v1901_v35, %v1897_v26  ;;  %v688_v3 = vsel %vm14059_vm4, 0, %v687_v10 }
  0xc3   : > { %v1987_v21 = vpack.c.b16 %v1961_v54, %v1960_v17  ;;  %v1977_v29 = vunpack.c.l.b16 %v1884_v39  ;;  %2620 = vmatmul.bf16.gmra.mxu2 %v2512_v55  ;;  %v1898_v38 = vsel %vm14102_vm12, %v1893_v31, %v1897_v26  ;;  %v1905_v43 = vshll.u32 %v1542_v51, 16  ;;  %689 = vst [vmem:[#allocation2 + $0x5c] sm:$0x1] %v688_v3 }
  0xc4   : > { %v854_v63 = vshrl.u32 %v729_v46, 16  ;;  %v857_v15 = vshll.u32 %v729_v46, 16  ;;  %v1903_v45 = vrot.slane %v1902_v30, 4  ;;  %v862_v47 = vshrl.u32 %v14443_v40, 16 }
  0xc5   : > { %2095 = vmatmul.bf16.gmra.mxu1 %v1987_v21  ;;  %v1995_v5 = vpack.c.b16 %v1977_v29, %v14407_v14  ;;  %v1516_v44 = vld [vmem:[#allocation2 + $0x48] sm:$0xf]  ;;  %v1907_v60 = vrot.slane %v1905_v43, 5  ;;  %v14453_v16 = vunpack.c.l.b16 %v1898_v38  ;;  %v522_v4 = vmul.f32 %v14364_v56, %v486_v33  ;;  %v711_v29 = vld [vmem:[#allocation2 + $0xbc] sm:$0x1] }
  0xc6   : > { %v2265_v41 = vld [vmem:[#allocation2 + $0x48] sm:$0xe]  ;;  %v1517_v2 = vld [vmem:[#allocation2 + $0x4c] sm:$0xf]  ;;  %v1694_v50 = vshrl.u32 %v1516_v44, 16  ;;  %v1697_v59 = vshll.u32 %v1516_v44, 16  ;;  %v523_v14 = vmul.f32 %v14364_v56, %v487_v62 }
  0xc7   : > { %v13228_v49 = vld [vmem:[#allocation2 + $0x48] sm:$0xff]  ;;  %2135 = vmatmul.bf16.gmra.mxu3 %v1995_v5  ;;  %v1518_v13 = vld [vmem:[#allocation2 + $0x50] sm:$0x1]  ;;  %v1703_v1 = vshll.u32 %v1517_v2, 16  ;;  %v1707_v9 = vshrl.u32 %v1517_v2, 16  ;;  %v1908_v25 = vsel %vm14102_vm12, %v1903_v45, %v1907_v60  ;;  %v12262_v23 = vrot.slane %v2265_v41, 9 }
  0xc8   : > { %v2266_v19 = vld [vmem:[#allocation2 + $0x4c] sm:$0xf]  ;;  %1415 = vmatmul.bf16.gmra.mxu0 %v13228_v49  ;;  %v1696_v17 = vrot.slane %v1694_v50, 4  ;;  %v1699_v61 = vrot.slane %v1697_v59, 5  ;;  %v1713_v20 = vshll.u32 %v1518_v13, 16  ;;  %v14459_v6 = vunpack.c.l.b16 %v1908_v25 }
  0xc9   : > { %v2267_v18 = vld [vmem:[#allocation2 + $0x50] sm:$0x1]  ;;  %v1705_v28 = vrot.slane %v1703_v1, 5  ;;  %v1709_v27 = vrot.slane %v1707_v9, 4  ;;  %v2390_v26 = vrot.slane %v2266_v19, 5  ;;  %v856_v37 = vrot.slane %v854_v63, 7 }
  0xca   : > { %v1700_v53 = vor.u32 %v1699_v61, %v1696_v17  ;;  %v1715_v52 = vrot.slane %v1713_v20, 5  ;;  %v2393_v34 = vrot.slane %v2267_v18, 5  ;;  %v1996_v32 = vpack.c.b16 %v14459_v6, %v14453_v16  ;;  %v1115_v35 = vld [vmem:[#allocation2 + $0x54] sm:$0xf]  ;;  %v1119_v21 = vld [vmem:[#allocation2 + $0x5c] sm:$0x1] }
  0xcb   : > { %v1710_v36 = vor.u32 %v1709_v27, %v1705_v28  ;;  %v864_v12 = vrot.slane %v862_v47, 7  ;;  %v2391_v10 = vsel %vm14094_vm11, %v12262_v23, %v2390_v26  ;;  %v2392_v54 = vrot.slane %v2390_v26, 4  ;;  %v1543_v38 = vld [vmem:[#allocation2 + $0xb4] sm:$0xf]  ;;  %v1544_v43 = vld [vmem:[#allocation2 + $0xb8] sm:$0xf] }
  0xcc   : > { %v1701_v0 = vrot.slane %v1700_v53, 4  ;;  %v865_v55 = vshll.u32 %v14443_v40, 16  ;;  %v2487_v39 = vunpack.c.l.b16 %v2391_v10  ;;  %v859_v31 = vor.u32 %v857_v15, %v856_v37  ;;  %v640_v5 = vld [vmem:[#allocation2 + $0x60] sm:$0x1]  ;;  %v690_v49 = vld [vmem:[#allocation2 + $0x68] sm:$0x1] }
  0xcd   : > { %v1711_v58 = vrot.slane %v1710_v36, 4  ;;  %v860_v46 = vrot.slane %v856_v37, 4  ;;  %v2394_v30 = vsel %vm14094_vm11, %v2392_v54, %v2393_v34  ;;  %v869_v33 = vrot.slane %v864_v12, 4  ;;  %v488_v19 = vld [vmem:[%s14021_s12 + $0x80] sm:$0xff]  ;;  %v489_v17 = vld [vmem:[%s14021_s12 + $0x88] sm:$0xff] }
  0xce   : > { %v1706_v51 = vsel %vm14102_vm12, %v1701_v0, %v1705_v28  ;;  %v867_v3 = vor.u32 %v865_v55, %v864_v12  ;;  %v2488_v62 = vunpack.c.l.b16 %v2394_v30  ;;  %v1116_v15 = vsel %vm14124_vm14, %v859_v31, %v1115_v35  ;;  %v14492_v23 = vld [vmem:[#allocation2 + $0x90] sm:$0xe]  ;;  %v14494_v53 = vld [vmem:[#allocation2 + $0x94] sm:$0xf] }
  0xcf   : > { %v1716_v40 = vsel %vm14102_vm12, %v1711_v58, %v1715_v52  ;;  %v1962_v63 = vunpack.c.l.b16 %v1706_v51  ;;  %1117 = vst [vmem:[#allocation2 + $0x54] sm:$0xf] %v1116_v15  ;;  %v1120_v41 = vsel %vm14047_vm3, %v869_v33, %v1119_v21  ;;  %v712_v47 = vsel %vm14059_vm4, 0, %v711_v29 }
  0xd0   : > { %v1963_v44 = vunpack.c.l.b16 %v1716_v40  ;;  %v868_v45 = vsel %vm14118_vm13, %v860_v46, %v867_v3  ;;  %v2513_v2 = vpack.c.b16 %v2488_v62, %v2487_v39  ;;  %v1910_v50 = vshrl.u32 %v1543_v38, 16  ;;  %1121 = vst [vmem:[#allocation2 + $0x5c] sm:$0x1] %v1120_v41 }
  0xd1   : > { %1118 = vst [vmem:[#allocation2 + $0x58] sm:$0xf] %v868_v45  ;;  %v1913_v59 = vshll.u32 %v1543_v38, 16  ;;  %v1919_v60 = vshll.u32 %v1544_v43, 16  ;;  %v1923_v13 = vshrl.u32 %v1544_v43, 16  ;;  %v558_v1 = vadd.f32 %v14375_v42, %v522_v4 }
  0xd2   : > { %v1988_v16 = vpack.c.b16 %v1963_v44, %v1962_v63  ;;  %v559_v9 = vadd.f32 %v14375_v42, %v523_v14  ;;  %713 = vst [vmem:[#allocation2 + $0xbc] sm:$0x1] %v712_v47  ;;  %v1912_v61 = vrot.slane %v1910_v50, 4  ;;  %v641_v18 = vsel %vm14047_vm3, 0, %v640_v5 }
  0xd3   : > { %2625 = vmatmul.bf16.gmra.mxu2 %v2513_v2  ;;  %v1915_v20 = vrot.slane %v1913_v59, 5  ;;  %v14484_v25 = vrot.slane %v1919_v60, 5  ;;  %v14488_v28 = vrot.slane %v1923_v13, 4  ;;  %v590_v27 = vmax.f32 %v558_v1, 0.0  ;;  %642 = vst [vmem:[#allocation2 + $0x60] sm:$0x1] %v641_v18 }
  0xd4   : > { %v591_v6 = vmax.f32 %v559_v9, 0.0  ;;  %v691_v4 = vsel %vm14059_vm4, 0, %v690_v49  ;;  %v524_v52 = vmul.f32 %v14364_v56, %v488_v19  ;;  %v1005_v26 = vrot.slane %v14299_v24, 4  ;;  %v13285_v60 = vld [vmem:[#allocation10 + $0xf8] sm:$0xff]  ;;  %v13288_v19 = vld [vmem:[#allocation10 + $0x110] sm:$0xff] }
  0xd5   : > { %2100 = vmatmul.bf16.gmra.mxu1 %v1988_v16  ;;  %v1916_v14 = vor.u32 %v1915_v20, %v1912_v61  ;;  %692 = vst [vmem:[#allocation2 + $0x68] sm:$0x1] %v691_v4  ;;  %v525_v34 = vmul.f32 %v14364_v56, %v489_v17  ;;  %v1926_v12 = vor.u32 %v14488_v28, %v14484_v25  ;;  %v12268_v10 = vrot.slane %v14492_v23, 9  ;;  %v13284_v28 = vld [vmem:[#allocation10 + $0xf0] sm:$0xff] }
  0xd6   : > { %v1519_v36 = vld [vmem:[#allocation2 + $0x54] sm:$0xf]  ;;  %v731_v39 = vpack.c.bf16 %v590_v27, %v590_v27  ;;  %v2432_v31 = vrot.slane %v14494_v53, 5  ;;  %v732_v29 = vpack.c.bf16 %v591_v6, %v591_v6  ;;  %v14506_v51 = vadd.f32 %v14375_v42, %v524_v52  ;;  %2965 = vmatpush.bf16.msrb.mxu3 %v13285_v60  ;;  %3716 = vmatpush.bf16.msrb.mxu0 %v13288_v19  ;;  %v491_v53 = vld [vmem:[%s14021_s12 + $0x98] sm:$0xff] }
  0xd7   : > { %2140 = vmatmul.bf16.gmra.mxu3 %v1996_v32  ;;  %v14499_v37 = vrot.slane %v1916_v14, 4  ;;  %v2268_v0 = vld [vmem:[#allocation2 + $0x54] sm:$0xe]  ;;  %v1718_v35 = vshrl.u32 %v1519_v36, 16  ;;  %v1721_v58 = vshll.u32 %v1519_v36, 16  ;;  %v14509_v43 = vadd.f32 %v14375_v42, %v525_v34 }
  0xd8   : > { %v13229_v54 = vld [vmem:[#allocation2 + $0x54] sm:$0xff]  ;;  %v1521_v24 = vld [vmem:[#allocation2 + $0x5c] sm:$0x1]  ;;  %v12263_v5 = vrot.slane %v2268_v0, 9  ;;  %v871_v2 = vshrl.u32 %v731_v39, 16  ;;  %v874_v50 = vshll.u32 %v731_v39, 16 }
  0xd9   : > { %v1520_v55 = vld [vmem:[#allocation2 + $0x58] sm:$0xf]  ;;  %1420 = vmatmul.bf16.gmra.mxu0 %v13229_v54  ;;  %v1720_v30 = vrot.slane %v1718_v35, 4  ;;  %v1723_v3 = vrot.slane %v1721_v58, 5  ;;  %v1737_v33 = vshll.u32 %v1521_v24, 16  ;;  %v879_v59 = vshrl.u32 %v732_v29, 16 }
  0xda   : > { %v1727_v46 = vshll.u32 %v1520_v55, 16  ;;  %v1731_v21 = vshrl.u32 %v1520_v55, 16  ;;  %v2269_v32 = vld [vmem:[#allocation2 + $0x58] sm:$0xf]  ;;  %v1175_v38 = vld [vmem:[#allocation2 + $0xbc] sm:$0x1]  ;;  %v1922_v6 = vsel %vm14102_vm12, %v14499_v37, %v14484_v25  ;;  %2966 = vmatpush.bf16.msrb.mxu3 %v13284_v28 }
  0xdb   : > { %v1176_v62 = vsel %vm14047_vm3, %v1005_v26, %v1175_v38  ;;  %v2270_v15 = vld [vmem:[#allocation2 + $0x5c] sm:$0x1]  ;;  %v1724_v44 = vor.u32 %v1723_v3, %v1720_v30  ;;  %v1739_v45 = vrot.slane %v1737_v33, 5  ;;  %v2397_v41 = vrot.slane %v2269_v32, 5  ;;  %v1122_v52 = vld [vmem:[#allocation2 + $0x60] sm:$0xf] }
  0xdc   : > { %v1729_v40 = vrot.slane %v1727_v46, 5  ;;  %v1733_v63 = vrot.slane %v1731_v21, 4  ;;  %1177 = vst [vmem:[#allocation2 + $0xbc] sm:$0x1] %v1176_v62  ;;  %v2400_v47 = vrot.slane %v2270_v15, 5  ;;  %v882_v9 = vshll.u32 %v732_v29, 16 }
  0xdd   : > { %v1725_v16 = vrot.slane %v1724_v44, 4  ;;  %v2398_v13 = vsel %vm14094_vm11, %v12263_v5, %v2397_v41  ;;  %v2399_v1 = vrot.slane %v2397_v41, 4  ;;  %v873_v20 = vrot.slane %v871_v2, 7  ;;  %v2285_v26 = vld [vmem:[#allocation2 + $0x98] sm:$0x1]  ;;  %v490_v44 = vld [vmem:[%s14021_s12 + $0x90] sm:$0xff] }
  0xde   : > { %v1734_v49 = vor.u32 %v1733_v63, %v1729_v40  ;;  %v2489_v61 = vunpack.c.l.b16 %v2398_v13  ;;  %v881_v18 = vrot.slane %v879_v59, 7  ;;  %v1927_v4 = vrot.slane %v1926_v12, 4  ;;  %v1126_v55 = vld [vmem:[#allocation2 + $0x68] sm:$0x1]  ;;  %v643_v46 = vld [vmem:[#allocation2 + $0x6c] sm:$0x1] }
  0xdf   : > { %v1730_v27 = vsel %vm14102_vm12, %v1725_v16, %v1729_v40  ;;  %v2401_v14 = vsel %vm14094_vm11, %v2399_v1, %v2400_v47  ;;  %v876_v54 = vor.u32 %v874_v50, %v873_v20  ;;  %v877_v58 = vrot.slane %v873_v20, 4  ;;  %v693_v29 = vld [vmem:[#allocation2 + $0x74] sm:$0x1]  ;;  %v14552_v59 = vld [vmem:[#allocation2 + $0xa0] sm:$0xf] }
  0xe0   : > { %v1735_v17 = vrot.slane %v1734_v49, 4  ;;  %v1964_v36 = vunpack.c.l.b16 %v1730_v27  ;;  %v2490_v0 = vunpack.c.l.b16 %v2401_v14  ;;  %v884_v39 = vor.u32 %v882_v9, %v881_v18 }
  0xe1   : > { %v886_v24 = vrot.slane %v881_v18, 4  ;;  %v1123_v12 = vsel %vm14124_vm14, %v876_v54, %v1122_v52  ;;  %v2434_v21 = vrot.slane %v2432_v31, 4  ;;  %v2435_v32 = vrot.slane %v2285_v26, 5  ;;  %v1386_v33 = vpop.f32.mrf.mxu0 }
  0xe2   : > { %v1740_v34 = vsel %vm14102_vm12, %v1735_v17, %v1739_v45  ;;  %v2514_v37 = vpack.c.b16 %v2490_v0, %v2489_v61  ;;  %v885_v38 = vsel %vm14118_vm13, %v877_v58, %v884_v39  ;;  %1124 = vst [vmem:[#allocation2 + $0x60] sm:$0xf] %v1123_v12  ;;  %v592_v62 = vmax.f32 %v14506_v51, 0.0 }
  0xe3   : > { %v1965_v35 = vunpack.c.l.b16 %v1740_v34  ;;  %v1545_v25 = vld [vmem:[#allocation2 + $0xbc] sm:$0x1]  ;;  %v1127_v40 = vsel %vm14047_vm3, %v886_v24, %v1126_v55  ;;  %v2071_v63 = vpop.f32.mrf.mxu1  ;;  %1125 = vst [vmem:[#allocation2 + $0x64] sm:$0xf] %v885_v38  ;;  %v593_v15 = vmax.f32 %v14509_v43, 0.0  ;;  %v644_v5 = vsel %vm14047_vm3, 0, %v643_v46 }
  0xe4   : > { %v1929_v3 = vshll.u32 %v1545_v25, 16  ;;  %2630 = vmatmul.bf16.gmra.mxu2 %v2514_v37  ;;  %v2183_v41 = vadd.f32 %v2071_v63, %v1386_v33  ;;  %1128 = vst [vmem:[#allocation2 + $0x68] sm:$0x1] %v1127_v40  ;;  %v14544_v47 = vsel %vm14094_vm11, %v12268_v10, %v2432_v31  ;;  %v694_v51 = vsel %vm14059_vm4, 0, %v693_v29  ;;  %v14568_v25 = vld [vmem:[#allocation2 + $0x9c] sm:$0xe] }
  0xe5   : > { %v1989_v30 = vpack.c.b16 %v1965_v35, %v1964_v36  ;;  %v1980_v43 = vunpack.c.l.b16 %v1922_v6  ;;  %v14550_v49 = vsel %vm14094_vm11, %v2434_v21, %v2435_v32  ;;  %645 = vst [vmem:[#allocation2 + $0x6c] sm:$0x1] %v644_v5  ;;  %v733_v2 = vpack.c.bf16 %v592_v62, %v592_v62  ;;  %v13283_v62 = vld [vmem:[#allocation10 + $0xe8] sm:$0xff] }
  0xe6   : > { %v1931_v45 = vrot.slane %v1929_v3, 5  ;;  %v734_v50 = vpack.c.bf16 %v593_v15, %v593_v15  ;;  %695 = vst [vmem:[#allocation2 + $0x74] sm:$0x1] %v694_v51  ;;  %v526_v10 = vmul.f32 %v14364_v56, %v490_v44  ;;  %v2499_v1 = vunpack.c.l.b16 %v14544_v47  ;;  %v13287_v51 = vld [vmem:[#allocation10 + $0x108] sm:$0xff]  ;;  %2967 = vmatpush.bf16.msrb.mxu3 %v13283_v62 }
  0xe7   : > { %2105 = vmatmul.bf16.gmra.mxu1 %v1989_v30  ;;  %v888_v60 = vshrl.u32 %v733_v2, 16  ;;  %v891_v16 = vshll.u32 %v733_v2, 16  ;;  %v2500_v9 = vunpack.c.l.b16 %v14550_v49  ;;  %v2439_v17 = vrot.slane %v14552_v59, 5  ;;  %3717 = vmatpush.bf16.msrb.mxu0 %v13287_v51 }
  0xe8   : > { %v1932_v23 = vsel %vm14102_vm12, %v1927_v4, %v1931_v45  ;;  %v896_v13 = vshrl.u32 %v734_v50, 16  ;;  %v899_v19 = vshll.u32 %v734_v50, 16  ;;  %v527_v4 = vmul.f32 %v14364_v56, %v491_v53  ;;  %v2288_v53 = vld [vmem:[#allocation2 + $0xa4] sm:$0x1] }
  0xe9   : > { %v1981_v31 = vunpack.c.l.b16 %v1932_v23  ;;  %v1522_v20 = vld [vmem:[#allocation2 + $0x60] sm:$0xf]  ;;  %v2596_v28 = vpop.f32.mrf.mxu2  ;;  %v890_v27 = vrot.slane %v888_v60, 7  ;;  %v14564_v54 = vpop.f32.mrf.mxu0  ;;  %v14571_v37 = vadd.f32 %v14375_v42, %v526_v10  ;;  %v13282_v10 = vld [vmem:[#allocation10 + $0xe0] sm:$0xff] }
  0xea   : > { %v2271_v18 = vld [vmem:[#allocation2 + $0x60] sm:$0xe]  ;;  %v898_v6 = vrot.slane %v896_v13, 7  ;;  %v1523_v52 = vld [vmem:[#allocation2 + $0x64] sm:$0xf]  ;;  %v1742_v26 = vshrl.u32 %v1522_v20, 16  ;;  %v14562_v0 = vadd.f32 %v2596_v28, %v2183_v41  ;;  %v14566_v24 = vpop.f32.mrf.mxu3  ;;  %2968 = vmatpush.bf16.msrb.mxu3 %v13282_v10 }
  0xeb   : > { %v1997_v61 = vpack.c.b16 %v1981_v31, %v1980_v43  ;;  %v13230_v14 = vld [vmem:[#allocation2 + $0x60] sm:$0xff]  ;;  %v1745_v34 = vshll.u32 %v1522_v20, 16  ;;  %v12264_v36 = vrot.slane %v2271_v18, 9  ;;  %v1524_v55 = vld [vmem:[#allocation2 + $0x68] sm:$0x1]  ;;  %v1751_v35 = vshll.u32 %v1523_v52, 16  ;;  %v14577_v13 = vpop.f32.mrf.mxu1 }
  0xec   : > { %v1755_v58 = vshrl.u32 %v1523_v52, 16  ;;  %v2272_v39 = vld [vmem:[#allocation2 + $0x64] sm:$0xf]  ;;  %v893_v46 = vor.u32 %v891_v16, %v890_v27  ;;  %1425 = vmatmul.bf16.gmra.mxu0 %v13230_v14  ;;  %v1744_v12 = vrot.slane %v1742_v26, 4  ;;  %v1761_v32 = vshll.u32 %v1524_v55, 16  ;;  %v13301_v31 = vld [vmem:[#allocation10 + $0x178] sm:$0xff] }
  0xed   : > { %2145 = vmatmul.bf16.gmra.mxu3 %v1997_v61  ;;  %v1747_v21 = vrot.slane %v1745_v34, 5  ;;  %v2273_v29 = vld [vmem:[#allocation2 + $0x68] sm:$0x1]  ;;  %v2404_v30 = vrot.slane %v2272_v39, 5  ;;  %v1753_v3 = vrot.slane %v1751_v35, 5  ;;  %v901_v40 = vor.u32 %v899_v19, %v898_v6  ;;  %4233 = vmatpush.bf16.msrb.mxu1 %v13301_v31 }
  0xee   : > { %v1757_v33 = vrot.slane %v1755_v58, 4  ;;  %v2407_v38 = vrot.slane %v2273_v29, 5  ;;  %v1129_v63 = vld [vmem:[#allocation2 + $0x6c] sm:$0xf]  ;;  %v1763_v5 = vrot.slane %v1761_v32, 5  ;;  %v894_v50 = vrot.slane %v890_v27, 4 }
  0xef   : > { %v1748_v15 = vor.u32 %v1747_v21, %v1744_v12  ;;  %v2405_v44 = vsel %vm14094_vm11, %v12264_v36, %v2404_v30  ;;  %v2406_v45 = vrot.slane %v2404_v30, 4  ;;  %v1133_v41 = vld [vmem:[#allocation2 + $0x74] sm:$0x1]  ;;  %v903_v23 = vrot.slane %v898_v6, 4  ;;  %v646_v6 = vld [vmem:[#allocation2 + $0x78] sm:$0x1] }
  0xf0   : > { %v1758_v43 = vor.u32 %v1757_v33, %v1753_v3  ;;  %v2491_v2 = vunpack.c.l.b16 %v2405_v44  ;;  %v1130_v19 = vsel %vm14124_vm14, %v893_v46, %v1129_v63  ;;  %v12269_v61 = vrot.slane %v14568_v25, 9  ;;  %v696_v55 = vld [vmem:[#allocation2 + $0x80] sm:$0x1]  ;;  %v14600_v29 = vld [vmem:[#allocation2 + $0xa8] sm:$0xe]  ;;  %v492_v63 = vld [vmem:[%s14021_s12 + $0xa0] sm:$0xff] }
  0xf1   : > { %v1749_v60 = vrot.slane %v1748_v15, 4  ;;  %v2408_v16 = vsel %vm14094_vm11, %v2406_v45, %v2407_v38  ;;  %v902_v28 = vsel %vm14118_vm13, %v894_v50, %v901_v40  ;;  %1131 = vst [vmem:[#allocation2 + $0x6c] sm:$0xf] %v1130_v19  ;;  %v1134_v27 = vsel %vm14047_vm3, %v903_v23, %v1133_v41  ;;  %v1391_v52 = vpop.f32.mrf.mxu0  ;;  %v14596_v21 = vpop.f32.mrf.mxu2 }
  0xf2   : > { %v1759_v20 = vrot.slane %v1758_v43, 4  ;;  %v2492_v18 = vunpack.c.l.b16 %v2408_v16  ;;  %1132 = vst [vmem:[#allocation2 + $0x70] sm:$0xf] %v902_v28  ;;  %v2441_v26 = vrot.slane %v2439_v17, 4  ;;  %v2442_v34 = vrot.slane %v2288_v53, 5  ;;  %v14593_v46 = vpop.f32.mrf.mxu3 }
  0xf3   : > { %v1754_v14 = vsel %vm14102_vm12, %v1749_v60, %v1753_v3  ;;  %v563_v36 = vadd.f32 %v14375_v42, %v527_v4  ;;  %1135 = vst [vmem:[#allocation2 + $0x74] sm:$0x1] %v1134_v27  ;;  %v594_v25 = vmax.f32 %v14571_v37, 0.0  ;;  %v647_v4 = vsel %vm14047_vm3, 0, %v646_v6 }
  0xf4   : > { %v1764_v35 = vsel %vm14102_vm12, %v1759_v20, %v1763_v5  ;;  %v1966_v58 = vunpack.c.l.b16 %v1754_v14  ;;  %v2515_v39 = vpack.c.b16 %v2492_v18, %v2491_v2  ;;  %v14606_v30 = vsel %vm14094_vm11, %v12269_v61, %v2439_v17  ;;  %648 = vst [vmem:[#allocation2 + $0x78] sm:$0x1] %v647_v4  ;;  %v493_v5 = vld [vmem:[%s14021_s12 + $0xa8] sm:$0xff] }
  0xf5   : > { %v1967_v12 = vunpack.c.l.b16 %v1764_v35  ;;  %v595_v32 = vmax.f32 %v563_v36, 0.0  ;;  %v735_v3 = vpack.c.bf16 %v594_v25, %v594_v25  ;;  %v697_v37 = vsel %vm14059_vm4, 0, %v696_v55 }
  0xf6   : > { %2635 = vmatmul.bf16.gmra.mxu2 %v2515_v39  ;;  %v2519_v38 = vpack.c.b16 %v2500_v9, %v2499_v1  ;;  %698 = vst [vmem:[#allocation2 + $0x80] sm:$0x1] %v697_v37  ;;  %v14619_v59 = vsel %vm14094_vm11, %v2441_v26, %v2442_v34  ;;  %v12270_v15 = vrot.slane %v14600_v29, 9  ;;  %v2501_v47 = vunpack.c.l.b16 %v14606_v30  ;;  %v13281_v26 = vld [vmem:[#allocation10 + $0xd8] sm:$0xff] }
  0xf7   : > { %v1990_v33 = vpack.c.b16 %v1967_v12, %v1966_v58  ;;  %v14614_v40 = vpack.c.bf16 %v595_v32, %v595_v32  ;;  %v905_v17 = vshrl.u32 %v735_v3, 16  ;;  %v908_v62 = vshll.u32 %v735_v3, 16  ;;  %2969 = vmatpush.bf16.msrb.mxu3 %v13281_v26  ;;  %v13325_v12 = vld [vmem:[#allocation10 + $0x1b8] sm:$0xff] }
  0xf8   : > { %v1525_v44 = vld [vmem:[#allocation2 + $0x6c] sm:$0xf]  ;;  %v528_v50 = vmul.f32 %v14364_v56, %v492_v63  ;;  %v2502_v16 = vunpack.c.l.b16 %v14619_v59  ;;  %v529_v61 = vmul.f32 %v14364_v56, %v493_v5  ;;  %4612 = vmatpush.bf16.msrb.mxu2 %v13325_v12 }
  0xf9   : > { %2110 = vmatmul.bf16.gmra.mxu1 %v1990_v33  ;;  %v2274_v45 = vld [vmem:[#allocation2 + $0x6c] sm:$0xe]  ;;  %v913_v49 = vshrl.u32 %v14614_v40, 16  ;;  %v916_v1 = vshll.u32 %v14614_v40, 16  ;;  %v1526_v41 = vld [vmem:[#allocation2 + $0x70] sm:$0xf]  ;;  %v14628_v19 = vpop.f32.mrf.mxu0 }
  0xfa   : > { %v13231_v9 = vld [vmem:[#allocation2 + $0x6c] sm:$0xff]  ;;  %v1766_v51 = vshrl.u32 %v1525_v44, 16  ;;  %v1769_v43 = vshll.u32 %v1525_v44, 16  ;;  %v12265_v2 = vrot.slane %v2274_v45, 9  ;;  %v2076_v23 = vpop.f32.mrf.mxu1  ;;  %v1527_v53 = vld [vmem:[#allocation2 + $0x74] sm:$0x1]  ;;  %v14631_v14 = vpop.f32.mrf.mxu3  ;;  %v564_v56 = vadd.f32 %v14375_v42, %v528_v50 }
  0xfb   : > { %v1775_v10 = vshll.u32 %v1526_v41, 16  ;;  %v1779_v31 = vshrl.u32 %v1526_v41, 16  ;;  %v2275_v60 = vld [vmem:[#allocation2 + $0x70] sm:$0xf]  ;;  %v2185_v20 = vadd.f32 %v2076_v23, %v1391_v52  ;;  %v1785_v27 = vshll.u32 %v1527_v53, 16  ;;  %v13300_v45 = vld [vmem:[#allocation10 + $0x170] sm:$0xff] }
  0xfc   : > { %v1768_v18 = vrot.slane %v1766_v51, 4  ;;  %v1771_v28 = vrot.slane %v1769_v43, 5  ;;  %v2276_v6 = vld [vmem:[#allocation2 + $0x74] sm:$0x1]  ;;  %1430 = vmatmul.bf16.gmra.mxu0 %v13231_v9  ;;  %v2411_v55 = vrot.slane %v2275_v60, 5  ;;  %v907_v39 = vrot.slane %v905_v17, 7  ;;  %4234 = vmatpush.bf16.msrb.mxu1 %v13300_v45 }
  0xfd   : > { %2655 = vmatmul.bf16.vlgmr.msra.gmra.mxu3 %v2519_v38  ;;  %v1777_v34 = vrot.slane %v1775_v10, 5  ;;  %v1781_v36 = vrot.slane %v1779_v31, 4  ;;  %v2414_v35 = vrot.slane %v2276_v6, 5  ;;  %v915_v25 = vrot.slane %v913_v49, 7  ;;  %v1136_v33 = vld [vmem:[#allocation2 + $0x78] sm:$0xf] }
  0xfe   : > { %v1772_v58 = vor.u32 %v1771_v28, %v1768_v18  ;;  %v1787_v32 = vrot.slane %v1785_v27, 5  ;;  %v2412_v4 = vsel %vm14094_vm11, %v12265_v2, %v2411_v55  ;;  %v2413_v3 = vrot.slane %v2411_v55, 4  ;;  %v2601_v37 = vpop.f32.mrf.mxu2  ;;  %v13280_v38 = vld [vmem:[#allocation10 + $0xd0] sm:$0xff]  ;;  %v1140_v43 = vld [vmem:[#allocation2 + $0x80] sm:$0x1] }
  0xff   : > { %v1782_v52 = vor.u32 %v1781_v36, %v1777_v34  ;;  %v2493_v63 = vunpack.c.l.b16 %v2412_v4  ;;  %v14636_v5 = vadd.f32 %v2601_v37, %v2185_v20  ;;  %v910_v44 = vor.u32 %v908_v62, %v907_v39  ;;  %v13324_v17 = vld [vmem:[#allocation10 + $0x1b0] sm:$0xff]  ;;  %v2290_v2 = vld [vmem:[#allocation2 + $0xac] sm:$0xf]  ;;  %2970 = vmatpush.bf16.msrb.mxu3 %v13280_v38  ;;  %v2291_v55 = vld [vmem:[#allocation2 + $0xb0] sm:$0x1] }
 0x100   : > { %v1773_v40 = vrot.slane %v1772_v58, 4  ;;  %v2415_v9 = vsel %vm14094_vm11, %v2413_v3, %v2414_v35  ;;  %v911_v41 = vrot.slane %v907_v39, 4  ;;  %v918_v51 = vor.u32 %v916_v1, %v915_v25  ;;  %v649_v62 = vld [vmem:[#allocation2 + $0x84] sm:$0x1]  ;;  %v699_v31 = vld [vmem:[#allocation2 + $0x8c] sm:$0x1]  ;;  %4613 = vmatpush.bf16.msrb.mxu2 %v13324_v17 }
 0x101   : > { %v1783_v49 = vrot.slane %v1782_v52, 4  ;;  %v2494_v23 = vunpack.c.l.b16 %v2415_v9  ;;  %v920_v53 = vrot.slane %v915_v25, 4  ;;  %v1137_v10 = vsel %vm14124_vm14, %v910_v44, %v1136_v33  ;;  %v14646_v1 = vpop.f32.mrf.mxu0  ;;  %v13323_v58 = vld [vmem:[#allocation10 + $0x1a8] sm:$0xff] }
 0x102   : > { %v1778_v50 = vsel %vm14102_vm12, %v1773_v40, %v1777_v34  ;;  %v2078_v18 = vpop.f32.mrf.mxu1  ;;  %v919_v28 = vsel %vm14118_vm13, %v911_v41, %v918_v51  ;;  %1138 = vst [vmem:[#allocation2 + $0x78] sm:$0xf] %v1137_v10  ;;  %v565_v27 = vadd.f32 %v14375_v42, %v529_v61  ;;  %v14651_v34 = vpop.f32.mrf.mxu3  ;;  %v2446_v35 = vrot.slane %v2290_v2, 5 }
 0x103   : > { %v1788_v60 = vsel %vm14102_vm12, %v1783_v49, %v1787_v32  ;;  %v1968_v20 = vunpack.c.l.b16 %v1778_v50  ;;  %v2516_v26 = vpack.c.b16 %v2494_v23, %v2493_v63  ;;  %1139 = vst [vmem:[#allocation2 + $0x7c] sm:$0xf] %v919_v28  ;;  %v1141_v36 = vsel %vm14047_vm3, %v920_v53, %v1140_v43 }
 0x104   : > { %v1969_v6 = vunpack.c.l.b16 %v1788_v60  ;;  %1142 = vst [vmem:[#allocation2 + $0x80] sm:$0x1] %v1141_v36  ;;  %v596_v39 = vmax.f32 %v564_v56, 0.0  ;;  %v597_v25 = vmax.f32 %v565_v27, 0.0  ;;  %v650_v12 = vsel %vm14047_vm3, 0, %v649_v62  ;;  %4614 = vmatpush.bf16.msrb.mxu2 %v13323_v58  ;;  %v13279_v58 = vld [vmem:[#allocation10 + $0xc8] sm:$0xff] }
 0x105   : > { %v700_v42 = vsel %vm14059_vm4, 0, %v699_v31  ;;  %v2186_v52 = vadd.f32 %v2078_v18, %v14628_v19  ;;  %651 = vst [vmem:[#allocation2 + $0x84] sm:$0x1] %v650_v12  ;;  %v2520_v56 = vpack.c.b16 %v2502_v16, %v2501_v47  ;;  %v2448_v33 = vrot.slane %v2446_v35, 4  ;;  %2971 = vmatpush.bf16.msrb.mxu3 %v13279_v58 }
 0x106   : > { %v1991_v61 = vpack.c.b16 %v1969_v6, %v1968_v20  ;;  %2640 = vmatmul.bf16.gmra.mxu2 %v2516_v26  ;;  %v2603_v32 = vpop.f32.mrf.mxu2  ;;  %v737_v4 = vpack.c.bf16 %v596_v39, %v596_v39  ;;  %v14660_v3 = vpack.c.bf16 %v597_v25, %v597_v25  ;;  %701 = vst [vmem:[#allocation2 + $0x8c] sm:$0x1] %v700_v42  ;;  %v2449_v38 = vrot.slane %v2291_v55, 5  ;;  %v13286_v39 = vld [vmem:[#allocation10 + $0x100] sm:$0xff] }
 0x107   : > { %v14666_v37 = vadd.f32 %v2603_v32, %v2186_v52  ;;  %v14672_v19 = vsel %vm14094_vm11, %v12270_v15, %v2446_v35  ;;  %v13299_v52 = vld [vmem:[#allocation10 + $0x168] sm:$0xff]  ;;  %v13322_v32 = vld [vmem:[#allocation10 + $0x1a0] sm:$0xff]  ;;  %3718 = vmatpush.bf16.msrb.mxu0 %v13286_v39 }
 0x108   : > { %v922_v40 = vshrl.u32 %v737_v4, 16  ;;  %v925_v17 = vshll.u32 %v737_v4, 16  ;;  %v930_v30 = vshrl.u32 %v14660_v3, 16  ;;  %v14679_v15 = vsel %vm14094_vm11, %v2448_v33, %v2449_v38  ;;  %4235 = vmatpush.bf16.msrb.mxu1 %v13299_v52  ;;  %4615 = vmatpush.bf16.msrb.mxu2 %v13322_v32 }
 0x109   : > { %2115 = vmatmul.bf16.gmra.mxu1 %v1991_v61  ;;  %v1528_v63 = vld [vmem:[#allocation2 + $0x78] sm:$0xf]  ;;  %v14675_v9 = vpop.f32.mrf.mxu0  ;;  %v2503_v2 = vunpack.c.l.b16 %v14672_v19  ;;  %v933_v55 = vshll.u32 %v14660_v3, 16 }
 0x10a   : > { %v2277_v44 = vld [vmem:[#allocation2 + $0x78] sm:$0xe]  ;;  %v1529_v47 = vld [vmem:[#allocation2 + $0x7c] sm:$0xf]  ;;  %v1790_v16 = vshrl.u32 %v1528_v63, 16  ;;  %v1793_v45 = vshll.u32 %v1528_v63, 16  ;;  %v14682_v50 = vpop.f32.mrf.mxu3  ;;  %v2504_v63 = vunpack.c.l.b16 %v14679_v15 }
 0x10b   : > { %v13232_v59 = vld [vmem:[#allocation2 + $0x78] sm:$0xff]  ;;  %v12266_v49 = vrot.slane %v2277_v44, 9  ;;  %v1530_v41 = vld [vmem:[#allocation2 + $0x80] sm:$0x1]  ;;  %v1799_v29 = vshll.u32 %v1529_v47, 16  ;;  %v1803_v51 = vshrl.u32 %v1529_v47, 16 }
 0x10c   : > { %v2278_v43 = vld [vmem:[#allocation2 + $0x7c] sm:$0xf]  ;;  %1435 = vmatmul.bf16.gmra.mxu0 %v13232_v59  ;;  %v1792_v23 = vrot.slane %v1790_v16, 4  ;;  %v1795_v53 = vrot.slane %v1793_v45, 5  ;;  %v1809_v10 = vshll.u32 %v1530_v41, 16  ;;  %v924_v27 = vrot.slane %v922_v40, 7 }
 0x10d   : > { %2660 = vmatmul.bf16.gmra.mxu3 %v2520_v56  ;;  %v2279_v62 = vld [vmem:[#allocation2 + $0x80] sm:$0x1]  ;;  %v2418_v31 = vrot.slane %v2278_v43, 5  ;;  %v2081_v60 = vpop.f32.mrf.mxu1  ;;  %v1801_v20 = vrot.slane %v1799_v29, 5  ;;  %v1805_v18 = vrot.slane %v1803_v51, 4  ;;  %v932_v38 = vrot.slane %v930_v30, 7 }
 0x10e   : > { %v2421_v28 = vrot.slane %v2279_v62, 5  ;;  %v2187_v6 = vadd.f32 %v2081_v60, %v14646_v1  ;;  %v1796_v26 = vor.u32 %v1795_v53, %v1792_v23  ;;  %v1143_v35 = vld [vmem:[#allocation2 + $0x84] sm:$0xf]  ;;  %v1811_v12 = vrot.slane %v1809_v10, 5  ;;  %v13278_v1 = vld [vmem:[#allocation10 + $0xc0] sm:$0xff]  ;;  %v13321_v47 = vld [vmem:[#allocation10 + $0x198] sm:$0xff] }
 0x10f   : > { %v2419_v36 = vsel %vm14094_vm11, %v12266_v49, %v2418_v31  ;;  %v1806_v25 = vor.u32 %v1805_v18, %v1801_v20  ;;  %v2420_v42 = vrot.slane %v2418_v31, 4  ;;  %v927_v61 = vor.u32 %v925_v17, %v924_v27  ;;  %v13298_v17 = vld [vmem:[#allocation10 + $0x160] sm:$0xff]  ;;  %v1147_v29 = vld [vmem:[#allocation2 + $0x8c] sm:$0x1]  ;;  %2972 = vmatpush.bf16.msrb.mxu3 %v13278_v1  ;;  %4616 = vmatpush.bf16.msrb.mxu2 %v13321_v47 }
 0x110   : > { %v1797_v4 = vrot.slane %v1796_v26, 4  ;;  %v2495_v56 = vunpack.c.l.b16 %v2419_v36  ;;  %v928_v33 = vrot.slane %v924_v27, 4  ;;  %v935_v41 = vor.u32 %v933_v55, %v932_v38  ;;  %v3150_v51 = vld [vmem:[#allocation2 + $0xc] sm:$0xf]  ;;  %v14703_v10 = vld [vmem:[#allocation2 + $0xb8] sm:$0xf]  ;;  %4236 = vmatpush.bf16.msrb.mxu1 %v13298_v17 }
 0x111   : > { %v1807_v40 = vrot.slane %v1806_v25, 4  ;;  %v2422_v3 = vsel %vm14094_vm11, %v2420_v42, %v2421_v28  ;;  %v1144_v59 = vsel %vm14124_vm14, %v927_v61, %v1143_v35  ;;  %v14697_v49 = vpop.f32.mrf.mxu0  ;;  %v937_v53 = vrot.slane %v932_v38, 4  ;;  %v3151_v62 = vld [vmem:[#allocation2 + $0x10] sm:$0xf]  ;;  %v2292_v28 = vld [vmem:[#allocation2 + $0xb4] sm:$0xe] }
 0x112   : > { %v2606_v44 = vpop.f32.mrf.mxu2  ;;  %v1802_v30 = vsel %vm14102_vm12, %v1797_v4, %v1801_v20  ;;  %v2496_v16 = vunpack.c.l.b16 %v2422_v3  ;;  %1145 = vst [vmem:[#allocation2 + $0x84] sm:$0xf] %v1144_v59  ;;  %v14701_v23 = vpop.f32.mrf.mxu3  ;;  %v3199_v31 = vshrl.u32 %v3150_v51, 16  ;;  %v936_v18 = vsel %vm14118_vm13, %v928_v33, %v935_v41  ;;  %v13297_v27 = vld [vmem:[#allocation10 + $0x158] sm:$0xff]  ;;  %v13320_v35 = vld [vmem:[#allocation10 + $0x190] sm:$0xff] }
 0x113   : > { %v14695_v45 = vadd.f32 %v2606_v44, %v2187_v6  ;;  %v1812_v43 = vsel %vm14102_vm12, %v1807_v40, %v1811_v12  ;;  %v1970_v15 = vunpack.c.l.b16 %v1802_v30  ;;  %v3152_v6 = vld [vmem:[#allocation2 + $0x14] sm:$0x1]  ;;  %v3202_v26 = vshll.u32 %v3150_v51, 16  ;;  %1146 = vst [vmem:[#allocation2 + $0x88] sm:$0xf] %v936_v18  ;;  %v13296_v40 = vld [vmem:[#allocation10 + $0x150] sm:$0xff]  ;;  %4617 = vmatpush.bf16.msrb.mxu2 %v13320_v35 }
 0x114   : > { %v1971_v60 = vunpack.c.l.b16 %v1812_v43  ;;  %v2517_v20 = vpack.c.b16 %v2496_v16, %v2495_v56  ;;  %v1148_v55 = vsel %vm14047_vm3, %v937_v53, %v1147_v29  ;;  %v3201_v58 = vrot.slane %v3199_v31, 4  ;;  %v2294_v61 = vld [vmem:[#allocation2 + $0xbc] sm:$0x1]  ;;  %4237 = vmatpush.bf16.msrb.mxu1 %v13297_v27  ;;  %v13333_v53 = vld [vmem:[#allocation10 + $0x1f8] sm:$0xff]  ;;  %v13318_v18 = vld [vmem:[#allocation10 + $0x180] sm:$0xff] }
 0x115   : > { %v2083_v36 = vpop.f32.mrf.mxu1  ;;  %v3208_v39 = vshll.u32 %v3151_v62, 16  ;;  %v3212_v25 = vshrl.u32 %v3151_v62, 16  ;;  %v2521_v42 = vpack.c.b16 %v2504_v63, %v2503_v2  ;;  %1149 = vst [vmem:[#allocation2 + $0x8c] sm:$0x1] %v1148_v55  ;;  %v3204_v52 = vrot.slane %v3202_v26, 5  ;;  %v13319_v2 = vld [vmem:[#allocation10 + $0x188] sm:$0xff]  ;;  %5358 = vmatpush.bf16.msra.mxu3 %v13333_v53 }
 0x116   : > { %v1992_v12 = vpack.c.b16 %v1971_v60, %v1970_v15  ;;  %2645 = vmatmul.bf16.gmra.mxu2 %v2517_v20  ;;  %v2453_v32 = vrot.slane %v14703_v10, 5  ;;  %v3218_v33 = vshll.u32 %v3152_v6, 16  ;;  %v2188_v38 = vadd.f32 %v2083_v36, %v14675_v9  ;;  %v13295_v10 = vld [vmem:[#allocation10 + $0x148] sm:$0xff] }
 0x117   : > { %v14712_v4 = vrot.slane %v3208_v39, 5  ;;  %v3214_v56 = vrot.slane %v3212_v25, 4  ;;  %v12271_v1 = vrot.slane %v2292_v28, 9  ;;  %v3205_v3 = vor.u32 %v3204_v52, %v3201_v58  ;;  %4618 = vmatpush.bf16.msrb.mxu2 %v13319_v2  ;;  %v3153_v2 = vld [vmem:[#allocation2 + $0x18] sm:$0xf] }
 0x118   : > { %v2456_v19 = vrot.slane %v2294_v61, 5  ;;  %v2455_v29 = vrot.slane %v2453_v32, 4  ;;  %v3220_v15 = vrot.slane %v3218_v33, 5  ;;  %4238 = vmatpush.bf16.msrb.mxu1 %v13296_v40 }
 0x119   : > { %2120 = vmatmul.bf16.gmra.mxu1 %v1992_v12  ;;  %v1531_v59 = vld [vmem:[#allocation2 + $0x84] sm:$0xf]  ;;  %v14717_v16 = vpop.f32.mrf.mxu0  ;;  %v3215_v41 = vor.u32 %v3214_v56, %v14712_v4  ;;  %v3206_v43 = vrot.slane %v3205_v3, 4  ;;  %v2454_v36 = vsel %vm14094_vm11, %v12271_v1, %v2453_v32 }
 0x11a   : > { %v2608_v44 = vpop.f32.mrf.mxu2  ;;  %v2280_v17 = vld [vmem:[#allocation2 + $0x84] sm:$0xe]  ;;  %v1814_v47 = vshrl.u32 %v1531_v59, 16  ;;  %v1817_v30 = vshll.u32 %v1531_v59, 16  ;;  %v1532_v31 = vld [vmem:[#allocation2 + $0x88] sm:$0xf]  ;;  %v2457_v40 = vsel %vm14094_vm11, %v2455_v29, %v2456_v19 }
 0x11b   : > { %v14715_v63 = vadd.f32 %v2608_v44, %v2188_v38  ;;  %v12267_v9 = vrot.slane %v2280_v17, 9  ;;  %v14720_v51 = vpop.f32.mrf.mxu3  ;;  %v13233_v62 = vld [vmem:[#allocation2 + $0x84] sm:$0xff]  ;;  %v1823_v27 = vshll.u32 %v1532_v31, 16  ;;  %v1827_v6 = vshrl.u32 %v1532_v31, 16  ;;  %4619 = vmatpush.bf16.msrb.mxu2 %v13318_v18 }
 0x11c   : > { %v1816_v60 = vrot.slane %v1814_v47, 4  ;;  %v1819_v20 = vrot.slane %v1817_v30, 5  ;;  %v1533_v28 = vld [vmem:[#allocation2 + $0x8c] sm:$0x1]  ;;  %v2281_v26 = vld [vmem:[#allocation2 + $0x88] sm:$0xf]  ;;  %1440 = vmatmul.bf16.gmra.mxu0 %v13233_v62  ;;  %v3211_v17 = vsel %vm14102_vm12, %v3206_v43, %v14712_v4  ;;  %4239 = vmatpush.bf16.msrb.mxu1 %v13295_v10  ;;  %v2506_v31 = vunpack.c.l.b16 %v2457_v40 }
 0x11d   : > { %2665 = vmatmul.bf16.gmra.mxu3 %v2521_v42  ;;  %v1833_v58 = vshll.u32 %v1533_v28, 16  ;;  %v2282_v39 = vld [vmem:[#allocation2 + $0x8c] sm:$0x1]  ;;  %v2425_v25 = vrot.slane %v2281_v26, 5  ;;  %v3216_v12 = vrot.slane %v3215_v41, 4  ;;  %v1825_v52 = vrot.slane %v1823_v27, 5 }
 0x11e   : > { %v1820_v35 = vor.u32 %v1819_v20, %v1816_v60  ;;  %v13341_v42 = vld [vmem:[#allocation10 + $0x238] sm:$0xff]  ;;  %v1829_v56 = vrot.slane %v1827_v6, 4  ;;  %v2428_v33 = vrot.slane %v2282_v39, 5  ;;  %v2505_v41 = vunpack.c.l.b16 %v2454_v36  ;;  %v3154_v60 = vld [vmem:[#allocation2 + $0x1c] sm:$0xf] }
 0x11f   : > { %v2086_v55 = vpop.f32.mrf.mxu1  ;;  %v2426_v32 = vsel %vm14094_vm11, %v12267_v9, %v2425_v25  ;;  %v2427_v1 = vrot.slane %v2425_v25, 4  ;;  %5880 = vmatpush.bf16.msra.mxu0 %v13341_v42  ;;  %v1835_v44 = vrot.slane %v1833_v58, 5  ;;  %v3221_v29 = vsel %vm14102_vm12, %v3216_v12, %v3220_v15  ;;  %v3897_v10 = vld [vmem:[#allocation2 + $0x10] sm:$0xf]  ;;  %v3898_v42 = vld [vmem:[#allocation2 + $0x14] sm:$0x1] }
 0x120   : > { %v2189_v61 = vadd.f32 %v2086_v55, %v14697_v49  ;;  %v1821_v38 = vrot.slane %v1820_v35, 4  ;;  %v1830_v3 = vor.u32 %v1829_v56, %v1825_v52  ;;  %v2497_v59 = vunpack.c.l.b16 %v2426_v32  ;;  %v13294_v49 = vld [vmem:[#allocation10 + $0x140] sm:$0xff]  ;;  %v3896_v35 = vld [vmem:[#allocation2 + $0xc] sm:$0xe] }
 0x121   : > { %v2429_v30 = vsel %vm14094_vm11, %v2427_v1, %v2428_v33  ;;  %v1406_v9 = vpop.f32.mrf.mxu0  ;;  %v3599_v18 = vunpack.c.l.b16 %v3211_v17  ;;  %v3223_v28 = vshrl.u32 %v3153_v2, 16  ;;  %v3600_v26 = vunpack.c.l.b16 %v3221_v29  ;;  %4240 = vmatpush.bf16.msrb.mxu1 %v13294_v49 }
 0x122   : > { %v1826_v47 = vsel %vm14102_vm12, %v1821_v38, %v1825_v52  ;;  %v1831_v53 = vrot.slane %v1830_v3, 4  ;;  %v2498_v62 = vunpack.c.l.b16 %v2429_v30  ;;  %v3226_v36 = vshll.u32 %v3153_v2, 16 }
 0x123   : > { %v14740_v43 = vpop.f32.mrf.mxu3  ;;  %v1972_v20 = vunpack.c.l.b16 %v1826_v47  ;;  %v3994_v58 = vrot.slane %v3897_v10, 5  ;;  %v3225_v39 = vrot.slane %v3223_v28, 4  ;;  %v3232_v25 = vshll.u32 %v3154_v60, 16  ;;  %v3157_v28 = vld [vmem:[#allocation2 + $0x28] sm:$0xf] }
 0x124   : > { %v2611_v19 = vpop.f32.mrf.mxu2  ;;  %v1836_v27 = vsel %vm14102_vm12, %v1831_v53, %v1835_v44  ;;  %v2518_v6 = vpack.c.b16 %v2498_v62, %v2497_v59  ;;  %v2522_v12 = vpack.c.b16 %v2506_v31, %v2505_v41  ;;  %v3228_v52 = vrot.slane %v3226_v36, 5 }
 0x125   : > { %v14738_v4 = vadd.f32 %v2611_v19, %v2189_v61  ;;  %v1973_v15 = vunpack.c.l.b16 %v1836_v27  ;;  %v3155_v61 = vld [vmem:[#allocation2 + $0x20] sm:$0x1]  ;;  %v3236_v56 = vshrl.u32 %v3154_v60, 16  ;;  %v3234_v38 = vrot.slane %v3232_v25, 5 }
 0x126   : > { %2650 = vmatmul.bf16.gmra.mxu2 %v2518_v6  ;;  %v12432_v1 = vrot.slane %v3896_v35, 9  ;;  %v3229_v40 = vor.u32 %v3228_v52, %v3225_v39  ;;  %v3631_v59 = vpack.c.b16 %v3600_v26, %v3599_v18  ;;  %v3996_v49 = vrot.slane %v3994_v58, 4 }
 0x127   : > { %v2088_v55 = vpop.f32.mrf.mxu1  ;;  %v1993_v33 = vpack.c.b16 %v1973_v15, %v1972_v20  ;;  %v3238_v3 = vrot.slane %v3236_v56, 4  ;;  %v3997_v2 = vrot.slane %v3898_v42, 5  ;;  %v3242_v47 = vshll.u32 %v3155_v61, 16  ;;  %v3156_v20 = vld [vmem:[#allocation2 + $0x24] sm:$0xf] }
 0x128   : > { %v2190_v32 = vadd.f32 %v2088_v55, %v14717_v16  ;;  %v3230_v53 = vrot.slane %v3229_v40, 4  ;;  %v3995_v62 = vsel %vm14094_vm11, %v12432_v1, %v3994_v58  ;;  %v3247_v26 = vshrl.u32 %v3156_v20, 16  ;;  %v3900_v42 = vld [vmem:[#allocation2 + $0x1c] sm:$0xf]  ;;  %v13262_v40 = vld [vmem:[#allocation2 + $0xc] sm:$0xff] }
 0x129   : > { %2125 = vmatmul.bf16.gmra.mxu1 %v1993_v33  ;;  %v1408_v17 = vpop.f32.mrf.mxu0  ;;  %v3239_v19 = vor.u32 %v3238_v3, %v3234_v38  ;;  %v3998_v31 = vsel %vm14094_vm11, %v3996_v49, %v3997_v2  ;;  %v3244_v60 = vrot.slane %v3242_v47, 5  ;;  %v4121_v27 = vunpack.c.l.b16 %v3995_v62  ;;  %v3901_v49 = vld [vmem:[#allocation2 + $0x20] sm:$0x1] }
 0x12a   : > { %v4122_v6 = vunpack.c.l.b16 %v3998_v31  ;;  %v3250_v35 = vshll.u32 %v3156_v20, 16  ;;  %v3256_v58 = vshll.u32 %v3157_v28, 16  ;;  %v3260_v39 = vshrl.u32 %v3157_v28, 16  ;;  %v13340_v28 = vld [vmem:[#allocation10 + $0x230] sm:$0xff] }
 0x12b   : > { %v2131_v41 = vpop.f32.mrf.mxu3  ;;  %v3240_v10 = vrot.slane %v3239_v19, 4  ;;  %v3249_v33 = vrot.slane %v3247_v26, 4  ;;  %v4001_v3 = vrot.slane %v3900_v42, 5  ;;  %v4004_v20 = vrot.slane %v3901_v49, 5  ;;  %5881 = vmatpush.bf16.msra.mxu0 %v13340_v28  ;;  %v13263_v49 = vld [vmem:[#allocation2 + $0x18] sm:$0xff] }
 0x12c   : > { %v2613_v44 = vpop.f32.mrf.mxu2  ;;  %v14748_v29 = vadd.f32 %v2131_v41, %v14566_v24  ;;  %3719 = vmatmul.bf16.vlgmr.msrb.gmra.mxu0 %v3631_v59  ;;  %v3235_v24 = vsel %vm14102_vm12, %v3230_v53, %v3234_v38  ;;  %v3258_v38 = vrot.slane %v3256_v58, 5  ;;  %v3262_v1 = vrot.slane %v3260_v39, 4  ;;  %v3899_v59 = vld [vmem:[#allocation2 + $0x18] sm:$0xe]  ;;  %v3160_v58 = vld [vmem:[#allocation2 + $0x34] sm:$0xf] }
 0x12d   : > { %2670 = vmatmul.bf16.gmra.mxu3 %v2522_v12  ;;  %v14745_v30 = vadd.f32 %v2613_v44, %v2190_v32  ;;  %v3245_v55 = vsel %vm14102_vm12, %v3240_v10, %v3244_v60  ;;  %v13302_v12 = vld [vmem:[#allocation2 + $0x18] sm:$0xff]  ;;  %v3601_v61 = vunpack.c.l.b16 %v3235_v24  ;;  %v3252_v32 = vrot.slane %v3250_v35, 5  ;;  %v3158_v44 = vld [vmem:[#allocation2 + $0x2c] sm:$0x1]  ;;  %v3159_v35 = vld [vmem:[#allocation2 + $0x30] sm:$0xf] }
 0x12e   : > { %v3602_v52 = vunpack.c.l.b16 %v3245_v55  ;;  %v3266_v62 = vshll.u32 %v3158_v44, 16  ;;  %v12433_v10 = vrot.slane %v3899_v59, 9  ;;  %v4003_v60 = vrot.slane %v4001_v3, 4  ;;  %v3161_v28 = vld [vmem:[#allocation2 + $0x38] sm:$0x1] }
 0x12f   : > { %v2091_v16 = vpop.f32.mrf.mxu1  ;;  %v3253_v53 = vor.u32 %v3252_v32, %v3249_v33  ;;  %v3903_v33 = vld [vmem:[#allocation2 + $0x28] sm:$0xf]  ;;  %v3271_v32 = vshrl.u32 %v3159_v35, 16 }
 0x130   : > { %v2191_v18 = vadd.f32 %v2091_v16, %v1406_v9  ;;  %v4153_v9 = vpack.c.b16 %v4122_v6, %v4121_v27  ;;  %v3632_v41 = vpack.c.b16 %v3602_v52, %v3601_v61  ;;  %v3263_v16 = vor.u32 %v3262_v1, %v3258_v38 }
 0x131   : > { %v3268_v24 = vrot.slane %v3266_v62, 5  ;;  %v4002_v26 = vsel %vm14094_vm11, %v12433_v10, %v4001_v3  ;;  %v3274_v1 = vshll.u32 %v3159_v35, 16  ;;  %v3284_v3 = vshrl.u32 %v3160_v58, 16 }
 0x132   : > { %v1411_v15 = vpop.f32.mrf.mxu0  ;;  %v3264_v6 = vrot.slane %v3263_v16, 4  ;;  %v4123_v42 = vunpack.c.l.b16 %v4002_v26  ;;  %v3273_v16 = vrot.slane %v3271_v32, 4 }
 0x133   : > { %v14762_v27 = vpop.f32.mrf.mxu3  ;;  %v3276_v62 = vrot.slane %v3274_v1, 5 }
 0x134   : > { %v2616_v36 = vpop.f32.mrf.mxu2  ;;  %v3269_v52 = vsel %vm14102_vm12, %v3264_v6, %v3268_v24 }
 0x135   : > { %v14758_v25 = vadd.f32 %v2616_v36, %v2191_v18  ;;  %v13332_v18 = vld [vmem:[#allocation10 + $0x1f0] sm:$0xff]  ;;  %v4005_v36 = vsel %vm14094_vm11, %v4003_v60, %v4004_v20  ;;  %v3286_v60 = vrot.slane %v3284_v3, 4  ;;  %v3277_v35 = vor.u32 %v3276_v62, %v3273_v16  ;;  %v13304_v16 = vld [vmem:[#allocation2 + $0x30] sm:$0xff] }
 0x136   : > { %4620 = vmatmul.bf16.vlgmr.msrb.gmra.mxu2 %v13302_v12  ;;  %5359 = vmatpush.bf16.msra.mxu3 %v13332_v18  ;;  %v13303_v12 = vld [vmem:[#allocation2 + $0x24] sm:$0xff] }
 0x137   : > { %v2093_v56 = vpop.f32.mrf.mxu1  ;;  %v3278_v32 = vrot.slane %v3277_v35, 4 }
 0x138   : > { %v2192_v2 = vadd.f32 %v2093_v56, %v1408_v17  ;;  %v3254_v17 = vrot.slane %v3253_v53, 4  ;;  %v4008_v53 = vrot.slane %v3903_v33, 5 }
 0x139   : > { %4241 = vmatmul.bf16.vlgmr.msrb.gmra.mxu1 %v4153_v9  ;;  %v4124_v9 = vunpack.c.l.b16 %v4005_v36 }
 0x13a   : > { %v1413_v19 = vpop.f32.mrf.mxu0  ;;  %v3259_v61 = vsel %vm14102_vm12, %v3254_v17, %v3258_v38  ;;  %v3904_v38 = vld [vmem:[#allocation2 + $0x2c] sm:$0x1]  ;;  %v4010_v24 = vrot.slane %v4008_v53, 4 }
 0x13b   : > { %v4011_v26 = vrot.slane %v3904_v38, 5 }
 0x13c   : > { %v2618_v47 = vpop.f32.mrf.mxu2  ;;  %3724 = vmatmul.bf16.gmra.mxu0 %v3632_v41  ;;  %v3902_v41 = vld [vmem:[#allocation2 + $0x24] sm:$0xe] }
 0x13d   : > { %2973 = vmatmul.bf16.vlgmr.msrb.gmra.mxu3 %v13262_v40  ;;  %v14760_v31 = vadd.f32 %v2618_v47, %v2192_v2  ;;  %v3280_v40 = vshll.u32 %v3160_v58, 16  ;;  %v3603_v2 = vunpack.c.l.b16 %v3259_v61  ;;  %v3604_v47 = vunpack.c.l.b16 %v3269_v52  ;;  %v3163_v52 = vld [vmem:[#allocation2 + $0x40] sm:$0xf] }
 0x13e   : > { %v12434_v6 = vrot.slane %v3902_v41, 9  ;;  %v4012_v33 = vsel %vm14094_vm11, %v4010_v24, %v4011_v26  ;;  %v3905_v24 = vld [vmem:[#allocation2 + $0x30] sm:$0xe] }
 0x13f   : > { %v3282_v10 = vrot.slane %v3280_v40, 5  ;;  %v3633_v17 = vpack.c.b16 %v3604_v47, %v3603_v2  ;;  %v3304_v2 = vshll.u32 %v3163_v52, 16  ;;  %v3308_v47 = vshrl.u32 %v3163_v52, 16 }
 0x140   : > { %v4009_v61 = vsel %vm14094_vm11, %v12434_v6, %v4008_v53  ;;  %v4126_v38 = vunpack.c.l.b16 %v4012_v33  ;;  %v12435_v33 = vrot.slane %v3905_v24, 9 }
 0x141   : > { %v3287_v58 = vor.u32 %v3286_v60, %v3282_v10  ;;  %v4125_v41 = vunpack.c.l.b16 %v4009_v61  ;;  %v3283_v53 = vsel %vm14102_vm12, %v3278_v32, %v3282_v10  ;;  %v3906_v60 = vld [vmem:[#allocation2 + $0x34] sm:$0xf]  ;;  %v3306_v26 = vrot.slane %v3304_v2, 5  ;;  %v13264_v61 = vld [vmem:[#allocation2 + $0x24] sm:$0xff]  ;;  %v3907_v10 = vld [vmem:[#allocation2 + $0x38] sm:$0x1] }
 0x142   : > { %v2096_v55 = vpop.f32.mrf.mxu1 }
 0x143   : > { %v2193_v39 = vadd.f32 %v2096_v55, %v1411_v15  ;;  %v4154_v15 = vpack.c.b16 %v4124_v9, %v4123_v42  ;;  %v3162_v9 = vld [vmem:[#allocation2 + $0x3c] sm:$0xf]  ;;  %v3288_v1 = vrot.slane %v3287_v58, 4  ;;  %v4155_v35 = vpack.c.b16 %v4126_v38, %v4125_v41 }
 0x144   : > { %v3605_v58 = vunpack.c.l.b16 %v3283_v53 }
 0x145   : > { %v1416_v56 = vpop.f32.mrf.mxu0 }
 0x146   : > { %v2621_v44 = vpop.f32.mrf.mxu2  ;;  %4625 = vmatmul.bf16.gmra.mxu2 %v13303_v12 }
 0x147   : > { %v14772_v59 = vadd.f32 %v2621_v44, %v2193_v39  ;;  %v3290_v39 = vshll.u32 %v3161_v28, 16  ;;  %v3295_v44 = vshrl.u32 %v3162_v9, 16 }
 0x149   : > { %4246 = vmatmul.bf16.gmra.mxu1 %v4154_v15  ;;  %v3292_v40 = vrot.slane %v3290_v39, 5  ;;  %v3298_v15 = vshll.u32 %v3162_v9, 16  ;;  %v3297_v28 = vrot.slane %v3295_v44, 4  ;;  %v3164_v9 = vld [vmem:[#allocation2 + $0x44] sm:$0x1] }
 0x14a   : > { %v14774_v20 = vpop.f32.mrf.mxu3  ;;  %v2098_v18 = vpop.f32.mrf.mxu1 }
 0x14b   : > { %v2194_v36 = vadd.f32 %v2098_v18, %v1413_v19  ;;  %v3293_v62 = vsel %vm14102_vm12, %v3288_v1, %v3292_v40  ;;  %v3314_v40 = vshll.u32 %v3164_v9, 16 }
 0x14c   : > { %3729 = vmatmul.bf16.gmra.mxu0 %v3633_v17  ;;  %v3606_v39 = vunpack.c.l.b16 %v3293_v62 }
 0x14d   : > { %2978 = vmatmul.bf16.gmra.mxu3 %v13263_v49  ;;  %v1418_v55 = vpop.f32.mrf.mxu0 }
 0x14e   : > { %v2623_v12 = vpop.f32.mrf.mxu2  ;;  %v3634_v44 = vpack.c.b16 %v3606_v39, %v3605_v58 }
 0x14f   : > { %v14776_v42 = vadd.f32 %v2623_v12, %v2194_v36  ;;  %v3310_v36 = vrot.slane %v3308_v47, 4  ;;  %v4015_v12 = vrot.slane %v3906_v60, 5  ;;  %v13331_v47 = vld [vmem:[#allocation10 + $0x1e8] sm:$0xff]  ;;  %v3316_v60 = vrot.slane %v3314_v40, 5 }
 0x150   : > { %5360 = vmatpush.bf16.msra.mxu3 %v13331_v47 }
 0x151   : > { %v3311_v1 = vor.u32 %v3310_v36, %v3306_v26  ;;  %v4016_v38 = vsel %vm14094_vm11, %v12435_v33, %v4015_v12  ;;  %v3166_v36 = vld [vmem:[#allocation2 + $0x4c] sm:$0xf] }
 0x152   : > { %v14782_v19 = vpop.f32.mrf.mxu3  ;;  %v2101_v3 = vpop.f32.mrf.mxu1  ;;  %v3328_v33 = vshll.u32 %v3166_v36, 16 }
 0x153   : > { %v2195_v49 = vadd.f32 %v2101_v3, %v1416_v56  ;;  %v3300_v56 = vrot.slane %v3298_v15, 5  ;;  %v4018_v15 = vrot.slane %v3907_v10, 5  ;;  %v3312_v62 = vrot.slane %v3311_v1, 4  ;;  %v3909_v10 = vld [vmem:[#allocation2 + $0x40] sm:$0xf] }
 0x154   : > { %v13305_v1 = vld [vmem:[#allocation2 + $0x3c] sm:$0xff]  ;;  %v4022_v47 = vrot.slane %v3909_v10, 5 }
 0x155   : > { %v3301_v32 = vor.u32 %v3300_v56, %v3297_v28  ;;  %v3165_v28 = vld [vmem:[#allocation2 + $0x48] sm:$0xf]  ;;  %v13339_v56 = vld [vmem:[#allocation10 + $0x228] sm:$0xff] }
 0x156   : > { %v2626_v18 = vpop.f32.mrf.mxu2  ;;  %v1421_v6 = vpop.f32.mrf.mxu0  ;;  %4630 = vmatmul.bf16.gmra.mxu2 %v13304_v16  ;;  %5882 = vmatpush.bf16.msra.mxu0 %v13339_v56  ;;  %v3319_v9 = vshrl.u32 %v3165_v28, 16 }
 0x157   : > { %v14788_v17 = vadd.f32 %v2626_v18, %v2195_v49  ;;  %v4017_v49 = vrot.slane %v4015_v12, 4  ;;  %v3302_v53 = vrot.slane %v3301_v32, 4  ;;  %v3317_v12 = vsel %vm14102_vm12, %v3312_v62, %v3316_v60 }
 0x158   : > { %v3332_v32 = vshrl.u32 %v3166_v36, 16  ;;  %v3330_v62 = vrot.slane %v3328_v33, 5 }
 0x159   : > { %17431 = vst [vmem:[#allocation20_spill] sm:$0xff] %v14788_v17  ;;  %4251 = vmatmul.bf16.gmra.mxu1 %v4155_v35  ;;  %v4019_v18 = vsel %vm14094_vm11, %v4017_v49, %v4018_v15  ;;  %v3307_v39 = vsel %vm14102_vm12, %v3302_v53, %v3306_v26  ;;  %v3608_v15 = vunpack.c.l.b16 %v3317_v12  ;;  %v3910_v26 = vld [vmem:[#allocation2 + $0x44] sm:$0x1] }
 0x15a   : > { %v2103_v52 = vpop.f32.mrf.mxu1  ;;  %v14790_v3 = vpop.f32.mrf.mxu3  ;;  %v4128_v58 = vunpack.c.l.b16 %v4019_v18  ;;  %v3607_v49 = vunpack.c.l.b16 %v3307_v39  ;;  %v3334_v60 = vrot.slane %v3332_v32, 4  ;;  %v13265_v18 = vld [vmem:[#allocation2 + $0x30] sm:$0xff] }
 0x15b   : > { %v2196_v2 = vadd.f32 %v2103_v52, %v1418_v55  ;;  %v4127_v55 = vunpack.c.l.b16 %v4016_v38  ;;  %v3322_v52 = vshll.u32 %v3165_v28, 16  ;;  %v3321_v38 = vrot.slane %v3319_v9, 4  ;;  %v3167_v28 = vld [vmem:[#allocation2 + $0x50] sm:$0x1] }
 0x15c   : > { %3734 = vmatmul.bf16.gmra.mxu0 %v3634_v44  ;;  %v3335_v10 = vor.u32 %v3334_v60, %v3330_v62  ;;  %v3338_v17 = vshll.u32 %v3167_v28, 16  ;;  %v13306_v28 = vld [vmem:[#allocation2 + $0x48] sm:$0xff] }
 0x15d   : > { %2983 = vmatmul.bf16.gmra.mxu3 %v13264_v61  ;;  %v4156_v44 = vpack.c.b16 %v4128_v58, %v4127_v55  ;;  %v3324_v53 = vrot.slane %v3322_v52, 5  ;;  %v4024_v55 = vrot.slane %v4022_v47, 4  ;;  %v4025_v58 = vrot.slane %v3910_v26, 5 }
 0x15e   : > { %v2628_v41 = vpop.f32.mrf.mxu2  ;;  %v1423_v24 = vpop.f32.mrf.mxu0 }
 0x15f   : > { %v14794_v16 = vadd.f32 %v2628_v41, %v2196_v2  ;;  %v3908_v2 = vld [vmem:[#allocation2 + $0x3c] sm:$0xe]  ;;  %v3325_v12 = vor.u32 %v3324_v53, %v3321_v38 }
 0x161   : > { %17432 = vst [vmem:[#allocation21_spill] sm:$0xff] %v14794_v16  ;;  %v12436_v16 = vrot.slane %v3908_v2, 9  ;;  %v3326_v32 = vrot.slane %v3325_v12, 4 }
 0x162   : > { %v14802_v40 = vpop.f32.mrf.mxu3 }
 0x163   : > { %v4023_v9 = vsel %vm14094_vm11, %v12436_v16, %v4022_v47  ;;  %v3331_v16 = vsel %vm14102_vm12, %v3326_v32, %v3330_v62  ;;  %v13266_v32 = vld [vmem:[#allocation2 + $0x3c] sm:$0xff] }
 0x164   : > { %v2106_v35 = vpop.f32.mrf.mxu1  ;;  %v4129_v2 = vunpack.c.l.b16 %v4023_v9 }
 0x165   : > { %v2197_v61 = vadd.f32 %v2106_v35, %v1421_v6  ;;  %v3635_v35 = vpack.c.b16 %v3608_v15, %v3607_v49  ;;  %v3340_v49 = vrot.slane %v3338_v17, 5  ;;  %v3168_v15 = vld [vmem:[#allocation2 + $0x54] sm:$0xf] }
 0x166   : > { %4635 = vmatmul.bf16.gmra.mxu2 %v13305_v1  ;;  %v3336_v1 = vrot.slane %v3335_v10, 4  ;;  %v3343_v38 = vshrl.u32 %v3168_v15, 16  ;;  %v3346_v53 = vshll.u32 %v3168_v15, 16 }
 0x167   : > { %v2631_v41 = vpop.f32.mrf.mxu2 }
 0x168   : > { %v14804_v6 = vadd.f32 %v2631_v41, %v2197_v61  ;;  %v4026_v61 = vsel %vm14094_vm11, %v4024_v55, %v4025_v58  ;;  %v3341_v47 = vsel %vm14102_vm12, %v3336_v1, %v3340_v49  ;;  %v3609_v55 = vunpack.c.l.b16 %v3331_v16  ;;  %v3913_v1 = vld [vmem:[#allocation2 + $0x50] sm:$0x1]  ;;  %v3170_v49 = vld [vmem:[#allocation2 + $0x5c] sm:$0x1] }
 0x169   : > { %v1426_v36 = vpop.f32.mrf.mxu0  ;;  %4256 = vmatmul.bf16.gmra.mxu1 %v4156_v44  ;;  %v3169_v44 = vld [vmem:[#allocation2 + $0x58] sm:$0xf]  ;;  %v4130_v41 = vunpack.c.l.b16 %v4026_v61  ;;  %v3610_v58 = vunpack.c.l.b16 %v3341_v47  ;;  %v3348_v12 = vrot.slane %v3346_v53, 5  ;;  %v3911_v61 = vld [vmem:[#allocation2 + $0x48] sm:$0xe]  ;;  %v4032_v53 = vrot.slane %v3913_v1, 5 }
 0x16a   : > { %17433 = vst [vmem:[#allocation22_spill] sm:$0xff] %v14804_v6  ;;  %v3352_v60 = vshll.u32 %v3169_v44, 16  ;;  %v12437_v16 = vrot.slane %v3911_v61, 9  ;;  %v13338_v61 = vld [vmem:[#allocation10 + $0x220] sm:$0xff] }
 0x16b   : > { %v4157_v17 = vpack.c.b16 %v4130_v41, %v4129_v2  ;;  %v3636_v41 = vpack.c.b16 %v3610_v58, %v3609_v55  ;;  %5883 = vmatpush.bf16.msra.mxu0 %v13338_v61 }
 0x16c   : > { %v2108_v56 = vpop.f32.mrf.mxu1  ;;  %3739 = vmatmul.bf16.gmra.mxu0 %v3635_v35  ;;  %v3354_v15 = vrot.slane %v3352_v60, 5 }
 0x16d   : > { %v2198_v39 = vadd.f32 %v2108_v56, %v1423_v24  ;;  %2988 = vmatmul.bf16.gmra.mxu3 %v13265_v18  ;;  %v3356_v18 = vshrl.u32 %v3169_v44, 16  ;;  %v3912_v56 = vld [vmem:[#allocation2 + $0x4c] sm:$0xf] }
 0x16f   : > { %v2633_v33 = vpop.f32.mrf.mxu2  ;;  %v3358_v62 = vrot.slane %v3356_v18, 4 }
 0x170   : > { %v14810_v52 = vpop.f32.mrf.mxu3  ;;  %v14812_v24 = vadd.f32 %v2633_v33, %v2198_v39  ;;  %v3345_v39 = vrot.slane %v3343_v38, 4  ;;  %v4029_v33 = vrot.slane %v3912_v56, 5  ;;  %v13330_v56 = vld [vmem:[#allocation10 + $0x1e0] sm:$0xff] }
 0x171   : > { %v1428_v26 = vpop.f32.mrf.mxu0  ;;  %v3359_v6 = vor.u32 %v3358_v62, %v3354_v15  ;;  %5361 = vmatpush.bf16.msra.mxu3 %v13330_v56  ;;  %v3172_v62 = vld [vmem:[#allocation2 + $0x64] sm:$0xf] }
 0x172   : > { %17434 = vst [vmem:[#allocation23_spill] sm:$0xff] %v14812_v24  ;;  %v3349_v47 = vor.u32 %v3348_v12, %v3345_v39  ;;  %v4031_v38 = vrot.slane %v4029_v33, 4  ;;  %v4030_v18 = vsel %vm14094_vm11, %v12437_v16, %v4029_v33  ;;  %v3171_v39 = vld [vmem:[#allocation2 + $0x60] sm:$0xf] }
 0x173   : > { %v3360_v58 = vrot.slane %v3359_v6, 4  ;;  %v4131_v1 = vunpack.c.l.b16 %v4030_v18  ;;  %v3370_v16 = vshll.u32 %v3171_v39, 16 }
 0x174   : > { %v4033_v55 = vsel %vm14094_vm11, %v4031_v38, %v4032_v53  ;;  %v13307_v38 = vld [vmem:[#allocation2 + $0x54] sm:$0xff]  ;;  %v2208_v53 = vadd.f32 %v14762_v27, %v14593_v46  ;;  %v3916_v46 = vld [vmem:[#allocation2 + $0x5c] sm:$0x1] }
 0x175   : > { %v3372_v61 = vrot.slane %v3370_v16, 5 }
 0x176   : > { %v2111_v35 = vpop.f32.mrf.mxu1  ;;  %4640 = vmatmul.bf16.gmra.mxu2 %v13306_v28  ;;  %v3350_v28 = vrot.slane %v3349_v47, 4  ;;  %v3376_v47 = vshll.u32 %v3172_v62, 16 }
 0x177   : > { %v2199_v9 = vadd.f32 %v2111_v35, %v1426_v36  ;;  %v3362_v36 = vshll.u32 %v3170_v49, 16 }
 0x178   : > { %v14818_v10 = vpop.f32.mrf.mxu3 }
 0x179   : > { %v2636_v44 = vpop.f32.mrf.mxu2  ;;  %v1431_v2 = vpop.f32.mrf.mxu0  ;;  %4261 = vmatmul.bf16.gmra.mxu1 %v4157_v17  ;;  %v3364_v17 = vrot.slane %v3362_v36, 5  ;;  %v3915_v36 = vld [vmem:[#allocation2 + $0x58] sm:$0xf] }
 0x17a   : > { %v14820_v24 = vadd.f32 %v2636_v44, %v2199_v9  ;;  %v4132_v44 = vunpack.c.l.b16 %v4033_v55 }
 0x17b   : > { %v3365_v6 = vsel %vm14102_vm12, %v3360_v58, %v3364_v17  ;;  %v13267_v17 = vld [vmem:[#allocation2 + $0x48] sm:$0xff] }
 0x17c   : > { %3744 = vmatmul.bf16.gmra.mxu0 %v3636_v41  ;;  %v3367_v41 = vshrl.u32 %v3171_v39, 16  ;;  %v4036_v39 = vrot.slane %v3915_v36, 5 }
 0x17d   : > { %2993 = vmatmul.bf16.gmra.mxu3 %v13266_v32 }
 0x17e   : > { %v2113_v60 = vpop.f32.mrf.mxu1  ;;  %v4038_v16 = vrot.slane %v4036_v39, 4 }
 0x17f   : > { %v2200_v9 = vadd.f32 %v2113_v60, %v1428_v26  ;;  %v3355_v26 = vsel %vm14102_vm12, %v3350_v28, %v3354_v15  ;;  %v4158_v60 = vpack.c.b16 %v4132_v44, %v4131_v1  ;;  %v3914_v28 = vld [vmem:[#allocation2 + $0x54] sm:$0xe] }
 0x180   : > { %v2656_v35 = vpop.f32.mrf.mxu3  ;;  %v3611_v18 = vunpack.c.l.b16 %v3355_v26  ;;  %v12438_v44 = vrot.slane %v3914_v28, 9 }
 0x181   : > { %v14827_v12 = vadd.f32 %v2656_v35, %v14748_v29  ;;  %v2638_v32 = vpop.f32.mrf.mxu2  ;;  %v1433_v33 = vpop.f32.mrf.mxu0  ;;  %v3380_v29 = vshrl.u32 %v3172_v62, 16  ;;  %v3612_v35 = vunpack.c.l.b16 %v3365_v6  ;;  %v3173_v62 = vld [vmem:[#allocation2 + $0x68] sm:$0x1] }
 0x182   : > { %v14829_v49 = vadd.f32 %v2638_v32, %v2200_v9  ;;  %v3369_v9 = vrot.slane %v3367_v41, 4  ;;  %v3378_v32 = vrot.slane %v3376_v47, 5  ;;  %v3386_v6 = vshll.u32 %v3173_v62, 16  ;;  %v13308_v62 = vld [vmem:[#allocation2 + $0x60] sm:$0xff] }
 0x183   : > { %17435 = vst [vmem:[#allocation24_spill] sm:$0xff] %v14827_v12  ;;  %v3382_v12 = vrot.slane %v3380_v29, 4  ;;  %v3637_v26 = vpack.c.b16 %v3612_v35, %v3611_v18  ;;  %v4039_v47 = vrot.slane %v3916_v46, 5  ;;  %v2209_v29 = vadd.f32 %v14774_v20, %v14631_v14  ;;  %v3174_v35 = vld [vmem:[#allocation2 + $0x6c] sm:$0xf] }
 0x184   : > { %17436 = vst [vmem:[#allocation25_spill] sm:$0xff] %v14829_v49  ;;  %v3373_v41 = vor.u32 %v3372_v61, %v3369_v9  ;;  %v3918_v46 = vld [vmem:[#allocation2 + $0x64] sm:$0xf] }
 0x186   : > { %v2116_v56 = vpop.f32.mrf.mxu1  ;;  %4645 = vmatmul.bf16.gmra.mxu2 %v13307_v38 }
 0x187   : > { %v2201_v15 = vadd.f32 %v2116_v56, %v1431_v2  ;;  %v3383_v2 = vor.u32 %v3382_v12, %v3378_v32  ;;  %v3374_v56 = vrot.slane %v3373_v41, 4  ;;  %v4040_v12 = vsel %vm14094_vm11, %v4038_v16, %v4039_v47 }
 0x188   : > { %v2658_v55 = vpop.f32.mrf.mxu3  ;;  %v4134_v61 = vunpack.c.l.b16 %v4040_v12 }
 0x189   : > { %v14837_v58 = vadd.f32 %v2658_v55, %v2208_v53  ;;  %v2641_v49 = vpop.f32.mrf.mxu2  ;;  %v1436_v1 = vpop.f32.mrf.mxu0  ;;  %4266 = vmatmul.bf16.gmra.mxu1 %v4158_v60  ;;  %v4037_v53 = vsel %vm14094_vm11, %v12438_v44, %v4036_v39  ;;  %v3384_v55 = vrot.slane %v3383_v2, 4  ;;  %v3388_v60 = vrot.slane %v3386_v6, 5 }
 0x18a   : > { %v14839_v27 = vadd.f32 %v2641_v49, %v2201_v15  ;;  %v3175_v15 = vld [vmem:[#allocation2 + $0x70] sm:$0xf]  ;;  %v4133_v20 = vunpack.c.l.b16 %v4037_v53  ;;  %v3391_v39 = vshrl.u32 %v3174_v35, 16  ;;  %v3394_v44 = vshll.u32 %v3174_v35, 16 }
 0x18b   : > { %v3404_v41 = vshrl.u32 %v3175_v15, 16  ;;  %v2210_v2 = vadd.f32 %v14782_v19, %v14651_v34 }
 0x18c   : > { %3749 = vmatmul.bf16.gmra.mxu0 %v3637_v26  ;;  %v3400_v26 = vshll.u32 %v3175_v15, 16  ;;  %v4159_v53 = vpack.c.b16 %v4134_v61, %v4133_v20  ;;  %v3396_v12 = vrot.slane %v3394_v44, 5  ;;  %v3176_v15 = vld [vmem:[#allocation2 + $0x74] sm:$0x1] }
 0x18d   : > { %2998 = vmatmul.bf16.gmra.mxu3 %v13267_v17  ;;  %v3389_v17 = vsel %vm14102_vm12, %v3384_v55, %v3388_v60  ;;  %v13268_v55 = vld [vmem:[#allocation2 + $0x54] sm:$0xff]  ;;  %v3919_v60 = vld [vmem:[#allocation2 + $0x68] sm:$0x1] }
 0x18e   : > { %v2118_v38 = vpop.f32.mrf.mxu1  ;;  %v3614_v47 = vunpack.c.l.b16 %v3389_v17  ;;  %v3402_v35 = vrot.slane %v3400_v26, 5  ;;  %v4046_v20 = vrot.slane %v3919_v60, 5 }
 0x18f   : > { %v2202_v49 = vadd.f32 %v2118_v38, %v1433_v33  ;;  %v3379_v33 = vsel %vm14102_vm12, %v3374_v56, %v3378_v32  ;;  %v4043_v32 = vrot.slane %v3918_v46, 5  ;;  %v3410_v46 = vshll.u32 %v3176_v15, 16  ;;  %v13309_v15 = vld [vmem:[#allocation2 + $0x6c] sm:$0xff] }
 0x190   : > { %v2661_v36 = vpop.f32.mrf.mxu3  ;;  %v3613_v16 = vunpack.c.l.b16 %v3379_v33 }
 0x191   : > { %v14845_v18 = vadd.f32 %v2661_v36, %v2209_v29  ;;  %v2643_v9 = vpop.f32.mrf.mxu2  ;;  %v1438_v14 = vpop.f32.mrf.mxu0  ;;  %v3917_v36 = vld [vmem:[#allocation2 + $0x60] sm:$0xe] }
 0x192   : > { %v14849_v28 = vadd.f32 %v2643_v9, %v2202_v49  ;;  %v3393_v49 = vrot.slane %v3391_v39, 4  ;;  %v3406_v9 = vrot.slane %v3404_v41, 4  ;;  %v3638_v34 = vpack.c.b16 %v3614_v47, %v3613_v16  ;;  %v3177_v16 = vld [vmem:[#allocation2 + $0x78] sm:$0xf]  ;;  %v3178_v47 = vld [vmem:[#allocation2 + $0x7c] sm:$0xf] }
 0x193   : > { %17437 = vst [vmem:[#allocation26_spill] sm:$0xff] %v14845_v18  ;;  %v12439_v33 = vrot.slane %v3917_v36, 9  ;;  %v3412_v36 = vrot.slane %v3410_v46, 5  ;;  %v3428_v60 = vshrl.u32 %v3178_v47, 16 }
 0x194   : > { %v3397_v17 = vor.u32 %v3396_v12, %v3393_v49  ;;  %v3407_v39 = vor.u32 %v3406_v9, %v3402_v35 }
 0x196   : > { %v2121_v6 = vpop.f32.mrf.mxu1  ;;  %4650 = vmatmul.bf16.gmra.mxu2 %v13308_v62  ;;  %v2211_v62 = vadd.f32 %v14790_v3, %v14682_v50  ;;  %v3415_v50 = vshrl.u32 %v3177_v16, 16  ;;  %v3418_v3 = vshll.u32 %v3177_v16, 16  ;;  %v3179_v16 = vld [vmem:[#allocation2 + $0x80] sm:$0x1] }
 0x197   : > { %v2203_v38 = vadd.f32 %v2121_v6, %v1436_v1  ;;  %v4045_v1 = vrot.slane %v4043_v32, 4 }
 0x198   : > { %v2663_v29 = vpop.f32.mrf.mxu3  ;;  %v3420_v46 = vrot.slane %v3418_v3, 5 }
 0x199   : > { %v14857_v56 = vadd.f32 %v2663_v29, %v2210_v2  ;;  %v2646_v18 = vpop.f32.mrf.mxu2  ;;  %4271 = vmatmul.bf16.gmra.mxu1 %v4159_v53  ;;  %v1441_v61 = vpop.f32.mrf.mxu0  ;;  %v13329_v2 = vld [vmem:[#allocation10 + $0x1d8] sm:$0xff]  ;;  %v4047_v6 = vsel %vm14094_vm11, %v4045_v1, %v4046_v20  ;;  %v3408_v53 = vrot.slane %v3407_v39, 4  ;;  %v3417_v39 = vrot.slane %v3415_v50, 4 }
 0x19a   : > { %v14859_v19 = vadd.f32 %v2646_v18, %v2203_v38  ;;  %5362 = vmatpush.bf16.msra.mxu3 %v13329_v2  ;;  %v4044_v18 = vsel %vm14094_vm11, %v12439_v33, %v4043_v32  ;;  %v3398_v38 = vrot.slane %v3397_v17, 4  ;;  %v4136_v9 = vunpack.c.l.b16 %v4047_v6  ;;  %v13337_v1 = vld [vmem:[#allocation10 + $0x218] sm:$0xff] }
 0x19b   : > { %v4135_v12 = vunpack.c.l.b16 %v4044_v18  ;;  %v3413_v33 = vsel %vm14102_vm12, %v3408_v53, %v3412_v36  ;;  %v3921_v20 = vld [vmem:[#allocation2 + $0x70] sm:$0xf]  ;;  %v2212_v17 = vadd.f32 %v14802_v40, %v14701_v23  ;;  %5884 = vmatpush.bf16.msra.mxu0 %v13337_v1  ;;  %v3920_v53 = vld [vmem:[#allocation2 + $0x6c] sm:$0xe]  ;;  %v3922_v36 = vld [vmem:[#allocation2 + $0x74] sm:$0x1]  ;;  %v3421_v23 = vor.u32 %v3420_v46, %v3417_v39 }
 0x19c   : > { %3754 = vmatmul.bf16.gmra.mxu0 %v3638_v34  ;;  %v3403_v34 = vsel %vm14102_vm12, %v3398_v38, %v3402_v35  ;;  %v3616_v18 = vunpack.c.l.b16 %v3413_v33  ;;  %v4050_v6 = vrot.slane %v3921_v20, 5  ;;  %v13269_v38 = vld [vmem:[#allocation2 + $0x60] sm:$0xff]  ;;  %v3434_v50 = vshll.u32 %v3179_v16, 16 }
 0x19d   : > { %3003 = vmatmul.bf16.gmra.mxu3 %v13268_v55  ;;  %v3424_v55 = vshll.u32 %v3178_v47, 16  ;;  %v3422_v1 = vrot.slane %v3421_v23, 4 }
 0x19e   : > { %v2123_v44 = vpop.f32.mrf.mxu1 }
 0x19f   : > { %v2204_v41 = vadd.f32 %v2123_v44, %v1438_v14  ;;  %v3426_v2 = vrot.slane %v3424_v55, 5 }
 0x1a0   : > { %v2666_v26 = vpop.f32.mrf.mxu3 }
 0x1a1   : > { %v14867_v29 = vadd.f32 %v2666_v26, %v2211_v62  ;;  %v2648_v49 = vpop.f32.mrf.mxu2  ;;  %v1443_v32 = vpop.f32.mrf.mxu0  ;;  %v3430_v62 = vrot.slane %v3428_v60, 4  ;;  %v4160_v26 = vpack.c.b16 %v4136_v9, %v4135_v12  ;;  %v12440_v60 = vrot.slane %v3920_v53, 9  ;;  %v3924_v53 = vld [vmem:[#allocation2 + $0x7c] sm:$0xf] }
 0x1a2   : > { %v14869_v14 = vadd.f32 %v2648_v49, %v2204_v41  ;;  %v3615_v41 = vunpack.c.l.b16 %v3403_v34  ;;  %v4052_v12 = vrot.slane %v4050_v6, 4  ;;  %v4053_v9 = vrot.slane %v3922_v36, 5 }
 0x1a3   : > { %v3431_v40 = vor.u32 %v3430_v62, %v3426_v2  ;;  %v4051_v39 = vsel %vm14094_vm11, %v12440_v60, %v4050_v6 }
 0x1a4   : > { %v3639_v55 = vpack.c.b16 %v3616_v18, %v3615_v41  ;;  %v4054_v46 = vsel %vm14094_vm11, %v4052_v12, %v4053_v9  ;;  %v3181_v41 = vld [vmem:[#allocation2 + $0x88] sm:$0xf]  ;;  %v4137_v16 = vunpack.c.l.b16 %v4051_v39  ;;  %v4057_v9 = vrot.slane %v3924_v53, 5 }
 0x1a5   : > { %v3432_v20 = vrot.slane %v3431_v40, 4  ;;  %v3452_v23 = vshrl.u32 %v3181_v41, 16  ;;  %v13365_v12 = vld [vmem:[#allocation11 + $0x38] sm:$0xff] }
 0x1a6   : > { %v2126_v47 = vpop.f32.mrf.mxu1  ;;  %4655 = vmatmul.bf16.gmra.mxu2 %v13309_v15  ;;  %v2213_v15 = vadd.f32 %v14810_v52, %v14720_v51  ;;  %v3427_v51 = vsel %vm14102_vm12, %v3422_v1, %v3426_v2  ;;  %v3923_v1 = vld [vmem:[#allocation2 + $0x78] sm:$0xe]  ;;  %6961 = vmatpush.bf16.msra.mxu1 %v13365_v12 }
 0x1a7   : > { %v2205_v49 = vadd.f32 %v2126_v47, %v1441_v61  ;;  %v3436_v61 = vrot.slane %v3434_v50, 5  ;;  %v4138_v47 = vunpack.c.l.b16 %v4054_v46  ;;  %v3617_v60 = vunpack.c.l.b16 %v3427_v51 }
 0x1a8   : > { %v2668_v44 = vpop.f32.mrf.mxu3  ;;  %v3454_v39 = vrot.slane %v3452_v23, 4 }
 0x1a9   : > { %v14877_v35 = vadd.f32 %v2668_v44, %v2212_v17  ;;  %v2651_v3 = vpop.f32.mrf.mxu2  ;;  %4276 = vmatmul.bf16.gmra.mxu1 %v4160_v26  ;;  %v14881_v33 = vpop.f32.mrf.mxu0  ;;  %v3180_v26 = vld [vmem:[#allocation2 + $0x84] sm:$0xf]  ;;  %v3437_v52 = vsel %vm14102_vm12, %v3432_v20, %v3436_v61 }
 0x1aa   : > { %v14879_v34 = vadd.f32 %v2651_v3, %v2205_v49  ;;  %v3439_v6 = vshrl.u32 %v3180_v26, 16  ;;  %v3442_v36 = vshll.u32 %v3180_v26, 16  ;;  %v3448_v49 = vshll.u32 %v3181_v41, 16  ;;  %v13310_v3 = vld [vmem:[#allocation2 + $0x78] sm:$0xff]  ;;  %v3925_v41 = vld [vmem:[#allocation2 + $0x80] sm:$0x1] }
 0x1ab   : > { %v3618_v2 = vunpack.c.l.b16 %v3437_v52  ;;  %v4060_v51 = vrot.slane %v3925_v41, 5  ;;  %v13311_v41 = vld [vmem:[#allocation2 + $0x84] sm:$0xff] }
 0x1ac   : > { %3759 = vmatmul.bf16.gmra.mxu0 %v3639_v55  ;;  %v4161_v55 = vpack.c.b16 %v4138_v47, %v4137_v16  ;;  %v3441_v20 = vrot.slane %v3439_v6, 4  ;;  %v3444_v61 = vrot.slane %v3442_v36, 5  ;;  %v4059_v16 = vrot.slane %v4057_v9, 4  ;;  %v13328_v36 = vld [vmem:[#allocation10 + $0x1d0] sm:$0xff] }
 0x1ad   : > { %3008 = vmatmul.bf16.gmra.mxu3 %v13269_v38 }
 0x1ae   : > { %v2128_v44 = vpop.f32.mrf.mxu1  ;;  %v3445_v52 = vor.u32 %v3444_v61, %v3441_v20  ;;  %5363 = vmatpush.bf16.msra.mxu3 %v13328_v36 }
 0x1af   : > { %v2206_v18 = vadd.f32 %v2128_v44, %v1443_v32  ;;  %v2214_v32 = vadd.f32 %v14818_v10, %v14740_v43  ;;  %v13270_v44 = vld [vmem:[#allocation2 + $0x6c] sm:$0xff]  ;;  %v3640_v43 = vpack.c.b16 %v3618_v2, %v3617_v60  ;;  %v12441_v10 = vrot.slane %v3923_v1, 9  ;;  %v3184_v1 = vld [vmem:[#allocation2 + $0x94] sm:$0xf] }
 0x1b0   : > { %v2671_v17 = vpop.f32.mrf.mxu3 }
 0x1b1   : > { %v14889_v62 = vadd.f32 %v2671_v17, %v2213_v15  ;;  %v2653_v38 = vpop.f32.mrf.mxu2  ;;  %v14897_v50 = vpop.f32.mrf.mxu0  ;;  %v3450_v17 = vrot.slane %v3448_v49, 5  ;;  %v4058_v49 = vsel %vm14094_vm11, %v12441_v10, %v4057_v9  ;;  %v2184_v9 = vadd.f32 %v14577_v13, %v14564_v54 }
 0x1b2   : > { %v14895_v40 = vadd.f32 %v2653_v38, %v2206_v18  ;;  %v3182_v18 = vld [vmem:[#allocation2 + $0x8c] sm:$0x1]  ;;  %v4139_v61 = vunpack.c.l.b16 %v4058_v49 }
 0x1b3   : > { %17438 = vst [vmem:[#allocation27_spill] sm:$0xff] %v14889_v62  ;;  %v3455_v38 = vor.u32 %v3454_v39, %v3450_v17  ;;  %v3458_v53 = vshll.u32 %v3182_v18, 16  ;;  %v2709_v36 = vadd.f32 %v14596_v21, %v2184_v9  ;;  %v3185_v62 = vld [vmem:[#allocation2 + $0x98] sm:$0x1] }
 0x1b5   : > { %v3456_v60 = vrot.slane %v3455_v38, 4  ;;  %v3472_v38 = vshll.u32 %v3184_v1, 16 }
 0x1b6   : > { %4660 = vmatmul.bf16.gmra.mxu2 %v13310_v3  ;;  %v4242_v26 = vpop.f32.mrf.mxu1  ;;  %v4061_v3 = vsel %vm14094_vm11, %v4059_v16, %v4060_v51  ;;  %v13336_v51 = vld [vmem:[#allocation10 + $0x210] sm:$0xff] }
 0x1b7   : > { %v4140_v39 = vunpack.c.l.b16 %v4061_v3  ;;  %5885 = vmatpush.bf16.msra.mxu0 %v13336_v51  ;;  %v3926_v3 = vld [vmem:[#allocation2 + $0x84] sm:$0xe]  ;;  %v3482_v51 = vshll.u32 %v3185_v62, 16 }
 0x1b8   : > { %v2673_v15 = vpop.f32.mrf.mxu3 }
 0x1b9   : > { %v14901_v46 = vadd.f32 %v2673_v15, %v2214_v32  ;;  %v4621_v47 = vpop.f32.mrf.mxu2  ;;  %4281 = vmatmul.bf16.gmra.mxu1 %v4161_v55  ;;  %v14903_v6 = vpop.f32.mrf.mxu0  ;;  %v3446_v32 = vrot.slane %v3445_v52, 4  ;;  %v3460_v55 = vrot.slane %v3458_v53, 5  ;;  %v3183_v15 = vld [vmem:[#allocation2 + $0x90] sm:$0xf]  ;;  %v3927_v52 = vld [vmem:[#allocation2 + $0x88] sm:$0xf]  ;;  %v4162_v13 = vpack.c.b16 %v4140_v39, %v4139_v61 }
 0x1ba   : > { %v3463_v10 = vshrl.u32 %v3183_v15, 16  ;;  %v3476_v53 = vshrl.u32 %v3184_v1, 16 }
 0x1bb   : > { %17439 = vst [vmem:[#allocation28_spill] sm:$0xff] %v14901_v46  ;;  %v3451_v18 = vsel %vm14102_vm12, %v3446_v32, %v3450_v17  ;;  %v4064_v32 = vrot.slane %v3927_v52, 5  ;;  %v3474_v46 = vrot.slane %v3472_v38, 5 }
 0x1bc   : > { %3764 = vmatmul.bf16.gmra.mxu0 %v3640_v43  ;;  %v3461_v43 = vsel %vm14102_vm12, %v3456_v60, %v3460_v55  ;;  %v3619_v17 = vunpack.c.l.b16 %v3451_v18  ;;  %v3465_v60 = vrot.slane %v3463_v10, 4  ;;  %v13271_v55 = vld [vmem:[#allocation2 + $0x78] sm:$0xff]  ;;  %v3478_v1 = vrot.slane %v3476_v53, 4 }
 0x1bd   : > { %3013 = vmatmul.bf16.gmra.mxu3 %v13270_v44  ;;  %v4066_v9 = vrot.slane %v4064_v32, 4  ;;  %v3186_v53 = vld [vmem:[#allocation2 + $0x9c] sm:$0xf] }
 0x1be   : > { %v4244_v12 = vpop.f32.mrf.mxu1 }
 0x1c0   : > { %v2974_v23 = vpop.f32.mrf.mxu3 }
 0x1c1   : > { %v3086_v2 = vadd.f32 %v2974_v23, %v14562_v0  ;;  %v4623_v44 = vpop.f32.mrf.mxu2  ;;  %v14917_v16 = vpop.f32.mrf.mxu0  ;;  %v3620_v23 = vunpack.c.l.b16 %v3461_v43 }
 0x1c3   : > { %v3832_v20 = vadd.f32 %v14881_v33, %v3086_v2  ;;  %v3466_v33 = vshll.u32 %v3183_v15, 16  ;;  %v3641_v39 = vpack.c.b16 %v3620_v23, %v3619_v17  ;;  %v3484_v17 = vrot.slane %v3482_v51, 5  ;;  %v3187_v23 = vld [vmem:[#allocation2 + $0xa0] sm:$0xf] }
 0x1c5   : > { %v4354_v0 = vadd.f32 %v4242_v26, %v3832_v20  ;;  %v3928_v20 = vld [vmem:[#allocation2 + $0x8c] sm:$0x1]  ;;  %v3468_v15 = vrot.slane %v3466_v33, 5 }
 0x1c6   : > { %4665 = vmatmul.bf16.gmra.mxu2 %v13311_v41  ;;  %v4247_v2 = vpop.f32.mrf.mxu1  ;;  %v4067_v18 = vrot.slane %v3928_v20, 5  ;;  %v3479_v41 = vor.u32 %v3478_v1, %v3474_v46  ;;  %v3496_v20 = vshll.u32 %v3187_v23, 16 }
 0x1c7   : > { %v14920_v54 = vadd.f32 %v4621_v47, %v4354_v0  ;;  %v12442_v47 = vrot.slane %v3926_v3, 9  ;;  %v3469_v0 = vor.u32 %v3468_v15, %v3465_v60  ;;  %v3930_v60 = vld [vmem:[#allocation2 + $0x94] sm:$0xf]  ;;  %v3500_v15 = vshrl.u32 %v3187_v23, 16 }
 0x1c8   : > { %v2976_v49 = vpop.f32.mrf.mxu3 }
 0x1c9   : > { %v3087_v26 = vadd.f32 %v2976_v49, %v2709_v36  ;;  %v4626_v61 = vpop.f32.mrf.mxu2  ;;  %4286 = vmatmul.bf16.gmra.mxu1 %v4162_v13  ;;  %v14923_v10 = vpop.f32.mrf.mxu0  ;;  %v4065_v33 = vsel %vm14094_vm11, %v12442_v47, %v4064_v32  ;;  %v3470_v13 = vrot.slane %v3469_v0, 4  ;;  %v3480_v49 = vrot.slane %v3479_v41, 4  ;;  %v13312_v47 = vld [vmem:[#allocation2 + $0x90] sm:$0xff] }
 0x1ca   : > { %v4141_v3 = vunpack.c.l.b16 %v4065_v33  ;;  %v3490_v32 = vshll.u32 %v3186_v53, 16  ;;  %v3929_v0 = vld [vmem:[#allocation2 + $0x90] sm:$0xe]  ;;  %v3502_v23 = vrot.slane %v3500_v15, 4 }
 0x1cb   : > { %v3833_v21 = vadd.f32 %v14897_v50, %v3087_v26  ;;  %v4068_v50 = vsel %vm14094_vm11, %v4066_v9, %v4067_v18  ;;  %v3487_v26 = vshrl.u32 %v3186_v53, 16  ;;  %v4071_v9 = vrot.slane %v3930_v60, 5  ;;  %v3188_v53 = vld [vmem:[#allocation2 + $0xa4] sm:$0x1] }
 0x1cc   : > { %3769 = vmatmul.bf16.gmra.mxu0 %v3641_v39  ;;  %v3485_v39 = vsel %vm14102_vm12, %v3480_v49, %v3484_v17  ;;  %v3492_v51 = vrot.slane %v3490_v32, 5  ;;  %v3506_v60 = vshll.u32 %v3188_v53, 16 }
 0x1cd   : > { %v4355_v43 = vadd.f32 %v4244_v12, %v3833_v21  ;;  %3018 = vmatmul.bf16.gmra.mxu3 %v13271_v55  ;;  %v3489_v41 = vrot.slane %v3487_v26, 4  ;;  %v4073_v17 = vrot.slane %v4071_v9, 4 }
 0x1ce   : > { %v4249_v12 = vpop.f32.mrf.mxu1 }
 0x1cf   : > { %v14925_v52 = vadd.f32 %v4623_v44, %v4355_v43  ;;  %v4142_v44 = vunpack.c.l.b16 %v4068_v50  ;;  %v13364_v43 = vld [vmem:[#allocation11 + $0x30] sm:$0xff]  ;;  %v3931_v50 = vld [vmem:[#allocation2 + $0x98] sm:$0x1] }
 0x1d0   : > { %v2979_v38 = vpop.f32.mrf.mxu3  ;;  %6962 = vmatpush.bf16.msra.mxu1 %v13364_v43  ;;  %v3508_v43 = vrot.slane %v3506_v60, 5 }
 0x1d1   : > { %v3088_v36 = vadd.f32 %v2979_v38, %v14636_v5  ;;  %v4628_v55 = vpop.f32.mrf.mxu2  ;;  %v14933_v21 = vpop.f32.mrf.mxu0  ;;  %v3475_v5 = vsel %vm14102_vm12, %v3470_v13, %v3474_v46  ;;  %v13272_v13 = vld [vmem:[#allocation2 + $0x84] sm:$0xff] }
 0x1d2   : > { %v3621_v38 = vunpack.c.l.b16 %v3475_v5 }
 0x1d3   : > { %v3834_v62 = vadd.f32 %v14903_v6, %v3088_v36  ;;  %v4163_v6 = vpack.c.b16 %v4142_v44, %v4141_v3  ;;  %v3498_v36 = vrot.slane %v3496_v20, 5  ;;  %v3493_v44 = vor.u32 %v3492_v51, %v3489_v41  ;;  %v3190_v51 = vld [vmem:[#allocation2 + $0xac] sm:$0xf] }
 0x1d5   : > { %v4356_v1 = vadd.f32 %v4247_v2, %v3834_v62  ;;  %v3622_v2 = vunpack.c.l.b16 %v3485_v39  ;;  %v4074_v62 = vrot.slane %v3931_v50, 5  ;;  %v3494_v39 = vrot.slane %v3493_v44, 4 }
 0x1d6   : > { %4670 = vmatmul.bf16.gmra.mxu2 %v13312_v47  ;;  %v4252_v49 = vpop.f32.mrf.mxu1 }
 0x1d7   : > { %v14939_v18 = vadd.f32 %v4626_v61, %v4356_v1  ;;  %v12443_v61 = vrot.slane %v3929_v0, 9  ;;  %v3642_v32 = vpack.c.b16 %v3622_v2, %v3621_v38  ;;  %v3503_v1 = vor.u32 %v3502_v23, %v3498_v36  ;;  %v3189_v0 = vld [vmem:[#allocation2 + $0xa8] sm:$0xf] }
 0x1d8   : > { %v2981_v33 = vpop.f32.mrf.mxu3  ;;  %v3514_v50 = vshll.u32 %v3189_v0, 16 }
 0x1d9   : > { %v3089_v46 = vadd.f32 %v2981_v33, %v14666_v37  ;;  %v4631_v26 = vpop.f32.mrf.mxu2  ;;  %4291 = vmatmul.bf16.gmra.mxu1 %v4163_v6  ;;  %v14943_v20 = vpop.f32.mrf.mxu0  ;;  %v13327_v37 = vld [vmem:[#allocation10 + $0x1c8] sm:$0xff]  ;;  %v4072_v15 = vsel %vm14094_vm11, %v12443_v61, %v4071_v9  ;;  %v3504_v41 = vrot.slane %v3503_v1, 4  ;;  %v3511_v33 = vshrl.u32 %v3189_v0, 16 }
 0x1da   : > { %5364 = vmatpush.bf16.msra.mxu3 %v13327_v37  ;;  %v3520_v9 = vshll.u32 %v3190_v51, 16  ;;  %v4143_v53 = vunpack.c.l.b16 %v4072_v15  ;;  %v3499_v61 = vsel %vm14102_vm12, %v3494_v39, %v3498_v36  ;;  %v3516_v60 = vrot.slane %v3514_v50, 5  ;;  %v13313_v1 = vld [vmem:[#allocation2 + $0x9c] sm:$0xff]  ;;  %v3191_v37 = vld [vmem:[#allocation2 + $0xb0] sm:$0x1]  ;;  %v503_v50 = vld [vmem:[%s14021_s12 + $0xf8] sm:$0xff] }
 0x1db   : > { %v3835_v3 = vadd.f32 %v14917_v16, %v3089_v46  ;;  %v4075_v16 = vsel %vm14094_vm11, %v4073_v17, %v4074_v62  ;;  %v3509_v17 = vsel %vm14102_vm12, %v3504_v41, %v3508_v43  ;;  %v3934_v62 = vld [vmem:[#allocation2 + $0xa4] sm:$0x1]  ;;  %v3513_v44 = vrot.slane %v3511_v33, 4 }
 0x1dc   : > { %3774 = vmatmul.bf16.gmra.mxu0 %v3642_v32  ;;  %v4144_v23 = vunpack.c.l.b16 %v4075_v16  ;;  %v3623_v43 = vunpack.c.l.b16 %v3499_v61  ;;  %v3624_v0 = vunpack.c.l.b16 %v3509_v17  ;;  %v3530_v33 = vshll.u32 %v3191_v37, 16 }
 0x1dd   : > { %v4357_v5 = vadd.f32 %v4249_v12, %v3835_v3  ;;  %3023 = vmatmul.bf16.gmra.mxu3 %v13272_v13  ;;  %v3933_v12 = vld [vmem:[#allocation2 + $0xa0] sm:$0xf]  ;;  %v3932_v3 = vld [vmem:[#allocation2 + $0x9c] sm:$0xe] }
 0x1de   : > { %v4254_v2 = vpop.f32.mrf.mxu1  ;;  %v4078_v13 = vrot.slane %v3933_v12, 5  ;;  %v4164_v36 = vpack.c.b16 %v4144_v23, %v4143_v53  ;;  %v4081_v12 = vrot.slane %v3934_v62, 5 }
 0x1df   : > { %v14947_v47 = vadd.f32 %v4628_v55, %v4357_v5  ;;  %v3524_v55 = vshrl.u32 %v3190_v51, 16  ;;  %v13335_v5 = vld [vmem:[#allocation10 + $0x208] sm:$0xff]  ;;  %v3517_v51 = vor.u32 %v3516_v60, %v3513_v44  ;;  %v3643_v60 = vpack.c.b16 %v3624_v0, %v3623_v43  ;;  %v3192_v0 = vld [vmem:[#allocation2 + $0xb4] sm:$0xf] }
 0x1e0   : > { %v2984_v6 = vpop.f32.mrf.mxu3  ;;  %5886 = vmatpush.bf16.msra.mxu0 %v13335_v5 }
 0x1e1   : > { %v3090_v38 = vadd.f32 %v2984_v6, %v14695_v45  ;;  %v14957_v32 = vpop.f32.mrf.mxu0  ;;  %v3526_v15 = vrot.slane %v3524_v55, 4  ;;  %v4633_v16 = vpop.f32.mrf.mxu2  ;;  %v12444_v6 = vrot.slane %v3932_v3, 9  ;;  %v13599_v3 = vld [vmem:[%s17394_s2] ss:$0 sm:$0xff] }
 0x1e3   : > { %v3836_v46 = vadd.f32 %v14923_v10, %v3090_v38  ;;  %v14959_v10 = vrot.slane %v3520_v9, 5  ;;  %v502_v38 = vld [vmem:[%s14021_s12 + $0xf0] sm:$0xff]  ;;  %v13273_v9 = vld [vmem:[#allocation2 + $0x90] sm:$0xff] }
 0x1e5   : > { %v4358_v45 = vadd.f32 %v4252_v49, %v3836_v46  ;;  %v4080_v49 = vrot.slane %v4078_v13, 4  ;;  %v3527_v53 = vor.u32 %v3526_v15, %v14959_v10 }
 0x1e6   : > { %4675 = vmatmul.bf16.gmra.mxu2 %v13313_v1  ;;  %v4257_v55 = vpop.f32.mrf.mxu1  ;;  %v3532_v1 = vrot.slane %v3530_v33, 5 }
 0x1e7   : > { %v14961_v39 = vadd.f32 %v4631_v26, %v4358_v45  ;;  %v13598_v26 = vld [vmem:[#allocation8] ss:$0 sm:$0xff]  ;;  %v4082_v45 = vsel %vm14094_vm11, %v4080_v49, %v4081_v12  ;;  %v3528_v15 = vrot.slane %v3527_v53, 4  ;;  %v3193_v12 = vld [vmem:[#allocation2 + $0xb8] sm:$0xf] }
 0x1e8   : > { %v2986_v41 = vpop.f32.mrf.mxu3  ;;  %v538_v23 = vmul.f32 %v13598_v26, %v502_v38  ;;  %v539_v61 = vmul.f32 %v13598_v26, %v503_v50  ;;  %v664_v38 = vld [vmem:[#allocation2 + $0xc0] sm:$0x1]  ;;  %v3538_v26 = vshll.u32 %v3192_v0, 16 }
 0x1e9   : > { %v3091_v46 = vadd.f32 %v2986_v41, %v14715_v63  ;;  %4296 = vmatmul.bf16.gmra.mxu1 %v4164_v36  ;;  %v4079_v63 = vsel %vm14094_vm11, %v12444_v6, %v4078_v13  ;;  %v14975_v37 = vpop.f32.mrf.mxu0  ;;  %v665_v36 = vsel %vm14047_vm3, 0, %v664_v38  ;;  %v3533_v53 = vsel %vm14102_vm12, %v3528_v15, %v3532_v1  ;;  %v714_v1 = vld [vmem:[#allocation2 + $0xc8] sm:$0x1]  ;;  %v3935_v15 = vld [vmem:[#allocation2 + $0xa8] sm:$0xe] }
 0x1ea   : > { %v574_v62 = vadd.f32 %v13599_v3, %v538_v23  ;;  %v575_v44 = vadd.f32 %v13599_v3, %v539_v61  ;;  %v4145_v49 = vunpack.c.l.b16 %v4079_v63  ;;  %666 = vst [vmem:[#allocation2 + $0xc0] sm:$0x1] %v665_v36  ;;  %v3936_v3 = vld [vmem:[#allocation2 + $0xac] sm:$0xf] }
 0x1eb   : > { %v3837_v17 = vadd.f32 %v14933_v21, %v3091_v46  ;;  %v3518_v21 = vrot.slane %v3517_v51, 4  ;;  %v4636_v46 = vpop.f32.mrf.mxu2  ;;  %v4085_v38 = vrot.slane %v3936_v3, 5  ;;  %v3194_v3 = vld [vmem:[#allocation2 + $0xbc] sm:$0x1] }
 0x1ec   : > { %v606_v41 = vmax.f32 %v574_v62, 0.0  ;;  %v607_v50 = vmax.f32 %v575_v44, 0.0  ;;  %3779 = vmatmul.bf16.gmra.mxu0 %v3643_v60  ;;  %v3544_v62 = vshll.u32 %v3193_v12, 16  ;;  %v3548_v60 = vshrl.u32 %v3193_v12, 16 }
 0x1ed   : > { %v4359_v5 = vadd.f32 %v4254_v2, %v3837_v17  ;;  %3028 = vmatmul.bf16.gmra.mxu3 %v13273_v9  ;;  %v4146_v2 = vunpack.c.l.b16 %v4082_v45  ;;  %v3523_v9 = vsel %vm14102_vm12, %v3518_v21, %v14959_v10  ;;  %v3626_v21 = vunpack.c.l.b16 %v3533_v53 }
 0x1ee   : > { %v747_v13 = vpack.c.bf16 %v606_v41, %v606_v41  ;;  %v4259_v51 = vpop.f32.mrf.mxu1  ;;  %v748_v23 = vpack.c.bf16 %v607_v50, %v607_v50  ;;  %v3625_v10 = vunpack.c.l.b16 %v3523_v9  ;;  %v3540_v50 = vrot.slane %v3538_v26, 5  ;;  %v13274_v26 = vld [vmem:[#allocation2 + $0x9c] sm:$0xff] }
 0x1ef   : > { %v14979_v43 = vadd.f32 %v4633_v16, %v4359_v5  ;;  %v3535_v16 = vshrl.u32 %v3192_v0, 16  ;;  %v4165_v44 = vpack.c.b16 %v4146_v2, %v4145_v49  ;;  %v13314_v5 = vld [vmem:[#allocation2 + $0xa8] sm:$0xff]  ;;  %v14992_v49 = vrot.slane %v3544_v62, 5 }
 0x1f0   : > { %v2989_v6 = vpop.f32.mrf.mxu3  ;;  %v1007_v61 = vshrl.u32 %v747_v13, 16  ;;  %v1010_v41 = vshll.u32 %v747_v13, 16  ;;  %v1015_v0 = vshrl.u32 %v748_v23, 16  ;;  %v715_v13 = vsel %vm14059_vm4, 0, %v714_v1 }
 0x1f1   : > { %17440 = vst [vmem:[#allocation29_spill] sm:$0xff] %v14979_v43  ;;  %v3092_v33 = vadd.f32 %v2989_v6, %v14738_v4  ;;  %v14988_v45 = vpop.f32.mrf.mxu0  ;;  %v3537_v36 = vrot.slane %v3535_v16, 4  ;;  %v1178_v53 = vld [vmem:[#allocation2 + $0xc0] sm:$0xf] }
 0x1f2   : > { %v1009_v4 = vrot.slane %v1007_v61, 7  ;;  %v3550_v61 = vrot.slane %v3548_v60, 4  ;;  %v1017_v9 = vrot.slane %v1015_v0, 7  ;;  %716 = vst [vmem:[#allocation2 + $0xc8] sm:$0x1] %v715_v13  ;;  %v4087_v0 = vrot.slane %v4085_v38, 4 }
 0x1f3   : > { %v3838_v17 = vadd.f32 %v14943_v20, %v3092_v33  ;;  %v13363_v20 = vld [vmem:[#allocation11 + $0x28] sm:$0xff]  ;;  %v3937_v33 = vld [vmem:[#allocation2 + $0xb0] sm:$0x1] }
 0x1f4   : > { %v1012_v2 = vor.u32 %v1010_v41, %v1009_v4  ;;  %6963 = vmatpush.bf16.msra.mxu1 %v13363_v20  ;;  %v12445_v41 = vrot.slane %v3935_v15, 9  ;;  %v4088_v1 = vrot.slane %v3937_v33, 5 }
 0x1f5   : > { %v4360_v63 = vadd.f32 %v4257_v55, %v3838_v17  ;;  %v1018_v55 = vshll.u32 %v748_v23, 16  ;;  %v1013_v17 = vrot.slane %v1009_v4, 4  ;;  %v4638_v23 = vpop.f32.mrf.mxu2 }
 0x1f6   : > { %4680 = vmatmul.bf16.gmra.mxu2 %v13314_v5  ;;  %v1179_v62 = vsel %vm14124_vm14, %v1012_v2, %v1178_v53  ;;  %v3551_v5 = vor.u32 %v3550_v61, %v14992_v49  ;;  %v4089_v15 = vsel %vm14094_vm11, %v4087_v0, %v4088_v1 }
 0x1f7   : > { %v14990_v6 = vadd.f32 %v4636_v46, %v4360_v63  ;;  %v4262_v46 = vpop.f32.mrf.mxu1  ;;  %v3644_v63 = vpack.c.b16 %v3626_v21, %v3625_v10  ;;  %v1020_v60 = vor.u32 %v1018_v55, %v1017_v9  ;;  %1180 = vst [vmem:[#allocation2 + $0xc0] sm:$0xf] %v1179_v62  ;;  %v13326_v10 = vld [vmem:[#allocation10 + $0x1c0] sm:$0xff]  ;;  %v1022_v21 = vrot.slane %v1017_v9, 4 }
 0x1f8   : > { %v2991_v12 = vpop.f32.mrf.mxu3  ;;  %5365 = vmatpush.bf16.msra.mxu3 %v13326_v10  ;;  %v4148_v13 = vunpack.c.l.b16 %v4089_v15  ;;  %v3938_v10 = vld [vmem:[#allocation2 + $0xb4] sm:$0xe] }
 0x1f9   : > { %17441 = vst [vmem:[#allocation30_spill] sm:$0xff] %v14990_v6  ;;  %v3093_v16 = vadd.f32 %v2991_v12, %v14745_v30  ;;  %4301 = vmatmul.bf16.gmra.mxu1 %v4165_v44  ;;  %v3541_v30 = vor.u32 %v3540_v50, %v3537_v36  ;;  %v3554_v12 = vshll.u32 %v3194_v3, 16  ;;  %v1021_v20 = vsel %vm14118_vm13, %v1013_v17, %v1020_v60  ;;  %v15003_v2 = vpop.f32.mrf.mxu0  ;;  %v1182_v33 = vld [vmem:[#allocation2 + $0xc8] sm:$0x1] }
 0x1fa   : > { %1181 = vst [vmem:[#allocation2 + $0xc4] sm:$0xf] %v1021_v20  ;;  %v3552_v50 = vrot.slane %v3551_v5, 4 }
 0x1fb   : > { %v3839_v4 = vadd.f32 %v14957_v32, %v3093_v16  ;;  %v4086_v32 = vsel %vm14094_vm11, %v12445_v41, %v4085_v38  ;;  %v3542_v36 = vrot.slane %v3541_v30, 4  ;;  %v3939_v41 = vld [vmem:[#allocation2 + $0xb8] sm:$0xf] }
 0x1fc   : > { %3784 = vmatmul.bf16.gmra.mxu0 %v3644_v63  ;;  %v4147_v53 = vunpack.c.l.b16 %v4086_v32 }
 0x1fd   : > { %v4361_v6 = vadd.f32 %v4259_v51, %v3839_v4  ;;  %3033 = vmatmul.bf16.gmra.mxu3 %v13274_v26  ;;  %v3556_v51 = vrot.slane %v3554_v12, 5  ;;  %v4641_v16 = vpop.f32.mrf.mxu2  ;;  %v13315_v26 = vld [vmem:[#allocation2 + $0xb4] sm:$0xff]  ;;  %v3547_v3 = vsel %vm14102_vm12, %v3542_v36, %v14992_v49  ;;  %v3940_v36 = vld [vmem:[#allocation2 + $0xbc] sm:$0x1] }
 0x1fe   : > { %v3195_v9 = vld [vmem:[#allocation2 + $0xc0] sm:$0xf]  ;;  %v13334_v4 = vld [vmem:[#allocation10 + $0x200] sm:$0xff]  ;;  %v4166_v5 = vpack.c.b16 %v4148_v13, %v4147_v53  ;;  %v3627_v20 = vunpack.c.l.b16 %v3547_v3  ;;  %v4095_v13 = vrot.slane %v3940_v36, 5 }
 0x1ff   : > { %v15005_v55 = vadd.f32 %v4638_v23, %v4361_v6  ;;  %v15012_v17 = vpop.f32.mrf.mxu1  ;;  %v1183_v6 = vsel %vm14047_vm3, %v1022_v21, %v1182_v33  ;;  %v3559_v23 = vshrl.u32 %v3195_v9, 16  ;;  %v3562_v0 = vshll.u32 %v3195_v9, 16  ;;  %5887 = vmatpush.bf16.msra.mxu0 %v13334_v4 }
 0x200   : > { %v2994_v44 = vpop.f32.mrf.mxu3  ;;  %1184 = vst [vmem:[#allocation2 + $0xc8] sm:$0x1] %v1183_v6  ;;  %v4092_v21 = vrot.slane %v3939_v41, 5 }
 0x201   : > { %17442 = vst [vmem:[#allocation31_spill] sm:$0xff] %v15005_v55  ;;  %v3094_v61 = vadd.f32 %v2994_v44, %v14758_v25  ;;  %v3557_v25 = vsel %vm14102_vm12, %v3552_v50, %v3556_v51  ;;  %v3196_v62 = vld [vmem:[#allocation2 + $0xc4] sm:$0xf]  ;;  %v15022_v60 = vpop.f32.mrf.mxu0  ;;  %v3561_v32 = vrot.slane %v3559_v23, 4  ;;  %v3564_v50 = vrot.slane %v3562_v0, 5 }
 0x202   : > { %v3572_v1 = vshrl.u32 %v3196_v62, 16  ;;  %v3628_v49 = vunpack.c.l.b16 %v3557_v25  ;;  %v4094_v53 = vrot.slane %v4092_v21, 4 }
 0x203   : > { %v3840_v38 = vadd.f32 %v14975_v37, %v3094_v61  ;;  %v3568_v37 = vshll.u32 %v3196_v62, 16  ;;  %v3565_v3 = vor.u32 %v3564_v50, %v3561_v32  ;;  %v13362_v32 = vld [vmem:[#allocation11 + $0x20] sm:$0xff] }
 0x204   : > { %v3574_v33 = vrot.slane %v3572_v1, 4  ;;  %v3645_v9 = vpack.c.b16 %v3628_v49, %v3627_v20  ;;  %v4096_v23 = vsel %vm14094_vm11, %v4094_v53, %v4095_v13  ;;  %v13316_v49 = vld [vmem:[#allocation2 + $0xc0] sm:$0xff]  ;;  %6964 = vmatpush.bf16.msra.mxu1 %v13362_v32  ;;  %v5544_v53 = vld [vmem:[#allocation2 + $0x1c] sm:$0xf] }
 0x205   : > { %v4362_v63 = vadd.f32 %v4262_v46, %v3840_v38  ;;  %v13275_v46 = vld [vmem:[#allocation2 + $0xa8] sm:$0xff]  ;;  %v3570_v51 = vrot.slane %v3568_v37, 5  ;;  %v12446_v38 = vrot.slane %v3938_v10, 9  ;;  %v3566_v4 = vrot.slane %v3565_v3, 4 }
 0x206   : > { %4685 = vmatmul.bf16.gmra.mxu2 %v13315_v26 }
 0x207   : > { %v15024_v30 = vadd.f32 %v4641_v16, %v4362_v63  ;;  %v4267_v15 = vpop.f32.mrf.mxu1  ;;  %v3197_v61 = vld [vmem:[#allocation2 + $0xc8] sm:$0x1]  ;;  %v4093_v62 = vsel %vm14094_vm11, %v12446_v38, %v4092_v21  ;;  %v3571_v10 = vsel %vm14102_vm12, %v3566_v4, %v3570_v51  ;;  %v3942_v21 = vld [vmem:[#allocation2 + $0xc4] sm:$0xf]  ;;  %v4798_v4 = vld [vmem:[#allocation2 + $0x1c] sm:$0xf] }
 0x208   : > { %v2996_v12 = vpop.f32.mrf.mxu3  ;;  %v3578_v25 = vshll.u32 %v3197_v61, 16  ;;  %v4149_v1 = vunpack.c.l.b16 %v4093_v62  ;;  %v3629_v36 = vunpack.c.l.b16 %v3571_v10  ;;  %v3943_v38 = vld [vmem:[#allocation2 + $0xc8] sm:$0x1]  ;;  %v4797_v62 = vld [vmem:[#allocation2 + $0x18] sm:$0xf] }
 0x209   : > { %17443 = vst [vmem:[#allocation32_spill] sm:$0xff] %v15024_v30  ;;  %v3095_v44 = vadd.f32 %v2996_v12, %v14760_v31  ;;  %4306 = vmatmul.bf16.gmra.mxu1 %v4166_v5  ;;  %v3750_v16 = vpop.f32.mrf.mxu0  ;;  %v3575_v31 = vor.u32 %v3574_v33, %v3570_v51  ;;  %v4150_v5 = vunpack.c.l.b16 %v4096_v23  ;;  %v5543_v23 = vld [vmem:[#allocation2 + $0x18] sm:$0xe] }
 0x20a   : > { %v3580_v0 = vrot.slane %v3578_v25, 5  ;;  %v4102_v25 = vrot.slane %v3943_v38, 5 }
 0x20b   : > { %v15028_v6 = vadd.f32 %v14988_v45, %v3095_v44  ;;  %v3576_v41 = vrot.slane %v3575_v31, 4 }
 0x20c   : > { %3789 = vmatmul.bf16.gmra.mxu0 %v3645_v9  ;;  %v3941_v9 = vld [vmem:[#allocation2 + $0xc0] sm:$0xe] }
 0x20d   : > { %3038 = vmatmul.bf16.gmra.mxu3 %v13275_v46  ;;  %v4167_v46 = vpack.c.b16 %v4150_v5, %v4149_v1  ;;  %v12447_v3 = vrot.slane %v3941_v9, 9  ;;  %v4849_v1 = vshll.u32 %v4797_v62, 16  ;;  %v17444_v5 = vld [vmem:[#allocation20_spill] sm:$0xff] }
 0x20f   : > { %v15035_v63 = vpop.f32.mrf.mxu1  ;;  %v4851_v9 = vrot.slane %v4849_v1, 5 }
 0x210   : > { %v2999_v26 = vpop.f32.mrf.mxu3 }
 0x211   : > { %v3096_v45 = vadd.f32 %v2999_v26, %v14772_v59  ;;  %v15040_v20 = vpop.f32.mrf.mxu0  ;;  %v3581_v59 = vsel %vm14102_vm12, %v3576_v41, %v3580_v0 }
 0x212   : > { %v3630_v50 = vunpack.c.l.b16 %v3581_v59  ;;  %v12608_v59 = vrot.slane %v5543_v23, 9 }
 0x213   : > { %v3842_v37 = vadd.f32 %v15003_v2, %v3096_v45  ;;  %v4099_v2 = vrot.slane %v3942_v21, 5  ;;  %v5545_v45 = vld [vmem:[#allocation2 + $0x20] sm:$0x1] }
 0x214   : > { %v3646_v13 = vpack.c.b16 %v3630_v50, %v3629_v36  ;;  %v5644_v32 = vrot.slane %v5545_v45, 5 }
 0x215   : > { %v15038_v12 = vadd.f32 %v4267_v15, %v3842_v37  ;;  %v13276_v15 = vld [vmem:[#allocation2 + $0xb4] sm:$0xff]  ;;  %v4101_v31 = vrot.slane %v4099_v2, 4  ;;  %v4100_v0 = vsel %vm14094_vm11, %v12447_v3, %v4099_v2  ;;  %v4846_v37 = vshrl.u32 %v4797_v62, 16  ;;  %v4799_v62 = vld [vmem:[#allocation2 + $0x20] sm:$0x1] }
 0x216   : > { %4690 = vmatmul.bf16.gmra.mxu2 %v13316_v49  ;;  %v4151_v50 = vunpack.c.l.b16 %v4100_v0  ;;  %v17445_v0 = vld [vmem:[#allocation21_spill] sm:$0xff] }
 0x217   : > { %v4272_v61 = vpop.f32.mrf.mxu1 }
 0x218   : > { %v3001_v44 = vpop.f32.mrf.mxu3 }
 0x219   : > { %v3097_v33 = vadd.f32 %v3001_v44, %v14776_v42  ;;  %4311 = vmatmul.bf16.gmra.mxu1 %v4167_v46  ;;  %v15050_v26 = vpop.f32.mrf.mxu0  ;;  %v5641_v42 = vrot.slane %v5544_v53, 5  ;;  %v4855_v44 = vshll.u32 %v4798_v4, 16  ;;  %v4859_v46 = vshrl.u32 %v4798_v4, 16  ;;  %v13317_v53 = vld [vmem:[#allocation2 + $0xcc] sm:$0xff] }
 0x21b   : > { %v15048_v51 = vadd.f32 %v15022_v60, %v3097_v33  ;;  %v4103_v60 = vsel %vm14094_vm11, %v4101_v31, %v4102_v25  ;;  %v5643_v21 = vrot.slane %v5641_v42, 4  ;;  %v4857_v31 = vrot.slane %v4855_v44, 5  ;;  %v4800_v44 = vld [vmem:[#allocation2 + $0x24] sm:$0xf] }
 0x21c   : > { %3794 = vmatmul.bf16.gmra.mxu0 %v3646_v13  ;;  %v4152_v33 = vunpack.c.l.b16 %v4103_v60  ;;  %v5642_v13 = vsel %vm14094_vm11, %v12608_v59, %v5641_v42  ;;  %v4861_v25 = vrot.slane %v4859_v46, 4  ;;  %v13277_v60 = vld [vmem:[#allocation2 + $0xc0] sm:$0xff] }
 0x21d   : > { %3043 = vmatmul.bf16.gmra.mxu3 %v13276_v15  ;;  %v4848_v15 = vrot.slane %v4846_v37, 4  ;;  %v5645_v3 = vsel %vm14094_vm11, %v5643_v21, %v5644_v32  ;;  %v5768_v4 = vunpack.c.l.b16 %v5642_v13 }
 0x21e   : > { %v4862_v1 = vor.u32 %v4861_v25, %v4857_v31  ;;  %v17446_v25 = vld [vmem:[#allocation22_spill] sm:$0xff] }
 0x21f   : > { %v15057_v10 = vpop.f32.mrf.mxu1  ;;  %v4852_v45 = vor.u32 %v4851_v9, %v4848_v15  ;;  %v5548_v15 = vld [vmem:[#allocation2 + $0x2c] sm:$0x1]  ;;  %v4801_v9 = vld [vmem:[#allocation2 + $0x28] sm:$0xf] }
 0x220   : > { %v3004_v41 = vpop.f32.mrf.mxu3 }
 0x221   : > { %v3098_v49 = vadd.f32 %v3004_v41, %v17444_v5  ;;  %v15061_v38 = vpop.f32.mrf.mxu0  ;;  %v5769_v41 = vunpack.c.l.b16 %v5645_v3  ;;  %v4865_v5 = vshll.u32 %v4799_v62, 16  ;;  %v4853_v59 = vrot.slane %v4852_v45, 4 }
 0x222   : > { %v4873_v3 = vshll.u32 %v4800_v44, 16 }
 0x223   : > { %v3844_v36 = vadd.f32 %v3750_v16, %v3098_v49  ;;  %v4168_v16 = vpack.c.b16 %v4152_v33, %v4151_v50  ;;  %v5547_v49 = vld [vmem:[#allocation2 + $0x28] sm:$0xf]  ;;  %v5800_v21 = vpack.c.b16 %v5769_v41, %v5768_v4  ;;  %v4867_v50 = vrot.slane %v4865_v5, 5  ;;  %v5546_v33 = vld [vmem:[#allocation2 + $0x24] sm:$0xe] }
 0x224   : > { %v5648_v46 = vrot.slane %v5547_v49, 5  ;;  %v4858_v13 = vsel %vm14102_vm12, %v4853_v59, %v4857_v31  ;;  %v5651_v4 = vrot.slane %v5548_v15, 5  ;;  %v4875_v31 = vrot.slane %v4873_v3, 5  ;;  %v17448_v3 = vld [vmem:[#allocation23_spill] sm:$0xff] }
 0x225   : > { %v15059_v2 = vadd.f32 %v4272_v61, %v3844_v36  ;;  %v4863_v36 = vrot.slane %v4862_v1, 4  ;;  %v5246_v1 = vunpack.c.l.b16 %v4858_v13 }
 0x226   : > { %4695 = vmatmul.bf16.gmra.mxu2 %v13317_v53  ;;  %v5650_v45 = vrot.slane %v5648_v46, 4 }
 0x227   : > { %v4277_v37 = vpop.f32.mrf.mxu1  ;;  %v4868_v41 = vsel %vm14102_vm12, %v4863_v36, %v4867_v50  ;;  %v4802_v50 = vld [vmem:[#allocation2 + $0x2c] sm:$0x1] }
 0x228   : > { %v3006_v23 = vpop.f32.mrf.mxu3  ;;  %v5247_v59 = vunpack.c.l.b16 %v4868_v41 }
 0x229   : > { %v3099_v61 = vadd.f32 %v3006_v23, %v17445_v0  ;;  %4316 = vmatmul.bf16.gmra.mxu1 %v4168_v16  ;;  %v15071_v32 = vpop.f32.mrf.mxu0  ;;  %v12609_v16 = vrot.slane %v5546_v33, 9  ;;  %v4879_v0 = vshll.u32 %v4801_v9, 16  ;;  %v5652_v33 = vsel %vm14094_vm11, %v5650_v45, %v5651_v4 }
 0x22b   : > { %v15069_v42 = vadd.f32 %v15040_v20, %v3099_v61  ;;  %v4870_v20 = vshrl.u32 %v4800_v44, 16  ;;  %v4883_v61 = vshrl.u32 %v4801_v9, 16  ;;  %v5649_v44 = vsel %vm14094_vm11, %v12609_v16, %v5648_v46  ;;  %v13361_v9 = vld [vmem:[#allocation11 + $0x18] sm:$0xff] }
 0x22c   : > { %5888 = vmatmul.bf16.vlgmr.msra.gmra.mxu0 %v5800_v21  ;;  %v4881_v15 = vrot.slane %v4879_v0, 5  ;;  %v5770_v13 = vunpack.c.l.b16 %v5649_v44  ;;  %6965 = vmatpush.bf16.msra.mxu1 %v13361_v9  ;;  %v4803_v0 = vld [vmem:[#allocation2 + $0x30] sm:$0xf] }
 0x22d   : > { %3048 = vmatmul.bf16.gmra.mxu3 %v13277_v60  ;;  %v4872_v5 = vrot.slane %v4870_v20, 4  ;;  %v4885_v36 = vrot.slane %v4883_v61, 4  ;;  %v5771_v20 = vunpack.c.l.b16 %v5652_v33  ;;  %v5549_v44 = vld [vmem:[#allocation2 + $0x30] sm:$0xe]  ;;  %v5551_v33 = vld [vmem:[#allocation2 + $0x38] sm:$0x1] }
 0x22f   : > { %v15076_v23 = vpop.f32.mrf.mxu1  ;;  %v4886_v41 = vor.u32 %v4885_v36, %v4881_v15  ;;  %v5801_v45 = vpack.c.b16 %v5771_v20, %v5770_v13  ;;  %v5658_v20 = vrot.slane %v5551_v33, 5 }
 0x230   : > { %v3009_v53 = vpop.f32.mrf.mxu3  ;;  %17447 = vst [vmem:[#allocation20_spill] sm:$0xff] %v15076_v23  ;;  %v5550_v23 = vld [vmem:[#allocation2 + $0x34] sm:$0xf] }
 0x231   : > { %v3100_v62 = vadd.f32 %v3009_v53, %v17446_v25  ;;  %v15083_v21 = vpop.f32.mrf.mxu0  ;;  %v5278_v25 = vpack.c.b16 %v5247_v59, %v5246_v1  ;;  %v5655_v61 = vrot.slane %v5550_v23, 5  ;;  %v4804_v1 = vld [vmem:[#allocation2 + $0x34] sm:$0xf] }
 0x233   : > { %v3846_v60 = vadd.f32 %v15050_v26, %v3100_v62  ;;  %v4876_v26 = vor.u32 %v4875_v31, %v4872_v5  ;;  %v4887_v5 = vrot.slane %v4886_v41, 4  ;;  %v5657_v13 = vrot.slane %v5655_v61, 4 }
 0x235   : > { %v15081_v49 = vadd.f32 %v4277_v37, %v3846_v60  ;;  %v4889_v60 = vshll.u32 %v4802_v50, 16  ;;  %v4877_v16 = vrot.slane %v4876_v26, 4  ;;  %v4894_v50 = vshrl.u32 %v4803_v0, 16 }
 0x236   : > { %v12610_v26 = vrot.slane %v5549_v44, 9  ;;  %v5659_v44 = vsel %vm14094_vm11, %v5657_v13, %v5658_v20 }
 0x237   : > { %v4282_v62 = vpop.f32.mrf.mxu1  ;;  %v4891_v31 = vrot.slane %v4889_v60, 5  ;;  %v4882_v36 = vsel %vm14102_vm12, %v4877_v16, %v4881_v15  ;;  %v4896_v60 = vrot.slane %v4894_v50, 4  ;;  %v5773_v50 = vunpack.c.l.b16 %v5659_v44  ;;  %v5554_v44 = vld [vmem:[#allocation2 + $0x44] sm:$0x1] }
 0x238   : > { %v3011_v53 = vpop.f32.mrf.mxu3  ;;  %v5248_v41 = vunpack.c.l.b16 %v4882_v36 }
 0x239   : > { %v3101_v37 = vadd.f32 %v3011_v53, %v17448_v3  ;;  %v15093_v4 = vpop.f32.mrf.mxu0  ;;  %v4892_v23 = vsel %vm14102_vm12, %v4887_v5, %v4891_v31  ;;  %v4903_v3 = vshll.u32 %v4804_v1, 16  ;;  %v4805_v31 = vld [vmem:[#allocation2 + $0x38] sm:$0x1] }
 0x23b   : > { %v15091_v46 = vadd.f32 %v15061_v38, %v3101_v37  ;;  %v4897_v38 = vshll.u32 %v4803_v0, 16  ;;  %v4907_v37 = vshrl.u32 %v4804_v1, 16  ;;  %v4905_v33 = vrot.slane %v4903_v3, 5  ;;  %v13373_v1 = vld [vmem:[#allocation11 + $0x78] sm:$0xff]  ;;  %v4806_v3 = vld [vmem:[#allocation2 + $0x3c] sm:$0xf] }
 0x23c   : > { %5893 = vmatmul.bf16.gmra.mxu0 %v5801_v45  ;;  %v5249_v45 = vunpack.c.l.b16 %v4892_v23  ;;  %7643 = vmatpush.bf16.msra.mxu2 %v13373_v1 }
 0x23d   : > { %17449 = vst [vmem:[#allocation21_spill] sm:$0xff] %v15091_v46  ;;  %5366 = vmatmul.bf16.vlgmr.msra.gmra.mxu3 %v5278_v25  ;;  %v4899_v15 = vrot.slane %v4897_v38, 5  ;;  %v4909_v5 = vrot.slane %v4907_v37, 4  ;;  %v17452_v38 = vld [vmem:[#allocation25_spill] sm:$0xff] }
 0x23f   : > { %v15098_v53 = vpop.f32.mrf.mxu1 }
 0x240   : > { %v3014_v59 = vpop.f32.mrf.mxu3  ;;  %17450 = vst [vmem:[#allocation22_spill] sm:$0xff] %v15098_v53  ;;  %v4913_v53 = vshll.u32 %v4805_v31, 16  ;;  %v4918_v31 = vshrl.u32 %v4806_v3, 16 }
 0x241   : > { %v3102_v9 = vadd.f32 %v3014_v59, %v14820_v24  ;;  %v15105_v0 = vpop.f32.mrf.mxu0  ;;  %v5656_v24 = vsel %vm14094_vm11, %v12610_v26, %v5655_v61 }
 0x242   : > { %v5772_v36 = vunpack.c.l.b16 %v5656_v24  ;;  %v5552_v24 = vld [vmem:[#allocation2 + $0x3c] sm:$0xe] }
 0x243   : > { %v3848_v25 = vadd.f32 %v15071_v32, %v3102_v9  ;;  %v4900_v32 = vor.u32 %v4899_v15, %v4896_v60  ;;  %v5279_v9 = vpack.c.b16 %v5249_v45, %v5248_v41  ;;  %v4915_v15 = vrot.slane %v4913_v53, 5  ;;  %v4807_v41 = vld [vmem:[#allocation2 + $0x40] sm:$0xf] }
 0x244   : > { %v5802_v13 = vpack.c.b16 %v5773_v50, %v5772_v36  ;;  %v5665_v50 = vrot.slane %v5554_v44, 5 }
 0x245   : > { %v15103_v16 = vadd.f32 %v4282_v62, %v3848_v25  ;;  %v4910_v25 = vor.u32 %v4909_v5, %v4905_v33  ;;  %v4901_v26 = vrot.slane %v4900_v32, 4  ;;  %v12611_v32 = vrot.slane %v5552_v24, 9 }
 0x247   : > { %17451 = vst [vmem:[#allocation23_spill] sm:$0xff] %v15103_v16  ;;  %v4287_v23 = vpop.f32.mrf.mxu1  ;;  %v5553_v16 = vld [vmem:[#allocation2 + $0x40] sm:$0xf]  ;;  %v4911_v60 = vrot.slane %v4910_v25, 4  ;;  %v4906_v5 = vsel %vm14102_vm12, %v4901_v26, %v4905_v33  ;;  %v4920_v25 = vrot.slane %v4918_v31, 4 }
 0x248   : > { %v3016_v59 = vpop.f32.mrf.mxu3  ;;  %v5662_v37 = vrot.slane %v5553_v16, 5  ;;  %v4927_v16 = vshll.u32 %v4807_v41, 16 }
 0x249   : > { %v3103_v62 = vadd.f32 %v3016_v59, %v17452_v38  ;;  %v15115_v20 = vpop.f32.mrf.mxu0  ;;  %v4916_v53 = vsel %vm14102_vm12, %v4911_v60, %v4915_v15  ;;  %v4931_v38 = vshrl.u32 %v4807_v41, 16  ;;  %v15133_v15 = vpop.f32.mrf.mxu2  ;;  %v4808_v41 = vld [vmem:[#allocation2 + $0x44] sm:$0x1] }
 0x24a   : > { %v5664_v36 = vrot.slane %v5662_v37, 4  ;;  %v4929_v44 = vrot.slane %v4927_v16, 5 }
 0x24b   : > { %v15113_v61 = vadd.f32 %v15083_v21, %v3103_v62  ;;  %v4921_v21 = vshll.u32 %v4806_v3, 16  ;;  %v4933_v60 = vrot.slane %v4931_v38, 4  ;;  %v4809_v38 = vld [vmem:[#allocation2 + $0x48] sm:$0xf] }
 0x24c   : > { %5898 = vmatmul.bf16.gmra.mxu0 %v5802_v13  ;;  %v5251_v13 = vunpack.c.l.b16 %v4916_v53  ;;  %v5666_v24 = vsel %vm14094_vm11, %v5664_v36, %v5665_v50 }
 0x24d   : > { %17453 = vst [vmem:[#allocation25_spill] sm:$0xff] %v15113_v61  ;;  %5371 = vmatmul.bf16.gmra.mxu3 %v5279_v9  ;;  %v5250_v9 = vunpack.c.l.b16 %v4906_v5  ;;  %v4923_v33 = vrot.slane %v4921_v21, 5 }
 0x24f   : > { %v15120_v59 = vpop.f32.mrf.mxu1  ;;  %v4924_v5 = vor.u32 %v4923_v33, %v4920_v25  ;;  %v4810_v25 = vld [vmem:[#allocation2 + $0x4c] sm:$0xf] }
 0x250   : > { %v3019_v45 = vpop.f32.mrf.mxu3  ;;  %17454 = vst [vmem:[#allocation33_spill] sm:$0xff] %v15120_v59 }
 0x251   : > { %v3104_v1 = vadd.f32 %v3019_v45, %v14839_v27  ;;  %v15127_v3 = vpop.f32.mrf.mxu0  ;;  %v5663_v27 = vsel %vm14094_vm11, %v12611_v32, %v5662_v37  ;;  %v4937_v37 = vshll.u32 %v4808_v41, 16  ;;  %v5556_v32 = vld [vmem:[#allocation2 + $0x4c] sm:$0xf]  ;;  %v4925_v50 = vrot.slane %v4924_v5, 4  ;;  %v15143_v5 = vpop.f32.mrf.mxu2 }
 0x252   : > { %v5774_v31 = vunpack.c.l.b16 %v5663_v27  ;;  %v5669_v33 = vrot.slane %v5556_v32, 5 }
 0x253   : > { %v3850_v62 = vadd.f32 %v15093_v4, %v3104_v1  ;;  %v13360_v4 = vld [vmem:[#allocation11 + $0x10] sm:$0xff]  ;;  %v5280_v1 = vpack.c.b16 %v5251_v13, %v5250_v9  ;;  %v5557_v9 = vld [vmem:[#allocation2 + $0x50] sm:$0x1]  ;;  %v4942_v13 = vshrl.u32 %v4809_v38, 16  ;;  %v4930_v41 = vsel %vm14102_vm12, %v4925_v50, %v4929_v44 }
 0x254   : > { %6966 = vmatpush.bf16.msra.mxu1 %v13360_v4  ;;  %v4945_v4 = vshll.u32 %v4809_v38, 16 }
 0x255   : > { %v15125_v26 = vadd.f32 %v4287_v23, %v3850_v62  ;;  %v5775_v23 = vunpack.c.l.b16 %v5666_v24  ;;  %v4934_v62 = vor.u32 %v4933_v60, %v4929_v44  ;;  %v4939_v24 = vrot.slane %v4937_v37, 5 }
 0x256   : > { %v4944_v38 = vrot.slane %v4942_v13, 4  ;;  %v5252_v44 = vunpack.c.l.b16 %v4930_v41 }
 0x257   : > { %17455 = vst [vmem:[#allocation34_spill] sm:$0xff] %v15125_v26  ;;  %v4292_v53 = vpop.f32.mrf.mxu1  ;;  %v5803_v16 = vpack.c.b16 %v5775_v23, %v5774_v31  ;;  %v4935_v27 = vrot.slane %v4934_v62, 4  ;;  %v5672_v62 = vrot.slane %v5557_v9, 5 }
 0x258   : > { %v3021_v45 = vpop.f32.mrf.mxu3 }
 0x259   : > { %v3105_v21 = vadd.f32 %v3021_v45, %v14849_v28  ;;  %v15139_v59 = vpop.f32.mrf.mxu0  ;;  %v5555_v28 = vld [vmem:[#allocation2 + $0x48] sm:$0xe]  ;;  %v4955_v45 = vshrl.u32 %v4810_v25, 16  ;;  %v4940_v37 = vsel %vm14102_vm12, %v4935_v27, %v4939_v24 }
 0x25a   : > { %v5253_v26 = vunpack.c.l.b16 %v4940_v37  ;;  %v13372_v24 = vld [vmem:[#allocation11 + $0x70] sm:$0xff]  ;;  %v15160_v37 = vpop.f32.mrf.mxu2 }
 0x25b   : > { %v15137_v36 = vadd.f32 %v15105_v0, %v3105_v21  ;;  %v4951_v0 = vshll.u32 %v4810_v25, 16  ;;  %v12612_v21 = vrot.slane %v5555_v28, 9  ;;  %7644 = vmatpush.bf16.msra.mxu2 %v13372_v24 }
 0x25c   : > { %5903 = vmatmul.bf16.gmra.mxu0 %v5803_v16  ;;  %v4957_v16 = vrot.slane %v4955_v45, 4 }
 0x25d   : > { %17456 = vst [vmem:[#allocation35_spill] sm:$0xff] %v15137_v36  ;;  %5376 = vmatmul.bf16.gmra.mxu3 %v5280_v1  ;;  %v5671_v1 = vrot.slane %v5669_v33, 4  ;;  %v4947_v36 = vrot.slane %v4945_v4, 5  ;;  %v4953_v50 = vrot.slane %v4951_v0, 5  ;;  %v5670_v28 = vsel %vm14094_vm11, %v12612_v21, %v5669_v33 }
 0x25e   : > { %v5281_v0 = vpack.c.b16 %v5253_v26, %v5252_v44  ;;  %v4813_v26 = vld [vmem:[#allocation2 + $0x58] sm:$0xf] }
 0x25f   : > { %v15146_v23 = vpop.f32.mrf.mxu1  ;;  %v5673_v9 = vsel %vm14094_vm11, %v5671_v1, %v5672_v62  ;;  %v4948_v27 = vor.u32 %v4947_v36, %v4944_v38  ;;  %v4958_v13 = vor.u32 %v4957_v16, %v4953_v50  ;;  %v4812_v38 = vld [vmem:[#allocation2 + $0x54] sm:$0xf] }
 0x260   : > { %v3024_v60 = vpop.f32.mrf.mxu3  ;;  %17457 = vst [vmem:[#allocation36_spill] sm:$0xff] %v15146_v23  ;;  %v5777_v41 = vunpack.c.l.b16 %v5673_v9  ;;  %v4966_v9 = vshrl.u32 %v4812_v38, 16 }
 0x261   : > { %v3106_v31 = vadd.f32 %v3024_v60, %v14859_v19  ;;  %v15153_v61 = vpop.f32.mrf.mxu0  ;;  %v4811_v19 = vld [vmem:[#allocation2 + $0x50] sm:$0x1]  ;;  %v5776_v60 = vunpack.c.l.b16 %v5670_v28  ;;  %v4949_v21 = vrot.slane %v4948_v27, 4  ;;  %v4959_v1 = vrot.slane %v4958_v13, 4 }
 0x262   : > { %v4961_v4 = vshll.u32 %v4811_v19, 16  ;;  %v5558_v19 = vld [vmem:[#allocation2 + $0x54] sm:$0xe]  ;;  %v4969_v27 = vshll.u32 %v4812_v38, 16 }
 0x263   : > { %v3852_v32 = vadd.f32 %v15115_v20, %v3106_v31  ;;  %v5559_v31 = vld [vmem:[#allocation2 + $0x58] sm:$0xf]  ;;  %v5804_v62 = vpack.c.b16 %v5777_v41, %v5776_v60  ;;  %v4954_v28 = vsel %vm14102_vm12, %v4949_v21, %v4953_v50  ;;  %v12613_v13 = vrot.slane %v5558_v19, 9  ;;  %v15175_v21 = vpop.f32.mrf.mxu2 }
 0x264   : > { %v4963_v36 = vrot.slane %v4961_v4, 5  ;;  %v5676_v16 = vrot.slane %v5559_v31, 5  ;;  %v4975_v41 = vshll.u32 %v4813_v26, 16  ;;  %v5254_v31 = vunpack.c.l.b16 %v4954_v28 }
 0x265   : > { %v15151_v25 = vadd.f32 %v4292_v53, %v3852_v32  ;;  %v4968_v50 = vrot.slane %v4966_v9, 4 }
 0x266   : > { %v5678_v4 = vrot.slane %v5676_v16, 4  ;;  %v4977_v19 = vrot.slane %v4975_v41, 5 }
 0x267   : > { %17458 = vst [vmem:[#allocation37_spill] sm:$0xff] %v15151_v25  ;;  %v4297_v45 = vpop.f32.mrf.mxu1 }
 0x268   : > { %v3026_v20 = vpop.f32.mrf.mxu3 }
 0x269   : > { %v3107_v53 = vadd.f32 %v3026_v20, %v14869_v14  ;;  %v15165_v32 = vpop.f32.mrf.mxu0  ;;  %v5560_v14 = vld [vmem:[#allocation2 + $0x5c] sm:$0x1] }
 0x26a   : > { %v5679_v60 = vrot.slane %v5560_v14, 5 }
 0x26b   : > { %v15163_v33 = vadd.f32 %v15127_v3, %v3107_v53  ;;  %v4964_v3 = vsel %vm14102_vm12, %v4959_v1, %v4963_v36  ;;  %v4979_v53 = vshrl.u32 %v4813_v26, 16  ;;  %v4814_v26 = vld [vmem:[#allocation2 + $0x5c] sm:$0x1] }
 0x26c   : > { %5908 = vmatmul.bf16.gmra.mxu0 %v5804_v62  ;;  %v5255_v23 = vunpack.c.l.b16 %v4964_v3  ;;  %v4971_v62 = vrot.slane %v4969_v27, 5  ;;  %v5680_v38 = vsel %vm14094_vm11, %v5678_v4, %v5679_v60  ;;  %v5562_v27 = vld [vmem:[#allocation2 + $0x64] sm:$0xf] }
 0x26d   : > { %17459 = vst [vmem:[#allocation38_spill] sm:$0xff] %v15163_v33  ;;  %5381 = vmatmul.bf16.gmra.mxu3 %v5281_v0  ;;  %v4981_v14 = vrot.slane %v4979_v53, 4  ;;  %v5779_v3 = vunpack.c.l.b16 %v5680_v38  ;;  %v4816_v60 = vld [vmem:[#allocation2 + $0x64] sm:$0xf]  ;;  %v5683_v41 = vrot.slane %v5562_v27, 5 }
 0x26e   : > { %v5561_v38 = vld [vmem:[#allocation2 + $0x60] sm:$0xe] }
 0x26f   : > { %v15172_v20 = vpop.f32.mrf.mxu1 }
 0x270   : > { %v3029_v44 = vpop.f32.mrf.mxu3  ;;  %17460 = vst [vmem:[#allocation39_spill] sm:$0xff] %v15172_v20  ;;  %v4982_v20 = vor.u32 %v4981_v14, %v4977_v19  ;;  %v4999_v14 = vshll.u32 %v4816_v60, 16 }
 0x271   : > { %v3108_v24 = vadd.f32 %v3029_v44, %v14879_v34  ;;  %v15179_v36 = vpop.f32.mrf.mxu0  ;;  %v5677_v34 = vsel %vm14094_vm11, %v12613_v13, %v5676_v16  ;;  %v4815_v13 = vld [vmem:[#allocation2 + $0x60] sm:$0xf] }
 0x272   : > { %v5778_v28 = vunpack.c.l.b16 %v5677_v34 }
 0x273   : > { %v3854_v0 = vadd.f32 %v15139_v59, %v3108_v24  ;;  %v13359_v59 = vld [vmem:[#allocation11 + $0x8] sm:$0xff] }
 0x274   : > { %6967 = vmatpush.bf16.msra.mxu1 %v13359_v59  ;;  %v5805_v4 = vpack.c.b16 %v5779_v3, %v5778_v28  ;;  %v15191_v59 = vpop.f32.mrf.mxu2  ;;  %v5685_v28 = vrot.slane %v5683_v41, 4 }
 0x275   : > { %v15177_v1 = vadd.f32 %v4297_v45, %v3854_v0  ;;  %v5282_v45 = vpack.c.b16 %v5255_v23, %v5254_v31  ;;  %v4972_v0 = vor.u32 %v4971_v62, %v4968_v50  ;;  %v4983_v23 = vrot.slane %v4982_v20, 4 }
 0x276   : > { %v4990_v50 = vshrl.u32 %v4815_v13, 16  ;;  %v4993_v62 = vshll.u32 %v4815_v13, 16 }
 0x277   : > { %17461 = vst [vmem:[#allocation40_spill] sm:$0xff] %v15177_v1  ;;  %v4302_v24 = vpop.f32.mrf.mxu1  ;;  %v4985_v1 = vshll.u32 %v4814_v26, 16  ;;  %v4973_v34 = vrot.slane %v4972_v0, 4  ;;  %v5003_v26 = vshrl.u32 %v4816_v60, 16  ;;  %v5001_v60 = vrot.slane %v4999_v14, 5  ;;  %v13371_v14 = vld [vmem:[#allocation11 + $0x68] sm:$0xff] }
 0x278   : > { %v3031_v44 = vpop.f32.mrf.mxu3  ;;  %v4995_v13 = vrot.slane %v4993_v62, 5  ;;  %7645 = vmatpush.bf16.msra.mxu2 %v13371_v14 }
 0x279   : > { %v3109_v9 = vadd.f32 %v3031_v44, %v14895_v40  ;;  %v15189_v53 = vpop.f32.mrf.mxu0  ;;  %v5563_v40 = vld [vmem:[#allocation2 + $0x68] sm:$0x1]  ;;  %v4987_v31 = vrot.slane %v4985_v1, 5  ;;  %v12614_v44 = vrot.slane %v5561_v38, 9  ;;  %v4978_v0 = vsel %vm14102_vm12, %v4973_v34, %v4977_v19 }
 0x27a   : > { %v5686_v3 = vrot.slane %v5563_v40, 5  ;;  %v4992_v1 = vrot.slane %v4990_v50, 4  ;;  %v5005_v33 = vrot.slane %v5003_v26, 4 }
 0x27b   : > { %v15187_v16 = vadd.f32 %v15153_v61, %v3109_v9  ;;  %v17463_v9 = vld [vmem:[#allocation24_spill] sm:$0xff]  ;;  %v4988_v20 = vsel %vm14102_vm12, %v4983_v23, %v4987_v31  ;;  %v5684_v38 = vsel %vm14094_vm11, %v12614_v44, %v5683_v41 }
 0x27c   : > { %5913 = vmatmul.bf16.gmra.mxu0 %v5805_v4  ;;  %v4817_v4 = vld [vmem:[#allocation2 + $0x68] sm:$0x1]  ;;  %v5687_v40 = vsel %vm14094_vm11, %v5685_v28, %v5686_v3  ;;  %v5257_v19 = vunpack.c.l.b16 %v4988_v20  ;;  %v4996_v23 = vor.u32 %v4995_v13, %v4992_v1  ;;  %v5006_v31 = vor.u32 %v5005_v33, %v5001_v60  ;;  %v4818_v28 = vld [vmem:[#allocation2 + $0x6c] sm:$0xf] }
 0x27d   : > { %17462 = vst [vmem:[#allocation41_spill] sm:$0xff] %v15187_v16  ;;  %5386 = vmatmul.bf16.gmra.mxu3 %v5282_v45  ;;  %v5009_v50 = vshll.u32 %v4817_v4, 16  ;;  %v5780_v62 = vunpack.c.l.b16 %v5684_v38  ;;  %v5014_v4 = vshrl.u32 %v4818_v28, 16  ;;  %v5017_v38 = vshll.u32 %v4818_v28, 16 }
 0x27e   : > { %v4997_v3 = vrot.slane %v4996_v23, 4  ;;  %v5007_v33 = vrot.slane %v5006_v31, 4 }
 0x27f   : > { %v15194_v27 = vpop.f32.mrf.mxu1  ;;  %v5011_v1 = vrot.slane %v5009_v50, 5  ;;  %v5016_v31 = vrot.slane %v5014_v4, 4  ;;  %v5019_v50 = vrot.slane %v5017_v38, 5 }
 0x280   : > { %v3034_v61 = vpop.f32.mrf.mxu3  ;;  %17464 = vst [vmem:[#allocation24_spill] sm:$0xff] %v15194_v27  ;;  %v5002_v23 = vsel %vm14102_vm12, %v4997_v3, %v5001_v60  ;;  %v4820_v3 = vld [vmem:[#allocation2 + $0x74] sm:$0x1] }
 0x281   : > { %v3110_v45 = vadd.f32 %v3034_v61, %v17463_v9  ;;  %v5256_v9 = vunpack.c.l.b16 %v4978_v0  ;;  %v15207_v34 = vpop.f32.mrf.mxu0  ;;  %v5565_v0 = vld [vmem:[#allocation2 + $0x70] sm:$0xf] }
 0x283   : > { %v3856_v16 = vadd.f32 %v15165_v32, %v3110_v45  ;;  %v5781_v32 = vunpack.c.l.b16 %v5687_v40  ;;  %v15209_v45 = vpop.f32.mrf.mxu2  ;;  %v5283_v44 = vpack.c.b16 %v5257_v19, %v5256_v9  ;;  %v5564_v9 = vld [vmem:[#allocation2 + $0x6c] sm:$0xe]  ;;  %v5566_v19 = vld [vmem:[#allocation2 + $0x74] sm:$0x1] }
 0x285   : > { %v15205_v61 = vadd.f32 %v4302_v24, %v3856_v16  ;;  %v4819_v24 = vld [vmem:[#allocation2 + $0x70] sm:$0xf]  ;;  %v5806_v13 = vpack.c.b16 %v5781_v32, %v5780_v62 }
 0x286   : > { %v5023_v40 = vshll.u32 %v4819_v24, 16  ;;  %v5027_v27 = vshrl.u32 %v4819_v24, 16  ;;  %v5693_v24 = vrot.slane %v5566_v19, 5  ;;  %v13369_v19 = vld [vmem:[#allocation11 + $0x58] sm:$0xff] }
 0x287   : > { %17465 = vst [vmem:[#allocation42_spill] sm:$0xff] %v15205_v61  ;;  %v4307_v16 = vpop.f32.mrf.mxu1 }
 0x288   : > { %v3036_v26 = vpop.f32.mrf.mxu3  ;;  %v15221_v62 = vrot.slane %v5023_v40, 5  ;;  %v5029_v32 = vrot.slane %v5027_v27, 4 }
 0x289   : > { %v3111_v41 = vadd.f32 %v3036_v26, %v14837_v58  ;;  %v15215_v61 = vpop.f32.mrf.mxu0  ;;  %v5690_v58 = vrot.slane %v5565_v0, 5  ;;  %v17467_v26 = vld [vmem:[#allocation26_spill] sm:$0xff]  ;;  %v13370_v0 = vld [vmem:[#allocation11 + $0x60] sm:$0xff] }
 0x28a   : > { %7646 = vmatpush.bf16.msra.mxu2 %v13370_v0  ;;  %v5030_v38 = vor.u32 %v5029_v32, %v15221_v62  ;;  %v5568_v32 = vld [vmem:[#allocation2 + $0x7c] sm:$0xf] }
 0x28b   : > { %v15213_v20 = vadd.f32 %v15179_v36, %v3111_v41  ;;  %v5012_v36 = vsel %vm14102_vm12, %v5007_v33, %v5011_v1  ;;  %v5692_v28 = vrot.slane %v5690_v58, 4  ;;  %v5258_v33 = vunpack.c.l.b16 %v5002_v23 }
 0x28c   : > { %5918 = vmatmul.bf16.gmra.mxu0 %v5806_v13  ;;  %v5259_v1 = vunpack.c.l.b16 %v5012_v36  ;;  %v5020_v13 = vor.u32 %v5019_v50, %v5016_v31 }
 0x28d   : > { %17466 = vst [vmem:[#allocation43_spill] sm:$0xff] %v15213_v20  ;;  %5391 = vmatmul.bf16.gmra.mxu3 %v5283_v44  ;;  %v12615_v44 = vrot.slane %v5564_v9, 9  ;;  %v15224_v20 = vpop.f32.mrf.mxu2  ;;  %v5694_v9 = vsel %vm14094_vm11, %v5692_v28, %v5693_v24  ;;  %v4821_v24 = vld [vmem:[#allocation2 + $0x78] sm:$0xf] }
 0x28e   : > { %17468 = vst [vmem:[#allocation26_spill] sm:$0xff] %v15224_v20  ;;  %v5783_v36 = vunpack.c.l.b16 %v5694_v9  ;;  %7647 = vmatpush.bf16.msra.mxu2 %v13369_v19  ;;  %v5284_v31 = vpack.c.b16 %v5259_v1, %v5258_v33  ;;  %v5021_v50 = vrot.slane %v5020_v13, 4  ;;  %v4822_v9 = vld [vmem:[#allocation2 + $0x7c] sm:$0xf]  ;;  %v5697_v19 = vrot.slane %v5568_v32, 5 }
 0x28f   : > { %v15227_v25 = vpop.f32.mrf.mxu1  ;;  %v5691_v40 = vsel %vm14094_vm11, %v12615_v44, %v5690_v58  ;;  %v7082_v58 = vld [vmem:[#allocation3] sm:$0xf]  ;;  %v7083_v44 = vld [vmem:[#allocation3 + $0x4] sm:$0xf] }
 0x290   : > { %v3039_v14 = vpop.f32.mrf.mxu3  ;;  %17469 = vst [vmem:[#allocation44_spill] sm:$0xff] %v15227_v25  ;;  %v5782_v23 = vunpack.c.l.b16 %v5691_v40  ;;  %v7134_v25 = vshll.u32 %v7082_v58, 16  ;;  %v7144_v33 = vshrl.u32 %v7083_v44, 16  ;;  %v13367_v32 = vld [vmem:[#allocation11 + $0x48] sm:$0xff]  ;;  %v5699_v46 = vrot.slane %v5697_v19, 4 }
 0x291   : > { %v3112_v41 = vadd.f32 %v3039_v14, %v17467_v26  ;;  %v15231_v27 = vpop.f32.mrf.mxu0  ;;  %v13358_v14 = vld [vmem:[#allocation11] sm:$0xff] }
 0x292   : > { %6968 = vmatpush.bf16.msra.mxu1 %v13358_v14  ;;  %v5807_v40 = vpack.c.b16 %v5783_v36, %v5782_v23  ;;  %v5038_v36 = vshrl.u32 %v4821_v24, 16 }
 0x293   : > { %v3858_v60 = vadd.f32 %v15189_v53, %v3112_v41  ;;  %v5033_v53 = vshll.u32 %v4820_v3, 16  ;;  %v5031_v41 = vrot.slane %v5030_v38, 4  ;;  %v7131_v3 = vshrl.u32 %v7082_v58, 16 }
 0x294   : > { %v5026_v38 = vsel %vm14102_vm12, %v5021_v50, %v15221_v62  ;;  %v5051_v62 = vshrl.u32 %v4822_v9, 16 }
 0x295   : > { %v15229_v4 = vadd.f32 %v4307_v16, %v3858_v60  ;;  %v5035_v0 = vrot.slane %v5033_v53, 5  ;;  %v13368_v60 = vld [vmem:[#allocation11 + $0x50] sm:$0xff]  ;;  %v15242_v1 = vpop.f32.mrf.mxu2  ;;  %v5569_v53 = vld [vmem:[#allocation2 + $0x80] sm:$0x1]  ;;  %v7133_v14 = vrot.slane %v7131_v3, 4  ;;  %v5260_v55 = vunpack.c.l.b16 %v5026_v38 }
 0x296   : > { %7648 = vmatpush.bf16.msra.mxu2 %v13368_v60  ;;  %17472 = vst [vmem:[#allocation47_spill] sm:$0xff] %v15242_v1  ;;  %v7084_v60 = vld [vmem:[#allocation3 + $0x8] sm:$0x1]  ;;  %v5700_v30 = vrot.slane %v5569_v53, 5 }
 0x297   : > { %17470 = vst [vmem:[#allocation45_spill] sm:$0xff] %v15229_v4  ;;  %v5036_v23 = vsel %vm14102_vm12, %v5031_v41, %v5035_v0  ;;  %v7150_v1 = vshll.u32 %v7084_v60, 16 }
 0x298   : > { %v3041_v26 = vpop.f32.mrf.mxu3  ;;  %v5261_v43 = vunpack.c.l.b16 %v5036_v23  ;;  %v5701_v38 = vsel %vm14094_vm11, %v5699_v46, %v5700_v30  ;;  %v5571_v46 = vld [vmem:[#allocation2 + $0x88] sm:$0xf] }
 0x299   : > { %v3113_v16 = vadd.f32 %v3041_v26, %v14857_v56  ;;  %v7140_v56 = vshll.u32 %v7083_v44, 16  ;;  %v15244_v13 = vpop.f32.mrf.mxu0  ;;  %v7136_v26 = vrot.slane %v7134_v25, 5  ;;  %v7146_v44 = vrot.slane %v7144_v33, 4 }
 0x29a   : > { %7649 = vmatpush.bf16.msra.mxu2 %v13367_v32  ;;  %v7152_v0 = vrot.slane %v7150_v1, 5 }
 0x29b   : > { %v15240_v28 = vadd.f32 %v15207_v34, %v3113_v16  ;;  %v5567_v34 = vld [vmem:[#allocation2 + $0x78] sm:$0xe]  ;;  %v4312_v16 = vpop.f32.mrf.mxu1  ;;  %v7142_v58 = vrot.slane %v7140_v56, 5  ;;  %v7137_v4 = vor.u32 %v7136_v26, %v7133_v14  ;;  %v5040_v14 = vrot.slane %v5038_v36, 4 }
 0x29c   : > { %5923 = vmatmul.bf16.gmra.mxu0 %v5807_v40  ;;  %v12616_v50 = vrot.slane %v5567_v34, 9  ;;  %v13366_v56 = vld [vmem:[#allocation11 + $0x40] sm:$0xff]  ;;  %v5053_v34 = vrot.slane %v5051_v62, 4  ;;  %v5285_v62 = vpack.c.b16 %v5261_v43, %v5260_v55  ;;  %v5704_v55 = vrot.slane %v5571_v46, 5 }
 0x29d   : > { %17471 = vst [vmem:[#allocation46_spill] sm:$0xff] %v15240_v28  ;;  %5396 = vmatmul.bf16.gmra.mxu3 %v5284_v31  ;;  %v5041_v31 = vshll.u32 %v4821_v24, 16  ;;  %v5047_v28 = vshll.u32 %v4822_v9, 16  ;;  %v7147_v25 = vor.u32 %v7146_v44, %v7142_v58  ;;  %v7138_v41 = vrot.slane %v7137_v4, 4  ;;  %v15267_v23 = vpop.f32.mrf.mxu2 }
 0x29e   : > { %7650 = vmatpush.bf16.msra.mxu2 %v13366_v56 }
 0x29f   : > { %v7148_v33 = vrot.slane %v7147_v25, 4  ;;  %v5043_v26 = vrot.slane %v5041_v31, 5  ;;  %v7143_v40 = vsel %vm14102_vm12, %v7138_v41, %v7142_v58  ;;  %v15255_v9 = vrot.slane %v5047_v28, 5  ;;  %v4823_v28 = vld [vmem:[#allocation2 + $0x80] sm:$0x1] }
 0x2a0   : > { %v3044_v20 = vpop.f32.mrf.mxu3  ;;  %v4824_v41 = vld [vmem:[#allocation2 + $0x84] sm:$0xf] }
 0x2a1   : > { %v3114_v3 = vadd.f32 %v3044_v20, %v14867_v29  ;;  %v7153_v29 = vsel %vm14102_vm12, %v7148_v33, %v7152_v0  ;;  %v7531_v20 = vunpack.c.l.b16 %v7143_v40  ;;  %v15261_v1 = vpop.f32.mrf.mxu0  ;;  %v5044_v58 = vor.u32 %v5043_v26, %v5040_v14  ;;  %v4825_v33 = vld [vmem:[#allocation2 + $0x88] sm:$0xf]  ;;  %v5570_v40 = vld [vmem:[#allocation2 + $0x84] sm:$0xe] }
 0x2a2   : > { %v7532_v53 = vunpack.c.l.b16 %v7153_v29  ;;  %v5054_v25 = vor.u32 %v5053_v34, %v15255_v9  ;;  %v5062_v26 = vshrl.u32 %v4824_v41, 16  ;;  %v5572_v34 = vld [vmem:[#allocation2 + $0x8c] sm:$0x1]  ;;  %v5065_v29 = vshll.u32 %v4824_v41, 16 }
 0x2a3   : > { %v3860_v24 = vadd.f32 %v15215_v61, %v3114_v3  ;;  %v5698_v61 = vsel %vm14094_vm11, %v12616_v50, %v5697_v19  ;;  %v15269_v60 = vpop.f32.mrf.mxu1  ;;  %v6209_v19 = vld [vmem:[#allocation3 + $0xc] sm:$0x1]  ;;  %v5057_v50 = vshll.u32 %v4823_v28, 16  ;;  %v5045_v0 = vrot.slane %v5044_v58, 4 }
 0x2a4   : > { %v7563_v36 = vpack.c.b16 %v7532_v53, %v7531_v20  ;;  %v5784_v44 = vunpack.c.l.b16 %v5698_v61  ;;  %v6210_v30 = vsel %vm14047_vm3, 0, %v6209_v19  ;;  %v5055_v43 = vrot.slane %v5054_v25, 4  ;;  %v17473_v53 = vld [vmem:[#allocation27_spill] sm:$0xff] }
 0x2a5   : > { %v15259_v4 = vadd.f32 %v4312_v16, %v3860_v24  ;;  %v5785_v16 = vunpack.c.l.b16 %v5701_v38  ;;  %6211 = vst [vmem:[#allocation3 + $0xc] sm:$0x1] %v6210_v30  ;;  %v13342_v24 = vld [vmem:[#allocation3] sm:$0xff]  ;;  %v5059_v14 = vrot.slane %v5057_v50, 5  ;;  %v5071_v20 = vshll.u32 %v4825_v33, 16 }
 0x2a6   : > { %7651 = vmatmul.bf16.vlgmr.msra.gmra.mxu2 %v7563_v36  ;;  %6969 = vmatmul.bf16.vlgmr.msra.gmra.mxu1 %v13342_v24  ;;  %v5050_v38 = vsel %vm14102_vm12, %v5045_v0, %v15255_v9  ;;  %v6257_v36 = vld [vmem:[#allocation3 + $0x14] sm:$0x1]  ;;  %v5706_v58 = vrot.slane %v5704_v55, 4  ;;  %v5064_v19 = vrot.slane %v5062_v26, 4  ;;  %v5067_v9 = vrot.slane %v5065_v29, 5 }
 0x2a7   : > { %v5808_v56 = vpack.c.b16 %v5785_v16, %v5784_v44  ;;  %v5707_v44 = vrot.slane %v5572_v34, 5  ;;  %v15284_v16 = vpop.f32.mrf.mxu2  ;;  %v6258_v25 = vsel %vm14059_vm4, 0, %v6257_v36  ;;  %v15291_v30 = vrot.slane %v5071_v20, 5  ;;  %v4826_v0 = vld [vmem:[#allocation2 + $0x8c] sm:$0x1] }
 0x2a8   : > { %v3046_v32 = vpop.f32.mrf.mxu3  ;;  %6259 = vst [vmem:[#allocation3 + $0x14] sm:$0x1] %v6258_v25  ;;  %v5262_v41 = vunpack.c.l.b16 %v5050_v38  ;;  %v4827_v26 = vld [vmem:[#allocation2 + $0x90] sm:$0xf]  ;;  %v5081_v34 = vshll.u32 %v4826_v0, 16 }
 0x2a9   : > { %v3115_v31 = vadd.f32 %v3046_v32, %v14877_v35  ;;  %v15278_v35 = vpop.f32.mrf.mxu0  ;;  %v12617_v32 = vrot.slane %v5570_v40, 9  ;;  %v4828_v29 = vld [vmem:[#allocation2 + $0x94] sm:$0xf]  ;;  %v5086_v38 = vshrl.u32 %v4827_v26, 16 }
 0x2aa   : > { %v5095_v25 = vshll.u32 %v4828_v29, 16 }
 0x2ab   : > { %v15276_v3 = vadd.f32 %v15231_v27, %v3115_v31  ;;  %v5075_v27 = vshrl.u32 %v4825_v33, 16  ;;  %v4317_v31 = vpop.f32.mrf.mxu1 }
 0x2ac   : > { %5928 = vmatmul.bf16.gmra.mxu0 %v5808_v56 }
 0x2ad   : > { %5401 = vmatmul.bf16.gmra.mxu3 %v5285_v62  ;;  %v5060_v62 = vsel %vm14102_vm12, %v5055_v43, %v5059_v14  ;;  %v5077_v46 = vrot.slane %v5075_v27, 4  ;;  %v5705_v43 = vsel %vm14094_vm11, %v12617_v32, %v5704_v55  ;;  %v5708_v14 = vsel %vm14094_vm11, %v5706_v58, %v5707_v44  ;;  %v5574_v32 = vld [vmem:[#allocation2 + $0x94] sm:$0xf] }
 0x2ae   : > { %v5263_v33 = vunpack.c.l.b16 %v5060_v62  ;;  %v5786_v27 = vunpack.c.l.b16 %v5705_v43  ;;  %v6212_v62 = vld [vmem:[#allocation3 + $0x18] sm:$0x1]  ;;  %v5099_v55 = vshrl.u32 %v4828_v29, 16  ;;  %v5088_v43 = vrot.slane %v5086_v38, 4 }
 0x2af   : > { %v5078_v40 = vor.u32 %v5077_v46, %v15291_v30  ;;  %v5711_v29 = vrot.slane %v5574_v32, 5  ;;  %v6260_v32 = vld [vmem:[#allocation3 + $0x20] sm:$0x1] }
 0x2b0   : > { %v3049_v61 = vpop.f32.mrf.mxu3 }
 0x2b1   : > { %v3116_v28 = vadd.f32 %v3049_v61, %v17473_v53  ;;  %v15295_v24 = vpop.f32.mrf.mxu0  ;;  %v5787_v61 = vunpack.c.l.b16 %v5708_v14  ;;  %v5089_v53 = vshll.u32 %v4827_v26, 16  ;;  %v5079_v46 = vrot.slane %v5078_v40, 4  ;;  %v5573_v26 = vld [vmem:[#allocation2 + $0x90] sm:$0xe] }
 0x2b2   : > { %v12618_v38 = vrot.slane %v5573_v26, 9  ;;  %v13413_v26 = vld [vmem:[#allocation11 + $0x138] sm:$0xff] }
 0x2b3   : > { %v3862_v50 = vadd.f32 %v15244_v13, %v3116_v28  ;;  %v5068_v13 = vor.u32 %v5067_v9, %v5064_v19  ;;  %v17475_v28 = vld [vmem:[#allocation28_spill] sm:$0xff]  ;;  %v5083_v19 = vrot.slane %v5081_v34, 5  ;;  %v15308_v9 = vpop.f32.mrf.mxu2  ;;  %v5809_v0 = vpack.c.b16 %v5787_v61, %v5786_v27  ;;  %9289 = vmatpush.bf16.msrb.mxu1 %v13413_v26 }
 0x2b4   : > { %v5091_v14 = vrot.slane %v5089_v53, 5  ;;  %v5575_v34 = vld [vmem:[#allocation2 + $0x98] sm:$0x1]  ;;  %v4830_v53 = vld [vmem:[#allocation2 + $0x9c] sm:$0xf] }
 0x2b5   : > { %v15293_v56 = vadd.f32 %v4317_v31, %v3862_v50  ;;  %v5286_v31 = vpack.c.b16 %v5263_v33, %v5262_v41  ;;  %v5069_v44 = vrot.slane %v5068_v13, 4  ;;  %v6213_v50 = vsel %vm14047_vm3, 0, %v6212_v62  ;;  %v13381_v33 = vld [vmem:[#allocation11 + $0xb8] sm:$0xff] }
 0x2b6   : > { %6214 = vst [vmem:[#allocation3 + $0x18] sm:$0x1] %v6213_v50  ;;  %v5101_v13 = vrot.slane %v5099_v55, 4  ;;  %8165 = vmatpush.bf16.msrb.mxu3 %v13381_v33  ;;  %v5084_v27 = vsel %vm14102_vm12, %v5079_v46, %v5083_v19  ;;  %v5092_v61 = vor.u32 %v5091_v14, %v5088_v43  ;;  %v5714_v55 = vrot.slane %v5575_v34, 5  ;;  %v13405_v33 = vld [vmem:[#allocation11 + $0xf8] sm:$0xff] }
 0x2b7   : > { %17474 = vst [vmem:[#allocation27_spill] sm:$0xff] %v15293_v56  ;;  %v5074_v40 = vsel %vm14102_vm12, %v5069_v44, %v15291_v30  ;;  %v4831_v44 = vld [vmem:[#allocation2 + $0xa0] sm:$0xf]  ;;  %v5110_v50 = vshrl.u32 %v4830_v53, 16  ;;  %v5113_v19 = vshll.u32 %v4830_v53, 16  ;;  %v5265_v14 = vunpack.c.l.b16 %v5084_v27  ;;  %8543 = vmatpush.bf16.msrb.mxu0 %v13405_v33 }
 0x2b8   : > { %v3051_v20 = vpop.f32.mrf.mxu3  ;;  %v5264_v43 = vunpack.c.l.b16 %v5074_v40  ;;  %v5119_v53 = vshll.u32 %v4831_v44, 16 }
 0x2b9   : > { %v3117_v36 = vadd.f32 %v3051_v20, %v17475_v28  ;;  %v15310_v41 = vpop.f32.mrf.mxu0  ;;  %v15312_v20 = vrot.slane %v5095_v25, 5  ;;  %v5713_v25 = vrot.slane %v5711_v29, 4 }
 0x2ba   : > { %v5287_v56 = vpack.c.b16 %v5265_v14, %v5264_v43 }
 0x2bb   : > { %v15304_v58 = vadd.f32 %v15261_v1, %v3117_v36  ;;  %v4829_v1 = vld [vmem:[#allocation2 + $0x98] sm:$0x1]  ;;  %v5102_v30 = vor.u32 %v5101_v13, %v15312_v20  ;;  %v5712_v13 = vsel %vm14094_vm11, %v12618_v38, %v5711_v29  ;;  %v4363_v29 = vadd.f32 %v15012_v17, %v15028_v6  ;;  %v6215_v6 = vld [vmem:[#allocation3 + $0x24] sm:$0x1] }
 0x2bc   : > { %5933 = vmatmul.bf16.gmra.mxu0 %v5809_v0  ;;  %v5105_v62 = vshll.u32 %v4829_v1, 16  ;;  %v6261_v0 = vsel %vm14059_vm4, 0, %v6260_v32  ;;  %v5093_v1 = vrot.slane %v5092_v61, 4  ;;  %v5112_v32 = vrot.slane %v5110_v50, 4 }
 0x2bd   : > { %17476 = vst [vmem:[#allocation28_spill] sm:$0xff] %v15304_v58  ;;  %5406 = vmatmul.bf16.gmra.mxu3 %v5286_v31  ;;  %v15323_v31 = vld [vmem:[%s17396_s4] ss:$0 sm:$0xff]  ;;  %v15341_v58 = vpop.f32.mrf.mxu2  ;;  %v5103_v40 = vrot.slane %v5102_v30, 4  ;;  %v5115_v61 = vrot.slane %v5113_v19, 5  ;;  %v15350_v50 = vrot.slane %v5119_v53, 5  ;;  %v15355_v43 = vadd.f32 %v15133_v15, %v4363_v29 }
 0x2be   : > { %6262 = vst [vmem:[#allocation3 + $0x20] sm:$0x1] %v6261_v0  ;;  %v5107_v27 = vrot.slane %v5105_v62, 5  ;;  %v4832_v62 = vld [vmem:[#allocation2 + $0xa4] sm:$0x1] }
 0x2bf   : > { %v5116_v26 = vor.u32 %v5115_v61, %v5112_v32 }
 0x2c0   : > { %v5367_v28 = vpop.f32.mrf.mxu3  ;;  %v5108_v17 = vsel %vm14102_vm12, %v5103_v40, %v5107_v27  ;;  %v5129_v40 = vshll.u32 %v4832_v62, 16 }
 0x2c1   : > { %v5479_v36 = vadd.f32 %v5367_v28, %v14920_v54  ;;  %v15330_v54 = vld [vmem:[%s17397_s5] ss:$0 sm:$0xff]  ;;  %v5715_v28 = vsel %vm14094_vm11, %v5713_v25, %v5714_v55  ;;  %v5098_v25 = vsel %vm14102_vm12, %v5093_v1, %v15312_v20  ;;  %v5788_v55 = vunpack.c.l.b16 %v5712_v13  ;;  %v5578_v13 = vld [vmem:[#allocation2 + $0xa4] sm:$0x1] }
 0x2c2   : > { %v6216_v1 = vsel %vm14047_vm3, 0, %v6215_v6  ;;  %v15362_v53 = vunpack.c.l.b16 %v5098_v25  ;;  %v15370_v29 = vrot.slane %v5116_v26, 4  ;;  %v15392_v62 = vrot.slane %v5129_v40, 5 }
 0x2c3   : > { %v6001_v46 = vadd.f32 %v15278_v35, %v5479_v36  ;;  %v15337_v35 = vpop.f32.mrf.mxu0  ;;  %v5123_v36 = vshrl.u32 %v4831_v44, 16  ;;  %v5789_v44 = vunpack.c.l.b16 %v5715_v28  ;;  %v4365_v28 = vadd.f32 %v15035_v63, %v15048_v51  ;;  %6217 = vst [vmem:[#allocation3 + $0x24] sm:$0x1] %v6216_v1 }
 0x2c4   : > { %v5721_v63 = vrot.slane %v5578_v13, 5  ;;  %v15374_v51 = vadd.f32 %v15143_v5, %v15038_v12  ;;  %v6657_v12 = vld [vmem:[#allocation3 + $0xc] sm:$0xf] }
 0x2c5   : > { %v6101_v34 = vmul.f32 %v15323_v31, %v6001_v46  ;;  %v5577_v46 = vld [vmem:[#allocation2 + $0xa0] sm:$0xf]  ;;  %v5125_v19 = vrot.slane %v5123_v36, 4  ;;  %v5810_v36 = vpack.c.b16 %v5789_v44, %v5788_v55  ;;  %v15380_v55 = vadd.f32 %v15160_v37, %v4365_v28 }
 0x2c6   : > { %v15384_v44 = vadd.f32 %v15175_v21, %v15059_v2  ;;  %v6263_v21 = vld [vmem:[#allocation3 + $0x2c] sm:$0x1] }
 0x2c7   : > { %v6137_v38 = vadd.f32 %v15330_v54, %v6101_v34  ;;  %v5718_v34 = vrot.slane %v5577_v46, 5  ;;  %v5126_v61 = vor.u32 %v5125_v19, %v15350_v50  ;;  %v6264_v13 = vsel %vm14059_vm4, 0, %v6263_v21 }
 0x2c8   : > { %v5369_v0 = vpop.f32.mrf.mxu3  ;;  %6265 = vst [vmem:[#allocation3 + $0x2c] sm:$0x1] %v6264_v13 }
 0x2c9   : > { %v6169_v33 = vmax.f32 %v6137_v38, 0.0  ;;  %v5480_v30 = vadd.f32 %v5369_v0, %v14925_v52  ;;  %v5576_v52 = vld [vmem:[#allocation2 + $0x9c] sm:$0xe]  ;;  %v5720_v46 = vrot.slane %v5718_v34, 4  ;;  %v15396_v6 = vrot.slane %v5126_v61, 4 }
 0x2ca   : > { %v12619_v38 = vrot.slane %v5576_v52, 9 }
 0x2cb   : > { %v6305_v14 = vpack.c.bf16 %v6169_v33, %v6169_v33  ;;  %v6002_v20 = vadd.f32 %v15295_v24, %v5480_v30  ;;  %v15365_v32 = vpop.f32.mrf.mxu0  ;;  %v15367_v24 = vunpack.c.l.b16 %v5108_v17  ;;  %v15388_v33 = vadd.f32 %v15057_v10, %v15069_v42  ;;  %v15390_v30 = vpop.f32.mrf.mxu2 }
 0x2cc   : > { %5938 = vmatmul.bf16.gmra.mxu0 %v5810_v36  ;;  %v5719_v42 = vsel %vm14094_vm11, %v12619_v38, %v5718_v34  ;;  %v5722_v26 = vsel %vm14094_vm11, %v5720_v46, %v5721_v63  ;;  %v4835_v63 = vld [vmem:[#allocation2 + $0xb0] sm:$0x1] }
 0x2cd   : > { %v6338_v27 = vshrl.u32 %v6305_v14, 16  ;;  %v6102_v15 = vmul.f32 %v15323_v31, %v6002_v20  ;;  %5411 = vmatmul.bf16.gmra.mxu3 %v5287_v56  ;;  %v6341_v25 = vshll.u32 %v6305_v14, 16  ;;  %v5288_v2 = vpack.c.b16 %v15367_v24, %v15362_v53  ;;  %v4833_v14 = vld [vmem:[#allocation2 + $0xa8] sm:$0xf]  ;;  %v4834_v20 = vld [vmem:[#allocation2 + $0xac] sm:$0xf] }
 0x2ce   : > { %v5134_v28 = vshrl.u32 %v4833_v14, 16  ;;  %v5137_v36 = vshll.u32 %v4833_v14, 16  ;;  %v5143_v40 = vshll.u32 %v4834_v20, 16  ;;  %v5790_v38 = vunpack.c.l.b16 %v5719_v42  ;;  %v6661_v14 = vld [vmem:[#allocation3 + $0x14] sm:$0x1] }
 0x2cf   : > { %v15376_v0 = vrot.slane %v6338_v27, 7  ;;  %v6138_v56 = vadd.f32 %v15330_v54, %v6102_v15  ;;  %v5147_v27 = vshrl.u32 %v4834_v20, 16  ;;  %v5791_v46 = vunpack.c.l.b16 %v5722_v26 }
 0x2d0   : > { %v5372_v5 = vpop.f32.mrf.mxu3  ;;  %v5132_v42 = vsel %vm14102_vm12, %v15396_v6, %v15392_v62 }
 0x2d1   : > { %v6343_v19 = vor.u32 %v6341_v25, %v15376_v0  ;;  %v6170_v17 = vmax.f32 %v6138_v56, 0.0  ;;  %v5481_v37 = vadd.f32 %v5372_v5, %v14939_v18  ;;  %v5136_v25 = vrot.slane %v5134_v28, 4 }
 0x2d2   : > { %v5139_v56 = vrot.slane %v5137_v36, 5  ;;  %v6344_v21 = vrot.slane %v15376_v0, 4 }
 0x2d3   : > { %v6658_v18 = vsel %vm14124_vm14, %v6343_v19, %v6657_v12  ;;  %v6306_v1 = vpack.c.bf16 %v6170_v17, %v6170_v17  ;;  %v6003_v52 = vadd.f32 %v15310_v41, %v5481_v37  ;;  %v15414_v61 = vpop.f32.mrf.mxu0  ;;  %v5145_v41 = vrot.slane %v5143_v40, 5  ;;  %v15423_v40 = vpop.f32.mrf.mxu2 }
 0x2d4   : > { %6659 = vst [vmem:[#allocation3 + $0xc] sm:$0xf] %v6658_v18  ;;  %v5149_v12 = vrot.slane %v5147_v27, 4  ;;  %v5153_v37 = vshll.u32 %v4835_v63, 16  ;;  %v5140_v26 = vor.u32 %v5139_v56, %v5136_v25  ;;  %v5811_v27 = vpack.c.b16 %v5791_v46, %v5790_v38 }
 0x2d5   : > { %v6346_v34 = vshrl.u32 %v6306_v1, 16  ;;  %v6103_v15 = vmul.f32 %v15323_v31, %v6003_v52  ;;  %v6349_v19 = vshll.u32 %v6306_v1, 16  ;;  %v5580_v1 = vld [vmem:[#allocation2 + $0xac] sm:$0xf] }
 0x2d6   : > { %v5150_v18 = vor.u32 %v5149_v12, %v5145_v41  ;;  %v5141_v0 = vrot.slane %v5140_v26, 4  ;;  %v5155_v63 = vrot.slane %v5153_v37, 5  ;;  %v5579_v12 = vld [vmem:[#allocation2 + $0xa8] sm:$0xe]  ;;  %v15449_v26 = vunpack.c.l.b16 %v5132_v42 }
 0x2d7   : > { %v6348_v5 = vrot.slane %v6346_v34, 7  ;;  %v6139_v17 = vadd.f32 %v15330_v54, %v6103_v15  ;;  %v6218_v34 = vld [vmem:[#allocation3 + $0x30] sm:$0x1]  ;;  %v12620_v53 = vrot.slane %v5579_v12, 9 }
 0x2d8   : > { %v5374_v20 = vpop.f32.mrf.mxu3  ;;  %v5151_v15 = vrot.slane %v5150_v18, 4  ;;  %v6219_v38 = vsel %vm14047_vm3, 0, %v6218_v34  ;;  %v15460_v34 = vadd.f32 %v15191_v59, %v15388_v33 }
 0x2d9   : > { %v6351_v52 = vor.u32 %v6349_v19, %v6348_v5  ;;  %v6353_v13 = vrot.slane %v6348_v5, 4  ;;  %v6171_v28 = vmax.f32 %v6139_v17, 0.0  ;;  %v5482_v36 = vadd.f32 %v5374_v20, %v14947_v47  ;;  %v5581_v47 = vld [vmem:[#allocation2 + $0xb0] sm:$0x1]  ;;  %6220 = vst [vmem:[#allocation3 + $0x30] sm:$0x1] %v6219_v38 }
 0x2da   : > { %v5146_v5 = vsel %vm14102_vm12, %v5141_v0, %v5145_v41  ;;  %v5725_v19 = vrot.slane %v5580_v1, 5  ;;  %v17477_v41 = vsel %vm14102_vm12, %v15370_v29, %v15350_v50  ;;  %v5728_v42 = vrot.slane %v5581_v47, 5  ;;  %v4836_v38 = vld [vmem:[#allocation2 + $0xb4] sm:$0xf] }
 0x2db   : > { %v6352_v10 = vsel %vm14118_vm13, %v6344_v21, %v6351_v52  ;;  %v6662_v62 = vsel %vm14047_vm3, %v6353_v13, %v6661_v14  ;;  %v6307_v6 = vpack.c.bf16 %v6171_v28, %v6171_v28  ;;  %v6004_v25 = vadd.f32 %v15337_v35, %v5482_v36  ;;  %v7085_v56 = vld [vmem:[#allocation3 + $0xc] sm:$0xf]  ;;  %v15438_v35 = vpop.f32.mrf.mxu0  ;;  %v6664_v28 = vld [vmem:[#allocation3 + $0x18] sm:$0xf] }
 0x2dc   : > { %6660 = vst [vmem:[#allocation3 + $0x10] sm:$0xf] %v6352_v10  ;;  %v7155_v46 = vshrl.u32 %v7085_v56, 16  ;;  %v13380_v21 = vld [vmem:[#allocation11 + $0xb0] sm:$0xff]  ;;  %v7158_v10 = vshll.u32 %v7085_v56, 16  ;;  %v5156_v14 = vsel %vm14102_vm12, %v5151_v15, %v5155_v63  ;;  %v15447_v20 = vunpack.c.l.b16 %v17477_v41  ;;  %5943 = vmatmul.bf16.gmra.mxu0 %v5811_v27 }
 0x2dd   : > { %6663 = vst [vmem:[#allocation3 + $0x14] sm:$0x1] %v6662_v62  ;;  %v6355_v17 = vshrl.u32 %v6307_v6, 16  ;;  %v6104_v37 = vmul.f32 %v15323_v31, %v6004_v25  ;;  %5416 = vmatmul.bf16.gmra.mxu3 %v5288_v2  ;;  %v6358_v2 = vshll.u32 %v6307_v6, 16  ;;  %v15454_v1 = vunpack.c.l.b16 %v5146_v5  ;;  %v13404_v41 = vld [vmem:[#allocation11 + $0xf0] sm:$0xff] }
 0x2de   : > { %v7157_v18 = vrot.slane %v7155_v46, 4  ;;  %8166 = vmatpush.bf16.msrb.mxu3 %v13380_v21  ;;  %v7160_v13 = vrot.slane %v7158_v10, 5  ;;  %v15456_v50 = vunpack.c.l.b16 %v5156_v14  ;;  %v5727_v29 = vrot.slane %v5725_v19, 4  ;;  %8544 = vmatpush.bf16.msrb.mxu0 %v13404_v41 }
 0x2df   : > { %v15451_v24 = vrot.slane %v6355_v17, 7  ;;  %v6140_v52 = vadd.f32 %v15330_v54, %v6104_v37  ;;  %v15466_v62 = vadd.f32 %v15209_v45, %v15081_v49  ;;  %v5289_v27 = vpack.c.b16 %v15449_v26, %v15447_v20  ;;  %v15476_v49 = vpop.f32.mrf.mxu2 }
 0x2e0   : > { %v5377_v36 = vpop.f32.mrf.mxu3  ;;  %v7161_v6 = vor.u32 %v7160_v13, %v7157_v18  ;;  %v5726_v25 = vsel %vm14094_vm11, %v12620_v53, %v5725_v19  ;;  %v5290_v19 = vpack.c.b16 %v15456_v50, %v15454_v1  ;;  %v5729_v17 = vsel %vm14094_vm11, %v5727_v29, %v5728_v42  ;;  %v4837_v42 = vld [vmem:[#allocation2 + $0xb8] sm:$0xf] }
 0x2e1   : > { %v6360_v0 = vor.u32 %v6358_v2, %v15451_v24  ;;  %v6172_v15 = vmax.f32 %v6140_v52, 0.0  ;;  %v5483_v63 = vadd.f32 %v5377_v36, %v14961_v39  ;;  %v6361_v56 = vrot.slane %v15451_v24, 4  ;;  %v13412_v24 = vld [vmem:[#allocation11 + $0x130] sm:$0xff]  ;;  %v6266_v2 = vld [vmem:[#allocation3 + $0x38] sm:$0x1] }
 0x2e2   : > { %v7162_v46 = vrot.slane %v7161_v6, 4  ;;  %v5792_v52 = vunpack.c.l.b16 %v5726_v25  ;;  %v5158_v13 = vshrl.u32 %v4836_v38, 16  ;;  %v6267_v29 = vsel %vm14059_vm4, 0, %v6266_v2  ;;  %9290 = vmatpush.bf16.msrb.mxu1 %v13412_v24 }
 0x2e3   : > { %v6665_v59 = vsel %vm14124_vm14, %v6360_v0, %v6664_v28  ;;  %v6308_v33 = vpack.c.bf16 %v6172_v15, %v6172_v15  ;;  %v6005_v12 = vadd.f32 %v15365_v32, %v5483_v63  ;;  %v13343_v39 = vld [vmem:[#allocation3 + $0xc] sm:$0xff]  ;;  %v15483_v14 = vpop.f32.mrf.mxu0  ;;  %v6668_v15 = vld [vmem:[#allocation3 + $0x20] sm:$0x1]  ;;  %6268 = vst [vmem:[#allocation3 + $0x38] sm:$0x1] %v6267_v29  ;;  %v5161_v25 = vshll.u32 %v4836_v38, 16 }
 0x2e4   : > { %v7086_v47 = vld [vmem:[#allocation3 + $0x10] sm:$0xf]  ;;  %6666 = vst [vmem:[#allocation3 + $0x18] sm:$0xf] %v6665_v59  ;;  %v7087_v45 = vld [vmem:[#allocation3 + $0x14] sm:$0x1]  ;;  %6974 = vmatmul.bf16.gmra.mxu1 %v13343_v39  ;;  %v5793_v59 = vunpack.c.l.b16 %v5729_v17 }
 0x2e5   : > { %v7164_v5 = vshll.u32 %v7086_v47, 16  ;;  %v6363_v37 = vshrl.u32 %v6308_v33, 16  ;;  %v6366_v21 = vshll.u32 %v6308_v33, 16  ;;  %v6105_v10 = vmul.f32 %v15323_v31, %v6005_v12  ;;  %v4838_v38 = vld [vmem:[#allocation2 + $0xbc] sm:$0x1] }
 0x2e6   : > { %v7168_v32 = vshrl.u32 %v7086_v47, 16  ;;  %v7174_v53 = vshll.u32 %v7087_v45, 16  ;;  %v5160_v33 = vrot.slane %v5158_v13, 4  ;;  %v17478_v45 = vld [vmem:[#allocation29_spill] sm:$0xff]  ;;  %v5167_v41 = vshll.u32 %v4837_v42, 16 }
 0x2e7   : > { %v7166_v18 = vrot.slane %v7164_v5, 5  ;;  %v6365_v28 = vrot.slane %v6363_v37, 7  ;;  %v6141_v36 = vadd.f32 %v15330_v54, %v6105_v10 }
 0x2e8   : > { %v7170_v0 = vrot.slane %v7168_v32, 4  ;;  %v5379_v63 = vpop.f32.mrf.mxu3  ;;  %v7176_v10 = vrot.slane %v7174_v53, 5  ;;  %v5163_v32 = vrot.slane %v5161_v25, 5 }
 0x2e9   : > { %v7167_v6 = vsel %vm14102_vm12, %v7162_v46, %v7166_v18  ;;  %v6368_v12 = vor.u32 %v6366_v21, %v6365_v28  ;;  %v6370_v39 = vrot.slane %v6365_v28, 4  ;;  %v6173_v47 = vmax.f32 %v6141_v36, 0.0  ;;  %v6221_v36 = vld [vmem:[#allocation3 + $0x3c] sm:$0x1] }
 0x2ea   : > { %v5484_v5 = vadd.f32 %v5379_v63, %v17478_v45  ;;  %v7171_v37 = vor.u32 %v7170_v0, %v7166_v18  ;;  %v5812_v28 = vpack.c.b16 %v5793_v59, %v5792_v52  ;;  %v5164_v18 = vor.u32 %v5163_v32, %v5160_v33  ;;  %v15504_v63 = vld [vmem:[#allocation2 + $0xb4] sm:$0xe]  ;;  %v15506_v52 = vpop.f32.mrf.mxu2 }
 0x2eb   : > { %v6369_v2 = vsel %vm14118_vm13, %v6361_v56, %v6368_v12  ;;  %v6669_v46 = vsel %vm14047_vm3, %v6370_v39, %v6668_v15  ;;  %v6309_v24 = vpack.c.bf16 %v6173_v47, %v6173_v47  ;;  %v7088_v13 = vld [vmem:[#allocation3 + $0x18] sm:$0xf]  ;;  %v7533_v56 = vunpack.c.l.b16 %v7167_v6  ;;  %v15500_v15 = vpop.f32.mrf.mxu0  ;;  %v6671_v6 = vld [vmem:[#allocation3 + $0x24] sm:$0xf] }
 0x2ec   : > { %v6006_v17 = vadd.f32 %v15414_v61, %v5484_v5  ;;  %6667 = vst [vmem:[#allocation3 + $0x1c] sm:$0xf] %v6369_v2  ;;  %v7172_v21 = vrot.slane %v7171_v37, 4  ;;  %v7179_v29 = vshrl.u32 %v7088_v13, 16  ;;  %v6222_v61 = vsel %vm14047_vm3, 0, %v6221_v36  ;;  %5948 = vmatmul.bf16.gmra.mxu0 %v5812_v28 }
 0x2ed   : > { %6670 = vst [vmem:[#allocation3 + $0x20] sm:$0x1] %v6669_v46  ;;  %v6372_v53 = vshrl.u32 %v6309_v24, 16  ;;  %5421 = vmatmul.bf16.gmra.mxu3 %v5289_v27  ;;  %v6375_v59 = vshll.u32 %v6309_v24, 16  ;;  %v7182_v12 = vshll.u32 %v7088_v13, 16  ;;  %v5165_v27 = vrot.slane %v5164_v18, 4 }
 0x2ee   : > { %v6106_v0 = vmul.f32 %v15323_v31, %v6006_v17  ;;  %v7177_v33 = vsel %vm14102_vm12, %v7172_v21, %v7176_v10  ;;  %6223 = vst [vmem:[#allocation3 + $0x3c] sm:$0x1] %v6222_v61  ;;  %v7181_v25 = vrot.slane %v7179_v29, 4  ;;  %v5169_v5 = vrot.slane %v5167_v41, 5  ;;  %v17479_v10 = vld [vmem:[#allocation30_spill] sm:$0xff] }
 0x2ef   : > { %v15510_v39 = vrot.slane %v6372_v53, 7  ;;  %v7534_v26 = vunpack.c.l.b16 %v7177_v33  ;;  %v7184_v45 = vrot.slane %v7182_v12, 5  ;;  %v5171_v37 = vshrl.u32 %v4837_v42, 16 }
 0x2f0   : > { %v6142_v20 = vadd.f32 %v15330_v54, %v6106_v0  ;;  %v5382_v47 = vpop.f32.mrf.mxu3  ;;  %v5177_v32 = vshll.u32 %v4838_v38, 16  ;;  %v12621_v17 = vrot.slane %v15504_v63, 9  ;;  %v5583_v0 = vld [vmem:[#allocation2 + $0xb8] sm:$0xf] }
 0x2f1   : > { %v6377_v2 = vor.u32 %v6375_v59, %v15510_v39  ;;  %v5485_v24 = vadd.f32 %v5382_v47, %v17479_v10  ;;  %v6378_v13 = vrot.slane %v15510_v39, 4  ;;  %v7564_v21 = vpack.c.b16 %v7534_v26, %v7533_v56  ;;  %v6269_v47 = vld [vmem:[#allocation3 + $0x44] sm:$0x1]  ;;  %v6675_v10 = vld [vmem:[#allocation3 + $0x2c] sm:$0x1] }
 0x2f2   : > { %v6174_v46 = vmax.f32 %v6142_v20, 0.0  ;;  %v7185_v36 = vor.u32 %v7184_v45, %v7181_v25  ;;  %v5173_v29 = vrot.slane %v5171_v37, 4  ;;  %v5179_v53 = vrot.slane %v5177_v32, 5 }
 0x2f3   : > { %v6672_v18 = vsel %vm14124_vm14, %v6377_v2, %v6671_v6  ;;  %v6007_v41 = vadd.f32 %v15438_v35, %v5485_v24  ;;  %v13344_v42 = vld [vmem:[#allocation3 + $0x18] sm:$0xff]  ;;  %7656 = vmatmul.bf16.gmra.mxu2 %v7564_v21  ;;  %v5170_v56 = vsel %vm14102_vm12, %v5165_v27, %v5169_v5  ;;  %v15523_v35 = vpop.f32.mrf.mxu0  ;;  %v5732_v37 = vrot.slane %v5583_v0, 5 }
 0x2f4   : > { %v6310_v28 = vpack.c.bf16 %v6174_v46, %v6174_v46  ;;  %v7089_v38 = vld [vmem:[#allocation3 + $0x1c] sm:$0xf]  ;;  %6673 = vst [vmem:[#allocation3 + $0x24] sm:$0xf] %v6672_v18  ;;  %v7090_v61 = vld [vmem:[#allocation3 + $0x20] sm:$0x1]  ;;  %v5174_v33 = vor.u32 %v5173_v29, %v5169_v5  ;;  %6979 = vmatmul.bf16.gmra.mxu1 %v13344_v42  ;;  %v15528_v5 = vpop.f32.mrf.mxu2  ;;  %v15534_v29 = vunpack.c.l.b16 %v5170_v56 }
 0x2f5   : > { %v7186_v59 = vrot.slane %v7185_v36, 4  ;;  %v7188_v63 = vshll.u32 %v7089_v38, 16  ;;  %v6107_v39 = vmul.f32 %v15323_v31, %v6007_v41  ;;  %v7192_v20 = vshrl.u32 %v7089_v38, 16  ;;  %v17480_v38 = vld [vmem:[#allocation31_spill] sm:$0xff] }
 0x2f6   : > { %v6380_v25 = vshrl.u32 %v6310_v28, 16  ;;  %v6383_v12 = vshll.u32 %v6310_v28, 16  ;;  %v7198_v6 = vshll.u32 %v7090_v61, 16  ;;  %v5175_v45 = vrot.slane %v5174_v33, 4  ;;  %v5584_v61 = vld [vmem:[#allocation2 + $0xbc] sm:$0x1] }
 0x2f7   : > { %v7190_v26 = vrot.slane %v7188_v63, 5  ;;  %v6143_v2 = vadd.f32 %v15330_v54, %v6107_v39  ;;  %v7194_v46 = vrot.slane %v7192_v20, 4  ;;  %v6270_v27 = vsel %vm14059_vm4, 0, %v6269_v47 }
 0x2f8   : > { %v6382_v32 = vrot.slane %v6380_v25, 7  ;;  %v5384_v24 = vpop.f32.mrf.mxu3  ;;  %6271 = vst [vmem:[#allocation3 + $0x44] sm:$0x1] %v6270_v27  ;;  %v5180_v36 = vsel %vm14102_vm12, %v5175_v45, %v5179_v53  ;;  %v5733_v18 = vsel %vm14094_vm11, %v12621_v17, %v5732_v37  ;;  %v7200_v33 = vrot.slane %v7198_v6, 5  ;;  %v6224_v6 = vld [vmem:[#allocation3 + $0x48] sm:$0x1] }
 0x2f9   : > { %v7191_v21 = vsel %vm14102_vm12, %v7186_v59, %v7190_v26  ;;  %v6175_v42 = vmax.f32 %v6143_v2, 0.0  ;;  %v5486_v0 = vadd.f32 %v5384_v24, %v17480_v38  ;;  %v7195_v63 = vor.u32 %v7194_v46, %v7190_v26 }
 0x2fa   : > { %v6385_v28 = vor.u32 %v6383_v12, %v6382_v32  ;;  %v6387_v41 = vrot.slane %v6382_v32, 4  ;;  %v7535_v25 = vunpack.c.l.b16 %v7191_v21  ;;  %v5734_v39 = vrot.slane %v5732_v37, 4  ;;  %v4839_v12 = vld [vmem:[#allocation2 + $0xc0] sm:$0xf] }
 0x2fb   : > { %v6311_v56 = vpack.c.bf16 %v6175_v42, %v6175_v42  ;;  %v6008_v20 = vadd.f32 %v15483_v14, %v5486_v0  ;;  %v7091_v17 = vld [vmem:[#allocation3 + $0x24] sm:$0xf]  ;;  %v7196_v47 = vrot.slane %v7195_v63, 4  ;;  %v15544_v45 = vunpack.c.l.b16 %v5180_v36  ;;  %v15550_v46 = vpop.f32.mrf.mxu0 }
 0x2fc   : > { %v6386_v59 = vsel %vm14118_vm13, %v6378_v13, %v6385_v28  ;;  %v6676_v53 = vsel %vm14047_vm3, %v6387_v41, %v6675_v10  ;;  %v5735_v32 = vrot.slane %v5584_v61, 5  ;;  %v5794_v26 = vunpack.c.l.b16 %v5733_v18  ;;  %v13379_v14 = vld [vmem:[#allocation11 + $0xa8] sm:$0xff]  ;;  %v6678_v28 = vld [vmem:[#allocation3 + $0x30] sm:$0xf] }
 0x2fd   : > { %6674 = vst [vmem:[#allocation3 + $0x28] sm:$0xf] %v6386_v59  ;;  %v6389_v37 = vshrl.u32 %v6311_v56, 16  ;;  %v6392_v2 = vshll.u32 %v6311_v56, 16  ;;  %v6108_v13 = vmul.f32 %v15323_v31, %v6008_v20  ;;  %5426 = vmatmul.bf16.gmra.mxu3 %v5290_v19  ;;  %v6225_v27 = vsel %vm14047_vm3, 0, %v6224_v6  ;;  %v17481_v59 = vld [vmem:[#allocation32_spill] sm:$0xff]  ;;  %v15564_v56 = vpop.f32.mrf.mxu2 }
 0x2fe   : > { %6677 = vst [vmem:[#allocation3 + $0x2c] sm:$0x1] %v6676_v53  ;;  %v7201_v10 = vsel %vm14102_vm12, %v7196_v47, %v7200_v33  ;;  %v5736_v24 = vsel %vm14094_vm11, %v5734_v39, %v5735_v32  ;;  %v7203_v21 = vshrl.u32 %v7091_v17, 16  ;;  %v7206_v36 = vshll.u32 %v7091_v17, 16  ;;  %8167 = vmatpush.bf16.msrb.mxu3 %v13379_v14 }
 0x2ff   : > { %6226 = vst [vmem:[#allocation3 + $0x48] sm:$0x1] %v6225_v27  ;;  %v15558_v18 = vrot.slane %v6389_v37, 7  ;;  %v6144_v1 = vadd.f32 %v15330_v54, %v6108_v13  ;;  %v7536_v50 = vunpack.c.l.b16 %v7201_v10  ;;  %v5795_v19 = vunpack.c.l.b16 %v5736_v24  ;;  %v17482_v10 = vld [vmem:[#allocation21_spill] sm:$0xff]  ;;  %v17483_v24 = vld [vmem:[#allocation20_spill] sm:$0xff] }
 0x300   : > { %v5387_v41 = vpop.f32.mrf.mxu3  ;;  %v7205_v42 = vrot.slane %v7203_v21, 4  ;;  %v7208_v38 = vrot.slane %v7206_v36, 5  ;;  %v5182_v0 = vshrl.u32 %v4839_v12, 16  ;;  %v5185_v61 = vshll.u32 %v4839_v12, 16 }
 0x301   : > { %v6394_v63 = vor.u32 %v6392_v2, %v15558_v18  ;;  %v6395_v33 = vrot.slane %v15558_v18, 4  ;;  %v6176_v39 = vmax.f32 %v6144_v1, 0.0  ;;  %v5487_v53 = vadd.f32 %v5387_v41, %v17481_v59  ;;  %v4840_v2 = vld [vmem:[#allocation2 + $0xc4] sm:$0xf]  ;;  %v13403_v41 = vld [vmem:[#allocation11 + $0xe8] sm:$0xff] }
 0x302   : > { %v7565_v20 = vpack.c.b16 %v7536_v50, %v7535_v25  ;;  %v5813_v17 = vpack.c.b16 %v5795_v19, %v5794_v26  ;;  %v7209_v47 = vor.u32 %v7208_v38, %v7205_v42  ;;  %v5184_v32 = vrot.slane %v5182_v0, 4  ;;  %v13411_v0 = vld [vmem:[#allocation11 + $0x128] sm:$0xff]  ;;  %8545 = vmatpush.bf16.msrb.mxu0 %v13403_v41 }
 0x303   : > { %v6679_v6 = vsel %vm14124_vm14, %v6394_v63, %v6678_v28  ;;  %v6312_v37 = vpack.c.bf16 %v6176_v39, %v6176_v39  ;;  %v6009_v13 = vadd.f32 %v15500_v15, %v5487_v53  ;;  %v5187_v27 = vrot.slane %v5185_v61, 5  ;;  %v15576_v28 = vpop.f32.mrf.mxu0  ;;  %v6272_v61 = vld [vmem:[#allocation3 + $0x50] sm:$0x1]  ;;  %9291 = vmatpush.bf16.msrb.mxu1 %v13411_v0 }
 0x304   : > { %v13345_v12 = vld [vmem:[#allocation3 + $0x24] sm:$0xff]  ;;  %v15571_v21 = vadd.f32 %v17483_v24, %v17482_v10  ;;  %6680 = vst [vmem:[#allocation3 + $0x30] sm:$0xf] %v6679_v6  ;;  %7661 = vmatmul.bf16.gmra.mxu2 %v7565_v20  ;;  %v5291_v25 = vpack.c.b16 %v15544_v45, %v15534_v29  ;;  %5953 = vmatmul.bf16.gmra.mxu0 %v5813_v17  ;;  %v7210_v36 = vrot.slane %v7209_v47, 4  ;;  %v5191_v39 = vshll.u32 %v4840_v2, 16 }
 0x305   : > { %v7092_v14 = vld [vmem:[#allocation3 + $0x28] sm:$0xf]  ;;  %v7093_v26 = vld [vmem:[#allocation3 + $0x2c] sm:$0x1]  ;;  %v6397_v1 = vshrl.u32 %v6312_v37, 16  ;;  %v6400_v50 = vshll.u32 %v6312_v37, 16  ;;  %v6109_v15 = vmul.f32 %v15323_v31, %v6009_v13  ;;  %6984 = vmatmul.bf16.gmra.mxu1 %v13345_v12  ;;  %v5188_v63 = vor.u32 %v5187_v27, %v5184_v32 }
 0x306   : > { %v7212_v18 = vshll.u32 %v7092_v14, 16  ;;  %v7216_v19 = vshrl.u32 %v7092_v14, 16  ;;  %v7222_v38 = vshll.u32 %v7093_v26, 16  ;;  %v6682_v45 = vld [vmem:[#allocation3 + $0x38] sm:$0x1]  ;;  %v6273_v20 = vsel %vm14059_vm4, 0, %v6272_v61 }
 0x307   : > { %v6399_v29 = vrot.slane %v6397_v1, 7  ;;  %v6145_v59 = vadd.f32 %v15330_v54, %v6109_v15  ;;  %6274 = vst [vmem:[#allocation3 + $0x50] sm:$0x1] %v6273_v20  ;;  %v5189_v37 = vrot.slane %v5188_v63, 4  ;;  %v5193_v13 = vrot.slane %v5191_v39, 5 }
 0x308   : > { %v7214_v42 = vrot.slane %v7212_v18, 5  ;;  %v7218_v53 = vrot.slane %v7216_v19, 4  ;;  %v5389_v17 = vpop.f32.mrf.mxu3  ;;  %v7224_v6 = vrot.slane %v7222_v38, 5  ;;  %v4841_v10 = vld [vmem:[#allocation2 + $0xc8] sm:$0x1]  ;;  %v5195_v1 = vshrl.u32 %v4840_v2, 16 }
 0x309   : > { %v6402_v32 = vor.u32 %v6400_v50, %v6399_v29  ;;  %v6404_v12 = vrot.slane %v6399_v29, 4  ;;  %v6177_v14 = vmax.f32 %v6145_v59, 0.0  ;;  %v5488_v27 = vadd.f32 %v5389_v17, %v15355_v43  ;;  %v5585_v15 = vld [vmem:[#allocation2 + $0xc0] sm:$0xe]  ;;  %v5586_v38 = vld [vmem:[#allocation2 + $0xc4] sm:$0xf]  ;;  %v15591_v43 = vpop.f32.mrf.mxu2 }
 0x30a   : > { %v7215_v47 = vsel %vm14102_vm12, %v7210_v36, %v7214_v42  ;;  %v7219_v24 = vor.u32 %v7218_v53, %v7214_v42  ;;  %v5194_v18 = vsel %vm14102_vm12, %v5189_v37, %v5193_v13  ;;  %v5587_v0 = vld [vmem:[#allocation2 + $0xc8] sm:$0x1]  ;;  %v5197_v61 = vrot.slane %v5195_v1, 4  ;;  %v13402_v1 = vld [vmem:[#allocation11 + $0xe0] sm:$0xff] }
 0x30b   : > { %v7537_v26 = vunpack.c.l.b16 %v7215_v47  ;;  %v6403_v36 = vsel %vm14118_vm13, %v6395_v33, %v6402_v32  ;;  %v6683_v19 = vsel %vm14047_vm3, %v6404_v12, %v6682_v45  ;;  %v6313_v41 = vpack.c.bf16 %v6177_v14, %v6177_v14  ;;  %v15596_v45 = vpop.f32.mrf.mxu0  ;;  %v6227_v47 = vld [vmem:[#allocation3 + $0x54] sm:$0x1]  ;;  %v6685_v32 = vld [vmem:[#allocation3 + $0x3c] sm:$0xf]  ;;  %8546 = vmatpush.bf16.msrb.mxu0 %v13402_v1 }
 0x30c   : > { %v6010_v50 = vadd.f32 %v15523_v35, %v5488_v27  ;;  %6681 = vst [vmem:[#allocation3 + $0x34] sm:$0xf] %v6403_v36  ;;  %v7220_v42 = vrot.slane %v7219_v24, 4  ;;  %v5201_v63 = vshll.u32 %v4841_v10, 16  ;;  %v15593_v39 = vunpack.c.l.b16 %v5194_v18 }
 0x30d   : > { %6684 = vst [vmem:[#allocation3 + $0x38] sm:$0x1] %v6683_v19  ;;  %v6406_v2 = vshrl.u32 %v6313_v41, 16  ;;  %v6409_v29 = vshll.u32 %v6313_v41, 16  ;;  %5431 = vmatmul.bf16.gmra.mxu3 %v5291_v25  ;;  %v12622_v59 = vrot.slane %v5585_v15, 9  ;;  %v5198_v53 = vor.u32 %v5197_v61, %v5193_v13  ;;  %v13378_v13 = vld [vmem:[#allocation11 + $0xa0] sm:$0xff] }
 0x30e   : > { %v6110_v33 = vmul.f32 %v15323_v31, %v6010_v50  ;;  %v7225_v35 = vsel %vm14102_vm12, %v7220_v42, %v7224_v6  ;;  %v5203_v20 = vrot.slane %v5201_v63, 5  ;;  %v5739_v17 = vrot.slane %v5586_v38, 5  ;;  %v7094_v50 = vld [vmem:[#allocation3 + $0x30] sm:$0xf]  ;;  %8168 = vmatpush.bf16.msrb.mxu3 %v13378_v13 }
 0x30f   : > { %v15600_v37 = vrot.slane %v6406_v2, 7  ;;  %v7538_v14 = vunpack.c.l.b16 %v7225_v35  ;;  %v5742_v27 = vrot.slane %v5587_v0, 5  ;;  %v5199_v24 = vrot.slane %v5198_v53, 4  ;;  %v17484_v35 = vld [vmem:[#allocation26_spill] sm:$0xff] }
 0x310   : > { %v6146_v12 = vadd.f32 %v15330_v54, %v6110_v33  ;;  %v5392_v10 = vpop.f32.mrf.mxu3  ;;  %v5740_v25 = vsel %vm14094_vm11, %v12622_v59, %v5739_v17  ;;  %v5741_v18 = vrot.slane %v5739_v17, 4  ;;  %v6228_v6 = vsel %vm14047_vm3, 0, %v6227_v47 }
 0x311   : > { %v6411_v15 = vor.u32 %v6409_v29, %v15600_v37  ;;  %v6412_v36 = vrot.slane %v15600_v37, 4  ;;  %v5489_v41 = vadd.f32 %v5392_v10, %v15374_v51  ;;  %6229 = vst [vmem:[#allocation3 + $0x54] sm:$0x1] %v6228_v6  ;;  %v7566_v38 = vpack.c.b16 %v7538_v14, %v7537_v26  ;;  %v15619_v26 = vld [vmem:[#allocation2 + $0xcc] sm:$0xf]  ;;  %v13376_v37 = vld [vmem:[#allocation11 + $0x90] sm:$0xff] }
 0x312   : > { %v6178_v19 = vmax.f32 %v6146_v12, 0.0  ;;  %v5204_v0 = vsel %vm14102_vm12, %v5199_v24, %v5203_v20  ;;  %v5743_v42 = vsel %vm14094_vm11, %v5741_v18, %v5742_v27  ;;  %v5796_v61 = vunpack.c.l.b16 %v5740_v25  ;;  %v6275_v24 = vld [vmem:[#allocation3 + $0x5c] sm:$0x1]  ;;  %v13377_v25 = vld [vmem:[#allocation11 + $0x98] sm:$0xff]  ;;  %v15630_v18 = vpop.f32.mrf.mxu2 }
 0x313   : > { %v6686_v63 = vsel %vm14124_vm14, %v6411_v15, %v6685_v32  ;;  %v6011_v29 = vadd.f32 %v15550_v46, %v5489_v41  ;;  %v13346_v33 = vld [vmem:[#allocation3 + $0x30] sm:$0xff]  ;;  %v15617_v51 = vunpack.c.l.b16 %v5204_v0  ;;  %v15623_v53 = vadd.f32 %v17484_v35, %v15571_v21  ;;  %v15628_v10 = vpop.f32.mrf.mxu0  ;;  %8169 = vmatpush.bf16.msrb.mxu3 %v13377_v25 }
 0x314   : > { %v6314_v2 = vpack.c.bf16 %v6178_v19, %v6178_v19  ;;  %v7095_v59 = vld [vmem:[#allocation3 + $0x34] sm:$0xf]  ;;  %6687 = vst [vmem:[#allocation3 + $0x3c] sm:$0xf] %v6686_v63  ;;  %7666 = vmatmul.bf16.gmra.mxu2 %v7566_v38  ;;  %v5797_v20 = vunpack.c.l.b16 %v5743_v42  ;;  %v7096_v17 = vld [vmem:[#allocation3 + $0x38] sm:$0x1] }
 0x315   : > { %v7227_v47 = vshrl.u32 %v7094_v50, 16  ;;  %v7230_v12 = vshll.u32 %v7094_v50, 16  ;;  %v6111_v46 = vmul.f32 %v15323_v31, %v6011_v29  ;;  %6989 = vmatmul.bf16.gmra.mxu1 %v13346_v33  ;;  %v5292_v27 = vpack.c.b16 %v15617_v51, %v15593_v39  ;;  %v13401_v21 = vld [vmem:[#allocation11 + $0xd8] sm:$0xff]  ;;  %v6689_v38 = vld [vmem:[#allocation3 + $0x44] sm:$0x1] }
 0x316   : > { %v6414_v32 = vshrl.u32 %v6314_v2, 16  ;;  %v6417_v14 = vshll.u32 %v6314_v2, 16  ;;  %v5814_v6 = vpack.c.b16 %v5797_v20, %v5796_v61  ;;  %v7236_v15 = vshll.u32 %v7095_v59, 16  ;;  %8547 = vmatpush.bf16.msrb.mxu0 %v13401_v21 }
 0x317   : > { %v7229_v13 = vrot.slane %v7227_v47, 4  ;;  %v7232_v1 = vrot.slane %v7230_v12, 5  ;;  %v6147_v41 = vadd.f32 %v15330_v54, %v6111_v46  ;;  %v7240_v50 = vshrl.u32 %v7095_v59, 16  ;;  %v4843_v54 = vld [vmem:[#allocation2 + $0xd0] sm:$0xf]  ;;  %8170 = vmatpush.bf16.msrb.mxu3 %v13376_v37 }
 0x318   : > { %v6416_v19 = vrot.slane %v6414_v32, 7  ;;  %v7246_v31 = vshll.u32 %v7096_v17, 16  ;;  %v5394_v39 = vpop.f32.mrf.mxu3  ;;  %5958 = vmatmul.bf16.gmra.mxu0 %v5814_v6  ;;  %v7238_v42 = vrot.slane %v7236_v15, 5  ;;  %v6276_v63 = vsel %vm14059_vm4, 0, %v6275_v24  ;;  %v4844_v46 = vld [vmem:[#allocation2 + $0xd4] sm:$0x1] }
 0x319   : > { %v7233_v0 = vor.u32 %v7232_v1, %v7229_v13  ;;  %v5206_v61 = vshrl.u32 %v15619_v26, 16  ;;  %v6179_v33 = vmax.f32 %v6147_v41, 0.0  ;;  %v5490_v51 = vadd.f32 %v5394_v39, %v15380_v55  ;;  %6277 = vst [vmem:[#allocation3 + $0x5c] sm:$0x1] %v6276_v63  ;;  %v5588_v24 = vld [vmem:[#allocation2 + $0xcc] sm:$0xe] }
 0x31a   : > { %v6419_v2 = vor.u32 %v6417_v14, %v6416_v19  ;;  %v6421_v29 = vrot.slane %v6416_v19, 4  ;;  %v7242_v35 = vrot.slane %v7240_v50, 4  ;;  %v7248_v20 = vrot.slane %v7246_v31, 5  ;;  %v13400_v13 = vld [vmem:[#allocation11 + $0xd0] sm:$0xff]  ;;  %v15650_v15 = vld [vmem:[%s17396_s4] ss:$0 sm:$0xff] }
 0x31b   : > { %v7234_v59 = vrot.slane %v7233_v0, 4  ;;  %v5208_v17 = vrot.slane %v5206_v61, 4  ;;  %v6315_v32 = vpack.c.bf16 %v6179_v33, %v6179_v33  ;;  %v6012_v14 = vadd.f32 %v15576_v28, %v5490_v51  ;;  %v15653_v41 = vpop.f32.mrf.mxu0  ;;  %v5589_v50 = vld [vmem:[#allocation2 + $0xd0] sm:$0xf]  ;;  %8548 = vmatpush.bf16.msrb.mxu0 %v13400_v13 }
 0x31c   : > { %v6420_v47 = vsel %vm14118_vm13, %v6412_v36, %v6419_v2  ;;  %v6690_v12 = vsel %vm14047_vm3, %v6421_v29, %v6689_v38  ;;  %v7243_v25 = vor.u32 %v7242_v35, %v7238_v42  ;;  %v5209_v21 = vshll.u32 %v15619_v26, 16  ;;  %v15663_v2 = vpop.f32.mrf.mxu2  ;;  %v6692_v29 = vld [vmem:[#allocation3 + $0x48] sm:$0xf] }
 0x31d   : > { %6688 = vst [vmem:[#allocation3 + $0x40] sm:$0xf] %v6420_v47  ;;  %v7239_v55 = vsel %vm14102_vm12, %v7234_v59, %v7238_v42  ;;  %v5215_v6 = vshll.u32 %v4843_v54, 16  ;;  %v6423_v36 = vshrl.u32 %v6315_v32, 16  ;;  %v6426_v1 = vshll.u32 %v6315_v32, 16  ;;  %5436 = vmatmul.bf16.gmra.mxu3 %v5292_v27  ;;  %v13375_v47 = vld [vmem:[#allocation11 + $0x88] sm:$0xff] }
 0x31e   : > { %6691 = vst [vmem:[#allocation3 + $0x44] sm:$0x1] %v6690_v12  ;;  %v6112_v28 = vmul.f32 %v15650_v15, %v6012_v14  ;;  %v7539_v19 = vunpack.c.l.b16 %v7239_v55  ;;  %v7244_v31 = vrot.slane %v7243_v25, 4  ;;  %v5211_v26 = vrot.slane %v5209_v21, 5  ;;  %v15660_v42 = vld [vmem:[%s17397_s5] ss:$0 sm:$0xff]  ;;  %8171 = vmatpush.bf16.msrb.mxu3 %v13375_v47 }
 0x31f   : > { %v5217_v38 = vrot.slane %v5215_v6, 5  ;;  %v5219_v39 = vshrl.u32 %v4843_v54, 16  ;;  %v15655_v0 = vrot.slane %v6423_v36, 7  ;;  %v5225_v27 = vshll.u32 %v4844_v46, 16  ;;  %v13399_v12 = vld [vmem:[#allocation11 + $0xc8] sm:$0xff]  ;;  %v13398_v47 = vld [vmem:[#allocation11 + $0xc0] sm:$0xff] }
 0x320   : > { %v6148_v63 = vadd.f32 %v15660_v42, %v6112_v28  ;;  %v12623_v61 = vrot.slane %v5588_v24, 9  ;;  %v5397_v33 = vpop.f32.mrf.mxu3  ;;  %v7249_v51 = vsel %vm14102_vm12, %v7244_v31, %v7248_v20  ;;  %v5212_v54 = vor.u32 %v5211_v26, %v5208_v17  ;;  %8549 = vmatpush.bf16.msrb.mxu0 %v13399_v12  ;;  %v5590_v36 = vld [vmem:[#allocation2 + $0xd4] sm:$0x1]  ;;  %v6230_v28 = vld [vmem:[#allocation3 + $0x60] sm:$0x1] }
 0x321   : > { %v5221_v59 = vrot.slane %v5219_v39, 4  ;;  %v5746_v35 = vrot.slane %v5589_v50, 5  ;;  %v6428_v32 = vor.u32 %v6426_v1, %v15655_v0  ;;  %v6429_v14 = vrot.slane %v15655_v0, 4  ;;  %v7097_v39 = vld [vmem:[#allocation3 + $0x3c] sm:$0xf] }
 0x322   : > { %v6180_v55 = vmax.f32 %v6148_v63, 0.0  ;;  %v5491_v46 = vadd.f32 %v5397_v33, %v15384_v44  ;;  %v7540_v24 = vunpack.c.l.b16 %v7249_v51  ;;  %v5213_v25 = vrot.slane %v5212_v54, 4  ;;  %v13410_v54 = vld [vmem:[#allocation11 + $0x120] sm:$0xff] }
 0x323   : > { %v5222_v21 = vor.u32 %v5221_v59, %v5217_v38  ;;  %v5227_v6 = vrot.slane %v5225_v27, 5  ;;  %v6693_v20 = vsel %vm14124_vm14, %v6428_v32, %v6692_v29  ;;  %v5747_v1 = vsel %vm14094_vm11, %v12623_v61, %v5746_v35  ;;  %v15678_v51 = vpop.f32.mrf.mxu0  ;;  %v13374_v61 = vld [vmem:[#allocation11 + $0x80] sm:$0xff]  ;;  %9292 = vmatpush.bf16.msrb.mxu1 %v13410_v54  ;;  %v7829_v54 = vld [vmem:[#allocation3 + $0x4] sm:$0xf] }
 0x324   : > { %v6316_v17 = vpack.c.bf16 %v6180_v55, %v6180_v55  ;;  %v6013_v37 = vadd.f32 %v15596_v45, %v5491_v46  ;;  %v13347_v13 = vld [vmem:[#allocation3 + $0x3c] sm:$0xff]  ;;  %6694 = vst [vmem:[#allocation3 + $0x48] sm:$0xf] %v6693_v20  ;;  %v7567_v44 = vpack.c.b16 %v7540_v24, %v7539_v19  ;;  %v5218_v50 = vsel %vm14102_vm12, %v5213_v25, %v5217_v38  ;;  %v6696_v24 = vld [vmem:[#allocation3 + $0x50] sm:$0x1] }
 0x325   : > { %v5223_v31 = vrot.slane %v5222_v21, 4  ;;  %v5748_v26 = vrot.slane %v5746_v35, 4  ;;  %6994 = vmatmul.bf16.gmra.mxu1 %v13347_v13  ;;  %v5276_v45 = vunpack.c.l.b16 %v5218_v50  ;;  %v7098_v33 = vld [vmem:[#allocation3 + $0x40] sm:$0xf]  ;;  %v5749_v59 = vrot.slane %v5590_v36, 5  ;;  %8172 = vmatpush.bf16.msrb.mxu3 %v13374_v61 }
 0x326   : > { %v6431_v63 = vshrl.u32 %v6316_v17, 16  ;;  %v6434_v27 = vshll.u32 %v6316_v17, 16  ;;  %v6113_v29 = vmul.f32 %v15650_v15, %v6013_v37  ;;  %7671 = vmatmul.bf16.gmra.mxu2 %v7567_v44  ;;  %v5798_v38 = vunpack.c.l.b16 %v5747_v1  ;;  %8550 = vmatpush.bf16.msrb.mxu0 %v13398_v47  ;;  %v7828_v61 = vld [vmem:[#allocation3] sm:$0xe] }
 0x327   : > { %v5228_v19 = vsel %vm14102_vm12, %v5223_v31, %v5227_v6  ;;  %v6231_v35 = vsel %vm14047_vm3, 0, %v6230_v28  ;;  %v7251_v46 = vshrl.u32 %v7097_v39, 16  ;;  %v5750_v21 = vsel %vm14094_vm11, %v5748_v26, %v5749_v59  ;;  %v15688_v28 = vpop.f32.mrf.mxu2  ;;  %v7099_v31 = vld [vmem:[#allocation3 + $0x44] sm:$0x1] }
 0x328   : > { %v6433_v12 = vrot.slane %v6431_v63, 7  ;;  %v6149_v32 = vadd.f32 %v15660_v42, %v6113_v29  ;;  %v5277_v55 = vunpack.c.l.b16 %v5228_v19  ;;  %6232 = vst [vmem:[#allocation3 + $0x60] sm:$0x1] %v6231_v35  ;;  %v5399_v25 = vpop.f32.mrf.mxu3  ;;  %v7254_v6 = vshll.u32 %v7097_v39, 16  ;;  %v7830_v19 = vld [vmem:[#allocation3 + $0x8] sm:$0x1] }
 0x329   : > { %v7260_v20 = vshll.u32 %v7098_v33, 16  ;;  %v7264_v17 = vshrl.u32 %v7098_v33, 16  ;;  %v5492_v1 = vadd.f32 %v5399_v25, %v15460_v34  ;;  %v5799_v50 = vunpack.c.l.b16 %v5750_v21  ;;  %v6278_v34 = vld [vmem:[#allocation3 + $0x68] sm:$0x1] }
 0x32a   : > { %v6436_v37 = vor.u32 %v6434_v27, %v6433_v12  ;;  %v6438_v13 = vrot.slane %v6433_v12, 4  ;;  %v6181_v36 = vmax.f32 %v6149_v32, 0.0  ;;  %v5293_v44 = vpack.c.b16 %v5277_v55, %v5276_v45 }
 0x32b   : > { %v7253_v63 = vrot.slane %v7251_v46, 4  ;;  %v7256_v29 = vrot.slane %v7254_v6, 5  ;;  %v6014_v33 = vadd.f32 %v15628_v10, %v5492_v1  ;;  %v5815_v45 = vpack.c.b16 %v5799_v50, %v5798_v38  ;;  %v15697_v12 = vld [vmem:[#allocation3 + $0x48] sm:$0xf]  ;;  %v15700_v46 = vpop.f32.mrf.mxu0 }
 0x32c   : > { %v6437_v26 = vsel %vm14118_vm13, %v6429_v14, %v6436_v37  ;;  %v6697_v39 = vsel %vm14047_vm3, %v6438_v13, %v6696_v24  ;;  %v6317_v27 = vpack.c.bf16 %v6181_v36, %v6181_v36  ;;  %v7262_v35 = vrot.slane %v7260_v20, 5  ;;  %v6699_v37 = vld [vmem:[#allocation3 + $0x54] sm:$0xf] }
 0x32d   : > { %6695 = vst [vmem:[#allocation3 + $0x4c] sm:$0xf] %v6437_v26  ;;  %v7257_v59 = vor.u32 %v7256_v29, %v7253_v63  ;;  %v7266_v47 = vrot.slane %v7264_v17, 4  ;;  %v6114_v14 = vmul.f32 %v15650_v15, %v6014_v33  ;;  %5441 = vmatmul.bf16.gmra.mxu3 %v5293_v44  ;;  %v7270_v55 = vshll.u32 %v7099_v31, 16  ;;  %5963 = vmatmul.bf16.gmra.mxu0 %v5815_v45 }
 0x32e   : > { %6698 = vst [vmem:[#allocation3 + $0x50] sm:$0x1] %v6697_v39  ;;  %v6440_v0 = vshrl.u32 %v6317_v27, 16  ;;  %v6443_v32 = vshll.u32 %v6317_v27, 16  ;;  %v6279_v38 = vsel %vm14059_vm4, 0, %v6278_v34  ;;  %v12784_v25 = vrot.slane %v7828_v61, 9 }
 0x32f   : > { %v7258_v10 = vrot.slane %v7257_v59, 4  ;;  %v7267_v24 = vor.u32 %v7266_v47, %v7262_v35  ;;  %v6150_v6 = vadd.f32 %v15660_v42, %v6114_v14  ;;  %v7272_v20 = vrot.slane %v7270_v55, 5  ;;  %6280 = vst [vmem:[#allocation3 + $0x68] sm:$0x1] %v6279_v38  ;;  %v6233_v39 = vld [vmem:[#allocation3 + $0x6c] sm:$0x1] }
 0x330   : > { %v15704_v21 = vrot.slane %v6440_v0, 7  ;;  %v7926_v17 = vrot.slane %v7829_v54, 5  ;;  %v5402_v13 = vpop.f32.mrf.mxu3  ;;  %v7929_v44 = vrot.slane %v7830_v19, 5  ;;  %v7275_v50 = vshrl.u32 %v15697_v12, 16  ;;  %v15720_v0 = vpop.f32.mrf.mxu1 }
 0x331   : > { %v7263_v36 = vsel %vm14102_vm12, %v7258_v10, %v7262_v35  ;;  %v7268_v1 = vrot.slane %v7267_v24, 4  ;;  %v6182_v29 = vmax.f32 %v6150_v6, 0.0  ;;  %v5493_v26 = vadd.f32 %v5402_v13, %v15466_v62  ;;  %v15722_v62 = vpop.f32.mrf.mxu2 }
 0x332   : > { %v6445_v31 = vor.u32 %v6443_v32, %v15704_v21  ;;  %v6446_v63 = vrot.slane %v15704_v21, 4  ;;  %v7541_v27 = vunpack.c.l.b16 %v7263_v36  ;;  %v7927_v33 = vsel %vm14094_vm11, %v12784_v25, %v7926_v17 }
 0x333   : > { %v7273_v54 = vsel %vm14102_vm12, %v7268_v1, %v7272_v20  ;;  %v7928_v34 = vrot.slane %v7926_v17, 4  ;;  %v6318_v19 = vpack.c.bf16 %v6182_v29, %v6182_v29  ;;  %v6015_v45 = vadd.f32 %v15653_v41, %v5493_v26  ;;  %v15729_v6 = vpop.f32.mrf.mxu0  ;;  %v6281_v20 = vld [vmem:[#allocation3 + $0x74] sm:$0x1]  ;;  %v7832_v1 = vld [vmem:[#allocation3 + $0x10] sm:$0xf] }
 0x334   : > { %v6700_v61 = vsel %vm14124_vm14, %v6445_v31, %v6699_v37  ;;  %v7542_v59 = vunpack.c.l.b16 %v7273_v54  ;;  %v13348_v35 = vld [vmem:[#allocation3 + $0x48] sm:$0xff]  ;;  %v8053_v14 = vunpack.c.l.b16 %v7927_v33  ;;  %v6234_v55 = vsel %vm14047_vm3, 0, %v6233_v39  ;;  %v6703_v31 = vld [vmem:[#allocation3 + $0x5c] sm:$0x1] }
 0x335   : > { %v7101_v47 = vld [vmem:[#allocation3 + $0x4c] sm:$0xf]  ;;  %6701 = vst [vmem:[#allocation3 + $0x54] sm:$0xf] %v6700_v61  ;;  %v7930_v32 = vsel %vm14094_vm11, %v7928_v34, %v7929_v44  ;;  %v7102_v10 = vld [vmem:[#allocation3 + $0x50] sm:$0x1]  ;;  %v6115_v41 = vmul.f32 %v15650_v15, %v6015_v45  ;;  %6999 = vmatmul.bf16.gmra.mxu1 %v13348_v35 }
 0x336   : > { %v7277_v24 = vrot.slane %v7275_v50, 4  ;;  %v6448_v38 = vshrl.u32 %v6318_v19, 16  ;;  %v6451_v25 = vshll.u32 %v6318_v19, 16  ;;  %v7568_v21 = vpack.c.b16 %v7542_v59, %v7541_v27  ;;  %6235 = vst [vmem:[#allocation3 + $0x6c] sm:$0x1] %v6234_v55 }
 0x337   : > { %v8054_v17 = vunpack.c.l.b16 %v7930_v32  ;;  %v7278_v37 = vshll.u32 %v15697_v12, 16  ;;  %v7284_v13 = vshll.u32 %v7101_v47, 16  ;;  %v7288_v36 = vshrl.u32 %v7101_v47, 16 }
 0x338   : > { %v6450_v44 = vrot.slane %v6448_v38, 7  ;;  %v6151_v50 = vadd.f32 %v15660_v42, %v6115_v41  ;;  %7676 = vmatmul.bf16.gmra.mxu2 %v7568_v21  ;;  %v7294_v29 = vshll.u32 %v7102_v10, 16  ;;  %v6282_v26 = vsel %vm14059_vm4, 0, %v6281_v20  ;;  %v5404_v39 = vpop.f32.mrf.mxu3  ;;  %v7831_v38 = vld [vmem:[#allocation3 + $0xc] sm:$0xe] }
 0x339   : > { %v8085_v54 = vpack.c.b16 %v8054_v17, %v8053_v14  ;;  %v7280_v27 = vrot.slane %v7278_v37, 5  ;;  %v7286_v33 = vrot.slane %v7284_v13, 5  ;;  %v7290_v34 = vrot.slane %v7288_v36, 4  ;;  %6283 = vst [vmem:[#allocation3 + $0x74] sm:$0x1] %v6282_v26  ;;  %v17485_v37 = vld [vmem:[#allocation23_spill] sm:$0xff] }
 0x33a   : > { %v6453_v61 = vor.u32 %v6451_v25, %v6450_v44  ;;  %v6455_v12 = vrot.slane %v6450_v44, 4  ;;  %v6183_v19 = vmax.f32 %v6151_v50, 0.0  ;;  %v5494_v45 = vadd.f32 %v5404_v39, %v15623_v53  ;;  %v7833_v41 = vld [vmem:[#allocation3 + $0x14] sm:$0x1]  ;;  %v13382_v25 = vld [vmem:[#allocation3 + $0xc] sm:$0xff]  ;;  %v6970_v53 = vpop.f32.mrf.mxu1 }
 0x33b   : > { %v7281_v59 = vor.u32 %v7280_v27, %v7277_v24  ;;  %v7291_v35 = vor.u32 %v7290_v34, %v7286_v33  ;;  %v7933_v47 = vrot.slane %v7832_v1, 5  ;;  %v7296_v17 = vrot.slane %v7294_v29, 5  ;;  %v7652_v24 = vpop.f32.mrf.mxu2  ;;  %v17486_v13 = vld [vmem:[#allocation47_spill] sm:$0xff]  ;;  %v15744_v44 = vpop.f32.mrf.mxu0 }
 0x33c   : > { %v6454_v32 = vsel %vm14118_vm13, %v6446_v63, %v6453_v61  ;;  %v6704_v55 = vsel %vm14047_vm3, %v6455_v12, %v6703_v31  ;;  %v6319_v10 = vpack.c.bf16 %v6183_v19, %v6183_v19  ;;  %v6016_v14 = vadd.f32 %v15678_v51, %v5494_v45  ;;  %v6236_v31 = vld [vmem:[#allocation3 + $0x78] sm:$0x1]  ;;  %v17487_v12 = vld [vmem:[#allocation25_spill] sm:$0xff]  ;;  %v17488_v19 = vld [vmem:[#allocation22_spill] sm:$0xff] }
 0x33d   : > { %6702 = vst [vmem:[#allocation3 + $0x58] sm:$0xf] %v6454_v32  ;;  %v7282_v21 = vrot.slane %v7281_v59, 4  ;;  %v7292_v20 = vrot.slane %v7291_v35, 4  ;;  %v4749_v36 = vadd.f32 %v17486_v13, %v17485_v37  ;;  %8173 = vmatmul.bf16.vlgmr.msrb.gmra.mxu3 %v8085_v54  ;;  %v15746_v51 = vadd.f32 %v7652_v24, %v6970_v53  ;;  %8551 = vmatmul.bf16.vlgmr.msrb.gmra.mxu0 %v13382_v25  ;;  %v6706_v59 = vld [vmem:[#allocation3 + $0x60] sm:$0xf] }
 0x33e   : > { %6705 = vst [vmem:[#allocation3 + $0x5c] sm:$0x1] %v6704_v55  ;;  %v6457_v63 = vshrl.u32 %v6319_v10, 16  ;;  %v6116_v1 = vmul.f32 %v15650_v15, %v6016_v14  ;;  %v12785_v26 = vrot.slane %v7831_v38, 9  ;;  %v7935_v39 = vrot.slane %v7933_v47, 4 }
 0x33f   : > { %v7287_v50 = vsel %vm14102_vm12, %v7282_v21, %v7286_v33  ;;  %v7297_v29 = vsel %vm14102_vm12, %v7292_v20, %v7296_v17  ;;  %v6460_v34 = vshll.u32 %v6319_v10, 16  ;;  %v4371_v45 = vadd.f32 %v17488_v19, %v17487_v12  ;;  %v15768_v37 = vld [vmem:[#allocation3 + $0x1c] sm:$0xf] }
 0x340   : > { %v15752_v27 = vrot.slane %v6457_v63, 7  ;;  %v6152_v61 = vadd.f32 %v15660_v42, %v6116_v1  ;;  %v7544_v54 = vunpack.c.l.b16 %v7297_v29  ;;  %v5407_v35 = vpop.f32.mrf.mxu3  ;;  %v7934_v32 = vsel %vm14094_vm11, %v12785_v26, %v7933_v47  ;;  %v7103_v63 = vld [vmem:[#allocation3 + $0x54] sm:$0xf] }
 0x341   : > { %v7936_v33 = vrot.slane %v7833_v41, 5  ;;  %v6237_v55 = vsel %vm14047_vm3, 0, %v6236_v31  ;;  %v5495_v25 = vadd.f32 %v5407_v35, %v4749_v36  ;;  %v7543_v10 = vunpack.c.l.b16 %v7287_v50  ;;  %v6284_v35 = vld [vmem:[#allocation3 + $0x80] sm:$0x1] }
 0x342   : > { %v6462_v14 = vor.u32 %v6460_v34, %v15752_v27  ;;  %v6184_v38 = vmax.f32 %v6152_v61, 0.0  ;;  %6238 = vst [vmem:[#allocation3 + $0x78] sm:$0x1] %v6237_v55  ;;  %v6463_v21 = vrot.slane %v15752_v27, 4  ;;  %v4750_v13 = vadd.f32 %v15267_v23, %v4371_v45 }
 0x343   : > { %v7937_v20 = vsel %vm14094_vm11, %v7935_v39, %v7936_v33  ;;  %v6017_v47 = vadd.f32 %v15700_v46, %v5495_v25  ;;  %v7569_v41 = vpack.c.b16 %v7544_v54, %v7543_v10  ;;  %v8055_v36 = vunpack.c.l.b16 %v7934_v32  ;;  %v15772_v27 = vpop.f32.mrf.mxu0  ;;  %v13409_v46 = vld [vmem:[#allocation11 + $0x118] sm:$0xff]  ;;  %v6710_v32 = vld [vmem:[#allocation3 + $0x68] sm:$0x1] }
 0x344   : > { %v6707_v17 = vsel %vm14124_vm14, %v6462_v14, %v6706_v59  ;;  %v6320_v53 = vpack.c.bf16 %v6184_v38, %v6184_v38  ;;  %v13349_v24 = vld [vmem:[#allocation3 + $0x54] sm:$0xff]  ;;  %v8056_v29 = vunpack.c.l.b16 %v7937_v20  ;;  %v7299_v39 = vshrl.u32 %v7103_v63, 16  ;;  %9293 = vmatpush.bf16.msrb.mxu1 %v13409_v46  ;;  %v7836_v46 = vld [vmem:[#allocation3 + $0x20] sm:$0x1] }
 0x345   : > { %6708 = vst [vmem:[#allocation3 + $0x60] sm:$0xf] %v6707_v17  ;;  %v7104_v1 = vld [vmem:[#allocation3 + $0x58] sm:$0xf]  ;;  %v6117_v50 = vmul.f32 %v15650_v15, %v6017_v47  ;;  %7004 = vmatmul.bf16.gmra.mxu1 %v13349_v24  ;;  %v7105_v26 = vld [vmem:[#allocation3 + $0x5c] sm:$0x1] }
 0x346   : > { %v6465_v31 = vshrl.u32 %v6320_v53, 16  ;;  %v7302_v34 = vshll.u32 %v7103_v63, 16  ;;  %v7308_v61 = vshll.u32 %v7104_v1, 16  ;;  %v7312_v54 = vshrl.u32 %v7104_v1, 16 }
 0x347   : > { %v7940_v12 = vrot.slane %v15768_v37, 5  ;;  %v6468_v19 = vshll.u32 %v6320_v53, 16  ;;  %v6153_v45 = vadd.f32 %v15660_v42, %v6117_v50  ;;  %v7301_v59 = vrot.slane %v7299_v39, 4  ;;  %v13383_v39 = vld [vmem:[#allocation3 + $0x18] sm:$0xff] }
 0x348   : > { %v6467_v23 = vrot.slane %v6465_v31, 7  ;;  %7681 = vmatmul.bf16.gmra.mxu2 %v7569_v41  ;;  %v5409_v33 = vpop.f32.mrf.mxu3  ;;  %v7304_v55 = vrot.slane %v7302_v34, 5  ;;  %v7310_v14 = vrot.slane %v7308_v61, 5  ;;  %v7314_v38 = vrot.slane %v7312_v54, 4  ;;  %v7834_v41 = vld [vmem:[#allocation3 + $0x18] sm:$0xe] }
 0x349   : > { %v7318_v25 = vshll.u32 %v7105_v26, 16  ;;  %v6185_v17 = vmax.f32 %v6153_v45, 0.0  ;;  %v5496_v47 = vadd.f32 %v5409_v33, %v4750_v13  ;;  %v8086_v24 = vpack.c.b16 %v8056_v29, %v8055_v36  ;;  %v17489_v61 = vld [vmem:[#allocation34_spill] sm:$0xff] }
 0x34a   : > { %v6470_v10 = vor.u32 %v6468_v19, %v6467_v23  ;;  %v6472_v20 = vrot.slane %v6467_v23, 4  ;;  %v7305_v37 = vor.u32 %v7304_v55, %v7301_v59  ;;  %v7315_v63 = vor.u32 %v7314_v38, %v7310_v14 }
 0x34b   : > { %v6285_v53 = vsel %vm14059_vm4, 0, %v6284_v35  ;;  %v6321_v50 = vpack.c.bf16 %v6185_v17, %v6185_v17  ;;  %v6018_v26 = vadd.f32 %v15729_v6, %v5496_v47  ;;  %v7320_v29 = vrot.slane %v7318_v25, 5  ;;  %v15786_v19 = vpop.f32.mrf.mxu0  ;;  %v6239_v6 = vld [vmem:[#allocation3 + $0x84] sm:$0x1]  ;;  %v6713_v47 = vld [vmem:[#allocation3 + $0x6c] sm:$0xf] }
 0x34c   : > { %v6471_v1 = vsel %vm14118_vm13, %v6463_v21, %v6470_v10  ;;  %v6711_v31 = vsel %vm14047_vm3, %v6472_v20, %v6710_v32  ;;  %6286 = vst [vmem:[#allocation3 + $0x80] sm:$0x1] %v6285_v53  ;;  %v7306_v13 = vrot.slane %v7305_v37, 4  ;;  %v7316_v36 = vrot.slane %v7315_v63, 4  ;;  %v17490_v10 = vld [vmem:[#allocation35_spill] sm:$0xff]  ;;  %v17491_v20 = vld [vmem:[#allocation33_spill] sm:$0xff] }
 0x34d   : > { %6709 = vst [vmem:[#allocation3 + $0x64] sm:$0xf] %v6471_v1  ;;  %v7942_v34 = vrot.slane %v7940_v12, 4  ;;  %v4751_v54 = vadd.f32 %v15284_v16, %v17489_v61  ;;  %v6474_v23 = vshrl.u32 %v6321_v50, 16  ;;  %v6118_v21 = vmul.f32 %v15650_v15, %v6018_v26  ;;  %8178 = vmatmul.bf16.gmra.mxu3 %v8086_v24  ;;  %8556 = vmatmul.bf16.gmra.mxu0 %v13383_v39 }
 0x34e   : > { %6712 = vst [vmem:[#allocation3 + $0x68] sm:$0x1] %v6711_v31  ;;  %v12786_v45 = vrot.slane %v7834_v41, 9  ;;  %v7311_v59 = vsel %vm14102_vm12, %v7306_v13, %v7310_v14  ;;  %v7321_v35 = vsel %vm14102_vm12, %v7316_v36, %v7320_v29  ;;  %v7943_v32 = vrot.slane %v7836_v46, 5  ;;  %v15804_v31 = vld [vmem:[#allocation3 + $0x28] sm:$0xf] }
 0x34f   : > { %v6240_v16 = vsel %vm14047_vm3, 0, %v6239_v6  ;;  %v15794_v33 = vrot.slane %v6474_v23, 7  ;;  %v6477_v55 = vshll.u32 %v6321_v50, 16  ;;  %v6154_v38 = vadd.f32 %v15660_v42, %v6118_v21 }
 0x350   : > { %v7546_v25 = vunpack.c.l.b16 %v7321_v35  ;;  %6241 = vst [vmem:[#allocation3 + $0x84] sm:$0x1] %v6240_v16  ;;  %v4373_v17 = vadd.f32 %v17491_v20, %v17490_v10  ;;  %v5412_v24 = vpop.f32.mrf.mxu3  ;;  %v7941_v14 = vsel %vm14094_vm11, %v12786_v45, %v7940_v12  ;;  %v7944_v37 = vsel %vm14094_vm11, %v7942_v34, %v7943_v32  ;;  %v7106_v34 = vld [vmem:[#allocation3 + $0x60] sm:$0xf]  ;;  %v6287_v20 = vld [vmem:[#allocation3 + $0x8c] sm:$0x1] }
 0x351   : > { %v6479_v63 = vor.u32 %v6477_v55, %v15794_v33  ;;  %v6186_v53 = vmax.f32 %v6154_v38, 0.0  ;;  %v5497_v41 = vadd.f32 %v5412_v24, %v4751_v54  ;;  %v7545_v1 = vunpack.c.l.b16 %v7311_v59  ;;  %v13421_v59 = vld [vmem:[#allocation11 + $0x178] sm:$0xff] }
 0x352   : > { %v4752_v12 = vadd.f32 %v15308_v9, %v4373_v17  ;;  %v8057_v36 = vunpack.c.l.b16 %v7941_v14  ;;  %v8058_v29 = vunpack.c.l.b16 %v7944_v37  ;;  %v7323_v45 = vshrl.u32 %v7106_v34, 16  ;;  %v6717_v17 = vld [vmem:[#allocation3 + $0x74] sm:$0x1]  ;;  %9811 = vmatpush.bf16.msrb.mxu2 %v13421_v59 }
 0x353   : > { %v6714_v50 = vsel %vm14124_vm14, %v6479_v63, %v6713_v47  ;;  %v6322_v26 = vpack.c.bf16 %v6186_v53, %v6186_v53  ;;  %v6019_v39 = vadd.f32 %v15744_v44, %v5497_v41  ;;  %v7570_v46 = vpack.c.b16 %v7546_v25, %v7545_v1  ;;  %v15811_v6 = vpop.f32.mrf.mxu0 }
 0x354   : > { %v13350_v13 = vld [vmem:[#allocation3 + $0x60] sm:$0xff]  ;;  %6715 = vst [vmem:[#allocation3 + $0x6c] sm:$0xf] %v6714_v50  ;;  %v7947_v44 = vrot.slane %v15804_v31, 5  ;;  %v6480_v35 = vrot.slane %v15794_v33, 4  ;;  %v7326_v32 = vshll.u32 %v7106_v34, 16  ;;  %v15816_v50 = vpop.f32.mrf.mxu1 }
 0x355   : > { %v7107_v61 = vld [vmem:[#allocation3 + $0x64] sm:$0xf]  ;;  %v6482_v23 = vshrl.u32 %v6322_v26, 16  ;;  %v6119_v54 = vmul.f32 %v15650_v15, %v6019_v39  ;;  %7009 = vmatmul.bf16.gmra.mxu1 %v13350_v13  ;;  %v7108_v21 = vld [vmem:[#allocation3 + $0x68] sm:$0x1]  ;;  %v6485_v38 = vshll.u32 %v6322_v26, 16  ;;  %v8087_v39 = vpack.c.b16 %v8058_v29, %v8057_v36 }
 0x356   : > { %v7332_v9 = vshll.u32 %v7107_v61, 16  ;;  %v7336_v16 = vshrl.u32 %v7107_v61, 16  ;;  %v7325_v10 = vrot.slane %v7323_v45, 4  ;;  %v7328_v24 = vrot.slane %v7326_v32, 5  ;;  %v7837_v34 = vld [vmem:[#allocation3 + $0x24] sm:$0xe] }
 0x357   : > { %v6484_v55 = vrot.slane %v6482_v23, 7  ;;  %v6155_v25 = vadd.f32 %v15660_v42, %v6119_v54  ;;  %v7342_v63 = vshll.u32 %v7108_v21, 16  ;;  %v13384_v45 = vld [vmem:[#allocation3 + $0x24] sm:$0xff]  ;;  %v7949_v32 = vrot.slane %v7947_v44, 4 }
 0x358   : > { %7686 = vmatmul.bf16.gmra.mxu2 %v7570_v46  ;;  %v5414_v47 = vpop.f32.mrf.mxu3  ;;  %v7334_v14 = vrot.slane %v7332_v9, 5  ;;  %v7338_v37 = vrot.slane %v7336_v16, 4  ;;  %v7329_v26 = vor.u32 %v7328_v24, %v7325_v10  ;;  %v6288_v46 = vsel %vm14059_vm4, 0, %v6287_v20  ;;  %v17492_v9 = vld [vmem:[#allocation37_spill] sm:$0xff] }
 0x359   : > { %v6487_v53 = vor.u32 %v6485_v38, %v6484_v55  ;;  %v6489_v41 = vrot.slane %v6484_v55, 4  ;;  %v6187_v33 = vmax.f32 %v6155_v25, 0.0  ;;  %v5498_v1 = vadd.f32 %v5414_v47, %v4752_v12  ;;  %6289 = vst [vmem:[#allocation3 + $0x8c] sm:$0x1] %v6288_v46  ;;  %v7839_v12 = vld [vmem:[#allocation3 + $0x2c] sm:$0x1] }
 0x35a   : > { %v7339_v13 = vor.u32 %v7338_v37, %v7334_v14  ;;  %v7330_v36 = vrot.slane %v7329_v26, 4  ;;  %v7344_v59 = vrot.slane %v7342_v63, 5  ;;  %v4753_v16 = vadd.f32 %v15341_v58, %v17492_v9  ;;  %v6242_v25 = vld [vmem:[#allocation3 + $0x90] sm:$0x1] }
 0x35b   : > { %v6488_v61 = vsel %vm14118_vm13, %v6480_v35, %v6487_v53  ;;  %v6718_v23 = vsel %vm14047_vm3, %v6489_v41, %v6717_v17  ;;  %v6323_v54 = vpack.c.bf16 %v6187_v33, %v6187_v33  ;;  %v6020_v21 = vadd.f32 %v15772_v27, %v5498_v1  ;;  %v15830_v38 = vpop.f32.mrf.mxu0  ;;  %v15841_v53 = vld [vmem:[#allocation3 + $0x30] sm:$0xe]  ;;  %v17494_v33 = vld [vmem:[#allocation36_spill] sm:$0xff] }
 0x35c   : > { %6716 = vst [vmem:[#allocation3 + $0x70] sm:$0xf] %v6488_v61  ;;  %v7340_v29 = vrot.slane %v7339_v13, 4  ;;  %v12787_v27 = vrot.slane %v7837_v34, 9  ;;  %v7335_v10 = vsel %vm14102_vm12, %v7330_v36, %v7334_v14  ;;  %v7950_v17 = vrot.slane %v7839_v12, 5  ;;  %v17493_v41 = vld [vmem:[#allocation38_spill] sm:$0xff] }
 0x35d   : > { %6719 = vst [vmem:[#allocation3 + $0x74] sm:$0x1] %v6718_v23  ;;  %v6491_v35 = vshrl.u32 %v6323_v54, 16  ;;  %v6120_v55 = vmul.f32 %v15650_v15, %v6020_v21  ;;  %8183 = vmatmul.bf16.gmra.mxu3 %v8087_v39  ;;  %8561 = vmatmul.bf16.gmra.mxu0 %v13384_v45  ;;  %v6243_v58 = vsel %vm14047_vm3, 0, %v6242_v25  ;;  %v6494_v24 = vshll.u32 %v6323_v54, 16 }
 0x35e   : > { %v7345_v20 = vsel %vm14102_vm12, %v7340_v29, %v7344_v59  ;;  %6244 = vst [vmem:[#allocation3 + $0x90] sm:$0x1] %v6243_v58  ;;  %v4375_v1 = vadd.f32 %v17494_v33, %v17493_v41  ;;  %v6720_v14 = vld [vmem:[#allocation3 + $0x78] sm:$0xf]  ;;  %v7948_v26 = vsel %vm14094_vm11, %v12787_v27, %v7947_v44  ;;  %v7951_v13 = vsel %vm14094_vm11, %v7949_v32, %v7950_v17  ;;  %v15854_v21 = vld [vmem:[#allocation3 + $0x34] sm:$0xf] }
 0x35f   : > { %v15838_v47 = vrot.slane %v6491_v35, 7  ;;  %v6156_v37 = vadd.f32 %v15660_v42, %v6120_v55  ;;  %v7548_v63 = vunpack.c.l.b16 %v7345_v20  ;;  %v7547_v23 = vunpack.c.l.b16 %v7335_v10  ;;  %v13408_v17 = vld [vmem:[#allocation11 + $0x110] sm:$0xff] }
 0x360   : > { %v5417_v39 = vpop.f32.mrf.mxu3  ;;  %v12788_v45 = vrot.slane %v15841_v53, 9  ;;  %v4754_v59 = vadd.f32 %v15390_v30, %v4375_v1  ;;  %v8059_v32 = vunpack.c.l.b16 %v7948_v26  ;;  %v8060_v9 = vunpack.c.l.b16 %v7951_v13  ;;  %9294 = vmatpush.bf16.msrb.mxu1 %v13408_v17 }
 0x361   : > { %v6496_v46 = vor.u32 %v6494_v24, %v15838_v47  ;;  %v6188_v34 = vmax.f32 %v6156_v37, 0.0  ;;  %v5499_v61 = vadd.f32 %v5417_v39, %v4753_v16  ;;  %v15852_v54 = vpop.f32.mrf.mxu1  ;;  %v7571_v36 = vpack.c.b16 %v7548_v63, %v7547_v23  ;;  %v7109_v16 = vld [vmem:[#allocation3 + $0x6c] sm:$0xf]  ;;  %v6724_v39 = vld [vmem:[#allocation3 + $0x80] sm:$0x1] }
 0x362   : > { %v7347_v10 = vshrl.u32 %v7109_v16, 16  ;;  %v6497_v58 = vrot.slane %v15838_v47, 4  ;;  %v7350_v24 = vshll.u32 %v7109_v16, 16  ;;  %v8088_v16 = vpack.c.b16 %v8060_v9, %v8059_v32 }
 0x363   : > { %v6721_v31 = vsel %vm14124_vm14, %v6496_v46, %v6720_v14  ;;  %v6324_v12 = vpack.c.bf16 %v6188_v34, %v6188_v34  ;;  %v6021_v44 = vadd.f32 %v15786_v19, %v5499_v61  ;;  %v13351_v29 = vld [vmem:[#allocation3 + $0x6c] sm:$0xff]  ;;  %v15862_v20 = vpop.f32.mrf.mxu0  ;;  %v7954_v19 = vrot.slane %v15854_v21, 5  ;;  %v6290_v14 = vld [vmem:[#allocation3 + $0x98] sm:$0x1] }
 0x364   : > { %6722 = vst [vmem:[#allocation3 + $0x78] sm:$0xf] %v6721_v31  ;;  %v7110_v35 = vld [vmem:[#allocation3 + $0x70] sm:$0xf]  ;;  %v7111_v25 = vld [vmem:[#allocation3 + $0x74] sm:$0x1] }
 0x365   : > { %v6499_v55 = vshrl.u32 %v6324_v12, 16  ;;  %v6121_v27 = vmul.f32 %v15650_v15, %v6021_v44  ;;  %7014 = vmatmul.bf16.gmra.mxu1 %v13351_v29  ;;  %v7356_v30 = vshll.u32 %v7110_v35, 16  ;;  %v7360_v37 = vshrl.u32 %v7110_v35, 16 }
 0x366   : > { %v6502_v41 = vshll.u32 %v6324_v12, 16  ;;  %v7349_v1 = vrot.slane %v7347_v10, 4  ;;  %v7352_v13 = vrot.slane %v7350_v24, 5  ;;  %v7366_v61 = vshll.u32 %v7111_v25, 16  ;;  %v13385_v24 = vld [vmem:[#allocation3 + $0x30] sm:$0xff] }
 0x367   : > { %v6501_v63 = vrot.slane %v6499_v55, 7  ;;  %v6157_v33 = vadd.f32 %v15660_v42, %v6121_v27  ;;  %v7358_v46 = vrot.slane %v7356_v30, 5  ;;  %v7362_v34 = vrot.slane %v7360_v37, 4  ;;  %v7842_v55 = vld [vmem:[#allocation3 + $0x38] sm:$0x1] }
 0x368   : > { %7691 = vmatmul.bf16.gmra.mxu2 %v7571_v36  ;;  %v5419_v26 = vpop.f32.mrf.mxu3  ;;  %v7353_v12 = vor.u32 %v7352_v13, %v7349_v1  ;;  %v6291_v36 = vsel %vm14059_vm4, 0, %v6290_v14  ;;  %v7368_v30 = vrot.slane %v7366_v61, 5  ;;  %v7956_v37 = vrot.slane %v7954_v19, 4  ;;  %v6245_v1 = vld [vmem:[#allocation3 + $0x9c] sm:$0x1] }
 0x369   : > { %v6504_v23 = vor.u32 %v6502_v41, %v6501_v63  ;;  %v6506_v31 = vrot.slane %v6501_v63, 4  ;;  %v6189_v47 = vmax.f32 %v6157_v33, 0.0  ;;  %v5500_v44 = vadd.f32 %v5419_v26, %v4754_v59  ;;  %v15867_v29 = vpop.f32.mrf.mxu1  ;;  %6292 = vst [vmem:[#allocation3 + $0x98] sm:$0x1] %v6291_v36  ;;  %v15876_v59 = vld [vmem:[#allocation3 + $0x40] sm:$0xf] }
 0x36a   : > { %v7363_v35 = vor.u32 %v7362_v34, %v7358_v46  ;;  %v7354_v32 = vrot.slane %v7353_v12, 4  ;;  %v17495_v63 = vld [vmem:[#allocation40_spill] sm:$0xff]  ;;  %v6246_v26 = vsel %vm14047_vm3, 0, %v6245_v1  ;;  %v15892_v34 = vpop.f32.mrf.mxu2  ;;  %v17497_v12 = vld [vmem:[#allocation39_spill] sm:$0xff]  ;;  %v6727_v36 = vld [vmem:[#allocation3 + $0x84] sm:$0xf] }
 0x36b   : > { %v6505_v27 = vsel %vm14118_vm13, %v6497_v58, %v6504_v23  ;;  %v6725_v10 = vsel %vm14047_vm3, %v6506_v31, %v6724_v39  ;;  %v6325_v25 = vpack.c.bf16 %v6189_v47, %v6189_v47  ;;  %v6022_v17 = vadd.f32 %v15811_v6, %v5500_v44  ;;  %v15889_v13 = vld [vmem:[#allocation3 + $0x3c] sm:$0xe]  ;;  %v15897_v44 = vpop.f32.mrf.mxu0  ;;  %6247 = vst [vmem:[#allocation3 + $0x9c] sm:$0x1] %v6246_v26  ;;  %v7112_v1 = vld [vmem:[#allocation3 + $0x78] sm:$0xf] }
 0x36c   : > { %6723 = vst [vmem:[#allocation3 + $0x7c] sm:$0xf] %v6505_v27  ;;  %v7364_v9 = vrot.slane %v7363_v35, 4  ;;  %v4755_v58 = vadd.f32 %v15423_v40, %v17495_v63  ;;  %v7957_v6 = vrot.slane %v7842_v55, 5  ;;  %v7359_v14 = vsel %vm14102_vm12, %v7354_v32, %v7358_v46  ;;  %v15899_v46 = vld [vmem:[#allocation3 + $0x44] sm:$0x1] }
 0x36d   : > { %6726 = vst [vmem:[#allocation3 + $0x80] sm:$0x1] %v6725_v10  ;;  %v6508_v41 = vshrl.u32 %v6325_v25, 16  ;;  %v6122_v33 = vmul.f32 %v15650_v15, %v6022_v17  ;;  %8188 = vmatmul.bf16.gmra.mxu3 %v8088_v16  ;;  %8566 = vmatmul.bf16.gmra.mxu0 %v13385_v24  ;;  %v7961_v40 = vrot.slane %v15876_v59, 5  ;;  %v6511_v23 = vshll.u32 %v6325_v25, 16  ;;  %v17496_v16 = vld [vmem:[#allocation41_spill] sm:$0xff] }
 0x36e   : > { %v7369_v39 = vsel %vm14102_vm12, %v7364_v9, %v7368_v30  ;;  %v4377_v35 = vadd.f32 %v17497_v12, %v17496_v16  ;;  %v7955_v27 = vsel %vm14094_vm11, %v12788_v45, %v7954_v19  ;;  %v7958_v10 = vsel %vm14094_vm11, %v7956_v37, %v7957_v6  ;;  %v13420_v12 = vld [vmem:[#allocation11 + $0x170] sm:$0xff] }
 0x36f   : > { %v15894_v61 = vrot.slane %v6508_v41, 7  ;;  %v6158_v31 = vadd.f32 %v15660_v42, %v6122_v33  ;;  %v7550_v47 = vunpack.c.l.b16 %v7369_v39  ;;  %v7549_v32 = vunpack.c.l.b16 %v7359_v14  ;;  %9812 = vmatpush.bf16.msrb.mxu2 %v13420_v12 }
 0x370   : > { %v5422_v55 = vpop.f32.mrf.mxu3  ;;  %v12789_v30 = vrot.slane %v15889_v13, 9  ;;  %v15917_v21 = vrot.slane %v7961_v40, 4  ;;  %v7964_v53 = vrot.slane %v15899_v46, 5  ;;  %v8061_v33 = vunpack.c.l.b16 %v7955_v27 }
 0x371   : > { %v6513_v25 = vor.u32 %v6511_v23, %v15894_v61  ;;  %v6190_v17 = vmax.f32 %v6158_v31, 0.0  ;;  %v5501_v24 = vadd.f32 %v5422_v55, %v4755_v58  ;;  %v15912_v9 = vpop.f32.mrf.mxu1  ;;  %v7572_v63 = vpack.c.b16 %v7550_v47, %v7549_v32 }
 0x372   : > { %v4756_v58 = vadd.f32 %v15476_v49, %v4377_v35  ;;  %v8062_v6 = vunpack.c.l.b16 %v7958_v10  ;;  %v6514_v39 = vrot.slane %v15894_v61, 4  ;;  %v7371_v16 = vshrl.u32 %v7112_v1, 16  ;;  %v6731_v61 = vld [vmem:[#allocation3 + $0x8c] sm:$0x1] }
 0x373   : > { %v6728_v45 = vsel %vm14124_vm14, %v6513_v25, %v6727_v36  ;;  %v6326_v19 = vpack.c.bf16 %v6190_v17, %v6190_v17  ;;  %v6023_v37 = vadd.f32 %v15830_v38, %v5501_v24  ;;  %v13352_v41 = vld [vmem:[#allocation3 + $0x78] sm:$0xff]  ;;  %v7374_v38 = vshll.u32 %v7112_v1, 16  ;;  %v6293_v17 = vld [vmem:[#allocation3 + $0xa4] sm:$0x1] }
 0x374   : > { %6729 = vst [vmem:[#allocation3 + $0x84] sm:$0xf] %v6728_v45  ;;  %v7113_v14 = vld [vmem:[#allocation3 + $0x7c] sm:$0xf]  ;;  %v7114_v31 = vld [vmem:[#allocation3 + $0x80] sm:$0x1] }
 0x375   : > { %v6516_v26 = vshrl.u32 %v6326_v19, 16  ;;  %v6123_v23 = vmul.f32 %v15650_v15, %v6023_v37  ;;  %7019 = vmatmul.bf16.gmra.mxu1 %v13352_v41  ;;  %v6519_v36 = vshll.u32 %v6326_v19, 16  ;;  %v7380_v47 = vshll.u32 %v7113_v14, 16 }
 0x376   : > { %v7384_v55 = vshrl.u32 %v7113_v14, 16  ;;  %v7657_v35 = vpop.f32.mrf.mxu2  ;;  %v7373_v27 = vrot.slane %v7371_v16, 4  ;;  %v7390_v10 = vshll.u32 %v7114_v31, 16  ;;  %v7376_v32 = vrot.slane %v7374_v38, 5 }
 0x377   : > { %v6518_v25 = vrot.slane %v6516_v26, 7  ;;  %v6159_v49 = vadd.f32 %v15660_v42, %v6123_v23  ;;  %v15928_v24 = vadd.f32 %v7657_v35, %v15852_v54  ;;  %v7382_v45 = vrot.slane %v7380_v47, 5  ;;  %v15930_v26 = vpop.f32.mrf.mxu0  ;;  %v17498_v47 = vld [vmem:[#allocation42_spill] sm:$0xff] }
 0x378   : > { %7696 = vmatmul.bf16.gmra.mxu2 %v7572_v63  ;;  %v5424_v15 = vpop.f32.mrf.mxu3  ;;  %v7386_v37 = vrot.slane %v7384_v55, 4  ;;  %v8089_v63 = vpack.c.b16 %v8062_v6, %v8061_v33  ;;  %v7377_v23 = vor.u32 %v7376_v32, %v7373_v27  ;;  %v6294_v54 = vsel %vm14059_vm4, 0, %v6293_v17  ;;  %v13386_v6 = vld [vmem:[#allocation3 + $0x3c] sm:$0xff]  ;;  %v15977_v32 = vld [vmem:[#allocation3 + $0x48] sm:$0xe] }
 0x379   : > { %v6521_v19 = vor.u32 %v6519_v36, %v6518_v25  ;;  %v6523_v41 = vrot.slane %v6518_v25, 4  ;;  %v6191_v1 = vmax.f32 %v6159_v49, 0.0  ;;  %v5502_v14 = vadd.f32 %v5424_v15, %v4756_v58  ;;  %v15932_v42 = vpop.f32.mrf.mxu1  ;;  %6295 = vst [vmem:[#allocation3 + $0xa4] sm:$0x1] %v6294_v54  ;;  %v15941_v58 = vld [vmem:[#allocation3 + $0x4c] sm:$0xf] }
 0x37a   : > { %v7387_v31 = vor.u32 %v7386_v37, %v7382_v45  ;;  %v4757_v33 = vadd.f32 %v15506_v52, %v17498_v47  ;;  %v7378_v55 = vrot.slane %v7377_v23, 4  ;;  %v7392_v49 = vrot.slane %v7390_v10, 5  ;;  %v6248_v10 = vld [vmem:[#allocation3 + $0xa8] sm:$0x1]  ;;  %v17500_v37 = vld [vmem:[#allocation24_spill] sm:$0xff] }
 0x37b   : > { %v6522_v16 = vsel %vm14118_vm13, %v6514_v39, %v6521_v19  ;;  %v6732_v12 = vsel %vm14047_vm3, %v6523_v41, %v6731_v61  ;;  %v6327_v36 = vpack.c.bf16 %v6191_v1, %v6191_v1  ;;  %v6024_v38 = vadd.f32 %v15862_v20, %v5502_v14  ;;  %v15948_v39 = vld [vmem:[%s17396_s4] ss:$0 sm:$0xff]  ;;  %v6734_v41 = vld [vmem:[#allocation3 + $0x90] sm:$0xf] }
 0x37c   : > { %6730 = vst [vmem:[#allocation3 + $0x88] sm:$0xf] %v6522_v16  ;;  %v7388_v25 = vrot.slane %v7387_v31, 4  ;;  %v7962_v52 = vsel %vm14094_vm11, %v12789_v30, %v7961_v40  ;;  %v7965_v27 = vsel %vm14094_vm11, %v15917_v21, %v7964_v53  ;;  %v7383_v17 = vsel %vm14102_vm12, %v7378_v55, %v7382_v45  ;;  %v15974_v30 = vld [vmem:[%s17397_s5] ss:$0 sm:$0xff]  ;;  %v17499_v45 = vld [vmem:[#allocation43_spill] sm:$0xff] }
 0x37d   : > { %6733 = vst [vmem:[#allocation3 + $0x8c] sm:$0x1] %v6732_v12  ;;  %v6525_v35 = vshrl.u32 %v6327_v36, 16  ;;  %v6124_v20 = vmul.f32 %v15948_v39, %v6024_v38  ;;  %8193 = vmatmul.bf16.gmra.mxu3 %v8089_v63  ;;  %8571 = vmatmul.bf16.gmra.mxu0 %v13386_v6  ;;  %v6249_v59 = vsel %vm14047_vm3, 0, %v6248_v10  ;;  %v7968_v13 = vrot.slane %v15941_v58, 5 }
 0x37e   : > { %v7393_v61 = vsel %vm14102_vm12, %v7388_v25, %v7392_v49  ;;  %v6528_v46 = vshll.u32 %v6327_v36, 16  ;;  %v7659_v53 = vpop.f32.mrf.mxu2  ;;  %6250 = vst [vmem:[#allocation3 + $0xa8] sm:$0x1] %v6249_v59  ;;  %v4379_v19 = vadd.f32 %v17500_v37, %v17499_v45  ;;  %v8064_v63 = vunpack.c.l.b16 %v7965_v27  ;;  %v7848_v37 = vld [vmem:[#allocation3 + $0x50] sm:$0x1] }
 0x37f   : > { %v15969_v40 = vrot.slane %v6525_v35, 7  ;;  %v6160_v21 = vadd.f32 %v15974_v30, %v6124_v20  ;;  %v7552_v15 = vunpack.c.l.b16 %v7393_v61  ;;  %v15982_v1 = vadd.f32 %v7659_v53, %v15867_v29 }
 0x380   : > { %v5427_v14 = vpop.f32.mrf.mxu3  ;;  %v7551_v16 = vunpack.c.l.b16 %v7383_v17  ;;  %v8063_v36 = vunpack.c.l.b16 %v7962_v52  ;;  %v12790_v38 = vrot.slane %v15977_v32, 9  ;;  %v15990_v47 = vrot.slane %v7968_v13, 4  ;;  %v7115_v52 = vld [vmem:[#allocation3 + $0x84] sm:$0xf] }
 0x381   : > { %v6530_v23 = vor.u32 %v6528_v46, %v15969_v40  ;;  %v6192_v31 = vmax.f32 %v6160_v21, 0.0  ;;  %v5503_v54 = vadd.f32 %v5427_v14, %v4757_v33  ;;  %v15995_v35 = vpop.f32.mrf.mxu0  ;;  %v4758_v33 = vadd.f32 %v15528_v5, %v4379_v19  ;;  %v13407_v21 = vld [vmem:[#allocation11 + $0x108] sm:$0xff] }
 0x382   : > { %v15985_v12 = vpop.f32.mrf.mxu1  ;;  %v7573_v25 = vpack.c.b16 %v7552_v15, %v7551_v16  ;;  %v8090_v20 = vpack.c.b16 %v8064_v63, %v8063_v36  ;;  %v6531_v10 = vrot.slane %v15969_v40, 4  ;;  %v7395_v46 = vshrl.u32 %v7115_v52, 16  ;;  %9295 = vmatpush.bf16.msrb.mxu1 %v13407_v21  ;;  %v6296_v40 = vld [vmem:[#allocation3 + $0xb0] sm:$0x1] }
 0x383   : > { %v6735_v29 = vsel %vm14124_vm14, %v6530_v23, %v6734_v41  ;;  %v6328_v6 = vpack.c.bf16 %v6192_v31, %v6192_v31  ;;  %v6025_v55 = vadd.f32 %v15897_v44, %v5503_v54  ;;  %v13353_v49 = vld [vmem:[#allocation3 + $0x84] sm:$0xff]  ;;  %v7398_v53 = vshll.u32 %v7115_v52, 16  ;;  %v6738_v23 = vld [vmem:[#allocation3 + $0x98] sm:$0x1] }
 0x384   : > { %6736 = vst [vmem:[#allocation3 + $0x90] sm:$0xf] %v6735_v29  ;;  %v7116_v27 = vld [vmem:[#allocation3 + $0x88] sm:$0xf]  ;;  %v7117_v59 = vld [vmem:[#allocation3 + $0x8c] sm:$0x1] }
 0x385   : > { %v6533_v17 = vshrl.u32 %v6328_v6, 16  ;;  %v6125_v61 = vmul.f32 %v15948_v39, %v6025_v55  ;;  %7024 = vmatmul.bf16.gmra.mxu1 %v13353_v49  ;;  %v6536_v44 = vshll.u32 %v6328_v6, 16  ;;  %v7404_v15 = vshll.u32 %v7116_v27, 16 }
 0x386   : > { %v7408_v45 = vshrl.u32 %v7116_v27, 16  ;;  %v7397_v14 = vrot.slane %v7395_v46, 4  ;;  %v7414_v63 = vshll.u32 %v7117_v59, 16  ;;  %v7400_v16 = vrot.slane %v7398_v53, 5  ;;  %v16013_v53 = vld [vmem:[#allocation3 + $0x58] sm:$0xf] }
 0x387   : > { %v6535_v41 = vrot.slane %v6533_v17, 7  ;;  %v6161_v5 = vadd.f32 %v15974_v30, %v6125_v61  ;;  %v7662_v19 = vpop.f32.mrf.mxu2  ;;  %v7406_v36 = vrot.slane %v7404_v15, 5  ;;  %v6297_v61 = vsel %vm14059_vm4, 0, %v6296_v40  ;;  %v6251_v40 = vld [vmem:[#allocation3 + $0xb4] sm:$0x1] }
 0x388   : > { %7701 = vmatmul.bf16.gmra.mxu2 %v7573_v25  ;;  %v16002_v31 = vadd.f32 %v7662_v19, %v15912_v9  ;;  %v5429_v54 = vpop.f32.mrf.mxu3  ;;  %v7410_v29 = vrot.slane %v7408_v45, 4  ;;  %v7401_v25 = vor.u32 %v7400_v16, %v7397_v14  ;;  %v7971_v59 = vrot.slane %v7848_v37, 5  ;;  %6298 = vst [vmem:[#allocation3 + $0xb0] sm:$0x1] %v6297_v61  ;;  %v13387_v45 = vld [vmem:[#allocation3 + $0x48] sm:$0xff] }
 0x389   : > { %v6538_v6 = vor.u32 %v6536_v44, %v6535_v41  ;;  %v6540_v55 = vrot.slane %v6535_v41, 4  ;;  %v6193_v49 = vmax.f32 %v6161_v5, 0.0  ;;  %v5504_v52 = vadd.f32 %v5429_v54, %v4758_v33  ;;  %v17501_v33 = vld [vmem:[#allocation45_spill] sm:$0xff]  ;;  %v16018_v14 = vpop.f32.mrf.mxu0  ;;  %v16039_v16 = vld [vmem:[#allocation3 + $0x54] sm:$0xe] }
 0x38a   : > { %v16004_v27 = vpop.f32.mrf.mxu1  ;;  %v7411_v17 = vor.u32 %v7410_v29, %v7406_v36  ;;  %v4759_v15 = vadd.f32 %v15564_v56, %v17501_v33  ;;  %v7402_v41 = vrot.slane %v7401_v25, 4  ;;  %v7416_v37 = vrot.slane %v7414_v63, 5  ;;  %v17502_v29 = vld [vmem:[#allocation46_spill] sm:$0xff] }
 0x38b   : > { %v6539_v9 = vsel %vm14118_vm13, %v6531_v10, %v6538_v6  ;;  %v6739_v46 = vsel %vm14047_vm3, %v6540_v55, %v6738_v23  ;;  %v6329_v21 = vpack.c.bf16 %v6193_v49, %v6193_v49  ;;  %v6026_v44 = vadd.f32 %v15930_v26, %v5504_v52  ;;  %v6741_v55 = vld [vmem:[#allocation3 + $0x9c] sm:$0xf] }
 0x38c   : > { %6737 = vst [vmem:[#allocation3 + $0x94] sm:$0xf] %v6539_v9  ;;  %v7412_v5 = vrot.slane %v7411_v17, 4  ;;  %v7969_v26 = vsel %vm14094_vm11, %v12790_v38, %v7968_v13  ;;  %v7972_v56 = vsel %vm14094_vm11, %v15990_v47, %v7971_v59  ;;  %v7407_v63 = vsel %vm14102_vm12, %v7402_v41, %v7406_v36  ;;  %v17503_v36 = vld [vmem:[#allocation44_spill] sm:$0xff] }
 0x38d   : > { %6740 = vst [vmem:[#allocation3 + $0x98] sm:$0x1] %v6739_v46  ;;  %v6542_v19 = vshrl.u32 %v6329_v21, 16  ;;  %v6126_v10 = vmul.f32 %v15948_v39, %v6026_v44  ;;  %8198 = vmatmul.bf16.gmra.mxu3 %v8090_v20  ;;  %8576 = vmatmul.bf16.gmra.mxu0 %v13387_v45  ;;  %v6252_v58 = vsel %vm14047_vm3, 0, %v6251_v40  ;;  %v7975_v32 = vrot.slane %v16013_v53, 5 }
 0x38e   : > { %v7417_v20 = vsel %vm14102_vm12, %v7412_v5, %v7416_v37  ;;  %v6545_v13 = vshll.u32 %v6329_v21, 16  ;;  %6253 = vst [vmem:[#allocation3 + $0xb4] sm:$0x1] %v6252_v58  ;;  %v4381_v6 = vadd.f32 %v17503_v36, %v17502_v29  ;;  %v8066_v25 = vunpack.c.l.b16 %v7972_v56  ;;  %v7851_v29 = vld [vmem:[#allocation3 + $0x5c] sm:$0x1] }
 0x38f   : > { %v16036_v23 = vrot.slane %v6542_v19, 7  ;;  %v6162_v38 = vadd.f32 %v15974_v30, %v6126_v10  ;;  %v7664_v54 = vpop.f32.mrf.mxu2  ;;  %v7554_v47 = vunpack.c.l.b16 %v7417_v20  ;;  %v7553_v9 = vunpack.c.l.b16 %v7407_v63  ;;  %v7118_v10 = vld [vmem:[#allocation3 + $0x90] sm:$0xf] }
 0x390   : > { %v16044_v49 = vadd.f32 %v7664_v54, %v15932_v42  ;;  %v5432_v52 = vpop.f32.mrf.mxu3  ;;  %v8065_v21 = vunpack.c.l.b16 %v7969_v26  ;;  %v12791_v44 = vrot.slane %v16039_v16, 9  ;;  %v16052_v33 = vrot.slane %v7975_v32, 4  ;;  %v6748_v16 = vld [vmem:[#allocation3 + $0xa8] sm:$0xf] }
 0x391   : > { %v6547_v17 = vor.u32 %v6545_v13, %v16036_v23  ;;  %v6194_v61 = vmax.f32 %v6162_v38, 0.0  ;;  %v5505_v59 = vadd.f32 %v5432_v52, %v4759_v15  ;;  %v7574_v5 = vpack.c.b16 %v7554_v47, %v7553_v9  ;;  %v13419_v13 = vld [vmem:[#allocation11 + $0x168] sm:$0xff] }
 0x392   : > { %v16047_v46 = vpop.f32.mrf.mxu1  ;;  %v4760_v15 = vadd.f32 %v15591_v43, %v4381_v6  ;;  %v8091_v19 = vpack.c.b16 %v8066_v25, %v8065_v21  ;;  %v6548_v56 = vrot.slane %v16036_v23, 4  ;;  %v7419_v58 = vshrl.u32 %v7118_v10, 16  ;;  %v6299_v25 = vld [vmem:[#allocation3 + $0xbc] sm:$0x1]  ;;  %9813 = vmatpush.bf16.msrb.mxu2 %v13419_v13 }
 0x393   : > { %v6742_v42 = vsel %vm14124_vm14, %v6547_v17, %v6741_v55  ;;  %v6330_v45 = vpack.c.bf16 %v6194_v61, %v6194_v61  ;;  %v6027_v41 = vadd.f32 %v15995_v35, %v5505_v59  ;;  %v13354_v37 = vld [vmem:[#allocation3 + $0x90] sm:$0xff]  ;;  %v7422_v54 = vshll.u32 %v7118_v10, 16  ;;  %v6745_v17 = vld [vmem:[#allocation3 + $0xa4] sm:$0x1] }
 0x394   : > { %6743 = vst [vmem:[#allocation3 + $0x9c] sm:$0xf] %v6742_v42  ;;  %v7119_v26 = vld [vmem:[#allocation3 + $0x94] sm:$0xf]  ;;  %v7120_v20 = vld [vmem:[#allocation3 + $0x98] sm:$0x1]  ;;  %v4383_v53 = vadd.f32 %v15269_v60, %v15276_v3 }
 0x395   : > { %v6550_v40 = vshrl.u32 %v6330_v45, 16  ;;  %v6127_v63 = vmul.f32 %v15948_v39, %v6027_v41  ;;  %7029 = vmatmul.bf16.gmra.mxu1 %v13354_v37  ;;  %v6553_v38 = vshll.u32 %v6330_v45, 16  ;;  %v7428_v35 = vshll.u32 %v7119_v26, 16  ;;  %v16061_v55 = vpop.f32.mrf.mxu0 }
 0x396   : > { %v7432_v47 = vshrl.u32 %v7119_v26, 16  ;;  %v7421_v23 = vrot.slane %v7419_v58, 4  ;;  %v7438_v52 = vshll.u32 %v7120_v20, 16  ;;  %v7424_v9 = vrot.slane %v7422_v54, 5 }
 0x397   : > { %v6552_v36 = vrot.slane %v6550_v40, 7  ;;  %v6163_v43 = vadd.f32 %v15974_v30, %v6127_v63  ;;  %v7667_v6 = vpop.f32.mrf.mxu2  ;;  %v7430_v21 = vrot.slane %v7428_v35, 5  ;;  %v6300_v63 = vsel %vm14059_vm4, 0, %v6299_v25 }
 0x398   : > { %7706 = vmatmul.bf16.gmra.mxu2 %v7574_v5  ;;  %v16064_v61 = vadd.f32 %v7667_v6, %v15985_v12  ;;  %v5434_v59 = vpop.f32.mrf.mxu3  ;;  %v7434_v42 = vrot.slane %v7432_v47, 4  ;;  %v7425_v26 = vor.u32 %v7424_v9, %v7421_v23  ;;  %v7978_v20 = vrot.slane %v7851_v29, 5  ;;  %6301 = vst [vmem:[#allocation3 + $0xbc] sm:$0x1] %v6300_v63  ;;  %v6254_v6 = vld [vmem:[#allocation3 + $0xc0] sm:$0x1] }
 0x399   : > { %v6555_v45 = vor.u32 %v6553_v38, %v6552_v36  ;;  %v6557_v41 = vrot.slane %v6552_v36, 4  ;;  %v6195_v37 = vmax.f32 %v6163_v43, 0.0  ;;  %v5506_v10 = vadd.f32 %v5434_v59, %v4760_v15  ;;  %v13388_v15 = vld [vmem:[#allocation3 + $0x54] sm:$0xff]  ;;  %v16096_v59 = vld [vmem:[#allocation3 + $0xc] sm:$0xf] }
 0x39a   : > { %v16066_v5 = vpop.f32.mrf.mxu1  ;;  %v7435_v40 = vor.u32 %v7434_v42, %v7430_v21  ;;  %v7426_v38 = vrot.slane %v7425_v26, 4  ;;  %v7440_v47 = vrot.slane %v7438_v52, 5  ;;  %v4761_v36 = vadd.f32 %v15630_v18, %v15259_v4 }
 0x39b   : > { %v6556_v12 = vsel %vm14118_vm13, %v6548_v56, %v6555_v45  ;;  %v6746_v58 = vsel %vm14047_vm3, %v6557_v41, %v6745_v17  ;;  %v6331_v54 = vpack.c.bf16 %v6195_v37, %v6195_v37  ;;  %v6028_v13 = vadd.f32 %v16018_v14, %v5506_v10 }
 0x39c   : > { %6744 = vst [vmem:[#allocation3 + $0xa0] sm:$0xf] %v6556_v12  ;;  %v7436_v35 = vrot.slane %v7435_v40, 4  ;;  %v7979_v56 = vsel %vm14094_vm11, %v16052_v33, %v7978_v20  ;;  %v7431_v14 = vsel %vm14102_vm12, %v7426_v38, %v7430_v21  ;;  %v7976_v4 = vsel %vm14094_vm11, %v12791_v44, %v7975_v32  ;;  %v16106_v40 = vld [vmem:[#allocation3 + $0x64] sm:$0xf] }
 0x39d   : > { %6747 = vst [vmem:[#allocation3 + $0xa4] sm:$0x1] %v6746_v58  ;;  %v6559_v29 = vshrl.u32 %v6331_v54, 16  ;;  %v6128_v43 = vmul.f32 %v15948_v39, %v6028_v13  ;;  %8203 = vmatmul.bf16.gmra.mxu3 %v8091_v19  ;;  %8581 = vmatmul.bf16.gmra.mxu0 %v13388_v15  ;;  %v6255_v18 = vsel %vm14047_vm3, 0, %v6254_v6  ;;  %v6562_v33 = vshll.u32 %v6331_v54, 16  ;;  %v5961_v37 = vpop.f32.mrf.mxu0 }
 0x39e   : > { %v7441_v23 = vsel %vm14102_vm12, %v7436_v35, %v7440_v47  ;;  %6256 = vst [vmem:[#allocation3 + $0xc0] sm:$0x1] %v6255_v18  ;;  %v8068_v44 = vunpack.c.l.b16 %v7979_v56  ;;  %v7555_v41 = vunpack.c.l.b16 %v7431_v14  ;;  %v8067_v26 = vunpack.c.l.b16 %v7976_v4  ;;  %v7121_v13 = vld [vmem:[#allocation3 + $0x9c] sm:$0xf] }
 0x39f   : > { %v16093_v19 = vrot.slane %v6559_v29, 7  ;;  %v6164_v52 = vadd.f32 %v15974_v30, %v6128_v43  ;;  %v7669_v25 = vpop.f32.mrf.mxu2  ;;  %v7556_v17 = vunpack.c.l.b16 %v7441_v23  ;;  %v8777_v63 = vshrl.u32 %v16096_v59, 16  ;;  %v13406_v29 = vld [vmem:[#allocation11 + $0x100] sm:$0xff] }
 0x3a0   : > { %v16101_v9 = vadd.f32 %v7669_v25, %v16004_v27  ;;  %v5437_v32 = vpop.f32.mrf.mxu3  ;;  %v4762_v58 = vadd.f32 %v15663_v2, %v4383_v53  ;;  %v8092_v54 = vpack.c.b16 %v8068_v44, %v8067_v26  ;;  %v7982_v43 = vrot.slane %v16106_v40, 5  ;;  %9296 = vmatpush.bf16.msrb.mxu1 %v13406_v29 }
 0x3a1   : > { %v6564_v21 = vor.u32 %v6562_v33, %v16093_v19  ;;  %v6196_v42 = vmax.f32 %v6164_v52, 0.0  ;;  %v5507_v45 = vadd.f32 %v5437_v32, %v4761_v36  ;;  %v7575_v20 = vpack.c.b16 %v7556_v17, %v7555_v41  ;;  %v6302_v33 = vld [vmem:[#allocation3 + $0xc8] sm:$0x1]  ;;  %v6752_v52 = vld [vmem:[#allocation3 + $0xb0] sm:$0x1] }
 0x3a2   : > { %v16104_v10 = vpop.f32.mrf.mxu1  ;;  %v7443_v36 = vshrl.u32 %v7121_v13, 16  ;;  %v6565_v56 = vrot.slane %v16093_v19, 4 }
 0x3a3   : > { %v6749_v60 = vsel %vm14124_vm14, %v6564_v21, %v6748_v16  ;;  %v6332_v3 = vpack.c.bf16 %v6196_v42, %v6196_v42  ;;  %v6029_v27 = vadd.f32 %v16061_v55, %v5507_v45  ;;  %v13355_v12 = vld [vmem:[#allocation3 + $0x9c] sm:$0xff]  ;;  %v7446_v55 = vshll.u32 %v7121_v13, 16 }
 0x3a4   : > { %6750 = vst [vmem:[#allocation3 + $0xa8] sm:$0xf] %v6749_v60  ;;  %v7122_v15 = vld [vmem:[#allocation3 + $0xa0] sm:$0xf]  ;;  %v7123_v47 = vld [vmem:[#allocation3 + $0xa4] sm:$0x1] }
 0x3a5   : > { %v6567_v38 = vshrl.u32 %v6332_v3, 16  ;;  %v6129_v35 = vmul.f32 %v15948_v39, %v6029_v27  ;;  %7034 = vmatmul.bf16.gmra.mxu1 %v13355_v12  ;;  %v7452_v6 = vshll.u32 %v7122_v15, 16  ;;  %v7456_v14 = vshrl.u32 %v7122_v15, 16 }
 0x3a6   : > { %v6570_v2 = vshll.u32 %v6332_v3, 16  ;;  %v7445_v18 = vrot.slane %v7443_v36, 4  ;;  %v7448_v17 = vrot.slane %v7446_v55, 5  ;;  %v7462_v32 = vshll.u32 %v7123_v47, 16  ;;  %v17504_v36 = vld [vmem:[#allocation27_spill] sm:$0xff] }
 0x3a7   : > { %v6569_v23 = vrot.slane %v6567_v38, 7  ;;  %v6165_v4 = vadd.f32 %v15974_v30, %v6129_v35  ;;  %v7454_v53 = vrot.slane %v7452_v6, 5  ;;  %v7458_v16 = vrot.slane %v7456_v14, 4  ;;  %v17505_v14 = vld [vmem:[#allocation28_spill] sm:$0xff] }
 0x3a8   : > { %7711 = vmatmul.bf16.gmra.mxu2 %v7575_v20  ;;  %v5439_v25 = vpop.f32.mrf.mxu3  ;;  %v7449_v60 = vor.u32 %v7448_v17, %v7445_v18  ;;  %v6303_v27 = vsel %vm14059_vm4, 0, %v6302_v33  ;;  %v7464_v47 = vrot.slane %v7462_v32, 5  ;;  %v4763_v29 = vadd.f32 %v15688_v28, %v17504_v36  ;;  %v13418_v33 = vld [vmem:[#allocation11 + $0x160] sm:$0xff] }
 0x3a9   : > { %v6572_v44 = vor.u32 %v6570_v2, %v6569_v23  ;;  %v6574_v21 = vrot.slane %v6569_v23, 4  ;;  %v6197_v19 = vmax.f32 %v6165_v4, 0.0  ;;  %v7672_v42 = vpop.f32.mrf.mxu2  ;;  %v5508_v45 = vadd.f32 %v5439_v25, %v4762_v58  ;;  %6304 = vst [vmem:[#allocation3 + $0xc8] sm:$0x1] %v6303_v27  ;;  %v7852_v4 = vld [vmem:[#allocation3 + $0x60] sm:$0xe]  ;;  %9814 = vmatpush.bf16.msrb.mxu2 %v13418_v33 }
 0x3aa   : > { %v16118_v41 = vadd.f32 %v7672_v42, %v16047_v46  ;;  %v16120_v26 = vpop.f32.mrf.mxu1  ;;  %v7459_v3 = vor.u32 %v7458_v16, %v7454_v53  ;;  %v5964_v38 = vpop.f32.mrf.mxu0  ;;  %v13389_v46 = vld [vmem:[#allocation3 + $0x60] sm:$0xff]  ;;  %v7450_v58 = vrot.slane %v7449_v60, 4  ;;  %v16131_v6 = vrot.slane %v8777_v63, 4 }
 0x3ab   : > { %v6573_v20 = vsel %vm14118_vm13, %v6565_v56, %v6572_v44  ;;  %v6753_v12 = vsel %vm14047_vm3, %v6574_v21, %v6752_v52  ;;  %v6333_v13 = vpack.c.bf16 %v6197_v19, %v6197_v19  ;;  %v6030_v15 = vadd.f32 %v5961_v37, %v5508_v45  ;;  %v7854_v56 = vld [vmem:[#allocation3 + $0x68] sm:$0x1] }
 0x3ac   : > { %6751 = vst [vmem:[#allocation3 + $0xac] sm:$0xf] %v6573_v20  ;;  %v7460_v35 = vrot.slane %v7459_v3, 4  ;;  %v4385_v37 = vadd.f32 %v15720_v0, %v17505_v14  ;;  %v7455_v23 = vsel %vm14102_vm12, %v7450_v58, %v7454_v53  ;;  %v7984_v28 = vrot.slane %v7982_v43, 4  ;;  %v7124_v18 = vld [vmem:[#allocation3 + $0xa8] sm:$0xf] }
 0x3ad   : > { %6754 = vst [vmem:[#allocation3 + $0xb0] sm:$0x1] %v6753_v12  ;;  %v6576_v11 = vshrl.u32 %v6333_v13, 16  ;;  %v6130_v55 = vmul.f32 %v15948_v39, %v6030_v15  ;;  %8208 = vmatmul.bf16.gmra.mxu3 %v8092_v54  ;;  %8586 = vmatmul.bf16.gmra.mxu0 %v13389_v46  ;;  %v6579_v63 = vshll.u32 %v6333_v13, 16  ;;  %v6755_v0 = vld [vmem:[#allocation3 + $0xb4] sm:$0xf]  ;;  %v7557_v16 = vunpack.c.l.b16 %v7455_v23 }
 0x3ae   : > { %v7465_v2 = vsel %vm14102_vm12, %v7460_v35, %v7464_v47  ;;  %v7985_v32 = vrot.slane %v7854_v56, 5  ;;  %v7467_v53 = vshrl.u32 %v7124_v18, 16  ;;  %v7470_v44 = vshll.u32 %v7124_v18, 16  ;;  %v16152_v15 = vld [vmem:[#allocation3 + $0x10] sm:$0xf] }
 0x3af   : > { %v16141_v54 = vrot.slane %v6576_v11, 7  ;;  %v6166_v52 = vadd.f32 %v15974_v30, %v6130_v55  ;;  %v7558_v25 = vunpack.c.l.b16 %v7465_v2  ;;  %v12792_v60 = vrot.slane %v7852_v4, 9 }
 0x3b0   : > { %v5442_v17 = vpop.f32.mrf.mxu3  ;;  %v7986_v12 = vsel %vm14094_vm11, %v7984_v28, %v7985_v32  ;;  %v7469_v13 = vrot.slane %v7467_v53, 4  ;;  %v7472_v11 = vrot.slane %v7470_v44, 5  ;;  %v4764_v55 = vadd.f32 %v15722_v62, %v4385_v37  ;;  %v6759_v32 = vld [vmem:[#allocation3 + $0xbc] sm:$0x1] }
 0x3b1   : > { %v6581_v21 = vor.u32 %v6579_v63, %v16141_v54  ;;  %v6198_v19 = vmax.f32 %v6166_v52, 0.0  ;;  %v7674_v42 = vpop.f32.mrf.mxu2  ;;  %v5509_v45 = vadd.f32 %v5442_v17, %v4763_v29  ;;  %v7576_v27 = vpack.c.b16 %v7558_v25, %v7557_v16  ;;  %v13417_v17 = vld [vmem:[#allocation11 + $0x158] sm:$0xff] }
 0x3b2   : > { %v16146_v3 = vadd.f32 %v7674_v42, %v16066_v5  ;;  %v16148_v20 = vpop.f32.mrf.mxu1  ;;  %v5966_v47 = vpop.f32.mrf.mxu0  ;;  %v13445_v5 = vld [vmem:[#allocation11 + $0x1b8] sm:$0xff]  ;;  %v7983_v56 = vsel %vm14094_vm11, %v12792_v60, %v7982_v43  ;;  %v8786_v18 = vshll.u32 %v16152_v15, 16  ;;  %v8070_v33 = vunpack.c.l.b16 %v7986_v12  ;;  %9815 = vmatpush.bf16.msrb.mxu2 %v13417_v17 }
 0x3b3   : > { %v6756_v46 = vsel %vm14124_vm14, %v6581_v21, %v6755_v0  ;;  %v6334_v58 = vpack.c.bf16 %v6198_v19, %v6198_v19  ;;  %v6031_v35 = vadd.f32 %v5964_v38, %v5509_v45  ;;  %v13356_v36 = vld [vmem:[#allocation3 + $0xa8] sm:$0xff]  ;;  %10190 = vmatpush.bf16.msra.mxu3 %v13445_v5  ;;  %v8780_v38 = vshll.u32 %v16096_v59, 16  ;;  %v16167_v0 = vld [vmem:[#allocation3 + $0x70] sm:$0xf] }
 0x3b4   : > { %v7125_v29 = vld [vmem:[#allocation3 + $0xac] sm:$0xf]  ;;  %6757 = vst [vmem:[#allocation3 + $0xb4] sm:$0xf] %v6756_v46  ;;  %v7126_v14 = vld [vmem:[#allocation3 + $0xb0] sm:$0x1]  ;;  %v8069_v25 = vunpack.c.l.b16 %v7983_v56  ;;  %v7473_v44 = vor.u32 %v7472_v11, %v7469_v13 }
 0x3b5   : > { %v7476_v23 = vshll.u32 %v7125_v29, 16  ;;  %v7480_v2 = vshrl.u32 %v7125_v29, 16  ;;  %v6584_v4 = vshrl.u32 %v6334_v58, 16  ;;  %v6131_v28 = vmul.f32 %v15948_v39, %v6031_v35  ;;  %7039 = vmatmul.bf16.gmra.mxu1 %v13356_v36 }
 0x3b6   : > { %v7486_v40 = vshll.u32 %v7126_v14, 16  ;;  %v6587_v52 = vshll.u32 %v6334_v58, 16  ;;  %v6582_v16 = vrot.slane %v16141_v54, 4  ;;  %v8790_v19 = vshrl.u32 %v16152_v15, 16  ;;  %v13453_v14 = vld [vmem:[#allocation11 + $0x1f8] sm:$0xff] }
 0x3b7   : > { %v16164_v62 = vrot.slane %v7476_v23, 5  ;;  %v7482_v37 = vrot.slane %v7480_v2, 4  ;;  %v6586_v63 = vrot.slane %v6584_v4, 7  ;;  %v6167_v43 = vadd.f32 %v15974_v30, %v6131_v28  ;;  %v13416_v23 = vld [vmem:[#allocation11 + $0x150] sm:$0xff]  ;;  %10936 = vmatpush.bf16.msra.mxu0 %v13453_v14 }
 0x3b8   : > { %7716 = vmatmul.bf16.gmra.mxu2 %v7576_v27  ;;  %v5444_v53 = vpop.f32.mrf.mxu3  ;;  %v8093_v58 = vpack.c.b16 %v8070_v33, %v8069_v25  ;;  %v7488_v36 = vrot.slane %v7486_v40, 5  ;;  %v7989_v54 = vrot.slane %v16167_v0, 5  ;;  %v13390_v4 = vld [vmem:[#allocation3 + $0x6c] sm:$0xff]  ;;  %v7474_v28 = vrot.slane %v7473_v44, 4 }
 0x3b9   : > { %v7483_v21 = vor.u32 %v7482_v37, %v16164_v62  ;;  %v6589_v42 = vor.u32 %v6587_v52, %v6586_v63  ;;  %v6591_v45 = vrot.slane %v6586_v63, 4  ;;  %v6199_v60 = vmax.f32 %v6167_v43, 0.0  ;;  %v13461_v40 = vld [vmem:[#allocation11 + $0x238] sm:$0xff]  ;;  %9816 = vmatpush.bf16.msrb.mxu2 %v13416_v23 }
 0x3ba   : > { %v5510_v12 = vadd.f32 %v5444_v53, %v4764_v55  ;;  %v16172_v27 = vpop.f32.mrf.mxu1  ;;  %v16182_v5 = vpop.f32.mrf.mxu0  ;;  %v7855_v55 = vld [vmem:[#allocation3 + $0x6c] sm:$0xe]  ;;  %v16186_v37 = vrot.slane %v8786_v18, 5  ;;  %v8792_v52 = vrot.slane %v8790_v19, 4  ;;  %v7991_v25 = vrot.slane %v7989_v54, 4  ;;  %v13415_v18 = vld [vmem:[#allocation11 + $0x148] sm:$0xff]  ;;  %11458 = vmatpush.bf16.msra.mxu1 %v13461_v40 }
 0x3bb   : > { %v7677_v46 = vpop.f32.mrf.mxu2  ;;  %v7484_v35 = vrot.slane %v7483_v21, 4  ;;  %v6590_v13 = vsel %vm14118_vm13, %v6582_v16, %v6589_v42  ;;  %v6760_v29 = vsel %vm14047_vm3, %v6591_v45, %v6759_v32  ;;  %v6335_v15 = vpack.c.bf16 %v6199_v60, %v6199_v60  ;;  %v7127_v56 = vld [vmem:[#allocation3 + $0xb4] sm:$0xf]  ;;  %v6762_v19 = vld [vmem:[#allocation3 + $0xc0] sm:$0xf] }
 0x3bc   : > { %v16180_v11 = vadd.f32 %v7677_v46, %v16104_v10  ;;  %6758 = vst [vmem:[#allocation3 + $0xb8] sm:$0xf] %v6590_v13  ;;  %v6032_v2 = vadd.f32 %v5966_v47, %v5510_v12  ;;  %v7857_v10 = vld [vmem:[#allocation3 + $0x74] sm:$0x1]  ;;  %v7479_v47 = vsel %vm14102_vm12, %v7474_v28, %v16164_v62  ;;  %v7491_v17 = vshrl.u32 %v7127_v56, 16 }
 0x3bd   : > { %v7489_v33 = vsel %vm14102_vm12, %v7484_v35, %v7488_v36  ;;  %6761 = vst [vmem:[#allocation3 + $0xbc] sm:$0x1] %v6760_v29  ;;  %v6593_v63 = vshrl.u32 %v6335_v15, 16  ;;  %8213 = vmatmul.bf16.gmra.mxu3 %v8093_v58  ;;  %8591 = vmatmul.bf16.gmra.mxu0 %v13390_v4  ;;  %v6596_v32 = vshll.u32 %v6335_v15, 16  ;;  %v7494_v44 = vshll.u32 %v7127_v56, 16 }
 0x3be   : > { %v6132_v43 = vmul.f32 %v15948_v39, %v6032_v2  ;;  %v7560_v53 = vunpack.c.l.b16 %v7489_v33  ;;  %v8730_v21 = vld [vmem:[#allocation3 + $0x14] sm:$0x1]  ;;  %v12793_v45 = vrot.slane %v7855_v55, 9  ;;  %v7992_v60 = vrot.slane %v7857_v10, 5  ;;  %9817 = vmatpush.bf16.msrb.mxu2 %v13415_v18 }
 0x3bf   : > { %v16194_v16 = vrot.slane %v6593_v63, 7  ;;  %v8782_v62 = vrot.slane %v8780_v38, 5  ;;  %v7559_v58 = vunpack.c.l.b16 %v7479_v47  ;;  %v8793_v35 = vor.u32 %v8792_v52, %v16186_v37 }
 0x3c0   : > { %v6168_v39 = vadd.f32 %v15974_v30, %v6132_v43  ;;  %v8174_v42 = vpop.f32.mrf.mxu3  ;;  %v7993_v30 = vsel %vm14094_vm11, %v7991_v25, %v7992_v60  ;;  %v7493_v15 = vrot.slane %v7491_v17, 4  ;;  %v8796_v55 = vshll.u32 %v8730_v21, 16  ;;  %v13414_v17 = vld [vmem:[#allocation11 + $0x140] sm:$0xff] }
 0x3c1   : > { %v6598_v12 = vor.u32 %v6596_v32, %v16194_v16  ;;  %v16201_v46 = vadd.f32 %v8174_v42, %v15746_v51  ;;  %v7577_v51 = vpack.c.b16 %v7560_v53, %v7559_v58  ;;  %v7496_v2 = vrot.slane %v7494_v44, 5 }
 0x3c2   : > { %v6200_v36 = vmax.f32 %v6168_v39, 0.0  ;;  %v16204_v29 = vpop.f32.mrf.mxu1  ;;  %v16213_v56 = vpop.f32.mrf.mxu0  ;;  %v7990_v28 = vsel %vm14094_vm11, %v12793_v45, %v7989_v54  ;;  %v8072_v63 = vunpack.c.l.b16 %v7993_v30  ;;  %v8794_v10 = vrot.slane %v8793_v35, 4  ;;  %9818 = vmatpush.bf16.msrb.mxu2 %v13414_v17 }
 0x3c3   : > { %v7679_v13 = vpop.f32.mrf.mxu2  ;;  %v6763_v59 = vsel %vm14124_vm14, %v6598_v12, %v6762_v19  ;;  %v13357_v14 = vld [vmem:[#allocation3 + $0xb4] sm:$0xff]  ;;  %v8071_v18 = vunpack.c.l.b16 %v7990_v28  ;;  %v7497_v32 = vor.u32 %v7496_v2, %v7493_v15  ;;  %v8798_v0 = vrot.slane %v8796_v55, 5  ;;  %v8732_v19 = vld [vmem:[#allocation3 + $0x1c] sm:$0xf] }
 0x3c4   : > { %v16211_v38 = vadd.f32 %v7679_v13, %v16120_v26  ;;  %v7128_v23 = vld [vmem:[#allocation3 + $0xb8] sm:$0xf]  ;;  %6764 = vst [vmem:[#allocation3 + $0xc0] sm:$0xf] %v6763_v59  ;;  %v6336_v4 = vpack.c.bf16 %v6200_v36, %v6200_v36  ;;  %v7129_v33 = vld [vmem:[#allocation3 + $0xbc] sm:$0x1]  ;;  %v8783_v26 = vor.u32 %v8782_v62, %v16131_v6 }
 0x3c5   : > { %v7500_v40 = vshll.u32 %v7128_v23, 16  ;;  %v7504_v22 = vshrl.u32 %v7128_v23, 16  ;;  %7044 = vmatmul.bf16.gmra.mxu1 %v13357_v14  ;;  %v7510_v25 = vshll.u32 %v7129_v33, 16  ;;  %v6599_v39 = vrot.slane %v16194_v16, 4  ;;  %v6766_v6 = vld [vmem:[#allocation3 + $0xc8] sm:$0x1] }
 0x3c6   : > { %v6601_v52 = vshrl.u32 %v6336_v4, 16  ;;  %v6604_v44 = vshll.u32 %v6336_v4, 16  ;;  %v8094_v42 = vpack.c.b16 %v8072_v63, %v8071_v18  ;;  %v8784_v45 = vrot.slane %v8783_v26, 4  ;;  %v7859_v62 = vld [vmem:[#allocation3 + $0x7c] sm:$0xf] }
 0x3c7   : > { %v7502_v43 = vrot.slane %v7500_v40, 5  ;;  %v7506_v47 = vrot.slane %v7504_v22, 4  ;;  %v8799_v60 = vsel %vm14102_vm12, %v8794_v10, %v8798_v0  ;;  %v7512_v30 = vrot.slane %v7510_v25, 5  ;;  %v13391_v2 = vld [vmem:[#allocation3 + $0x78] sm:$0xff]  ;;  %v7860_v22 = vld [vmem:[#allocation3 + $0x80] sm:$0x1] }
 0x3c8   : > { %7721 = vmatmul.bf16.gmra.mxu2 %v7577_v51  ;;  %v6603_v53 = vrot.slane %v6601_v52, 7  ;;  %v16220_v54 = vpop.f32.mrf.mxu3  ;;  %v7498_v16 = vrot.slane %v7497_v32, 4  ;;  %v8810_v59 = vshll.u32 %v8732_v19, 16  ;;  %v8814_v51 = vshrl.u32 %v8732_v19, 16  ;;  %v8731_v33 = vld [vmem:[#allocation3 + $0x18] sm:$0xf] }
 0x3c9   : > { %v7507_v21 = vor.u32 %v7506_v47, %v7502_v43  ;;  %v7996_v28 = vrot.slane %v7859_v62, 5  ;;  %v9178_v40 = vunpack.c.l.b16 %v8799_v60  ;;  %v8801_v63 = vshrl.u32 %v8731_v33, 16  ;;  %v7858_v32 = vld [vmem:[#allocation3 + $0x78] sm:$0xe]  ;;  %v13444_v62 = vld [vmem:[#allocation11 + $0x1b0] sm:$0xff] }
 0x3ca   : > { %v6606_v12 = vor.u32 %v6604_v44, %v6603_v53  ;;  %v6608_v58 = vrot.slane %v6603_v53, 4  ;;  %v16225_v36 = vpop.f32.mrf.mxu1  ;;  %v16230_v55 = vpop.f32.mrf.mxu0  ;;  %v7503_v7 = vsel %vm14102_vm12, %v7498_v16, %v7502_v43  ;;  %v8804_v26 = vshll.u32 %v8731_v33, 16  ;;  %10191 = vmatpush.bf16.msra.mxu3 %v13444_v62  ;;  %v8735_v33 = vld [vmem:[#allocation3 + $0x28] sm:$0xf] }
 0x3cb   : > { %v7682_v35 = vpop.f32.mrf.mxu2  ;;  %v7508_v13 = vrot.slane %v7507_v21, 4  ;;  %v7998_v47 = vrot.slane %v7996_v28, 4  ;;  %v16243_v25 = vrot.slane %v8810_v59, 5  ;;  %v8816_v17 = vrot.slane %v8814_v51, 4  ;;  %v9475_v21 = vld [vmem:[#allocation3 + $0x10] sm:$0xf] }
 0x3cc   : > { %v16228_v15 = vadd.f32 %v7682_v35, %v16148_v20  ;;  %v6607_v14 = vsel %vm14118_vm13, %v6599_v39, %v6606_v12  ;;  %v6767_v23 = vsel %vm14047_vm3, %v6608_v58, %v6766_v6  ;;  %v8789_v20 = vsel %vm14102_vm12, %v8784_v45, %v16186_v37  ;;  %v9476_v51 = vld [vmem:[#allocation3 + $0x14] sm:$0x1] }
 0x3cd   : > { %v7513_v4 = vsel %vm14102_vm12, %v7508_v13, %v7512_v30  ;;  %6765 = vst [vmem:[#allocation3 + $0xc4] sm:$0xf] %v6607_v14  ;;  %8218 = vmatmul.bf16.gmra.mxu3 %v8094_v42  ;;  %8596 = vmatmul.bf16.gmra.mxu0 %v13391_v2  ;;  %v9177_v52 = vunpack.c.l.b16 %v8789_v20  ;;  %v7561_v37 = vunpack.c.l.b16 %v7503_v7  ;;  %v7999_v44 = vrot.slane %v7860_v22, 5  ;;  %v8733_v42 = vld [vmem:[#allocation3 + $0x20] sm:$0x1] }
 0x3ce   : > { %6768 = vst [vmem:[#allocation3 + $0xc8] sm:$0x1] %v6767_v23  ;;  %v7562_v8 = vunpack.c.l.b16 %v7513_v4  ;;  %v8803_v45 = vrot.slane %v8801_v63, 4  ;;  %v8806_v60 = vrot.slane %v8804_v26, 5  ;;  %v8817_v58 = vor.u32 %v8816_v17, %v16243_v25  ;;  %v7862_v4 = vld [vmem:[#allocation3 + $0x88] sm:$0xf] }
 0x3cf   : > { %v9209_v43 = vpack.c.b16 %v9178_v40, %v9177_v52  ;;  %v8000_v12 = vsel %vm14094_vm11, %v7998_v47, %v7999_v44  ;;  %v8820_v13 = vshll.u32 %v8733_v42, 16  ;;  %v9474_v40 = vld [vmem:[#allocation3 + $0xc] sm:$0xe]  ;;  %v13392_v17 = vld [vmem:[#allocation3 + $0x84] sm:$0xff]  ;;  %v8838_v44 = vshrl.u32 %v8735_v33, 16 }
 0x3d0   : > { %v8179_v10 = vpop.f32.mrf.mxu3  ;;  %v7578_v39 = vpack.c.b16 %v7562_v8, %v7561_v37  ;;  %v8074_v30 = vunpack.c.l.b16 %v8000_v12  ;;  %v8807_v16 = vor.u32 %v8806_v60, %v8803_v45  ;;  %v8818_v14 = vrot.slane %v8817_v58, 4  ;;  %v13452_v47 = vld [vmem:[#allocation11 + $0x1f0] sm:$0xff] }
 0x3d1   : > { %v16246_v18 = vadd.f32 %v8179_v10, %v15928_v24  ;;  %v12794_v24 = vrot.slane %v7858_v32, 9  ;;  %v9575_v10 = vrot.slane %v9476_v51, 5  ;;  %v8003_v32 = vrot.slane %v7862_v4, 5  ;;  %10937 = vmatpush.bf16.msra.mxu0 %v13452_v47  ;;  %v7863_v60 = vld [vmem:[#allocation3 + $0x8c] sm:$0x1] }
 0x3d2   : > { %v16248_v53 = vpop.f32.mrf.mxu1  ;;  %v16253_v6 = vpop.f32.mrf.mxu0  ;;  %v8808_v52 = vrot.slane %v8807_v16, 4  ;;  %v7861_v51 = vld [vmem:[#allocation3 + $0x84] sm:$0xe] }
 0x3d3   : > { %v7684_v0 = vpop.f32.mrf.mxu2  ;;  %v7997_v35 = vsel %vm14094_vm11, %v12794_v24, %v7996_v28  ;;  %v8822_v28 = vrot.slane %v8820_v13, 5  ;;  %v8005_v58 = vrot.slane %v8003_v32, 4  ;;  %v8840_v13 = vrot.slane %v8838_v44, 4  ;;  %v9479_v44 = vld [vmem:[#allocation3 + $0x20] sm:$0x1] }
 0x3d4   : > { %v16251_v19 = vadd.f32 %v7684_v0, %v16172_v27  ;;  %v9572_v27 = vrot.slane %v9475_v21, 5  ;;  %v8073_v2 = vunpack.c.l.b16 %v7997_v35  ;;  %v8734_v0 = vld [vmem:[#allocation3 + $0x24] sm:$0xf]  ;;  %v12960_v21 = vrot.slane %v9474_v40, 9  ;;  %v9478_v40 = vld [vmem:[#allocation3 + $0x1c] sm:$0xf] }
 0x3d5   : > { %9297 = vmatmul.bf16.vlgmr.msrb.gmra.mxu1 %v9209_v43  ;;  %v8823_v37 = vsel %vm14102_vm12, %v8818_v14, %v8822_v28  ;;  %v8834_v43 = vshll.u32 %v8735_v33, 16  ;;  %v8825_v62 = vshrl.u32 %v8734_v0, 16  ;;  %v8828_v24 = vshll.u32 %v8734_v0, 16 }
 0x3d6   : > { %v9574_v8 = vrot.slane %v9572_v27, 4  ;;  %v8095_v26 = vpack.c.b16 %v8074_v30, %v8073_v2  ;;  %v9573_v42 = vsel %vm14094_vm11, %v12960_v21, %v9572_v27  ;;  %v9180_v45 = vunpack.c.l.b16 %v8823_v37 }
 0x3d7   : > { %v16279_v35 = vrot.slane %v8834_v43, 5  ;;  %v9699_v14 = vunpack.c.l.b16 %v9573_v42  ;;  %v8006_v27 = vrot.slane %v7863_v60, 5  ;;  %v8827_v28 = vrot.slane %v8825_v62, 4  ;;  %v7865_v42 = vld [vmem:[#allocation3 + $0x94] sm:$0xf] }
 0x3d8   : > { %7726 = vmatmul.bf16.gmra.mxu2 %v7578_v39  ;;  %v8181_v59 = vpop.f32.mrf.mxu3  ;;  %v8813_v39 = vsel %vm14102_vm12, %v8808_v52, %v16243_v25 }
 0x3d9   : > { %v16261_v23 = vadd.f32 %v8181_v59, %v15982_v1  ;;  %v13460_v1 = vld [vmem:[#allocation11 + $0x230] sm:$0xff]  ;;  %v9179_v59 = vunpack.c.l.b16 %v8813_v39  ;;  %v8841_v52 = vor.u32 %v8840_v13, %v16279_v35 }
 0x3da   : > { %v16263_v7 = vpop.f32.mrf.mxu1  ;;  %v16268_v63 = vpop.f32.mrf.mxu0  ;;  %11459 = vmatpush.bf16.msra.mxu1 %v13460_v1 }
 0x3db   : > { %v7687_v20 = vpop.f32.mrf.mxu2  ;;  %v8842_v21 = vrot.slane %v8841_v52, 4 }
 0x3dc   : > { %v16266_v22 = vadd.f32 %v7687_v20, %v16204_v29  ;;  %v9576_v29 = vsel %vm14094_vm11, %v9574_v8, %v9575_v10  ;;  %v9210_v20 = vpack.c.b16 %v9180_v45, %v9179_v59  ;;  %v8736_v8 = vld [vmem:[#allocation3 + $0x2c] sm:$0x1]  ;;  %v8007_v10 = vsel %vm14094_vm11, %v8005_v58, %v8006_v27  ;;  %v8738_v45 = vld [vmem:[#allocation3 + $0x34] sm:$0xf]  ;;  %v8737_v27 = vld [vmem:[#allocation3 + $0x30] sm:$0xf] }
 0x3dd   : > { %8223 = vmatmul.bf16.gmra.mxu3 %v8095_v26  ;;  %8601 = vmatmul.bf16.gmra.mxu0 %v13392_v17  ;;  %v9700_v16 = vunpack.c.l.b16 %v9576_v29  ;;  %v8830_v26 = vrot.slane %v8828_v24, 5  ;;  %v8844_v17 = vshll.u32 %v8736_v8, 16  ;;  %v8076_v37 = vunpack.c.l.b16 %v8007_v10  ;;  %v9477_v24 = vld [vmem:[#allocation3 + $0x18] sm:$0xe]  ;;  %v7866_v10 = vld [vmem:[#allocation3 + $0x98] sm:$0x1] }
 0x3de   : > { %v9582_v59 = vrot.slane %v9479_v44, 5  ;;  %v12961_v8 = vrot.slane %v9477_v24, 9  ;;  %v8849_v52 = vshrl.u32 %v8737_v27, 16 }
 0x3df   : > { %v9731_v47 = vpack.c.b16 %v9700_v16, %v9699_v14  ;;  %v8831_v0 = vor.u32 %v8830_v26, %v8827_v28  ;;  %v8010_v14 = vrot.slane %v7865_v42, 5 }
 0x3e0   : > { %v8184_v12 = vpop.f32.mrf.mxu3 }
 0x3e1   : > { %v16282_v30 = vadd.f32 %v8184_v12, %v16002_v31  ;;  %v12795_v31 = vrot.slane %v7861_v51, 9  ;;  %v8832_v51 = vrot.slane %v8831_v0, 4 }
 0x3e2   : > { %v16284_v2 = vpop.f32.mrf.mxu1  ;;  %v16289_v33 = vpop.f32.mrf.mxu0 }
 0x3e3   : > { %v7689_v25 = vpop.f32.mrf.mxu2  ;;  %v8004_v1 = vsel %vm14094_vm11, %v12795_v31, %v8003_v32  ;;  %v8846_v32 = vrot.slane %v8844_v17, 5  ;;  %v8837_v28 = vsel %vm14102_vm12, %v8832_v51, %v16279_v35  ;;  %v8012_v17 = vrot.slane %v8010_v14, 4 }
 0x3e4   : > { %v16287_v4 = vadd.f32 %v7689_v25, %v16225_v36  ;;  %v9579_v36 = vrot.slane %v9478_v40, 5  ;;  %v8075_v39 = vunpack.c.l.b16 %v8004_v1  ;;  %v13393_v25 = vld [vmem:[#allocation3 + $0x90] sm:$0xff]  ;;  %v8862_v40 = vshrl.u32 %v8738_v45, 16 }
 0x3e5   : > { %9302 = vmatmul.bf16.gmra.mxu1 %v9210_v20  ;;  %v8858_v20 = vshll.u32 %v8738_v45, 16 }
 0x3e6   : > { %v9581_v12 = vrot.slane %v9579_v36, 4  ;;  %v8096_v16 = vpack.c.b16 %v8076_v37, %v8075_v39  ;;  %v9580_v26 = vsel %vm14094_vm11, %v12961_v8, %v9579_v36  ;;  %v8864_v0 = vrot.slane %v8862_v40, 4  ;;  %v7864_v39 = vld [vmem:[#allocation3 + $0x90] sm:$0xe] }
 0x3e7   : > { %v16315_v37 = vrot.slane %v8858_v20, 5  ;;  %v9701_v35 = vunpack.c.l.b16 %v9580_v26  ;;  %v8013_v36 = vrot.slane %v7866_v10, 5 }
 0x3e8   : > { %9819 = vmatmul.bf16.vlgmr.msrb.gmra.mxu2 %v9731_v47  ;;  %v8186_v43 = vpop.f32.mrf.mxu3  ;;  %v8852_v47 = vshll.u32 %v8737_v27, 16 }
 0x3e9   : > { %v16297_v29 = vadd.f32 %v8186_v43, %v16044_v49  ;;  %v8847_v49 = vsel %vm14102_vm12, %v8842_v21, %v8846_v32  ;;  %v9181_v21 = vunpack.c.l.b16 %v8837_v28  ;;  %v8865_v27 = vor.u32 %v8864_v0, %v16315_v37 }
 0x3ea   : > { %v16299_v62 = vpop.f32.mrf.mxu1  ;;  %v16304_v13 = vpop.f32.mrf.mxu0  ;;  %v9182_v31 = vunpack.c.l.b16 %v8847_v49  ;;  %v8854_v51 = vrot.slane %v8852_v47, 5  ;;  %v8014_v49 = vsel %vm14094_vm11, %v8012_v17, %v8013_v36  ;;  %v8741_v17 = vld [vmem:[#allocation3 + $0x40] sm:$0xf] }
 0x3eb   : > { %v7692_v60 = vpop.f32.mrf.mxu2  ;;  %v8866_v10 = vrot.slane %v8865_v27, 4  ;;  %v8886_v27 = vshrl.u32 %v8741_v17, 16 }
 0x3ec   : > { %v16302_v58 = vadd.f32 %v7692_v60, %v16248_v53  ;;  %v9583_v53 = vsel %vm14094_vm11, %v9581_v12, %v9582_v59  ;;  %v9481_v60 = vld [vmem:[#allocation3 + $0x28] sm:$0xf]  ;;  %v9211_v32 = vpack.c.b16 %v9182_v31, %v9181_v21  ;;  %v8851_v59 = vrot.slane %v8849_v52, 4  ;;  %v9482_v31 = vld [vmem:[#allocation3 + $0x2c] sm:$0x1] }
 0x3ed   : > { %8228 = vmatmul.bf16.gmra.mxu3 %v8096_v16  ;;  %8606 = vmatmul.bf16.gmra.mxu0 %v13393_v25  ;;  %v9702_v44 = vunpack.c.l.b16 %v9583_v53  ;;  %v8739_v16 = vld [vmem:[#allocation3 + $0x38] sm:$0x1]  ;;  %v12796_v25 = vrot.slane %v7864_v39, 9  ;;  %v9586_v40 = vrot.slane %v9481_v60, 5  ;;  %v8078_v53 = vunpack.c.l.b16 %v8014_v49  ;;  %v9480_v21 = vld [vmem:[#allocation3 + $0x24] sm:$0xe] }
 0x3ee   : > { %v8868_v8 = vshll.u32 %v8739_v16, 16  ;;  %v8855_v28 = vor.u32 %v8854_v51, %v8851_v59  ;;  %v9589_v60 = vrot.slane %v9482_v31, 5  ;;  %v13451_v16 = vld [vmem:[#allocation11 + $0x1e8] sm:$0xff]  ;;  %v8882_v49 = vshll.u32 %v8741_v17, 16 }
 0x3ef   : > { %v9732_v20 = vpack.c.b16 %v9702_v44, %v9701_v35  ;;  %v9588_v39 = vrot.slane %v9586_v40, 4  ;;  %v13394_v59 = vld [vmem:[#allocation3 + $0x9c] sm:$0xff]  ;;  %10938 = vmatpush.bf16.msra.mxu0 %v13451_v16  ;;  %v8888_v17 = vrot.slane %v8886_v27, 4 }
 0x3f0   : > { %v8189_v1 = vpop.f32.mrf.mxu3 }
 0x3f1   : > { %v16318_v43 = vadd.f32 %v8189_v1, %v16064_v61  ;;  %v13443_v61 = vld [vmem:[#allocation11 + $0x1a8] sm:$0xff] }
 0x3f2   : > { %v16320_v45 = vpop.f32.mrf.mxu1  ;;  %v16325_v12 = vpop.f32.mrf.mxu0  ;;  %10192 = vmatpush.bf16.msra.mxu3 %v13443_v61  ;;  %v7868_v1 = vld [vmem:[#allocation3 + $0xa0] sm:$0xf] }
 0x3f3   : > { %v7694_v42 = vpop.f32.mrf.mxu2  ;;  %17506 = vst [vmem:[#allocation29_spill] sm:$0xff] %v16325_v12  ;;  %v8017_v61 = vrot.slane %v7868_v1, 5  ;;  %v16351_v1 = vrot.slane %v8882_v49, 5 }
 0x3f4   : > { %v16323_v24 = vadd.f32 %v7694_v42, %v16263_v7  ;;  %v8011_v7 = vsel %vm14094_vm11, %v12796_v25, %v8010_v14  ;;  %v8870_v14 = vrot.slane %v8868_v8, 5  ;;  %v8740_v25 = vld [vmem:[#allocation3 + $0x3c] sm:$0xf] }
 0x3f5   : > { %9307 = vmatmul.bf16.gmra.mxu1 %v9211_v32  ;;  %v8077_v47 = vunpack.c.l.b16 %v8011_v7  ;;  %v8856_v32 = vrot.slane %v8855_v28, 4  ;;  %v7869_v28 = vld [vmem:[#allocation3 + $0xa4] sm:$0x1]  ;;  %v8876_v31 = vshll.u32 %v8740_v25, 16 }
 0x3f6   : > { %v8871_v51 = vsel %vm14102_vm12, %v8866_v10, %v8870_v14  ;;  %v7867_v14 = vld [vmem:[#allocation3 + $0x9c] sm:$0xe] }
 0x3f7   : > { %v8097_v36 = vpack.c.b16 %v8078_v53, %v8077_v47  ;;  %v8861_v7 = vsel %vm14102_vm12, %v8856_v32, %v16315_v37  ;;  %v9184_v53 = vunpack.c.l.b16 %v8871_v51  ;;  %v8019_v47 = vrot.slane %v8017_v61, 4  ;;  %v8742_v51 = vld [vmem:[#allocation3 + $0x44] sm:$0x1] }
 0x3f8   : > { %9824 = vmatmul.bf16.gmra.mxu2 %v9732_v20  ;;  %v8191_v26 = vpop.f32.mrf.mxu3  ;;  %v12962_v20 = vrot.slane %v9480_v21, 9  ;;  %v8878_v49 = vrot.slane %v8876_v31, 5 }
 0x3f9   : > { %v16333_v52 = vadd.f32 %v8191_v26, %v16101_v9  ;;  %v13459_v9 = vld [vmem:[#allocation11 + $0x228] sm:$0xff]  ;;  %v8873_v26 = vshrl.u32 %v8740_v25, 16 }
 0x3fa   : > { %v16335_v44 = vpop.f32.mrf.mxu1  ;;  %v16340_v35 = vpop.f32.mrf.mxu0  ;;  %11460 = vmatpush.bf16.msra.mxu1 %v13459_v9  ;;  %v9587_v8 = vsel %vm14094_vm11, %v12962_v20, %v9586_v40  ;;  %v8020_v40 = vrot.slane %v7869_v28, 5  ;;  %v8889_v20 = vor.u32 %v8888_v17, %v16351_v1 }
 0x3fb   : > { %v7697_v0 = vpop.f32.mrf.mxu2  ;;  %17507 = vst [vmem:[#allocation30_spill] sm:$0xff] %v16340_v35  ;;  %v8875_v25 = vrot.slane %v8873_v26, 4 }
 0x3fc   : > { %v16338_v42 = vadd.f32 %v7697_v0, %v16284_v2  ;;  %v9590_v2 = vsel %vm14094_vm11, %v9588_v39, %v9589_v60  ;;  %v9183_v39 = vunpack.c.l.b16 %v8861_v7  ;;  %v8021_v27 = vsel %vm14094_vm11, %v8019_v47, %v8020_v40  ;;  %v7871_v47 = vld [vmem:[#allocation3 + $0xac] sm:$0xf] }
 0x3fd   : > { %8233 = vmatmul.bf16.gmra.mxu3 %v8097_v36  ;;  %8611 = vmatmul.bf16.gmra.mxu0 %v13394_v59  ;;  %v9704_v21 = vunpack.c.l.b16 %v9590_v2  ;;  %v9703_v36 = vunpack.c.l.b16 %v9587_v8  ;;  %v9484_v59 = vld [vmem:[#allocation3 + $0x34] sm:$0xf]  ;;  %v8892_v8 = vshll.u32 %v8742_v51, 16  ;;  %v8080_v28 = vunpack.c.l.b16 %v8021_v27  ;;  %v13395_v27 = vld [vmem:[#allocation3 + $0xa8] sm:$0xff] }
 0x3fe   : > { %v9212_v9 = vpack.c.b16 %v9184_v53, %v9183_v39  ;;  %v8879_v53 = vor.u32 %v8878_v49, %v8875_v25  ;;  %v9485_v39 = vld [vmem:[#allocation3 + $0x38] sm:$0x1]  ;;  %v8890_v26 = vrot.slane %v8889_v20, 4 }
 0x3ff   : > { %v9733_v2 = vpack.c.b16 %v9704_v21, %v9703_v36  ;;  %v9483_v36 = vld [vmem:[#allocation3 + $0x30] sm:$0xe]  ;;  %v9596_v25 = vrot.slane %v9485_v39, 5 }
 0x400   : > { %v8194_v10 = vpop.f32.mrf.mxu3  ;;  %v8880_v49 = vrot.slane %v8879_v53, 4 }
 0x401   : > { %v16354_v0 = vadd.f32 %v8194_v10, %v16118_v41  ;;  %v12797_v41 = vrot.slane %v7867_v14, 9 }
 0x402   : > { %v16356_v60 = vpop.f32.mrf.mxu1  ;;  %v16361_v16 = vpop.f32.mrf.mxu0 }
 0x403   : > { %17508 = vst [vmem:[#allocation31_spill] sm:$0xff] %v16354_v0  ;;  %v7699_v37 = vpop.f32.mrf.mxu2  ;;  %v8018_v7 = vsel %vm14094_vm11, %v12797_v41, %v8017_v61  ;;  %v8894_v61 = vrot.slane %v8892_v8, 5  ;;  %v13442_v41 = vld [vmem:[#allocation11 + $0x1a0] sm:$0xff]  ;;  %v12963_v8 = vrot.slane %v9483_v36, 9 }
 0x404   : > { %v16359_v32 = vadd.f32 %v7699_v37, %v16299_v62  ;;  %17509 = vst [vmem:[#allocation32_spill] sm:$0xff] %v16361_v16  ;;  %v9593_v62 = vrot.slane %v9484_v59, 5  ;;  %v8079_v14 = vunpack.c.l.b16 %v8018_v7  ;;  %v8744_v37 = vld [vmem:[#allocation3 + $0x4c] sm:$0xf]  ;;  %v8743_v7 = vld [vmem:[#allocation3 + $0x48] sm:$0xf]  ;;  %10193 = vmatpush.bf16.msra.mxu3 %v13442_v41 }
 0x405   : > { %9312 = vmatmul.bf16.gmra.mxu1 %v9212_v9  ;;  %v8895_v20 = vsel %vm14102_vm12, %v8890_v26, %v8894_v61  ;;  %v8910_v16 = vshrl.u32 %v8744_v37, 16  ;;  %v7872_v26 = vld [vmem:[#allocation3 + $0xb0] sm:$0x1] }
 0x406   : > { %v9595_v40 = vrot.slane %v9593_v62, 4  ;;  %v8098_v51 = vpack.c.b16 %v8080_v28, %v8079_v14  ;;  %v8885_v28 = vsel %vm14102_vm12, %v8880_v49, %v16351_v1  ;;  %v9594_v53 = vsel %vm14094_vm11, %v12963_v8, %v9593_v62  ;;  %v8745_v8 = vld [vmem:[#allocation3 + $0x50] sm:$0x1] }
 0x407   : > { %v9186_v39 = vunpack.c.l.b16 %v8895_v20  ;;  %v8897_v14 = vshrl.u32 %v8743_v7, 16  ;;  %v8912_v61 = vrot.slane %v8910_v16, 4  ;;  %v9705_v49 = vunpack.c.l.b16 %v9594_v53 }
 0x408   : > { %9829 = vmatmul.bf16.gmra.mxu2 %v9733_v2  ;;  %v8196_v10 = vpop.f32.mrf.mxu3  ;;  %v8024_v2 = vrot.slane %v7871_v47, 5  ;;  %v8900_v47 = vshll.u32 %v8743_v7, 16  ;;  %v8027_v62 = vrot.slane %v7872_v26, 5  ;;  %v9487_v7 = vld [vmem:[#allocation3 + $0x40] sm:$0xf]  ;;  %v8916_v26 = vshll.u32 %v8745_v8, 16 }
 0x409   : > { %v16369_v31 = vadd.f32 %v8196_v10, %v16146_v3  ;;  %v13450_v3 = vld [vmem:[#allocation11 + $0x1e0] sm:$0xff]  ;;  %v8906_v10 = vshll.u32 %v8744_v37, 16 }
 0x40a   : > { %v16371_v21 = vpop.f32.mrf.mxu1  ;;  %v16376_v59 = vpop.f32.mrf.mxu0  ;;  %10939 = vmatpush.bf16.msra.mxu0 %v13450_v3  ;;  %v7870_v3 = vld [vmem:[#allocation3 + $0xa8] sm:$0xe]  ;;  %v9486_v8 = vld [vmem:[#allocation3 + $0x3c] sm:$0xe] }
 0x40b   : > { %17510 = vst [vmem:[#allocation21_spill] sm:$0xff] %v16369_v31  ;;  %v7702_v17 = vpop.f32.mrf.mxu2  ;;  %v16387_v36 = vrot.slane %v8906_v10, 5  ;;  %v8899_v10 = vrot.slane %v8897_v14, 4  ;;  %v12798_v16 = vrot.slane %v7870_v3, 9 }
 0x40c   : > { %v16374_v9 = vadd.f32 %v7702_v17, %v16320_v45  ;;  %17511 = vst [vmem:[#allocation20_spill] sm:$0xff] %v16376_v59  ;;  %v9597_v45 = vsel %vm14094_vm11, %v9595_v40, %v9596_v25  ;;  %v8026_v17 = vrot.slane %v8024_v2, 4  ;;  %v9185_v25 = vunpack.c.l.b16 %v8885_v28  ;;  %v13441_v28 = vld [vmem:[#allocation11 + $0x198] sm:$0xff] }
 0x40d   : > { %8238 = vmatmul.bf16.gmra.mxu3 %v8098_v51  ;;  %8616 = vmatmul.bf16.gmra.mxu0 %v13395_v27  ;;  %v9706_v40 = vunpack.c.l.b16 %v9597_v45  ;;  %v8902_v59 = vrot.slane %v8900_v47, 5  ;;  %v8913_v45 = vor.u32 %v8912_v61, %v16387_v36  ;;  %v9488_v61 = vld [vmem:[#allocation3 + $0x44] sm:$0x1] }
 0x40e   : > { %v9213_v20 = vpack.c.b16 %v9186_v39, %v9185_v25  ;;  %v9600_v39 = vrot.slane %v9487_v7, 5  ;;  %10194 = vmatpush.bf16.msra.mxu3 %v13441_v28  ;;  %v13440_v25 = vld [vmem:[#allocation11 + $0x190] sm:$0xff]  ;;  %v8918_v28 = vrot.slane %v8916_v26, 5 }
 0x40f   : > { %v9734_v53 = vpack.c.b16 %v9706_v40, %v9705_v49  ;;  %v8903_v47 = vor.u32 %v8902_v59, %v8899_v10 }
 0x410   : > { %v8199_v37 = vpop.f32.mrf.mxu3 }
 0x411   : > { %v16390_v51 = vadd.f32 %v8199_v37, %v16180_v11  ;;  %v8028_v11 = vsel %vm14094_vm11, %v8026_v17, %v8027_v62  ;;  %v13449_v37 = vld [vmem:[#allocation11 + $0x1d8] sm:$0xff]  ;;  %v13448_v17 = vld [vmem:[#allocation11 + $0x1d0] sm:$0xff] }
 0x412   : > { %v16392_v41 = vpop.f32.mrf.mxu1  ;;  %10940 = vmatpush.bf16.msra.mxu0 %v13449_v37  ;;  %v8082_v14 = vunpack.c.l.b16 %v8028_v11  ;;  %v16407_v62 = vld [vmem:[#allocation3 + $0xb8] sm:$0xf]  ;;  %10195 = vmatpush.bf16.msra.mxu3 %v13440_v25  ;;  %v9603_v11 = vrot.slane %v9488_v61, 5  ;;  %v13447_v37 = vld [vmem:[#allocation11 + $0x1c8] sm:$0xff]  ;;  %v12964_v25 = vrot.slane %v9486_v8, 9 }
 0x413   : > { %17512 = vst [vmem:[#allocation26_spill] sm:$0xff] %v16390_v51  ;;  %v7704_v1 = vpop.f32.mrf.mxu2  ;;  %v16400_v51 = vpop.f32.mrf.mxu0 }
 0x414   : > { %v16395_v27 = vadd.f32 %v7704_v1, %v16335_v44  ;;  %17513 = vst [vmem:[#allocation23_spill] sm:$0xff] %v16400_v51  ;;  %v8025_v44 = vsel %vm14094_vm11, %v12798_v16, %v8024_v2  ;;  %v8914_v1 = vrot.slane %v8913_v45, 4  ;;  %v9602_v16 = vrot.slane %v9600_v39, 4 }
 0x415   : > { %9317 = vmatmul.bf16.gmra.mxu1 %v9213_v20  ;;  %v8081_v49 = vunpack.c.l.b16 %v8025_v44  ;;  %v8747_v20 = vld [vmem:[#allocation3 + $0x58] sm:$0xf]  ;;  %v8904_v45 = vrot.slane %v8903_v47, 4  ;;  %v8031_v51 = vrot.slane %v16407_v62, 5  ;;  %v9601_v61 = vsel %vm14094_vm11, %v12964_v25, %v9600_v39 }
 0x416   : > { %10941 = vmatpush.bf16.msra.mxu0 %v13448_v17  ;;  %v13396_v44 = vld [vmem:[#allocation3 + $0xb4] sm:$0xff]  ;;  %v8930_v31 = vshll.u32 %v8747_v20, 16  ;;  %v8934_v26 = vshrl.u32 %v8747_v20, 16  ;;  %v9707_v39 = vunpack.c.l.b16 %v9601_v61 }
 0x417   : > { %v8099_v10 = vpack.c.b16 %v8082_v14, %v8081_v49  ;;  %v8909_v14 = vsel %vm14102_vm12, %v8904_v45, %v16387_v36  ;;  %v13438_v47 = vld [vmem:[#allocation11 + $0x180] sm:$0xff] }
 0x418   : > { %9834 = vmatmul.bf16.gmra.mxu2 %v9734_v53  ;;  %v8201_v3 = vpop.f32.mrf.mxu3  ;;  %v13458_v53 = vld [vmem:[#allocation11 + $0x220] sm:$0xff] }
 0x419   : > { %v16405_v40 = vadd.f32 %v8201_v3, %v16211_v38  ;;  %v13439_v38 = vld [vmem:[#allocation11 + $0x188] sm:$0xff]  ;;  %v8919_v3 = vsel %vm14102_vm12, %v8914_v1, %v8918_v28  ;;  %11461 = vmatpush.bf16.msra.mxu1 %v13458_v53  ;;  %v7875_v49 = vld [vmem:[#allocation3 + $0xbc] sm:$0x1]  ;;  %v8033_v28 = vrot.slane %v8031_v51, 4  ;;  %v7873_v53 = vld [vmem:[#allocation3 + $0xb4] sm:$0xe] }
 0x41a   : > { %v16409_v7 = vpop.f32.mrf.mxu1  ;;  %10196 = vmatpush.bf16.msra.mxu3 %v13439_v38  ;;  %v9188_v1 = vunpack.c.l.b16 %v8919_v3  ;;  %10942 = vmatpush.bf16.msra.mxu0 %v13447_v37  ;;  %v13446_v20 = vld [vmem:[#allocation11 + $0x1c0] sm:$0xff]  ;;  %v9187_v38 = vunpack.c.l.b16 %v8909_v14  ;;  %v8034_v25 = vrot.slane %v7875_v49, 5 }
 0x41b   : > { %17514 = vst [vmem:[#allocation47_spill] sm:$0xff] %v16405_v40  ;;  %v7707_v2 = vpop.f32.mrf.mxu2  ;;  %v8746_v40 = vld [vmem:[#allocation3 + $0x54] sm:$0xf]  ;;  %v16422_v17 = vpop.f32.mrf.mxu0  ;;  %v10375_v37 = vld [vmem:[#allocation3 + $0x18] sm:$0xf] }
 0x41c   : > { %v16412_v59 = vadd.f32 %v7707_v2, %v16356_v60  ;;  %v9604_v60 = vsel %vm14094_vm11, %v9602_v16, %v9603_v11  ;;  %17515 = vst [vmem:[#allocation25_spill] sm:$0xff] %v16422_v17  ;;  %v8921_v62 = vshrl.u32 %v8746_v40, 16  ;;  %v10376_v2 = vld [vmem:[#allocation3 + $0x1c] sm:$0xf]  ;;  %v8924_v16 = vshll.u32 %v8746_v40, 16 }
 0x41d   : > { %8243 = vmatmul.bf16.gmra.mxu3 %v8099_v10  ;;  %8621 = vmatmul.bf16.gmra.mxu0 %v13396_v44  ;;  %v16426_v10 = vrot.slane %v8930_v31, 5  ;;  %v8936_v11 = vrot.slane %v8934_v26, 4  ;;  %v9708_v45 = vunpack.c.l.b16 %v9604_v60  ;;  %v10433_v17 = vshll.u32 %v10376_v2, 16  ;;  %v9490_v40 = vld [vmem:[#allocation3 + $0x4c] sm:$0xf] }
 0x41e   : > { %10197 = vmatpush.bf16.msra.mxu3 %v13438_v47  ;;  %v9214_v31 = vpack.c.b16 %v9188_v1, %v9187_v38  ;;  %v8748_v26 = vld [vmem:[#allocation3 + $0x5c] sm:$0x1]  ;;  %v8923_v0 = vrot.slane %v8921_v62, 4  ;;  %10943 = vmatpush.bf16.msra.mxu0 %v13446_v20  ;;  %v12799_v60 = vrot.slane %v7873_v53, 9  ;;  %v8035_v14 = vsel %vm14094_vm11, %v8033_v28, %v8034_v25 }
 0x41f   : > { %v8926_v61 = vrot.slane %v8924_v16, 5  ;;  %v9735_v49 = vpack.c.b16 %v9708_v45, %v9707_v39  ;;  %v10424_v47 = vshrl.u32 %v10375_v37, 16  ;;  %v8940_v1 = vshll.u32 %v8748_v26, 16 }
 0x420   : > { %v8204_v8 = vpop.f32.mrf.mxu3  ;;  %v10427_v38 = vshll.u32 %v10375_v37, 16  ;;  %v8084_v62 = vunpack.c.l.b16 %v8035_v14  ;;  %v16441_v20 = vrot.slane %v10433_v17, 5  ;;  %v10377_v14 = vld [vmem:[#allocation3 + $0x20] sm:$0x1] }
 0x421   : > { %v16429_v36 = vadd.f32 %v8204_v8, %v16228_v15  ;;  %v10437_v15 = vshrl.u32 %v10376_v2, 16  ;;  %v8937_v8 = vor.u32 %v8936_v11, %v16426_v10  ;;  %v8927_v28 = vor.u32 %v8926_v61, %v8923_v0 }
 0x422   : > { %v16431_v3 = vpop.f32.mrf.mxu1  ;;  %v10426_v26 = vrot.slane %v10424_v47, 4  ;;  %v10429_v17 = vrot.slane %v10427_v38, 5  ;;  %v8749_v47 = vld [vmem:[#allocation3 + $0x60] sm:$0xf] }
 0x423   : > { %17516 = vst [vmem:[#allocation22_spill] sm:$0xff] %v16429_v36  ;;  %v7709_v44 = vpop.f32.mrf.mxu2  ;;  %v10439_v2 = vrot.slane %v10437_v15, 4  ;;  %v9491_v36 = vld [vmem:[#allocation3 + $0x50] sm:$0x1]  ;;  %v8938_v16 = vrot.slane %v8937_v8, 4  ;;  %v16443_v25 = vpop.f32.mrf.mxu0 }
 0x424   : > { %v16434_v35 = vadd.f32 %v7709_v44, %v16371_v21  ;;  %v8032_v21 = vsel %vm14094_vm11, %v12799_v60, %v8031_v51  ;;  %v9607_v44 = vrot.slane %v9490_v40, 5  ;;  %17517 = vst [vmem:[#allocation34_spill] sm:$0xff] %v16443_v25  ;;  %v8942_v40 = vrot.slane %v8940_v1, 5  ;;  %v8750_v8 = vld [vmem:[#allocation3 + $0x64] sm:$0xf] }
 0x425   : > { %9322 = vmatmul.bf16.gmra.mxu1 %v9214_v31  ;;  %v8083_v45 = vunpack.c.l.b16 %v8032_v21  ;;  %v9489_v31 = vld [vmem:[#allocation3 + $0x48] sm:$0xe]  ;;  %v9610_v0 = vrot.slane %v9491_v36, 5  ;;  %v10440_v61 = vor.u32 %v10439_v2, %v16441_v20  ;;  %v8958_v25 = vshrl.u32 %v8750_v8, 16 }
 0x426   : > { %v9609_v37 = vrot.slane %v9607_v44, 4  ;;  %v8943_v21 = vsel %vm14102_vm12, %v8938_v16, %v8942_v40  ;;  %v12965_v1 = vrot.slane %v9489_v31, 9  ;;  %v10430_v38 = vor.u32 %v10429_v17, %v10426_v26 }
 0x427   : > { %v8100_v60 = vpack.c.b16 %v8084_v62, %v8083_v45  ;;  %v10443_v62 = vshll.u32 %v10377_v14, 16  ;;  %v10441_v16 = vrot.slane %v10440_v61, 4  ;;  %v10379_v45 = vld [vmem:[#allocation3 + $0x28] sm:$0xf]  ;;  %v8945_v40 = vshrl.u32 %v8749_v47, 16 }
 0x428   : > { %9839 = vmatmul.bf16.gmra.mxu2 %v9735_v49  ;;  %v8206_v53 = vpop.f32.mrf.mxu3  ;;  %v8928_v49 = vrot.slane %v8927_v28, 4  ;;  %v9608_v2 = vsel %vm14094_vm11, %v12965_v1, %v9607_v44  ;;  %v9190_v28 = vunpack.c.l.b16 %v8943_v21  ;;  %v8948_v31 = vshll.u32 %v8749_v47, 16  ;;  %v10378_v44 = vld [vmem:[#allocation3 + $0x24] sm:$0xf]  ;;  %v8751_v47 = vld [vmem:[#allocation3 + $0x68] sm:$0x1] }
 0x429   : > { %v16446_v11 = vadd.f32 %v8206_v53, %v16251_v19  ;;  %v13397_v19 = vld [vmem:[#allocation3 + $0xc0] sm:$0xff]  ;;  %v8954_v53 = vshll.u32 %v8750_v8, 16  ;;  %v8960_v8 = vrot.slane %v8958_v25, 4  ;;  %v10431_v17 = vrot.slane %v10430_v38, 4  ;;  %v9493_v25 = vld [vmem:[#allocation3 + $0x58] sm:$0xf] }
 0x42a   : > { %v16448_v51 = vpop.f32.mrf.mxu1  ;;  %v8933_v36 = vsel %vm14102_vm12, %v8928_v49, %v16426_v10  ;;  %v10445_v14 = vrot.slane %v10443_v62, 5  ;;  %v10457_v49 = vshll.u32 %v10379_v45, 16 }
 0x42b   : > { %17518 = vst [vmem:[#allocation35_spill] sm:$0xff] %v16446_v11  ;;  %v7712_v39 = vpop.f32.mrf.mxu2  ;;  %v16470_v61 = vpop.f32.mrf.mxu0 }
 0x42c   : > { %v16451_v15 = vadd.f32 %v7712_v39, %v16392_v41  ;;  %v9611_v41 = vsel %vm14094_vm11, %v9609_v37, %v9610_v0  ;;  %17520 = vst [vmem:[#allocation37_spill] sm:$0xff] %v16470_v61 }
 0x42d   : > { %8248 = vmatmul.bf16.gmra.mxu3 %v8100_v60  ;;  %8626 = vmatmul.bf16.gmra.mxu0 %v13397_v19  ;;  %v16463_v60 = vrot.slane %v8954_v53, 5  ;;  %v9710_v0 = vunpack.c.l.b16 %v9611_v41  ;;  %v9189_v19 = vunpack.c.l.b16 %v8933_v36  ;;  %v9709_v53 = vunpack.c.l.b16 %v9608_v2 }
 0x42e   : > { %v10446_v41 = vsel %vm14102_vm12, %v10441_v16, %v10445_v14  ;;  %v8947_v36 = vrot.slane %v8945_v40, 4  ;;  %v8964_v2 = vshll.u32 %v8751_v47, 16  ;;  %v9494_v40 = vld [vmem:[#allocation3 + $0x5c] sm:$0x1] }
 0x42f   : > { %v9215_v1 = vpack.c.b16 %v9190_v28, %v9189_v19  ;;  %v8961_v38 = vor.u32 %v8960_v8, %v16463_v60  ;;  %v9736_v62 = vpack.c.b16 %v9710_v0, %v9709_v53  ;;  %v10451_v28 = vshll.u32 %v10378_v44, 16  ;;  %v13422_v0 = vld [vmem:[#allocation3 + $0x18] sm:$0xff] }
 0x430   : > { %v8209_v39 = vpop.f32.mrf.mxu3  ;;  %v10825_v19 = vunpack.c.l.b16 %v10446_v41  ;;  %v9617_v41 = vrot.slane %v9494_v40, 5 }
 0x431   : > { %v16466_v37 = vadd.f32 %v8209_v39, %v16266_v22  ;;  %v10461_v22 = vshrl.u32 %v10379_v45, 16  ;;  %v8950_v39 = vrot.slane %v8948_v31, 5  ;;  %v16481_v45 = vrot.slane %v10457_v49, 5 }
 0x432   : > { %v16468_v26 = vpop.f32.mrf.mxu1  ;;  %v8962_v14 = vrot.slane %v8961_v38, 4  ;;  %v10453_v47 = vrot.slane %v10451_v28, 5  ;;  %v13457_v38 = vld [vmem:[#allocation11 + $0x218] sm:$0xff] }
 0x433   : > { %17519 = vst [vmem:[#allocation33_spill] sm:$0xff] %v16466_v37  ;;  %v7714_v10 = vpop.f32.mrf.mxu2  ;;  %v10448_v37 = vshrl.u32 %v10378_v44, 16  ;;  %v10463_v61 = vrot.slane %v10461_v22, 4  ;;  %v8951_v31 = vor.u32 %v8950_v39, %v8947_v36  ;;  %v8966_v44 = vrot.slane %v8964_v2, 5  ;;  %v10380_v36 = vld [vmem:[#allocation3 + $0x2c] sm:$0x1]  ;;  %v16494_v12 = vpop.f32.mrf.mxu0  ;;  %11462 = vmatpush.bf16.msra.mxu1 %v13457_v38 }
 0x434   : > { %v16473_v21 = vadd.f32 %v7714_v10, %v16409_v7  ;;  %v10436_v7 = vsel %vm14102_vm12, %v10431_v17, %v16441_v20  ;;  %v9614_v10 = vrot.slane %v9493_v25, 5  ;;  %v9492_v20 = vld [vmem:[#allocation3 + $0x54] sm:$0xe]  ;;  %v8752_v2 = vld [vmem:[#allocation3 + $0x6c] sm:$0xf] }
 0x435   : > { %9327 = vmatmul.bf16.gmra.mxu1 %v9215_v1  ;;  %v10824_v53 = vunpack.c.l.b16 %v10436_v7  ;;  %v10450_v25 = vrot.slane %v10448_v37, 4  ;;  %v10464_v39 = vor.u32 %v10463_v61, %v16481_v45  ;;  %v8967_v7 = vsel %vm14102_vm12, %v8962_v14, %v8966_v44 }
 0x436   : > { %v9616_v17 = vrot.slane %v9614_v10, 4  ;;  %v12966_v37 = vrot.slane %v9492_v20, 9  ;;  %v8972_v20 = vshll.u32 %v8752_v2, 16 }
 0x437   : > { %v10856_v22 = vpack.c.b16 %v10825_v19, %v10824_v53  ;;  %v10454_v28 = vor.u32 %v10453_v47, %v10450_v25  ;;  %v10467_v19 = vshll.u32 %v10380_v36, 16  ;;  %v10465_v14 = vrot.slane %v10464_v39, 4  ;;  %v10382_v53 = vld [vmem:[#allocation3 + $0x34] sm:$0xf] }
 0x438   : > { %9844 = vmatmul.bf16.gmra.mxu2 %v9736_v62  ;;  %v8211_v16 = vpop.f32.mrf.mxu3  ;;  %v8952_v62 = vrot.slane %v8951_v31, 4  ;;  %v9615_v40 = vsel %vm14094_vm11, %v12966_v37, %v9614_v10  ;;  %v9192_v31 = vunpack.c.l.b16 %v8967_v7  ;;  %v10381_v10 = vld [vmem:[#allocation3 + $0x30] sm:$0xf]  ;;  %v10481_v38 = vshll.u32 %v10382_v53, 16  ;;  %v8754_v37 = vld [vmem:[#allocation3 + $0x74] sm:$0x1] }
 0x439   : > { %v16484_v8 = vadd.f32 %v8211_v16, %v16287_v4  ;;  %v8753_v4 = vld [vmem:[#allocation3 + $0x70] sm:$0xf]  ;;  %v10455_v47 = vrot.slane %v10454_v28, 4  ;;  %v10469_v36 = vrot.slane %v10467_v19, 5  ;;  %v8988_v19 = vshll.u32 %v8754_v37, 16 }
 0x43a   : > { %v16486_v11 = vpop.f32.mrf.mxu1  ;;  %v8978_v16 = vshll.u32 %v8753_v4, 16  ;;  %v8957_v61 = vsel %vm14102_vm12, %v8952_v62, %v16463_v60  ;;  %v9711_v62 = vunpack.c.l.b16 %v9615_v40  ;;  %v10472_v40 = vshrl.u32 %v10381_v10, 16 }
 0x43b   : > { %17521 = vst [vmem:[#allocation38_spill] sm:$0xff] %v16484_v8  ;;  %v7717_v1 = vpop.f32.mrf.mxu2  ;;  %v8982_v8 = vshrl.u32 %v8753_v4, 16  ;;  %v9191_v4 = vunpack.c.l.b16 %v8957_v61  ;;  %v10460_v28 = vsel %vm14102_vm12, %v10455_v47, %v16481_v45  ;;  %v8990_v37 = vrot.slane %v8988_v19, 5 }
 0x43c   : > { %v16489_v49 = vadd.f32 %v7717_v1, %v16431_v3  ;;  %v9618_v3 = vsel %vm14094_vm11, %v9616_v17, %v9617_v41  ;;  %v8969_v1 = vshrl.u32 %v8752_v2, 16  ;;  %v16503_v44 = vrot.slane %v8978_v16, 5  ;;  %v9496_v16 = vld [vmem:[#allocation3 + $0x64] sm:$0xf] }
 0x43d   : > { %10198 = vmatmul.bf16.vlgmr.msra.gmra.mxu3 %v13422_v0  ;;  %10944 = vmatmul.bf16.vlgmr.msra.gmra.mxu0 %v10856_v22  ;;  %v8984_v22 = vrot.slane %v8982_v8, 4  ;;  %v9712_v41 = vunpack.c.l.b16 %v9618_v3  ;;  %v9216_v7 = vpack.c.b16 %v9192_v31, %v9191_v4  ;;  %v10485_v8 = vshrl.u32 %v10382_v53, 16  ;;  %v16519_v4 = vpop.f32.mrf.mxu0 }
 0x43e   : > { %v8971_v2 = vrot.slane %v8969_v1, 4  ;;  %v8974_v3 = vrot.slane %v8972_v20, 5  ;;  %v10475_v31 = vshll.u32 %v10381_v10, 16  ;;  %17523 = vst [vmem:[#allocation40_spill] sm:$0xff] %v16519_v4  ;;  %v9497_v20 = vld [vmem:[#allocation3 + $0x68] sm:$0x1]  ;;  %v10826_v45 = vunpack.c.l.b16 %v10460_v28 }
 0x43f   : > { %v8985_v61 = vor.u32 %v8984_v22, %v16503_v44  ;;  %v9495_v10 = vld [vmem:[#allocation3 + $0x60] sm:$0xe]  ;;  %v9624_v4 = vrot.slane %v9497_v20, 5  ;;  %v7765_v19 = vadd.f32 %v15892_v34, %v15816_v50 }
 0x440   : > { %v8214_v0 = vpop.f32.mrf.mxu3  ;;  %v8975_v22 = vor.u32 %v8974_v3, %v8971_v2  ;;  %v10383_v2 = vld [vmem:[#allocation3 + $0x38] sm:$0x1] }
 0x441   : > { %v16506_v17 = vadd.f32 %v8214_v0, %v16302_v58  ;;  %v10470_v58 = vsel %vm14102_vm12, %v10465_v14, %v10469_v36  ;;  %v9737_v0 = vpack.c.b16 %v9712_v41, %v9711_v62  ;;  %v10487_v14 = vrot.slane %v10485_v8, 4  ;;  %v13423_v62 = vld [vmem:[#allocation3 + $0x24] sm:$0xff] }
 0x442   : > { %v16508_v25 = vpop.f32.mrf.mxu1  ;;  %v10827_v53 = vunpack.c.l.b16 %v10470_v58  ;;  %v8986_v41 = vrot.slane %v8985_v61, 4  ;;  %v10477_v58 = vrot.slane %v10475_v31, 5  ;;  %v13469_v61 = vld [vmem:[#allocation13 + $0x38] sm:$0xff]  ;;  %v10491_v20 = vshll.u32 %v10383_v2, 16 }
 0x443   : > { %17522 = vst [vmem:[#allocation36_spill] sm:$0xff] %v16506_v17  ;;  %v7719_v60 = vpop.f32.mrf.mxu2  ;;  %11863 = vmatpush.bf16.msra.mxu2 %v13469_v61 }
 0x444   : > { %v16511_v39 = vadd.f32 %v7719_v60, %v16448_v51  ;;  %v9621_v51 = vrot.slane %v9496_v16, 5  ;;  %v16521_v60 = vrot.slane %v10481_v38, 5  ;;  %v10857_v8 = vpack.c.b16 %v10827_v53, %v10826_v45 }
 0x445   : > { %9332 = vmatmul.bf16.gmra.mxu1 %v9216_v7  ;;  %v8991_v28 = vsel %vm14102_vm12, %v8986_v41, %v8990_v37 }
 0x446   : > { %v9623_v16 = vrot.slane %v9621_v51, 4  ;;  %v10488_v3 = vor.u32 %v10487_v14, %v16521_v60  ;;  %v9194_v50 = vunpack.c.l.b16 %v8991_v28 }
 0x448   : > { %9849 = vmatmul.bf16.gmra.mxu2 %v9737_v0  ;;  %v8216_v1 = vpop.f32.mrf.mxu3  ;;  %v10474_v0 = vrot.slane %v10472_v40, 4  ;;  %v12967_v40 = vrot.slane %v9495_v10, 9  ;;  %v9625_v31 = vsel %vm14094_vm11, %v9623_v16, %v9624_v4  ;;  %v10489_v34 = vrot.slane %v10488_v3, 4  ;;  %v16546_v16 = vpop.f32.mrf.mxu0 }
 0x449   : > { %v16524_v36 = vadd.f32 %v8216_v1, %v16323_v24  ;;  %v8756_v24 = vld [vmem:[#allocation3 + $0x7c] sm:$0xf]  ;;  %v8976_v1 = vrot.slane %v8975_v22, 4  ;;  %v8287_v22 = vadd.f32 %v16220_v54, %v7765_v19  ;;  %v8664_v54 = vadd.f32 %v16182_v5, %v16201_v46  ;;  %v9499_v19 = vld [vmem:[#allocation3 + $0x70] sm:$0xf] }
 0x44a   : > { %v16526_v7 = vpop.f32.mrf.mxu1  ;;  %v9006_v17 = vshrl.u32 %v8756_v24, 16  ;;  %v10478_v14 = vor.u32 %v10477_v58, %v10474_v0  ;;  %v9622_v41 = vsel %vm14094_vm11, %v12967_v40, %v9621_v51  ;;  %v9714_v0 = vunpack.c.l.b16 %v9625_v31  ;;  %v8757_v40 = vld [vmem:[#allocation3 + $0x80] sm:$0x1] }
 0x44b   : > { %17524 = vst [vmem:[#allocation41_spill] sm:$0xff] %v16524_v36  ;;  %v7722_v47 = vpop.f32.mrf.mxu2  ;;  %v9002_v36 = vshll.u32 %v8756_v24, 16  ;;  %v8981_v53 = vsel %vm14102_vm12, %v8976_v1, %v16503_v44  ;;  %v10493_v3 = vrot.slane %v10491_v20, 5  ;;  %v10384_v24 = vld [vmem:[#allocation3 + $0x3c] sm:$0xf] }
 0x44c   : > { %v16529_v38 = vadd.f32 %v7722_v47, %v16468_v26  ;;  %v8755_v26 = vld [vmem:[#allocation3 + $0x78] sm:$0xf]  ;;  %v9008_v4 = vrot.slane %v9006_v17, 4  ;;  %v9193_v58 = vunpack.c.l.b16 %v8981_v53  ;;  %v10479_v2 = vrot.slane %v10478_v14, 4 }
 0x44d   : > { %10203 = vmatmul.bf16.gmra.mxu3 %v13423_v62  ;;  %10949 = vmatmul.bf16.gmra.mxu0 %v10857_v8  ;;  %v10385_v62 = vld [vmem:[#allocation3 + $0x40] sm:$0xf]  ;;  %v8993_v47 = vshrl.u32 %v8755_v26, 16  ;;  %v8996_v10 = vshll.u32 %v8755_v26, 16  ;;  %v16544_v37 = vrot.slane %v9002_v36, 5  ;;  %v9713_v17 = vunpack.c.l.b16 %v9622_v41 }
 0x44e   : > { %v10505_v61 = vshll.u32 %v10385_v62, 16  ;;  %v10509_v1 = vshrl.u32 %v10385_v62, 16  ;;  %v10494_v5 = vsel %vm14102_vm12, %v10489_v34, %v10493_v3  ;;  %v10496_v14 = vshrl.u32 %v10384_v24, 16  ;;  %v13424_v3 = vld [vmem:[#allocation3 + $0x30] sm:$0xff] }
 0x44f   : > { %v8995_v46 = vrot.slane %v8993_v47, 4  ;;  %v8998_v26 = vrot.slane %v8996_v10, 5  ;;  %v9009_v31 = vor.u32 %v9008_v4, %v16544_v37  ;;  %v9738_v53 = vpack.c.b16 %v9714_v0, %v9713_v17  ;;  %v9500_v47 = vld [vmem:[#allocation3 + $0x74] sm:$0x1] }
 0x450   : > { %v8219_v45 = vpop.f32.mrf.mxu3  ;;  %v10499_v20 = vshll.u32 %v10384_v24, 16  ;;  %v9628_v41 = vrot.slane %v9499_v19, 5  ;;  %v9012_v62 = vshll.u32 %v8757_v40, 16  ;;  %v8665_v0 = vadd.f32 %v16213_v56, %v8287_v22  ;;  %v9498_v24 = vld [vmem:[#allocation3 + $0x6c] sm:$0xe]  ;;  %v16571_v19 = vpop.f32.mrf.mxu0 }
 0x451   : > { %v16549_v44 = vadd.f32 %v8219_v45, %v16338_v42  ;;  %v9217_v42 = vpack.c.b16 %v9194_v50, %v9193_v58  ;;  %v16564_v50 = vrot.slane %v10505_v61, 5  ;;  %v10511_v45 = vrot.slane %v10509_v1, 4  ;;  %v10386_v22 = vld [vmem:[#allocation3 + $0x44] sm:$0x1] }
 0x452   : > { %v9298_v8 = vpop.f32.mrf.mxu1  ;;  %v8999_v10 = vor.u32 %v8998_v26, %v8995_v46  ;;  %v9010_v58 = vrot.slane %v9009_v31, 4  ;;  %v9630_v61 = vrot.slane %v9628_v41, 4  ;;  %v9014_v17 = vrot.slane %v9012_v62, 5  ;;  %v8759_v46 = vld [vmem:[#allocation3 + $0x88] sm:$0xf] }
 0x453   : > { %v7724_v51 = vpop.f32.mrf.mxu2  ;;  %v16556_v28 = vadd.f32 %v9298_v8, %v8664_v54  ;;  %v10829_v54 = vunpack.c.l.b16 %v10494_v5  ;;  %v10501_v1 = vrot.slane %v10499_v20, 5  ;;  %v9631_v56 = vrot.slane %v9500_v47, 5  ;;  %v13456_v26 = vld [vmem:[#allocation11 + $0x210] sm:$0xff] }
 0x454   : > { %v16554_v36 = vadd.f32 %v7724_v51, %v16486_v11  ;;  %v10484_v11 = vsel %vm14102_vm12, %v10479_v2, %v16521_v60  ;;  %v10498_v60 = vrot.slane %v10496_v14, 4  ;;  %v9000_v31 = vrot.slane %v8999_v10, 4  ;;  %v10387_v20 = vld [vmem:[#allocation3 + $0x48] sm:$0xf]  ;;  %11463 = vmatpush.bf16.msra.mxu1 %v13456_v26 }
 0x455   : > { %9337 = vmatmul.bf16.gmra.mxu1 %v9217_v42  ;;  %v10828_v51 = vunpack.c.l.b16 %v10484_v11  ;;  %v10512_v42 = vor.u32 %v10511_v45, %v16564_v50  ;;  %v9026_v11 = vshll.u32 %v8759_v46, 16  ;;  %v9030_v14 = vshrl.u32 %v8759_v46, 16  ;;  %v8758_v45 = vld [vmem:[#allocation3 + $0x84] sm:$0xf] }
 0x456   : > { %v12968_v62 = vrot.slane %v9498_v24, 9  ;;  %v10515_v47 = vshll.u32 %v10386_v22, 16  ;;  %v9020_v24 = vshll.u32 %v8758_v45, 16 }
 0x457   : > { %v10858_v5 = vpack.c.b16 %v10829_v54, %v10828_v51  ;;  %v9005_v54 = vsel %vm14102_vm12, %v9000_v31, %v16544_v37  ;;  %v10388_v51 = vld [vmem:[#allocation3 + $0x4c] sm:$0xf]  ;;  %v8666_v37 = vadd.f32 %v16230_v55, %v16246_v18 }
 0x458   : > { %9854 = vmatmul.bf16.gmra.mxu2 %v9738_v53  ;;  %v8221_v34 = vpop.f32.mrf.mxu3  ;;  %v9015_v53 = vsel %vm14102_vm12, %v9010_v58, %v9014_v17  ;;  %v9629_v10 = vsel %vm14094_vm11, %v12968_v62, %v9628_v41  ;;  %v16587_v17 = vrot.slane %v9026_v11, 5  ;;  %v10529_v46 = vshll.u32 %v10388_v51, 16  ;;  %v8760_v62 = vld [vmem:[#allocation3 + $0x8c] sm:$0x1] }
 0x459   : > { %v16567_v4 = vadd.f32 %v8221_v34, %v16359_v32  ;;  %v10502_v34 = vor.u32 %v10501_v1, %v10498_v60  ;;  %v9196_v58 = vunpack.c.l.b16 %v9015_v53  ;;  %v9195_v60 = vunpack.c.l.b16 %v9005_v54  ;;  %v16602_v54 = vpop.f32.mrf.mxu0 }
 0x45a   : > { %v9300_v2 = vpop.f32.mrf.mxu1  ;;  %v10533_v26 = vshrl.u32 %v10388_v51, 16  ;;  %v9715_v53 = vunpack.c.l.b16 %v9629_v10  ;;  %v9022_v18 = vrot.slane %v9020_v24, 5  ;;  %v16607_v51 = vrot.slane %v10529_v46, 5  ;;  %v9501_v46 = vld [vmem:[#allocation3 + $0x78] sm:$0xe] }
 0x45b   : > { %v7727_v8 = vpop.f32.mrf.mxu2  ;;  %v16576_v32 = vadd.f32 %v9300_v2, %v8665_v0  ;;  %v10513_v0 = vrot.slane %v10512_v42, 4  ;;  %v10503_v22 = vrot.slane %v10502_v34, 4  ;;  %v10517_v42 = vrot.slane %v10515_v47, 5 }
 0x45c   : > { %v16574_v40 = vadd.f32 %v7727_v8, %v16508_v25  ;;  %v9632_v25 = vsel %vm14094_vm11, %v9630_v61, %v9631_v56  ;;  %v10520_v8 = vshrl.u32 %v10387_v20, 16  ;;  %v10523_v47 = vshll.u32 %v10387_v20, 16 }
 0x45d   : > { %10208 = vmatmul.bf16.gmra.mxu3 %v13424_v3  ;;  %10954 = vmatmul.bf16.gmra.mxu0 %v10858_v5  ;;  %v9017_v3 = vshrl.u32 %v8758_v45, 16  ;;  %v9032_v5 = vrot.slane %v9030_v14, 4  ;;  %v9716_v56 = vunpack.c.l.b16 %v9632_v25  ;;  %v9218_v14 = vpack.c.b16 %v9196_v58, %v9195_v60 }
 0x45e   : > { %v10518_v45 = vsel %vm14102_vm12, %v10513_v0, %v10517_v42  ;;  %v9036_v58 = vshll.u32 %v8760_v62, 16 }
 0x45f   : > { %v9019_v55 = vrot.slane %v9017_v3, 4  ;;  %v9033_v25 = vor.u32 %v9032_v5, %v16587_v17  ;;  %v9739_v34 = vpack.c.b16 %v9716_v56, %v9715_v53  ;;  %v10831_v0 = vunpack.c.l.b16 %v10518_v45  ;;  %v10389_v3 = vld [vmem:[#allocation3 + $0x50] sm:$0x1] }
 0x460   : > { %v8224_v2 = vpop.f32.mrf.mxu3  ;;  %v9038_v53 = vrot.slane %v9036_v58, 5  ;;  %v8761_v58 = vld [vmem:[#allocation3 + $0x90] sm:$0xf] }
 0x461   : > { %v16590_v61 = vadd.f32 %v8224_v2, %v16374_v9  ;;  %v9502_v9 = vld [vmem:[#allocation3 + $0x7c] sm:$0xf]  ;;  %v10535_v2 = vrot.slane %v10533_v26, 4  ;;  %v9023_v5 = vor.u32 %v9022_v18, %v9019_v55  ;;  %v9034_v60 = vrot.slane %v9033_v25, 4  ;;  %v8762_v18 = vld [vmem:[#allocation3 + $0x94] sm:$0xf] }
 0x462   : > { %v9303_v41 = vpop.f32.mrf.mxu1  ;;  %v9635_v10 = vrot.slane %v9502_v9, 5  ;;  %v10539_v9 = vshll.u32 %v10389_v3, 16 }
 0x463   : > { %v7729_v1 = vpop.f32.mrf.mxu2  ;;  %v16597_v11 = vadd.f32 %v9303_v41, %v8666_v37  ;;  %v9503_v37 = vld [vmem:[#allocation3 + $0x80] sm:$0x1]  ;;  %v10525_v41 = vrot.slane %v10523_v47, 5  ;;  %v9039_v25 = vsel %vm14102_vm12, %v9034_v60, %v9038_v53  ;;  %v12969_v47 = vrot.slane %v9501_v46, 9 }
 0x464   : > { %v16595_v31 = vadd.f32 %v7729_v1, %v16526_v7  ;;  %v10508_v7 = vsel %vm14102_vm12, %v10503_v22, %v16564_v50  ;;  %v10522_v1 = vrot.slane %v10520_v8, 4  ;;  %v8667_v50 = vadd.f32 %v16253_v6, %v16261_v23  ;;  %v13468_v6 = vld [vmem:[#allocation13 + $0x30] sm:$0xff] }
 0x465   : > { %9342 = vmatmul.bf16.gmra.mxu1 %v9218_v14  ;;  %v10830_v20 = vunpack.c.l.b16 %v10508_v7  ;;  %v9637_v26 = vrot.slane %v9635_v10, 4  ;;  %v10536_v14 = vor.u32 %v10535_v2, %v16607_v51  ;;  %v9638_v55 = vrot.slane %v9503_v37, 5  ;;  %11864 = vmatpush.bf16.msra.mxu2 %v13468_v6 }
 0x466   : > { %v9024_v23 = vrot.slane %v9023_v5, 4  ;;  %v9054_v7 = vshrl.u32 %v8762_v18, 16  ;;  %v9636_v37 = vsel %vm14094_vm11, %v12969_v47, %v9635_v10  ;;  %v9198_v5 = vunpack.c.l.b16 %v9039_v25 }
 0x467   : > { %v10859_v45 = vpack.c.b16 %v10831_v0, %v10830_v20  ;;  %v10526_v0 = vor.u32 %v10525_v41, %v10522_v1  ;;  %v10537_v3 = vrot.slane %v10536_v14, 4  ;;  %v10541_v60 = vrot.slane %v10539_v9, 5 }
 0x468   : > { %9859 = vmatmul.bf16.gmra.mxu2 %v9739_v34  ;;  %v8226_v24 = vpop.f32.mrf.mxu3  ;;  %v9050_v34 = vshll.u32 %v8762_v18, 16  ;;  %v9029_v2 = vsel %vm14102_vm12, %v9024_v23, %v16587_v17  ;;  %v8668_v1 = vadd.f32 %v16268_v63, %v16282_v30  ;;  %v9717_v23 = vunpack.c.l.b16 %v9636_v37 }
 0x469   : > { %v16610_v56 = vadd.f32 %v8226_v24, %v16395_v27  ;;  %v13425_v27 = vld [vmem:[#allocation3 + $0x3c] sm:$0xff]  ;;  %v16627_v24 = vpop.f32.mrf.mxu0  ;;  %v9197_v41 = vunpack.c.l.b16 %v9029_v2  ;;  %v10527_v10 = vrot.slane %v10526_v0, 4  ;;  %v10542_v9 = vsel %vm14102_vm12, %v10537_v3, %v10541_v60 }
 0x46a   : > { %v9305_v42 = vpop.f32.mrf.mxu1  ;;  %v16631_v46 = vrot.slane %v9050_v34, 5  ;;  %v9505_v34 = vld [vmem:[#allocation3 + $0x88] sm:$0xf]  ;;  %v10833_v2 = vunpack.c.l.b16 %v10542_v9 }
 0x46b   : > { %v9820_v22 = vpop.f32.mrf.mxu2  ;;  %v16618_v8 = vadd.f32 %v9305_v42, %v8667_v50  ;;  %v10391_v50 = vld [vmem:[#allocation3 + $0x58] sm:$0xf]  ;;  %v9044_v42 = vshll.u32 %v8761_v58, 16  ;;  %v9219_v25 = vpack.c.b16 %v9198_v5, %v9197_v41  ;;  %v10532_v63 = vsel %vm14102_vm12, %v10527_v10, %v16607_v51 }
 0x46c   : > { %v16616_v62 = vadd.f32 %v9820_v22, %v16556_v28  ;;  %v9639_v28 = vsel %vm14094_vm11, %v9637_v26, %v9638_v55  ;;  %v9041_v22 = vshrl.u32 %v8761_v58, 16  ;;  %v9056_v26 = vrot.slane %v9054_v7, 4  ;;  %v8763_v7 = vld [vmem:[#allocation3 + $0x98] sm:$0x1] }
 0x46d   : > { %10213 = vmatmul.bf16.gmra.mxu3 %v13425_v27  ;;  %10959 = vmatmul.bf16.gmra.mxu0 %v10859_v45  ;;  %v9718_v17 = vunpack.c.l.b16 %v9639_v28  ;;  %v10390_v45 = vld [vmem:[#allocation3 + $0x54] sm:$0xf]  ;;  %v10553_v55 = vshll.u32 %v10391_v50, 16  ;;  %v10557_v18 = vshrl.u32 %v10391_v50, 16  ;;  %v9046_v47 = vrot.slane %v9044_v42, 5 }
 0x46e   : > { %v9043_v30 = vrot.slane %v9041_v22, 4  ;;  %v9057_v58 = vor.u32 %v9056_v26, %v16631_v46  ;;  %v10544_v0 = vshrl.u32 %v10390_v45, 16  ;;  %v9642_v3 = vrot.slane %v9505_v34, 5  ;;  %v10392_v22 = vld [vmem:[#allocation3 + $0x5c] sm:$0x1] }
 0x46f   : > { %v9740_v28 = vpack.c.b16 %v9718_v17, %v9717_v23  ;;  %v9060_v37 = vshll.u32 %v8763_v7, 16  ;;  %v16649_v60 = vrot.slane %v10553_v55, 5  ;;  %v10559_v5 = vrot.slane %v10557_v18, 4  ;;  %v9504_v55 = vld [vmem:[#allocation3 + $0x84] sm:$0xe] }
 0x470   : > { %v8229_v20 = vpop.f32.mrf.mxu3  ;;  %v9047_v41 = vor.u32 %v9046_v47, %v9043_v30  ;;  %v9058_v51 = vrot.slane %v9057_v58, 4  ;;  %v8669_v17 = vadd.f32 %v16289_v33, %v16297_v29  ;;  %v9644_v18 = vrot.slane %v9642_v3, 4  ;;  %v8765_v47 = vld [vmem:[#allocation3 + $0xa0] sm:$0xf] }
 0x471   : > { %v16634_v53 = vadd.f32 %v8229_v20, %v16412_v59  ;;  %v10832_v20 = vunpack.c.l.b16 %v10532_v63  ;;  %v16651_v42 = vpop.f32.mrf.mxu0  ;;  %v9062_v23 = vrot.slane %v9060_v37, 5  ;;  %v10563_v30 = vshll.u32 %v10392_v22, 16  ;;  %v13455_v33 = vld [vmem:[#allocation11 + $0x208] sm:$0xff] }
 0x472   : > { %v9308_v27 = vpop.f32.mrf.mxu1  ;;  %v9048_v29 = vrot.slane %v9047_v41, 4  ;;  %11464 = vmatpush.bf16.msra.mxu1 %v13455_v33 }
 0x473   : > { %v9822_v14 = vpop.f32.mrf.mxu2  ;;  %v16643_v59 = vadd.f32 %v9308_v27, %v8668_v1  ;;  %v9506_v1 = vld [vmem:[#allocation3 + $0x8c] sm:$0x1]  ;;  %v9063_v58 = vsel %vm14102_vm12, %v9058_v51, %v9062_v23  ;;  %v10565_v41 = vrot.slane %v10563_v30, 5  ;;  %v10394_v51 = vld [vmem:[#allocation3 + $0x64] sm:$0xf] }
 0x474   : > { %v16641_v6 = vadd.f32 %v9822_v14, %v16576_v32  ;;  %v10547_v32 = vshll.u32 %v10390_v45, 16  ;;  %v10546_v14 = vrot.slane %v10544_v0, 4  ;;  %v10860_v45 = vpack.c.b16 %v10833_v2, %v10832_v20 }
 0x475   : > { %9347 = vmatmul.bf16.gmra.mxu1 %v9219_v25  ;;  %v10560_v25 = vor.u32 %v10559_v5, %v16649_v60  ;;  %v9645_v63 = vrot.slane %v9506_v1, 5  ;;  %v9078_v2 = vshrl.u32 %v8765_v47, 16  ;;  %v12970_v0 = vrot.slane %v9504_v55, 9 }
 0x476   : > { %v10549_v27 = vrot.slane %v10547_v32, 5  ;;  %v8764_v32 = vld [vmem:[#allocation3 + $0x9c] sm:$0xf]  ;;  %v9053_v37 = vsel %vm14102_vm12, %v9048_v29, %v16631_v46  ;;  %v9200_v1 = vunpack.c.l.b16 %v9063_v58  ;;  %v8670_v46 = vadd.f32 %v16304_v13, %v16318_v43  ;;  %v9508_v13 = vld [vmem:[#allocation3 + $0x94] sm:$0xf] }
 0x477   : > { %v9643_v20 = vsel %vm14094_vm11, %v12970_v0, %v9642_v3  ;;  %v10581_v30 = vshrl.u32 %v10394_v51, 16  ;;  %v8766_v43 = vld [vmem:[#allocation3 + $0xa4] sm:$0x1] }
 0x478   : > { %9864 = vmatmul.bf16.gmra.mxu2 %v9740_v28  ;;  %v8231_v50 = vpop.f32.mrf.mxu3  ;;  %v9074_v28 = vshll.u32 %v8765_v47, 16  ;;  %v10550_v5 = vor.u32 %v10549_v27, %v10546_v14  ;;  %v9199_v14 = vunpack.c.l.b16 %v9053_v37 }
 0x479   : > { %v16654_v26 = vadd.f32 %v8231_v50, %v16434_v35  ;;  %v13426_v35 = vld [vmem:[#allocation3 + $0x48] sm:$0xff]  ;;  %v10561_v50 = vrot.slane %v10560_v25, 4  ;;  %v16682_v47 = vpop.f32.mrf.mxu0 }
 0x47a   : > { %v9310_v9 = vpop.f32.mrf.mxu1  ;;  %v10551_v3 = vrot.slane %v10550_v5, 4  ;;  %v9220_v58 = vpack.c.b16 %v9200_v1, %v9199_v14  ;;  %v10583_v1 = vrot.slane %v10581_v30, 4 }
 0x47b   : > { %v9825_v10 = vpop.f32.mrf.mxu2  ;;  %v16662_v7 = vadd.f32 %v9310_v9, %v8669_v17  ;;  %v9065_v17 = vshrl.u32 %v8764_v32, 16  ;;  %v16673_v9 = vrot.slane %v9074_v28, 5  ;;  %v10566_v25 = vsel %vm14102_vm12, %v10561_v50, %v10565_v41 }
 0x47c   : > { %v16660_v34 = vadd.f32 %v9825_v10, %v16597_v11  ;;  %v9646_v11 = vsel %vm14094_vm11, %v9644_v18, %v9645_v63  ;;  %v9068_v10 = vshll.u32 %v8764_v32, 16  ;;  %v10577_v63 = vshll.u32 %v10394_v51, 16 }
 0x47d   : > { %10218 = vmatmul.bf16.gmra.mxu3 %v13426_v35  ;;  %10964 = vmatmul.bf16.gmra.mxu0 %v10860_v45  ;;  %v9080_v45 = vrot.slane %v9078_v2, 4  ;;  %v9720_v18 = vunpack.c.l.b16 %v9646_v11  ;;  %v10393_v35 = vld [vmem:[#allocation3 + $0x60] sm:$0xf]  ;;  %v10556_v28 = vsel %vm14102_vm12, %v10551_v3, %v16649_v60  ;;  %v9067_v2 = vrot.slane %v9065_v17, 4  ;;  %v10395_v17 = vld [vmem:[#allocation3 + $0x68] sm:$0x1] }
 0x47e   : > { %v9070_v0 = vrot.slane %v9068_v10, 5  ;;  %v10835_v37 = vunpack.c.l.b16 %v10566_v25  ;;  %v10568_v5 = vshrl.u32 %v10393_v35, 16  ;;  %v9649_v50 = vrot.slane %v9508_v13, 5 }
 0x47f   : > { %v9081_v32 = vor.u32 %v9080_v45, %v16673_v9  ;;  %v16693_v41 = vrot.slane %v10577_v63, 5  ;;  %v17525_v45 = vld [vmem:[#allocation29_spill] sm:$0xff]  ;;  %v9507_v63 = vld [vmem:[#allocation3 + $0x90] sm:$0xe] }
 0x480   : > { %v8234_v22 = vpop.f32.mrf.mxu3  ;;  %v9071_v14 = vor.u32 %v9070_v0, %v9067_v2  ;;  %v9651_v30 = vrot.slane %v9649_v50, 4  ;;  %v10587_v2 = vshll.u32 %v10395_v17, 16  ;;  %v8768_v0 = vld [vmem:[#allocation3 + $0xac] sm:$0xf] }
 0x481   : > { %v16676_v55 = vadd.f32 %v8234_v22, %v16451_v15  ;;  %v9719_v15 = vunpack.c.l.b16 %v9643_v20  ;;  %v9084_v20 = vshll.u32 %v8766_v43, 16  ;;  %v10834_v22 = vunpack.c.l.b16 %v10556_v28 }
 0x482   : > { %v9313_v23 = vpop.f32.mrf.mxu1  ;;  %v9082_v60 = vrot.slane %v9081_v32, 4  ;;  %v9072_v32 = vrot.slane %v9071_v14, 4  ;;  %v10589_v17 = vrot.slane %v10587_v2, 5 }
 0x483   : > { %v9827_v27 = vpop.f32.mrf.mxu2  ;;  %v16687_v29 = vadd.f32 %v9313_v23, %v8670_v46  ;;  %v9741_v11 = vpack.c.b16 %v9720_v18, %v9719_v15  ;;  %v9509_v46 = vld [vmem:[#allocation3 + $0x98] sm:$0x1]  ;;  %v8671_v18 = vadd.f32 %v17525_v45, %v16333_v52  ;;  %v9086_v15 = vrot.slane %v9084_v20, 5  ;;  %v13467_v52 = vld [vmem:[#allocation13 + $0x28] sm:$0xff]  ;;  %v10397_v45 = vld [vmem:[#allocation3 + $0x70] sm:$0xf] }
 0x484   : > { %v16685_v33 = vadd.f32 %v9827_v27, %v16618_v8  ;;  %v10571_v8 = vshll.u32 %v10393_v35, 16  ;;  %v10570_v27 = vrot.slane %v10568_v5, 4  ;;  %v10861_v35 = vpack.c.b16 %v10835_v37, %v10834_v22  ;;  %11865 = vmatpush.bf16.msra.mxu2 %v13467_v52 }
 0x485   : > { %9352 = vmatmul.bf16.gmra.mxu1 %v9220_v58  ;;  %v10584_v58 = vor.u32 %v10583_v1, %v16693_v41  ;;  %v9652_v28 = vrot.slane %v9509_v46, 5  ;;  %v9098_v37 = vshll.u32 %v8768_v0, 16  ;;  %v9102_v5 = vshrl.u32 %v8768_v0, 16  ;;  %v8767_v1 = vld [vmem:[#allocation3 + $0xa8] sm:$0xf] }
 0x486   : > { %v10573_v23 = vrot.slane %v10571_v8, 5  ;;  %v16708_v8 = vpop.f32.mrf.mxu0  ;;  %v12971_v20 = vrot.slane %v9507_v63, 9  ;;  %v10396_v0 = vld [vmem:[#allocation3 + $0x6c] sm:$0xf]  ;;  %v10601_v52 = vshll.u32 %v10397_v45, 16 }
 0x487   : > { %v10585_v46 = vrot.slane %v10584_v58, 4  ;;  %v16717_v63 = vrot.slane %v9098_v37, 5 }
 0x488   : > { %9869 = vmatmul.bf16.gmra.mxu2 %v9741_v11  ;;  %v8236_v51 = vpop.f32.mrf.mxu3  ;;  %v9087_v11 = vsel %vm14102_vm12, %v9082_v60, %v9086_v15  ;;  %v10574_v22 = vor.u32 %v10573_v23, %v10570_v27  ;;  %v9650_v14 = vsel %vm14094_vm11, %v12971_v20, %v9649_v50  ;;  %v9511_v20 = vld [vmem:[#allocation3 + $0xa0] sm:$0xf] }
 0x489   : > { %v16696_v10 = vadd.f32 %v8236_v51, %v16473_v21  ;;  %v13427_v21 = vld [vmem:[#allocation3 + $0x54] sm:$0xff]  ;;  %v9077_v51 = vsel %vm14102_vm12, %v9072_v32, %v16673_v9  ;;  %v9202_v60 = vunpack.c.l.b16 %v9087_v11  ;;  %v17528_v9 = vld [vmem:[#allocation30_spill] sm:$0xff]  ;;  %v10590_v2 = vsel %vm14102_vm12, %v10585_v46, %v10589_v17 }
 0x48a   : > { %v9315_v25 = vpop.f32.mrf.mxu1  ;;  %v9201_v23 = vunpack.c.l.b16 %v9077_v51  ;;  %v10575_v50 = vrot.slane %v10574_v22, 4  ;;  %v10605_v32 = vshrl.u32 %v10397_v45, 16  ;;  %v9721_v37 = vunpack.c.l.b16 %v9650_v14 }
 0x48b   : > { %v9830_v3 = vpop.f32.mrf.mxu2  ;;  %v16704_v43 = vadd.f32 %v9315_v25, %v8671_v18  ;;  %v9092_v25 = vshll.u32 %v8767_v1, 16  ;;  %v10837_v45 = vunpack.c.l.b16 %v10590_v2 }
 0x48c   : > { %v16702_v13 = vadd.f32 %v9830_v3, %v16643_v59  ;;  %v9653_v59 = vsel %vm14094_vm11, %v9651_v30, %v9652_v28  ;;  %v9089_v3 = vshrl.u32 %v8767_v1, 16  ;;  %v8769_v1 = vld [vmem:[#allocation3 + $0xb0] sm:$0x1] }
 0x48d   : > { %10223 = vmatmul.bf16.gmra.mxu3 %v13427_v21  ;;  %10969 = vmatmul.bf16.gmra.mxu0 %v10861_v35  ;;  %v9104_v35 = vrot.slane %v9102_v5, 4  ;;  %v9722_v15 = vunpack.c.l.b16 %v9653_v59  ;;  %v17527_v21 = vld [vmem:[#allocation31_spill] sm:$0xff]  ;;  %v9221_v5 = vpack.c.b16 %v9202_v60, %v9201_v23  ;;  %v10580_v59 = vsel %vm14102_vm12, %v10575_v50, %v16693_v41  ;;  %v9512_v41 = vld [vmem:[#allocation3 + $0xa4] sm:$0x1]  ;;  %v17531_v50 = vld [vmem:[#allocation32_spill] sm:$0xff] }
 0x48e   : > { %v8672_v27 = vadd.f32 %v17528_v9, %v17527_v21  ;;  %v9091_v51 = vrot.slane %v9089_v3, 4  ;;  %v9094_v22 = vrot.slane %v9092_v25, 5  ;;  %v9656_v21 = vrot.slane %v9511_v20, 5  ;;  %v9510_v20 = vld [vmem:[#allocation3 + $0x9c] sm:$0xe] }
 0x48f   : > { %v9105_v46 = vor.u32 %v9104_v35, %v16717_v63  ;;  %v9742_v17 = vpack.c.b16 %v9722_v15, %v9721_v37  ;;  %v9108_v14 = vshll.u32 %v8769_v1, 16  ;;  %v16735_v9 = vrot.slane %v10601_v52, 5  ;;  %v17530_v15 = vld [vmem:[#allocation21_spill] sm:$0xff] }
 0x490   : > { %v8239_v18 = vpop.f32.mrf.mxu3  ;;  %v10607_v60 = vrot.slane %v10605_v32, 4  ;;  %v9095_v3 = vor.u32 %v9094_v22, %v9091_v51  ;;  %v8673_v2 = vadd.f32 %v17531_v50, %v17530_v15  ;;  %v9658_v1 = vrot.slane %v9656_v21, 4  ;;  %v13454_v15 = vld [vmem:[#allocation11 + $0x200] sm:$0xff]  ;;  %v8770_v50 = vld [vmem:[#allocation3 + $0xb4] sm:$0xf] }
 0x491   : > { %v16720_v30 = vadd.f32 %v8239_v18, %v16489_v49  ;;  %v10592_v18 = vshrl.u32 %v10396_v0, 16  ;;  %v9106_v25 = vrot.slane %v9105_v46, 4  ;;  %v9659_v46 = vrot.slane %v9512_v41, 5  ;;  %11465 = vmatpush.bf16.msra.mxu1 %v13454_v15 }
 0x492   : > { %v9318_v28 = vpop.f32.mrf.mxu1 }
 0x493   : > { %17526 = vst [vmem:[#allocation39_spill] sm:$0xff] %v16720_v30  ;;  %v9832_v58 = vpop.f32.mrf.mxu2  ;;  %v16729_v49 = vadd.f32 %v9318_v28, %v8672_v27  ;;  %v16737_v27 = vpop.f32.mrf.mxu0  ;;  %v10398_v28 = vld [vmem:[#allocation3 + $0x74] sm:$0x1] }
 0x494   : > { %v16727_v11 = vadd.f32 %v9832_v58, %v16662_v7  ;;  %v10595_v7 = vshll.u32 %v10396_v0, 16  ;;  %v10836_v58 = vunpack.c.l.b16 %v10580_v59  ;;  %v10594_v0 = vrot.slane %v10592_v18, 4 }
 0x495   : > { %9357 = vmatmul.bf16.gmra.mxu1 %v9221_v5  ;;  %v10608_v59 = vor.u32 %v10607_v60, %v16735_v9  ;;  %v9096_v18 = vrot.slane %v9095_v3, 4 }
 0x496   : > { %v10597_v37 = vrot.slane %v10595_v7, 5  ;;  %v10862_v32 = vpack.c.b16 %v10837_v45, %v10836_v58 }
 0x497   : > { %v9101_v60 = vsel %vm14102_vm12, %v9096_v18, %v16717_v63 }
 0x498   : > { %9874 = vmatmul.bf16.gmra.mxu2 %v9742_v17  ;;  %v8241_v23 = vpop.f32.mrf.mxu3  ;;  %v9110_v17 = vrot.slane %v9108_v14, 5  ;;  %v12972_v14 = vrot.slane %v9510_v20, 9  ;;  %v10598_v41 = vor.u32 %v10597_v37, %v10594_v0  ;;  %v9116_v20 = vshll.u32 %v8770_v50, 16  ;;  %v17534_v0 = vld [vmem:[#allocation26_spill] sm:$0xff]  ;;  %v17535_v37 = vld [vmem:[#allocation20_spill] sm:$0xff] }
 0x499   : > { %v16740_v35 = vadd.f32 %v8241_v23, %v16511_v39  ;;  %v13428_v39 = vld [vmem:[#allocation3 + $0x60] sm:$0xff]  ;;  %v10611_v23 = vshll.u32 %v10398_v28, 16  ;;  %v10609_v28 = vrot.slane %v10608_v59, 4  ;;  %v8674_v59 = vadd.f32 %v17535_v37, %v17534_v0 }
 0x49a   : > { %v9320_v5 = vpop.f32.mrf.mxu1  ;;  %v9111_v7 = vsel %vm14102_vm12, %v9106_v25, %v9110_v17  ;;  %v9657_v3 = vsel %vm14094_vm11, %v12972_v14, %v9656_v21  ;;  %v9118_v0 = vrot.slane %v9116_v20, 5 }
 0x49b   : > { %17529 = vst [vmem:[#allocation42_spill] sm:$0xff] %v16740_v35  ;;  %v9835_v52 = vpop.f32.mrf.mxu2  ;;  %v16748_v22 = vadd.f32 %v9320_v5, %v8673_v2  ;;  %v8771_v35 = vld [vmem:[#allocation3 + $0xb8] sm:$0xf]  ;;  %v9204_v25 = vunpack.c.l.b16 %v9111_v7  ;;  %v10613_v2 = vrot.slane %v10611_v23, 5  ;;  %v9113_v5 = vshrl.u32 %v8770_v50, 16 }
 0x49c   : > { %v16746_v51 = vadd.f32 %v9835_v52, %v16687_v29  ;;  %v9122_v45 = vshll.u32 %v8771_v35, 16  ;;  %v9126_v58 = vshrl.u32 %v8771_v35, 16  ;;  %v9660_v29 = vsel %vm14094_vm11, %v9658_v1, %v9659_v46  ;;  %v10400_v35 = vld [vmem:[#allocation3 + $0x7c] sm:$0xf]  ;;  %v10399_v7 = vld [vmem:[#allocation3 + $0x78] sm:$0xf] }
 0x49d   : > { %17532 = vst [vmem:[#allocation43_spill] sm:$0xff] %v16748_v22  ;;  %10228 = vmatmul.bf16.gmra.mxu3 %v13428_v39  ;;  %10974 = vmatmul.bf16.gmra.mxu0 %v10862_v32  ;;  %v16761_v39 = vpop.f32.mrf.mxu0  ;;  %v9724_v63 = vunpack.c.l.b16 %v9660_v29  ;;  %v9203_v46 = vunpack.c.l.b16 %v9101_v60  ;;  %v10599_v23 = vrot.slane %v10598_v41, 4  ;;  %v10614_v18 = vsel %vm14102_vm12, %v10609_v28, %v10613_v2  ;;  %v8772_v22 = vld [vmem:[#allocation3 + $0xbc] sm:$0x1] }
 0x49e   : > { %v16759_v17 = vrot.slane %v9122_v45, 5  ;;  %v9128_v32 = vrot.slane %v9126_v58, 4  ;;  %v10625_v45 = vshll.u32 %v10400_v35, 16  ;;  %v10629_v14 = vshrl.u32 %v10400_v35, 16 }
 0x49f   : > { %v9723_v50 = vunpack.c.l.b16 %v9657_v3  ;;  %v9222_v29 = vpack.c.b16 %v9204_v25, %v9203_v46  ;;  %v10604_v60 = vsel %vm14102_vm12, %v10599_v23, %v16735_v9  ;;  %v9115_v41 = vrot.slane %v9113_v5, 4  ;;  %v10401_v5 = vld [vmem:[#allocation3 + $0x80] sm:$0x1] }
 0x4a0   : > { %v8244_v52 = vpop.f32.mrf.mxu3  ;;  %v9129_v28 = vor.u32 %v9128_v32, %v16759_v17  ;;  %v10839_v35 = vunpack.c.l.b16 %v10614_v18  ;;  %v10616_v37 = vshrl.u32 %v10399_v7, 16  ;;  %v9132_v3 = vshll.u32 %v8772_v22, 16  ;;  %v17536_v32 = vld [vmem:[#allocation47_spill] sm:$0xff] }
 0x4a1   : > { %v16764_v1 = vadd.f32 %v8244_v52, %v16529_v38  ;;  %v9514_v52 = vld [vmem:[#allocation3 + $0xac] sm:$0xf]  ;;  %v9743_v2 = vpack.c.b16 %v9724_v63, %v9723_v50  ;;  %v10631_v25 = vrot.slane %v10629_v14, 4  ;;  %v9119_v30 = vor.u32 %v9118_v0, %v9115_v41  ;;  %v17537_v63 = vld [vmem:[#allocation23_spill] sm:$0xff] }
 0x4a2   : > { %v9323_v15 = vpop.f32.mrf.mxu1  ;;  %v9130_v9 = vrot.slane %v9129_v28, 4  ;;  %v8675_v23 = vadd.f32 %v17537_v63, %v17536_v32  ;;  %v10618_v18 = vrot.slane %v10616_v37, 4  ;;  %v13429_v0 = vld [vmem:[#allocation3 + $0x6c] sm:$0xff]  ;;  %v8774_v37 = vld [vmem:[#allocation3 + $0xc4] sm:$0xf] }
 0x4a3   : > { %17533 = vst [vmem:[#allocation24_spill] sm:$0xff] %v16764_v1  ;;  %v9837_v21 = vpop.f32.mrf.mxu2  ;;  %v16773_v38 = vadd.f32 %v9323_v15, %v8674_v59  ;;  %v16779_v59 = vrot.slane %v10625_v45, 5  ;;  %v10838_v15 = vunpack.c.l.b16 %v10604_v60  ;;  %v9515_v1 = vld [vmem:[#allocation3 + $0xb0] sm:$0x1]  ;;  %v9120_v32 = vrot.slane %v9119_v30, 4 }
 0x4a4   : > { %v16771_v58 = vadd.f32 %v9837_v21, %v16704_v43  ;;  %v10619_v43 = vshll.u32 %v10399_v7, 16  ;;  %v9663_v21 = vrot.slane %v9514_v52, 5  ;;  %v9134_v52 = vrot.slane %v9132_v3, 5  ;;  %v8773_v63 = vld [vmem:[#allocation3 + $0xc0] sm:$0xf] }
 0x4a5   : > { %9362 = vmatmul.bf16.gmra.mxu1 %v9222_v29  ;;  %v10863_v45 = vpack.c.b16 %v10839_v35, %v10838_v15  ;;  %v9513_v29 = vld [vmem:[#allocation3 + $0xa8] sm:$0xe]  ;;  %v10632_v60 = vor.u32 %v10631_v25, %v16779_v59  ;;  %v9666_v28 = vrot.slane %v9515_v1, 5  ;;  %v9146_v15 = vshll.u32 %v8774_v37, 16 }
 0x4a6   : > { %v10621_v7 = vrot.slane %v10619_v43, 5  ;;  %v9665_v14 = vrot.slane %v9663_v21, 4  ;;  %v13466_v43 = vld [vmem:[#allocation13 + $0x20] sm:$0xff]  ;;  %v9135_v35 = vsel %vm14102_vm12, %v9130_v9, %v9134_v52  ;;  %v9150_v3 = vshrl.u32 %v8774_v37, 16  ;;  %v10403_v37 = vld [vmem:[#allocation3 + $0x88] sm:$0xf] }
 0x4a7   : > { %v12973_v25 = vrot.slane %v9513_v29, 9  ;;  %11866 = vmatpush.bf16.msra.mxu2 %v13466_v43  ;;  %v9125_v1 = vsel %vm14102_vm12, %v9120_v32, %v16759_v17  ;;  %v9206_v9 = vunpack.c.l.b16 %v9135_v35  ;;  %v9137_v52 = vshrl.u32 %v8773_v63, 16  ;;  %v17540_v43 = vld [vmem:[#allocation22_spill] sm:$0xff]  ;;  %v17541_v17 = vld [vmem:[#allocation25_spill] sm:$0xff] }
 0x4a8   : > { %9879 = vmatmul.bf16.gmra.mxu2 %v9743_v2  ;;  %v8246_v46 = vpop.f32.mrf.mxu3  ;;  %v16787_v2 = vpop.f32.mrf.mxu0  ;;  %v9140_v29 = vshll.u32 %v8773_v63, 16  ;;  %v10402_v35 = vld [vmem:[#allocation3 + $0x84] sm:$0xf]  ;;  %v9517_v63 = vld [vmem:[#allocation3 + $0xb8] sm:$0xf] }
 0x4a9   : > { %v16782_v20 = vadd.f32 %v8246_v46, %v16554_v36  ;;  %v10635_v46 = vshll.u32 %v10401_v5, 16  ;;  %v10622_v5 = vor.u32 %v10621_v7, %v10618_v18  ;;  %v9664_v30 = vsel %vm14094_vm11, %v12973_v25, %v9663_v21 }
 0x4aa   : > { %v9325_v22 = vpop.f32.mrf.mxu1  ;;  %v8676_v18 = vadd.f32 %v17541_v17, %v17540_v43  ;;  %v9205_v7 = vunpack.c.l.b16 %v9125_v1  ;;  %v10653_v1 = vshrl.u32 %v10403_v37, 16 }
 0x4ab   : > { %v9840_v50 = vpop.f32.mrf.mxu2  ;;  %v16792_v36 = vadd.f32 %v9325_v22, %v8675_v23  ;;  %v10633_v23 = vrot.slane %v10632_v60, 4  ;;  %v10623_v32 = vrot.slane %v10622_v5, 4 }
 0x4ac   : > { %v16790_v41 = vadd.f32 %v9840_v50, %v16729_v49  ;;  %v9667_v49 = vsel %vm14094_vm11, %v9665_v14, %v9666_v28  ;;  %v10637_v50 = vrot.slane %v10635_v46, 5 }
 0x4ad   : > { %17539 = vst [vmem:[#allocation46_spill] sm:$0xff] %v16792_v36  ;;  %10233 = vmatmul.bf16.gmra.mxu3 %v13429_v0  ;;  %10979 = vmatmul.bf16.gmra.mxu0 %v10863_v45  ;;  %v16803_v0 = vrot.slane %v9146_v15, 5  ;;  %v9152_v45 = vrot.slane %v9150_v3, 4  ;;  %v9726_v28 = vunpack.c.l.b16 %v9667_v49  ;;  %v9725_v15 = vunpack.c.l.b16 %v9664_v30 }
 0x4ae   : > { %17538 = vst [vmem:[#allocation45_spill] sm:$0xff] %v16790_v41  ;;  %v10638_v46 = vsel %vm14102_vm12, %v10633_v23, %v10637_v50  ;;  %v9223_v3 = vpack.c.b16 %v9206_v9, %v9205_v7  ;;  %v9139_v49 = vrot.slane %v9137_v52, 4  ;;  %v9142_v36 = vrot.slane %v9140_v29, 5 }
 0x4af   : > { %v9153_v43 = vor.u32 %v9152_v45, %v16803_v0  ;;  %v10628_v5 = vsel %vm14102_vm12, %v10623_v32, %v16779_v59  ;;  %v9670_v23 = vrot.slane %v9517_v63, 5  ;;  %v10640_v50 = vshrl.u32 %v10402_v35, 16  ;;  %v9518_v59 = vld [vmem:[#allocation3 + $0xbc] sm:$0x1] }
 0x4b0   : > { %v8249_v22 = vpop.f32.mrf.mxu3  ;;  %v16817_v17 = vpop.f32.mrf.mxu0  ;;  %v10841_v9 = vunpack.c.l.b16 %v10638_v46  ;;  %v9143_v52 = vor.u32 %v9142_v36, %v9139_v49  ;;  %v10655_v45 = vrot.slane %v10653_v1, 4  ;;  %v10840_v41 = vunpack.c.l.b16 %v10628_v5 }
 0x4b1   : > { %v16806_v14 = vadd.f32 %v8249_v22, %v16574_v40  ;;  %v8775_v40 = vld [vmem:[#allocation3 + $0xc8] sm:$0x1]  ;;  %v10649_v22 = vshll.u32 %v10403_v37, 16  ;;  %v9154_v29 = vrot.slane %v9153_v43, 4  ;;  %v10642_v46 = vrot.slane %v10640_v50, 4 }
 0x4b2   : > { %v9328_v21 = vpop.f32.mrf.mxu1  ;;  %v9156_v30 = vshll.u32 %v8775_v40, 16  ;;  %v9672_v40 = vrot.slane %v9670_v23, 4  ;;  %v10864_v49 = vpack.c.b16 %v10841_v9, %v10840_v41  ;;  %v9516_v43 = vld [vmem:[#allocation3 + $0xb4] sm:$0xe]  ;;  %v9673_v1 = vrot.slane %v9518_v59, 5 }
 0x4b3   : > { %v16810_v60 = vpop.f32.mrf.mxu2  ;;  %v16814_v25 = vadd.f32 %v9328_v21, %v8676_v18  ;;  %v10643_v18 = vshll.u32 %v10402_v35, 16  ;;  %v16822_v21 = vrot.slane %v10649_v22, 5  ;;  %v13430_v22 = vld [vmem:[#allocation3 + $0x78] sm:$0xff] }
 0x4b4   : > { %17542 = vst [vmem:[#allocation44_spill] sm:$0xff] %v16810_v60  ;;  %v9744_v60 = vpack.c.b16 %v9726_v28, %v9725_v15  ;;  %v17543_v28 = vld [vmem:[#allocation35_spill] sm:$0xff]  ;;  %v17544_v15 = vld [vmem:[#allocation34_spill] sm:$0xff] }
 0x4b5   : > { %9367 = vmatmul.bf16.gmra.mxu1 %v9223_v3  ;;  %v8677_v3 = vadd.f32 %v17544_v15, %v17543_v28  ;;  %v10404_v28 = vld [vmem:[#allocation3 + $0x8c] sm:$0x1]  ;;  %v10656_v15 = vor.u32 %v10655_v45, %v16822_v21 }
 0x4b7   : > { %v10657_v59 = vrot.slane %v10656_v15, 4 }
 0x4b8   : > { %9884 = vmatmul.bf16.gmra.mxu2 %v9744_v60  ;;  %v8251_v7 = vpop.f32.mrf.mxu3  ;;  %v9158_v60 = vrot.slane %v9156_v30, 5  ;;  %v12974_v30 = vrot.slane %v9516_v43, 9  ;;  %v16842_v50 = vpop.f32.mrf.mxu0 }
 0x4b9   : > { %v16825_v37 = vadd.f32 %v8251_v7, %v16595_v31  ;;  %v10645_v31 = vrot.slane %v10643_v18, 5  ;;  %v9144_v7 = vrot.slane %v9143_v52, 4  ;;  %v10659_v18 = vshll.u32 %v10404_v28, 16  ;;  %v11122_v52 = vld [vmem:[#allocation3 + $0x1c] sm:$0xf] }
 0x4ba   : > { %v9330_v63 = vpop.f32.mrf.mxu1  ;;  %v9159_v5 = vsel %vm14102_vm12, %v9154_v29, %v9158_v60  ;;  %v9671_v29 = vsel %vm14094_vm11, %v12974_v30, %v9670_v23  ;;  %v17548_v60 = vld [vmem:[#allocation37_spill] sm:$0xff]  ;;  %v11123_v30 = vld [vmem:[#allocation3 + $0x20] sm:$0x1] }
 0x4bb   : > { %v9845_v32 = vpop.f32.mrf.mxu2  ;;  %v16832_v36 = vadd.f32 %v9330_v63, %v8677_v3  ;;  %v9149_v41 = vsel %vm14102_vm12, %v9144_v7, %v16803_v0  ;;  %v9208_v9 = vunpack.c.l.b16 %v9159_v5  ;;  %v10646_v45 = vor.u32 %v10645_v31, %v10642_v46  ;;  %v10406_v7 = vld [vmem:[#allocation3 + $0x94] sm:$0xf]  ;;  %v9520_v46 = vld [vmem:[#allocation3 + $0xc4] sm:$0xf] }
 0x4bc   : > { %v16830_v35 = vadd.f32 %v9845_v32, %v16773_v38  ;;  %v9674_v38 = vsel %vm14094_vm11, %v9672_v40, %v9673_v1  ;;  %v17547_v40 = vld [vmem:[#allocation33_spill] sm:$0xff]  ;;  %v11219_v1 = vrot.slane %v11122_v52, 5  ;;  %v9727_v5 = vunpack.c.l.b16 %v9671_v29 }
 0x4bd   : > { %17546 = vst [vmem:[#allocation28_spill] sm:$0xff] %v16832_v36  ;;  %10238 = vmatmul.bf16.gmra.mxu3 %v13430_v22  ;;  %10984 = vmatmul.bf16.gmra.mxu0 %v10864_v49  ;;  %v9728_v63 = vunpack.c.l.b16 %v9674_v38  ;;  %v8678_v22 = vadd.f32 %v17548_v60, %v17547_v40  ;;  %v9207_v49 = vunpack.c.l.b16 %v9149_v41  ;;  %v10661_v23 = vrot.slane %v10659_v18, 5  ;;  %v10405_v38 = vld [vmem:[#allocation3 + $0x90] sm:$0xf]  ;;  %v11121_v60 = vld [vmem:[#allocation3 + $0x18] sm:$0xe] }
 0x4be   : > { %17545 = vst [vmem:[#allocation27_spill] sm:$0xff] %v16830_v35  ;;  %v10647_v31 = vrot.slane %v10646_v45, 4  ;;  %v10673_v41 = vshll.u32 %v10406_v7, 16  ;;  %v9677_v40 = vrot.slane %v9520_v46, 5  ;;  %v11221_v29 = vrot.slane %v11219_v1, 4 }
 0x4bf   : > { %v9224_v36 = vpack.c.b16 %v9208_v9, %v9207_v49  ;;  %v9745_v15 = vpack.c.b16 %v9728_v63, %v9727_v5  ;;  %v11222_v45 = vrot.slane %v11123_v30, 5  ;;  %v10664_v63 = vshrl.u32 %v10405_v38, 16  ;;  %v17551_v49 = vld [vmem:[#allocation38_spill] sm:$0xff]  ;;  %v10407_v35 = vld [vmem:[#allocation3 + $0x98] sm:$0x1] }
 0x4c0   : > { %v10199_v3 = vpop.f32.mrf.mxu3  ;;  %v10652_v52 = vsel %vm14102_vm12, %v10647_v31, %v16822_v21  ;;  %v16867_v5 = vrot.slane %v10673_v41, 5 }
 0x4c1   : > { %v16847_v32 = vadd.f32 %v10199_v3, %v16616_v62  ;;  %v10662_v62 = vsel %vm14102_vm12, %v10657_v59, %v10661_v23  ;;  %v10677_v3 = vshrl.u32 %v10406_v7, 16  ;;  %v9521_v7 = vld [vmem:[#allocation3 + $0xc8] sm:$0x1]  ;;  %v10842_v31 = vunpack.c.l.b16 %v10652_v52 }
 0x4c2   : > { %v9333_v43 = vpop.f32.mrf.mxu1  ;;  %v10843_v18 = vunpack.c.l.b16 %v10662_v62  ;;  %v9680_v41 = vrot.slane %v9521_v7, 5 }
 0x4c3   : > { %v16851_v0 = vpop.f32.mrf.mxu2  ;;  %v16853_v28 = vadd.f32 %v9333_v43, %v8678_v22  ;;  %v16860_v22 = vpop.f32.mrf.mxu0  ;;  %v8679_v43 = vadd.f32 %v16494_v12, %v17551_v49  ;;  %v10679_v23 = vrot.slane %v10677_v3, 4  ;;  %v13465_v12 = vld [vmem:[#allocation13 + $0x18] sm:$0xff]  ;;  %v10666_v3 = vrot.slane %v10664_v63, 4 }
 0x4c4   : > { %17549 = vst [vmem:[#allocation29_spill] sm:$0xff] %v16851_v0  ;;  %v9519_v0 = vld [vmem:[#allocation3 + $0xc0] sm:$0xe]  ;;  %v10865_v49 = vpack.c.b16 %v10843_v18, %v10842_v31  ;;  %11867 = vmatpush.bf16.msra.mxu2 %v13465_v12 }
 0x4c5   : > { %9372 = vmatmul.bf16.gmra.mxu1 %v9224_v36  ;;  %v10667_v36 = vshll.u32 %v10405_v38, 16  ;;  %v13431_v38 = vld [vmem:[#allocation3 + $0x84] sm:$0xff] }
 0x4c8   : > { %9889 = vmatmul.bf16.gmra.mxu2 %v9745_v15  ;;  %v10201_v9 = vpop.f32.mrf.mxu3  ;;  %v9679_v15 = vrot.slane %v9677_v40, 4 }
 0x4c9   : > { %v16863_v59 = vadd.f32 %v10201_v9, %v16641_v6  ;;  %v13136_v6 = vrot.slane %v11121_v60, 9  ;;  %v11223_v9 = vsel %vm14094_vm11, %v11221_v29, %v11222_v45  ;;  %v10683_v29 = vshll.u32 %v10407_v35, 16 }
 0x4ca   : > { %v9335_v46 = vpop.f32.mrf.mxu1  ;;  %v9681_v60 = vsel %vm14094_vm11, %v9679_v15, %v9680_v41 }
 0x4cb   : > { %17550 = vst [vmem:[#allocation31_spill] sm:$0xff] %v16863_v59  ;;  %v9850_v21 = vpop.f32.mrf.mxu2  ;;  %v16872_v30 = vadd.f32 %v9335_v46, %v8679_v43  ;;  %v10669_v59 = vrot.slane %v10667_v36, 5  ;;  %v11220_v52 = vsel %vm14094_vm11, %v13136_v6, %v11219_v1  ;;  %v12975_v43 = vrot.slane %v9519_v0, 9  ;;  %v17553_v46 = vld [vmem:[#allocation36_spill] sm:$0xff]  ;;  %v11125_v0 = vld [vmem:[#allocation3 + $0x28] sm:$0xf]  ;;  %v16890_v35 = vpop.f32.mrf.mxu0 }
 0x4cc   : > { %v16870_v62 = vadd.f32 %v9850_v21, %v16814_v25  ;;  %v10680_v25 = vor.u32 %v10679_v23, %v16867_v5  ;;  %v11347_v21 = vunpack.c.l.b16 %v11223_v9  ;;  %v11346_v63 = vunpack.c.l.b16 %v11220_v52  ;;  %v17554_v23 = vld [vmem:[#allocation40_spill] sm:$0xff] }
 0x4cd   : > { %17552 = vst [vmem:[#allocation30_spill] sm:$0xff] %v16872_v30  ;;  %10243 = vmatmul.bf16.gmra.mxu3 %v13431_v38  ;;  %10989 = vmatmul.bf16.gmra.mxu0 %v10865_v49  ;;  %v9678_v18 = vsel %vm14094_vm11, %v12975_v43, %v9677_v40  ;;  %v10670_v36 = vor.u32 %v10669_v59, %v10666_v3  ;;  %v9730_v1 = vunpack.c.l.b16 %v9681_v60  ;;  %v10409_v9 = vld [vmem:[#allocation3 + $0xa0] sm:$0xf]  ;;  %v10685_v59 = vrot.slane %v10683_v29, 5 }
 0x4ce   : > { %v8680_v31 = vadd.f32 %v17554_v23, %v17553_v46  ;;  %v10681_v38 = vrot.slane %v10680_v25, 4  ;;  %v9729_v12 = vunpack.c.l.b16 %v9678_v18  ;;  %v11378_v40 = vpack.c.b16 %v11347_v21, %v11346_v63  ;;  %v10408_v25 = vld [vmem:[#allocation3 + $0x9c] sm:$0xf]  ;;  %v11126_v18 = vld [vmem:[#allocation3 + $0x2c] sm:$0x1] }
 0x4cf   : > { %v10671_v41 = vrot.slane %v10670_v36, 4  ;;  %v10697_v43 = vshll.u32 %v10409_v9, 16  ;;  %v10701_v60 = vshrl.u32 %v10409_v9, 16  ;;  %v11124_v21 = vld [vmem:[#allocation3 + $0x24] sm:$0xe]  ;;  %v10688_v63 = vshrl.u32 %v10408_v25, 16 }
 0x4d0   : > { %v10204_v45 = vpop.f32.mrf.mxu3  ;;  %v9746_v3 = vpack.c.b16 %v9730_v1, %v9729_v12  ;;  %v10686_v52 = vsel %vm14102_vm12, %v10681_v38, %v10685_v59  ;;  %v10691_v36 = vshll.u32 %v10408_v25, 16  ;;  %v11229_v59 = vrot.slane %v11126_v18, 5 }
 0x4d1   : > { %v16884_v7 = vadd.f32 %v10204_v45, %v16660_v34  ;;  %v11226_v34 = vrot.slane %v11125_v0, 5  ;;  %v10676_v45 = vsel %vm14102_vm12, %v10671_v41, %v16867_v5  ;;  %v10845_v23 = vunpack.c.l.b16 %v10686_v52 }
 0x4d2   : > { %v9338_v15 = vpop.f32.mrf.mxu1  ;;  %v10699_v0 = vrot.slane %v10697_v43, 5  ;;  %v13137_v52 = vrot.slane %v11124_v21, 9  ;;  %v10690_v43 = vrot.slane %v10688_v63, 4  ;;  %v8682_v21 = vadd.f32 %v16571_v19, %v16549_v44  ;;  %v10412_v63 = vld [vmem:[#allocation3 + $0xac] sm:$0xf] }
 0x4d3   : > { %v16888_v6 = vpop.f32.mrf.mxu2  ;;  %v16892_v49 = vadd.f32 %v9338_v15, %v8680_v31  ;;  %v11228_v29 = vrot.slane %v11226_v34, 4  ;;  %v17555_v31 = vld [vmem:[#allocation41_spill] sm:$0xff]  ;;  %v10703_v15 = vrot.slane %v10701_v60, 4  ;;  %v16911_v30 = vpop.f32.mrf.mxu0  ;;  %v10693_v60 = vrot.slane %v10691_v36, 5 }
 0x4d4   : > { %v8681_v38 = vadd.f32 %v16546_v16, %v17555_v31  ;;  %v11227_v16 = vsel %vm14094_vm11, %v13137_v52, %v11226_v34  ;;  %v10725_v44 = vshrl.u32 %v10412_v63, 16  ;;  %v17570_v48 = vld [vmem:[#allocation30_spill] sm:$0xff] }
 0x4d5   : > { %11466 = vmatmul.bf16.vlgmr.msra.gmra.mxu1 %v11378_v40  ;;  %v10844_v40 = vunpack.c.l.b16 %v10676_v45  ;;  %v10704_v45 = vor.u32 %v10703_v15, %v10699_v0 }
 0x4d7   : > { %v10866_v25 = vpack.c.b16 %v10845_v23, %v10844_v40 }
 0x4d8   : > { %9894 = vmatmul.bf16.gmra.mxu2 %v9746_v3  ;;  %v10206_v46 = vpop.f32.mrf.mxu3  ;;  %v13432_v3 = vld [vmem:[#allocation3 + $0x90] sm:$0xff] }
 0x4d9   : > { %v16900_v1 = vadd.f32 %v10206_v46, %v16685_v33  ;;  %v11230_v33 = vsel %vm14094_vm11, %v11228_v29, %v11229_v59  ;;  %v10410_v46 = vld [vmem:[#allocation3 + $0xa4] sm:$0x1]  ;;  %v10694_v29 = vor.u32 %v10693_v60, %v10690_v43 }
 0x4da   : > { %v9340_v12 = vpop.f32.mrf.mxu1  ;;  %v10707_v18 = vshll.u32 %v10410_v46, 16 }
 0x4db   : > { %v9855_v9 = vpop.f32.mrf.mxu2  ;;  %v16907_v41 = vadd.f32 %v9340_v12, %v8681_v38  ;;  %v11348_v38 = vunpack.c.l.b16 %v11227_v16  ;;  %v11128_v12 = vld [vmem:[#allocation3 + $0x34] sm:$0xf]  ;;  %v10695_v52 = vrot.slane %v10694_v29, 4  ;;  %v16926_v19 = vpop.f32.mrf.mxu0  ;;  %v11129_v16 = vld [vmem:[#allocation3 + $0x38] sm:$0x1] }
 0x4dc   : > { %v16905_v5 = vadd.f32 %v9855_v9, %v16853_v28  ;;  %v11349_v28 = vunpack.c.l.b16 %v11230_v33  ;;  %v10705_v9 = vrot.slane %v10704_v45, 4  ;;  %v10709_v59 = vrot.slane %v10707_v18, 5  ;;  %v11127_v45 = vld [vmem:[#allocation3 + $0x30] sm:$0xe] }
 0x4dd   : > { %17556 = vst [vmem:[#allocation21_spill] sm:$0xff] %v16907_v41  ;;  %10248 = vmatmul.bf16.gmra.mxu3 %v13432_v3  ;;  %10994 = vmatmul.bf16.gmra.mxu0 %v10866_v25  ;;  %v11233_v3 = vrot.slane %v11128_v12, 5  ;;  %v10411_v25 = vld [vmem:[#allocation3 + $0xa8] sm:$0xf]  ;;  %v10721_v33 = vshll.u32 %v10412_v63, 16  ;;  %v10700_v46 = vsel %vm14102_vm12, %v10695_v52, %v10699_v0  ;;  %v13433_v52 = vld [vmem:[#allocation3 + $0x9c] sm:$0xff] }
 0x4de   : > { %v11379_v15 = vpack.c.b16 %v11349_v28, %v11348_v38  ;;  %v10712_v18 = vshrl.u32 %v10411_v25, 16  ;;  %v10846_v63 = vunpack.c.l.b16 %v10700_v46 }
 0x4df   : > { %v11235_v28 = vrot.slane %v11233_v3, 4  ;;  %v10723_v29 = vrot.slane %v10721_v33, 5 }
 0x4e0   : > { %v10209_v31 = vpop.f32.mrf.mxu3 }
 0x4e1   : > { %v16916_v23 = vadd.f32 %v10209_v31, %v16702_v13  ;;  %v10710_v13 = vsel %vm14102_vm12, %v10705_v9, %v10709_v59  ;;  %v10715_v31 = vshll.u32 %v10411_v25, 16  ;;  %v10727_v9 = vrot.slane %v10725_v44, 4  ;;  %v13464_v25 = vld [vmem:[#allocation13 + $0x10] sm:$0xff] }
 0x4e2   : > { %v9343_v34 = vpop.f32.mrf.mxu1  ;;  %v10847_v60 = vunpack.c.l.b16 %v10710_v13  ;;  %v13138_v13 = vrot.slane %v11127_v45, 9  ;;  %11868 = vmatpush.bf16.msra.mxu2 %v13464_v25  ;;  %v10414_v25 = vld [vmem:[#allocation3 + $0xb4] sm:$0xf] }
 0x4e3   : > { %v16920_v40 = vpop.f32.mrf.mxu2  ;;  %v16922_v36 = vadd.f32 %v9343_v34, %v8682_v21  ;;  %v8683_v21 = vadd.f32 %v16602_v54, %v16567_v4  ;;  %v10714_v54 = vrot.slane %v10712_v18, 4  ;;  %v10717_v33 = vrot.slane %v10715_v31, 5  ;;  %v16944_v45 = vpop.f32.mrf.mxu0 }
 0x4e4   : > { %v10867_v41 = vpack.c.b16 %v10847_v60, %v10846_v63  ;;  %v11234_v4 = vsel %vm14094_vm11, %v13138_v13, %v11233_v3  ;;  %v10728_v44 = vor.u32 %v10727_v9, %v10723_v29  ;;  %v11131_v3 = vld [vmem:[#allocation3 + $0x40] sm:$0xf]  ;;  %v10415_v9 = vld [vmem:[#allocation3 + $0xb8] sm:$0xf] }
 0x4e5   : > { %11471 = vmatmul.bf16.gmra.mxu1 %v11379_v15  ;;  %v11236_v15 = vrot.slane %v11129_v16, 5 }
 0x4e8   : > { %v10211_v43 = vpop.f32.mrf.mxu3 }
 0x4e9   : > { %v16931_v38 = vadd.f32 %v10211_v43, %v16727_v11  ;;  %v11237_v11 = vsel %vm14094_vm11, %v11235_v28, %v11236_v15  ;;  %v10413_v43 = vld [vmem:[#allocation3 + $0xb0] sm:$0x1]  ;;  %v8684_v28 = vadd.f32 %v16627_v24, %v16590_v61  ;;  %v10749_v61 = vshrl.u32 %v10415_v9, 16 }
 0x4ea   : > { %v9345_v34 = vpop.f32.mrf.mxu1  ;;  %v10731_v46 = vshll.u32 %v10413_v43, 16  ;;  %v11132_v43 = vld [vmem:[#allocation3 + $0x44] sm:$0x1] }
 0x4eb   : > { %v9860_v12 = vpop.f32.mrf.mxu2  ;;  %v16938_v59 = vadd.f32 %v9345_v34, %v8683_v21  ;;  %v11350_v21 = vunpack.c.l.b16 %v11234_v4  ;;  %v10729_v34 = vrot.slane %v10728_v44, 4  ;;  %v10736_v44 = vshrl.u32 %v10414_v25, 16 }
 0x4ec   : > { %v16936_v0 = vadd.f32 %v9860_v12, %v16892_v49  ;;  %v11351_v49 = vunpack.c.l.b16 %v11237_v11  ;;  %v10718_v12 = vor.u32 %v10717_v33, %v10714_v54  ;;  %v10733_v15 = vrot.slane %v10731_v46, 5 }
 0x4ed   : > { %10253 = vmatmul.bf16.gmra.mxu3 %v13433_v52  ;;  %10999 = vmatmul.bf16.gmra.mxu0 %v10867_v41  ;;  %v11240_v52 = vrot.slane %v11131_v3, 5  ;;  %v10745_v11 = vshll.u32 %v10415_v9, 16  ;;  %v8685_v46 = vadd.f32 %v16651_v42, %v16610_v56  ;;  %v11243_v9 = vrot.slane %v11132_v43, 5  ;;  %v10416_v42 = vld [vmem:[#allocation3 + $0xbc] sm:$0x1] }
 0x4ee   : > { %v11380_v63 = vpack.c.b16 %v11351_v49, %v11350_v21  ;;  %v10719_v13 = vrot.slane %v10718_v12, 4  ;;  %v11130_v21 = vld [vmem:[#allocation3 + $0x3c] sm:$0xe]  ;;  %v10751_v12 = vrot.slane %v10749_v61, 4 }
 0x4ef   : > { %v11242_v33 = vrot.slane %v11240_v52, 4 }
 0x4f0   : > { %v10214_v16 = vpop.f32.mrf.mxu3  ;;  %v10724_v24 = vsel %vm14102_vm12, %v10719_v13, %v10723_v29  ;;  %v16964_v29 = vpop.f32.mrf.mxu0  ;;  %v13434_v13 = vld [vmem:[#allocation3 + $0xa8] sm:$0xff] }
 0x4f1   : > { %v16947_v60 = vadd.f32 %v10214_v16, %v16746_v51  ;;  %v10734_v51 = vsel %vm14102_vm12, %v10729_v34, %v10733_v15  ;;  %v10739_v16 = vshll.u32 %v10414_v25, 16  ;;  %v11244_v56 = vsel %vm14094_vm11, %v11242_v33, %v11243_v9 }
 0x4f2   : > { %v9348_v31 = vpop.f32.mrf.mxu1  ;;  %v10849_v54 = vunpack.c.l.b16 %v10734_v51  ;;  %v13139_v51 = vrot.slane %v11130_v21, 9  ;;  %v10738_v25 = vrot.slane %v10736_v44, 4  ;;  %v11353_v43 = vunpack.c.l.b16 %v11244_v56 }
 0x4f3   : > { %v16951_v18 = vpop.f32.mrf.mxu2  ;;  %v16953_v41 = vadd.f32 %v9348_v31, %v8684_v28  ;;  %v10747_v28 = vrot.slane %v10745_v11, 5  ;;  %v10848_v31 = vunpack.c.l.b16 %v10724_v24  ;;  %v10741_v11 = vrot.slane %v10739_v16, 5 }
 0x4f4   : > { %v11241_v24 = vsel %vm14094_vm11, %v13139_v51, %v11240_v52 }
 0x4f5   : > { %11476 = vmatmul.bf16.gmra.mxu1 %v11380_v63  ;;  %v10752_v61 = vor.u32 %v10751_v12, %v10747_v28  ;;  %v10742_v21 = vor.u32 %v10741_v11, %v10738_v25 }
 0x4f7   : > { %v10743_v56 = vrot.slane %v10742_v21, 4 }
 0x4f8   : > { %v10216_v4 = vpop.f32.mrf.mxu3  ;;  %v16981_v51 = vpop.f32.mrf.mxu0 }
 0x4f9   : > { %v16960_v49 = vadd.f32 %v10216_v4, %v16771_v58  ;;  %v10868_v58 = vpack.c.b16 %v10849_v54, %v10848_v31  ;;  %v11134_v4 = vld [vmem:[#allocation3 + $0x4c] sm:$0xf]  ;;  %v11352_v54 = vunpack.c.l.b16 %v11241_v24  ;;  %v11133_v24 = vld [vmem:[#allocation3 + $0x48] sm:$0xe] }
 0x4fa   : > { %v9350_v3 = vpop.f32.mrf.mxu1  ;;  %v11247_v9 = vrot.slane %v11134_v4, 5 }
 0x4fb   : > { %v9865_v34 = vpop.f32.mrf.mxu2  ;;  %v16969_v15 = vadd.f32 %v9350_v3, %v8685_v46  ;;  %v8686_v46 = vadd.f32 %v16682_v47, %v16634_v53  ;;  %v10418_v3 = vld [vmem:[#allocation3 + $0xc4] sm:$0xf]  ;;  %v11381_v16 = vpack.c.b16 %v11353_v43, %v11352_v54  ;;  %v11135_v47 = vld [vmem:[#allocation3 + $0x50] sm:$0x1] }
 0x4fc   : > { %v16967_v63 = vadd.f32 %v9865_v34, %v16922_v36  ;;  %v10755_v36 = vshll.u32 %v10416_v42, 16  ;;  %v10753_v34 = vrot.slane %v10752_v61, 4  ;;  %v10769_v52 = vshll.u32 %v10418_v3, 16 }
 0x4fd   : > { %17557 = vst [vmem:[#allocation32_spill] sm:$0xff] %v16969_v15  ;;  %10258 = vmatmul.bf16.gmra.mxu3 %v13434_v13  ;;  %11004 = vmatmul.bf16.gmra.mxu0 %v10868_v58  ;;  %v10417_v13 = vld [vmem:[#allocation3 + $0xc0] sm:$0xf]  ;;  %v10773_v58 = vshrl.u32 %v10418_v3, 16  ;;  %v10748_v42 = vsel %vm14102_vm12, %v10743_v56, %v10747_v28  ;;  %v11249_v25 = vrot.slane %v11247_v9, 4  ;;  %v11250_v54 = vrot.slane %v11135_v47, 5 }
 0x4fe   : > { %v10757_v12 = vrot.slane %v10755_v36, 5  ;;  %v10760_v11 = vshrl.u32 %v10417_v13, 16  ;;  %v10763_v43 = vshll.u32 %v10417_v13, 16  ;;  %v10771_v36 = vrot.slane %v10769_v52, 5  ;;  %v13435_v28 = vld [vmem:[#allocation3 + $0xb4] sm:$0xff]  ;;  %v13463_v52 = vld [vmem:[#allocation13 + $0x8] sm:$0xff] }
 0x4ff   : > { %v10775_v4 = vrot.slane %v10773_v58, 4  ;;  %v11251_v56 = vsel %vm14094_vm11, %v11249_v25, %v11250_v54  ;;  %v10419_v13 = vld [vmem:[#allocation3 + $0xc8] sm:$0x1]  ;;  %11869 = vmatpush.bf16.msra.mxu2 %v13463_v52  ;;  %v8688_v25 = vadd.f32 %v16737_v27, %v16676_v55  ;;  %v11136_v55 = vld [vmem:[#allocation3 + $0x54] sm:$0xe]  ;;  %v8689_v52 = vadd.f32 %v16761_v39, %v16696_v10 }
 0x500   : > { %v10758_v53 = vsel %vm14102_vm12, %v10753_v34, %v10757_v12  ;;  %v13140_v12 = vrot.slane %v11133_v24, 9  ;;  %v10765_v15 = vrot.slane %v10763_v43, 5  ;;  %v16998_v47 = vpop.f32.mrf.mxu0 }
 0x501   : > { %v10851_v61 = vunpack.c.l.b16 %v10758_v53  ;;  %v10762_v53 = vrot.slane %v10760_v11, 4 }
 0x502   : > { %v9353_v31 = vpop.f32.mrf.mxu1 }
 0x503   : > { %v16977_v33 = vpop.f32.mrf.mxu2  ;;  %v16979_v44 = vadd.f32 %v9353_v31, %v8686_v46  ;;  %v8687_v46 = vadd.f32 %v16708_v8, %v16654_v26  ;;  %v10850_v31 = vunpack.c.l.b16 %v10748_v42  ;;  %v10776_v26 = vor.u32 %v10775_v4, %v10771_v36 }
 0x504   : > { %v11248_v8 = vsel %vm14094_vm11, %v13140_v12, %v11247_v9  ;;  %v11355_v42 = vunpack.c.l.b16 %v11251_v56  ;;  %v10766_v24 = vor.u32 %v10765_v15, %v10762_v53  ;;  %v11138_v12 = vld [vmem:[#allocation3 + $0x5c] sm:$0x1] }
 0x505   : > { %11481 = vmatmul.bf16.gmra.mxu1 %v11381_v16  ;;  %v10869_v58 = vpack.c.b16 %v10851_v61, %v10850_v31  ;;  %v11354_v61 = vunpack.c.l.b16 %v11248_v8  ;;  %v11257_v53 = vrot.slane %v11138_v12, 5 }
 0x506   : > { %v10767_v9 = vrot.slane %v10766_v24, 4 }
 0x508   : > { %v10772_v15 = vsel %vm14102_vm12, %v10767_v9, %v10771_v36 }
 0x50a   : > { %v9355_v21 = vpop.f32.mrf.mxu1 }
 0x50b   : > { %v9870_v3 = vpop.f32.mrf.mxu2  ;;  %v16992_v16 = vadd.f32 %v9355_v21, %v8687_v46  ;;  %v10777_v46 = vrot.slane %v10776_v26, 4  ;;  %v11382_v21 = vpack.c.b16 %v11355_v42, %v11354_v61  ;;  %v13141_v42 = vrot.slane %v11136_v55, 9  ;;  %v10421_v61 = vld [vmem:[#allocation3 + $0xd0] sm:$0xf] }
 0x50c   : > { %v16990_v34 = vadd.f32 %v9870_v3, %v16953_v41  ;;  %v10779_v41 = vshll.u32 %v10419_v13, 16  ;;  %v11137_v3 = vld [vmem:[#allocation3 + $0x58] sm:$0xf]  ;;  %v17010_v13 = vpop.f32.mrf.mxu0  ;;  %v10793_v39 = vshll.u32 %v10421_v61, 16 }
 0x50d   : > { %10263 = vmatmul.bf16.gmra.mxu3 %v13435_v28  ;;  %11009 = vmatmul.bf16.gmra.mxu0 %v10869_v58  ;;  %v11254_v31 = vrot.slane %v11137_v3, 5  ;;  %v10852_v58 = vunpack.c.l.b16 %v10772_v15 }
 0x50e   : > { %v10781_v4 = vrot.slane %v10779_v41, 5  ;;  %v13436_v41 = vld [vmem:[#allocation3 + $0xc0] sm:$0xff]  ;;  %v10795_v12 = vrot.slane %v10793_v39, 5 }
 0x50f   : > { %v11256_v27 = vrot.slane %v11254_v31, 4  ;;  %v11255_v9 = vsel %vm14094_vm11, %v13141_v42, %v11254_v31 }
 0x510   : > { %v10782_v28 = vsel %vm14102_vm12, %v10777_v46, %v10781_v4 }
 0x511   : > { %v10853_v56 = vunpack.c.l.b16 %v10782_v28  ;;  %v11258_v3 = vsel %vm14094_vm11, %v11256_v27, %v11257_v53  ;;  %v17559_v53 = vld [vmem:[#allocation39_spill] sm:$0xff] }
 0x512   : > { %v9358_v43 = vpop.f32.mrf.mxu1  ;;  %v11357_v55 = vunpack.c.l.b16 %v11258_v3 }
 0x513   : > { %v17002_v11 = vpop.f32.mrf.mxu2  ;;  %v17004_v54 = vadd.f32 %v9358_v43, %v8688_v25  ;;  %v10870_v36 = vpack.c.b16 %v10853_v56, %v10852_v58  ;;  %v10420_v25 = vld [vmem:[#allocation3 + $0xcc] sm:$0xf]  ;;  %v10422_v43 = vld [vmem:[#allocation3 + $0xd4] sm:$0x1] }
 0x514   : > { %v10784_v4 = vshrl.u32 %v10420_v25, 16  ;;  %v10787_v10 = vshll.u32 %v10420_v25, 16  ;;  %v10803_v28 = vshll.u32 %v10422_v43, 16  ;;  %v11140_v25 = vld [vmem:[#allocation3 + $0x64] sm:$0xf]  ;;  %v17027_v43 = vpop.f32.mrf.mxu0 }
 0x515   : > { %11486 = vmatmul.bf16.gmra.mxu1 %v11382_v21  ;;  %v10797_v21 = vshrl.u32 %v10421_v61, 16 }
 0x516   : > { %v10789_v15 = vrot.slane %v10787_v10, 5  ;;  %v10805_v58 = vrot.slane %v10803_v28, 5  ;;  %v11261_v10 = vrot.slane %v11140_v25, 5  ;;  %v17560_v28 = vld [vmem:[#allocation42_spill] sm:$0xff] }
 0x517   : > { %v10799_v56 = vrot.slane %v10797_v21, 4  ;;  %v11141_v21 = vld [vmem:[#allocation3 + $0x68] sm:$0x1] }
 0x519   : > { %v10800_v27 = vor.u32 %v10799_v56, %v10795_v12  ;;  %v11139_v56 = vld [vmem:[#allocation3 + $0x60] sm:$0xe] }
 0x51a   : > { %v9360_v8 = vpop.f32.mrf.mxu1 }
 0x51b   : > { %v9875_v26 = vpop.f32.mrf.mxu2  ;;  %v17017_v46 = vadd.f32 %v9360_v8, %v8689_v52  ;;  %v11356_v8 = vunpack.c.l.b16 %v11255_v9  ;;  %v10801_v31 = vrot.slane %v10800_v27, 4  ;;  %v11263_v9 = vrot.slane %v11261_v10, 4 }
 0x51c   : > { %v17015_v24 = vadd.f32 %v9875_v26, %v16979_v44  ;;  %v10786_v44 = vrot.slane %v10784_v4, 4  ;;  %v8690_v26 = vadd.f32 %v16787_v2, %v17559_v53  ;;  %v11264_v53 = vrot.slane %v11141_v21, 5 }
 0x51d   : > { %17558 = vst [vmem:[#allocation26_spill] sm:$0xff] %v17017_v46  ;;  %10268 = vmatmul.bf16.gmra.mxu3 %v13436_v41  ;;  %11014 = vmatmul.bf16.gmra.mxu0 %v10870_v36  ;;  %v11383_v36 = vpack.c.b16 %v11357_v55, %v11356_v8  ;;  %v10806_v4 = vsel %vm14102_vm12, %v10801_v31, %v10805_v58  ;;  %v13142_v58 = vrot.slane %v11139_v56, 9  ;;  %v17042_v8 = vpop.f32.mrf.mxu0 }
 0x51e   : > { %v10790_v52 = vor.u32 %v10789_v15, %v10786_v44  ;;  %v10855_v39 = vunpack.c.l.b16 %v10806_v4  ;;  %v8691_v44 = vadd.f32 %v16817_v17, %v17560_v28  ;;  %v13437_v15 = vld [vmem:[#allocation3 + $0xcc] sm:$0xff] }
 0x51f   : > { %v11262_v17 = vsel %vm14094_vm11, %v13142_v58, %v11261_v10 }
 0x520   : > { %v10791_v46 = vrot.slane %v10790_v52, 4  ;;  %v11358_v31 = vunpack.c.l.b16 %v11262_v17 }
 0x522   : > { %v9363_v41 = vpop.f32.mrf.mxu1  ;;  %v10796_v3 = vsel %vm14102_vm12, %v10791_v46, %v10795_v12  ;;  %v13462_v12 = vld [vmem:[#allocation13] sm:$0xff] }
 0x523   : > { %v17025_v61 = vpop.f32.mrf.mxu2  ;;  %v9436_v42 = vadd.f32 %v9363_v41, %v8690_v26  ;;  %v10854_v2 = vunpack.c.l.b16 %v10796_v3  ;;  %v11265_v26 = vsel %vm14094_vm11, %v11263_v9, %v11264_v53  ;;  %11870 = vmatpush.bf16.msra.mxu2 %v13462_v12  ;;  %v17561_v41 = vld [vmem:[#allocation24_spill] sm:$0xff]  ;;  %v11144_v9 = vld [vmem:[#allocation3 + $0x74] sm:$0x1] }
 0x524   : > { %v11359_v25 = vunpack.c.l.b16 %v11265_v26  ;;  %v8694_v26 = vadd.f32 %v16890_v35, %v16806_v14 }
 0x525   : > { %11491 = vmatmul.bf16.gmra.mxu1 %v11383_v36  ;;  %v10871_v27 = vpack.c.b16 %v10855_v39, %v10854_v2  ;;  %v11143_v36 = vld [vmem:[#allocation3 + $0x70] sm:$0xf] }
 0x526   : > { %v11384_v39 = vpack.c.b16 %v11359_v25, %v11358_v31  ;;  %v11268_v21 = vrot.slane %v11143_v36, 5  ;;  %v11147_v31 = vld [vmem:[#allocation3 + $0x80] sm:$0x1] }
 0x528   : > { %v11270_v28 = vrot.slane %v11268_v21, 4 }
 0x52a   : > { %v9365_v52 = vpop.f32.mrf.mxu1 }
 0x52b   : > { %v9880_v55 = vpop.f32.mrf.mxu2  ;;  %v17038_v57 = vadd.f32 %v9365_v52, %v8691_v44  ;;  %v8693_v44 = vadd.f32 %v16860_v22, %v16782_v20  ;;  %v11146_v22 = vld [vmem:[#allocation3 + $0x7c] sm:$0xf] }
 0x52c   : > { %v17036_v46 = vadd.f32 %v9880_v55, %v17004_v54  ;;  %v8692_v54 = vadd.f32 %v16842_v50, %v17561_v41  ;;  %v11271_v55 = vrot.slane %v11144_v9, 5 }
 0x52d   : > { %10273 = vmatmul.bf16.gmra.mxu3 %v13437_v15  ;;  %11019 = vmatmul.bf16.gmra.mxu0 %v10871_v27  ;;  %v11142_v15 = vld [vmem:[#allocation3 + $0x6c] sm:$0xe] }
 0x52e   : > { %v13143_v27 = vrot.slane %v11142_v15, 9  ;;  %v11272_v53 = vsel %vm14094_vm11, %v11270_v28, %v11271_v55  ;;  %v11278_v28 = vrot.slane %v11147_v31, 5 }
 0x52f   : > { %v11361_v58 = vunpack.c.l.b16 %v11272_v53 }
 0x530   : > { %v11269_v12 = vsel %vm14094_vm11, %v13143_v27, %v11268_v21  ;;  %v11149_v27 = vld [vmem:[#allocation3 + $0x88] sm:$0xf] }
 0x531   : > { %v11360_v20 = vunpack.c.l.b16 %v11269_v12  ;;  %v11282_v12 = vrot.slane %v11149_v27, 5 }
 0x532   : > { %v9368_v4 = vpop.f32.mrf.mxu1 }
 0x533   : > { %v17048_v3 = vpop.f32.mrf.mxu2  ;;  %v9438_v2 = vadd.f32 %v9368_v4, %v8692_v54  ;;  %v11385_v41 = vpack.c.b16 %v11361_v58, %v11360_v20  ;;  %v11275_v54 = vrot.slane %v11146_v22, 5  ;;  %v8695_v4 = vadd.f32 %v16911_v30, %v16825_v37  ;;  %v11150_v20 = vld [vmem:[#allocation3 + $0x8c] sm:$0x1] }
 0x534   : > { %v11057_v30 = vadd.f32 %v16926_v19, %v16847_v32  ;;  %v11284_v22 = vrot.slane %v11282_v12, 4  ;;  %v11148_v19 = vld [vmem:[#allocation3 + $0x84] sm:$0xe] }
 0x535   : > { %11496 = vmatmul.bf16.gmra.mxu1 %v11384_v39  ;;  %v11277_v36 = vrot.slane %v11275_v54, 4  ;;  %v11145_v39 = vld [vmem:[#allocation3 + $0x78] sm:$0xe] }
 0x536   : > { %v13144_v35 = vrot.slane %v11145_v39, 9 }
 0x537   : > { %v11279_v15 = vsel %vm14094_vm11, %v11277_v36, %v11278_v28  ;;  %v13145_v28 = vrot.slane %v11148_v19, 9  ;;  %v11153_v19 = vld [vmem:[#allocation3 + $0x98] sm:$0x1] }
 0x53a   : > { %v9370_v56 = vpop.f32.mrf.mxu1 }
 0x53b   : > { %v9885_v10 = vpop.f32.mrf.mxu2  ;;  %v17054_v50 = vadd.f32 %v9370_v56, %v8693_v44  ;;  %v11363_v56 = vunpack.c.l.b16 %v11279_v15 }
 0x53c   : > { %v17052_v52 = vadd.f32 %v9885_v10, %v9436_v42  ;;  %v11276_v10 = vsel %vm14094_vm11, %v13144_v35, %v11275_v54  ;;  %v17562_v54 = vld [vmem:[#allocation31_spill] sm:$0xff] }
 0x53d   : > { %v11362_v55 = vunpack.c.l.b16 %v11276_v10  ;;  %v11058_v32 = vadd.f32 %v16944_v45, %v17562_v54  ;;  %v11283_v45 = vsel %vm14094_vm11, %v13145_v28, %v11282_v12 }
 0x542   : > { %v9373_v25 = vpop.f32.mrf.mxu1 }
 0x543   : > { %v17062_v17 = vpop.f32.mrf.mxu2  ;;  %v9440_v42 = vadd.f32 %v9373_v25, %v8694_v26  ;;  %v17081_v26 = vld [vmem:[%s17399_s7] ss:$0 sm:$0xff] }
 0x545   : > { %11501 = vmatmul.bf16.gmra.mxu1 %v11385_v41  ;;  %v17087_v41 = vld [vmem:[%s17400_s8] ss:$0 sm:$0xff] }
 0x54a   : > { %v9375_v9 = vpop.f32.mrf.mxu1 }
 0x54b   : > { %v9890_v21 = vpop.f32.mrf.mxu2  ;;  %v17068_v14 = vadd.f32 %v9375_v9, %v8695_v4  ;;  %v11285_v4 = vrot.slane %v11150_v20, 5  ;;  %v17093_v9 = vpop.f32.mrf.mxu3 }
 0x54c   : > { %v17066_v44 = vadd.f32 %v9890_v21, %v9438_v2  ;;  %v11386_v2 = vpack.c.b16 %v11363_v56, %v11362_v55 }
 0x54d   : > { %v11286_v35 = vsel %vm14094_vm11, %v11284_v22, %v11285_v4  ;;  %v11059_v22 = vadd.f32 %v16964_v29, %v16884_v7  ;;  %v11060_v4 = vadd.f32 %v16981_v51, %v16900_v1 }
 0x54e   : > { %v11365_v55 = vunpack.c.l.b16 %v11286_v35  ;;  %v11292_v35 = vrot.slane %v11153_v19, 5 }
 0x552   : > { %v11467_v37 = vpop.f32.mrf.mxu1 }
 0x553   : > { %v17074_v53 = vpop.f32.mrf.mxu2  ;;  %v11579_v58 = vadd.f32 %v11467_v37, %v11057_v30  ;;  %v11364_v37 = vunpack.c.l.b16 %v11283_v45  ;;  %v11152_v30 = vld [vmem:[#allocation3 + $0x94] sm:$0xf]  ;;  %v17106_v12 = vpop.f32.mrf.mxu3 }
 0x554   : > { %v11289_v54 = vrot.slane %v11152_v30, 5 }
 0x555   : > { %11506 = vmatmul.bf16.gmra.mxu1 %v11386_v2  ;;  %v11679_v25 = vmul.f32 %v17081_v26, %v11579_v58  ;;  %v17102_v2 = vpop.f32.mrf.mxu0 }
 0x557   : > { %v11715_v15 = vadd.f32 %v17087_v41, %v11679_v25  ;;  %v11387_v25 = vpack.c.b16 %v11365_v55, %v11364_v37 }
 0x559   : > { %v11747_v27 = vmax.f32 %v11715_v15, 0.0 }
 0x55a   : > { %v11469_v36 = vpop.f32.mrf.mxu1 }
 0x55b   : > { %v9895_v31 = vpop.f32.mrf.mxu2  ;;  %v11580_v21 = vadd.f32 %v11469_v36, %v11058_v32  ;;  %v17120_v51 = vpop.f32.mrf.mxu3 }
 0x55c   : > { %v17091_v39 = vadd.f32 %v9895_v31, %v9440_v42  ;;  %v11291_v31 = vrot.slane %v11289_v54, 4 }
 0x55d   : > { %v11680_v10 = vmul.f32 %v17081_v26, %v11580_v21  ;;  %v11151_v21 = vld [vmem:[#allocation3 + $0x90] sm:$0xe] }
 0x55e   : > { %v13146_v7 = vrot.slane %v11151_v21, 9  ;;  %v11293_v29 = vsel %vm14094_vm11, %v11291_v31, %v11292_v35  ;;  %v11154_v35 = vld [vmem:[#allocation3 + $0x9c] sm:$0xe] }
 0x55f   : > { %v11716_v56 = vadd.f32 %v17087_v41, %v11680_v10  ;;  %v17111_v10 = vpop.f32.mrf.mxu0  ;;  %v11367_v1 = vunpack.c.l.b16 %v11293_v29  ;;  %v13147_v29 = vrot.slane %v11154_v35, 9  ;;  %v11064_v35 = vadd.f32 %v17042_v8, %v16960_v49  ;;  %v17563_v49 = vld [vmem:[#allocation45_spill] sm:$0xff] }
 0x560   : > { %v11290_v55 = vsel %vm14094_vm11, %v13146_v7, %v11289_v54  ;;  %v10319_v8 = vadd.f32 %v17093_v9, %v17563_v49 }
 0x561   : > { %v11748_v42 = vmax.f32 %v11716_v56, 0.0  ;;  %v11366_v37 = vunpack.c.l.b16 %v11290_v55 }
 0x562   : > { %v11472_v58 = vpop.f32.mrf.mxu1 }
 0x563   : > { %v11779_v20 = vpack.c.bf16 %v11748_v42, %v11747_v27  ;;  %v11581_v32 = vadd.f32 %v11472_v58, %v11059_v22  ;;  %v11155_v58 = vld [vmem:[#allocation3 + $0xa0] sm:$0xf]  ;;  %v11061_v22 = vadd.f32 %v16998_v47, %v16916_v23 }
 0x564   : > { %v11296_v19 = vrot.slane %v11155_v58, 5  ;;  %v11158_v58 = vld [vmem:[#allocation3 + $0xac] sm:$0xf] }
 0x565   : > { %11511 = vmatmul.bf16.gmra.mxu1 %v11387_v25  ;;  %11871 = vmatmul.bf16.vlgmr.msra.gmra.mxu2 %v11779_v20  ;;  %v11681_v36 = vmul.f32 %v17081_v26, %v11581_v32  ;;  %v11388_v25 = vpack.c.b16 %v11367_v1, %v11366_v37 }
 0x567   : > { %v11717_v45 = vadd.f32 %v17087_v41, %v11681_v36  ;;  %v17124_v54 = vpop.f32.mrf.mxu0  ;;  %v11156_v36 = vld [vmem:[#allocation3 + $0xa4] sm:$0x1] }
 0x568   : > { %v11299_v23 = vrot.slane %v11156_v36, 5  ;;  %v11303_v36 = vrot.slane %v11158_v58, 5 }
 0x569   : > { %v11749_v42 = vmax.f32 %v11717_v45, 0.0 }
 0x56a   : > { %v11474_v28 = vpop.f32.mrf.mxu1 }
 0x56b   : > { %v11582_v15 = vadd.f32 %v11474_v28, %v11060_v4  ;;  %v11298_v4 = vrot.slane %v11296_v19, 4  ;;  %v11062_v28 = vadd.f32 %v17010_v13, %v16931_v38 }
 0x56d   : > { %v11682_v56 = vmul.f32 %v17081_v26, %v11582_v15  ;;  %v17129_v15 = vpop.f32.mrf.mxu3  ;;  %v11300_v45 = vsel %vm14094_vm11, %v11298_v4, %v11299_v23 }
 0x56e   : > { %v11369_v38 = vunpack.c.l.b16 %v11300_v45 }
 0x56f   : > { %v11718_v27 = vadd.f32 %v17087_v41, %v11682_v56  ;;  %v17138_v13 = vpop.f32.mrf.mxu0 }
 0x571   : > { %v11750_v30 = vmax.f32 %v11718_v27, 0.0  ;;  %v11297_v27 = vsel %vm14094_vm11, %v13147_v29, %v11296_v19  ;;  %v11159_v19 = vld [vmem:[#allocation3 + $0xb0] sm:$0x1] }
 0x572   : > { %v11477_v20 = vpop.f32.mrf.mxu1  ;;  %v11368_v37 = vunpack.c.l.b16 %v11297_v27 }
 0x573   : > { %v11780_v32 = vpack.c.bf16 %v11750_v30, %v11749_v42  ;;  %v11583_v31 = vadd.f32 %v11477_v20, %v11061_v22  ;;  %v11063_v22 = vadd.f32 %v17027_v43, %v16947_v60  ;;  %v11306_v60 = vrot.slane %v11159_v19, 5 }
 0x574   : > { %v11065_v19 = vadd.f32 %v17102_v2, %v10319_v8 }
 0x575   : > { %11516 = vmatmul.bf16.gmra.mxu1 %v11388_v25  ;;  %11876 = vmatmul.bf16.gmra.mxu2 %v11780_v32  ;;  %v11683_v21 = vmul.f32 %v17081_v26, %v11583_v31  ;;  %v11389_v25 = vpack.c.b16 %v11369_v38, %v11368_v37  ;;  %v17142_v31 = vpop.f32.mrf.mxu3 }
 0x577   : > { %v11719_v56 = vadd.f32 %v17087_v41, %v11683_v21  ;;  %v11305_v21 = vrot.slane %v11303_v36, 4  ;;  %v17147_v23 = vpop.f32.mrf.mxu0 }
 0x579   : > { %v11751_v42 = vmax.f32 %v11719_v56, 0.0  ;;  %v11307_v45 = vsel %vm14094_vm11, %v11305_v21, %v11306_v60 }
 0x57a   : > { %v11479_v7 = vpop.f32.mrf.mxu1 }
 0x57b   : > { %v11584_v47 = vadd.f32 %v11479_v7, %v11062_v28  ;;  %v11157_v7 = vld [vmem:[#allocation3 + $0xa8] sm:$0xe] }
 0x57c   : > { %v13148_v29 = vrot.slane %v11157_v7, 9 }
 0x57d   : > { %v11684_v55 = vmul.f32 %v17081_v26, %v11584_v47  ;;  %v17153_v27 = vpop.f32.mrf.mxu3 }
 0x57f   : > { %v11720_v1 = vadd.f32 %v17087_v41, %v11684_v55 }
 0x581   : > { %v11752_v30 = vmax.f32 %v11720_v1, 0.0  ;;  %v11304_v1 = vsel %vm14094_vm11, %v13148_v29, %v11303_v36 }
 0x582   : > { %v11482_v20 = vpop.f32.mrf.mxu1 }
 0x583   : > { %v11781_v32 = vpack.c.bf16 %v11752_v30, %v11751_v42  ;;  %v11585_v4 = vadd.f32 %v11482_v20, %v11063_v22  ;;  %v11371_v42 = vunpack.c.l.b16 %v11307_v45  ;;  %v11370_v30 = vunpack.c.l.b16 %v11304_v1  ;;  %v11161_v20 = vld [vmem:[#allocation3 + $0xb8] sm:$0xf] }
 0x584   : > { %v11310_v36 = vrot.slane %v11161_v20, 5 }
 0x585   : > { %11521 = vmatmul.bf16.gmra.mxu1 %v11389_v25  ;;  %11881 = vmatmul.bf16.gmra.mxu2 %v11781_v32  ;;  %v11685_v28 = vmul.f32 %v17081_v26, %v11585_v4  ;;  %v17564_v25 = vld [vmem:[#allocation43_spill] sm:$0xff]  ;;  %v17565_v32 = vld [vmem:[#allocation44_spill] sm:$0xff]  ;;  %v11390_v21 = vpack.c.b16 %v11371_v42, %v11370_v30  ;;  %v17166_v60 = vpop.f32.mrf.mxu3 }
 0x586   : > { %v9941_v4 = vadd.f32 %v17565_v32, %v17564_v25  ;;  %v17566_v30 = vld [vmem:[#allocation27_spill] sm:$0xff] }
 0x587   : > { %v11721_v56 = vadd.f32 %v17087_v41, %v11685_v28 }
 0x588   : > { %v10320_v9 = vadd.f32 %v17106_v12, %v9941_v4  ;;  %v11164_v4 = vld [vmem:[#allocation3 + $0xc4] sm:$0xf] }
 0x589   : > { %v11753_v37 = vmax.f32 %v11721_v56, 0.0  ;;  %v11160_v56 = vld [vmem:[#allocation3 + $0xb4] sm:$0xe] }
 0x58a   : > { %v11484_v47 = vpop.f32.mrf.mxu1  ;;  %v11066_v45 = vadd.f32 %v17111_v10, %v10320_v9  ;;  %v13149_v49 = vrot.slane %v11160_v56, 9  ;;  %v10321_v10 = vadd.f32 %v17120_v51, %v17566_v30  ;;  %v17568_v9 = vld [vmem:[#allocation29_spill] sm:$0xff] }
 0x58b   : > { %v11586_v43 = vadd.f32 %v11484_v47, %v11064_v35  ;;  %v17163_v35 = vpop.f32.mrf.mxu0  ;;  %v11162_v47 = vld [vmem:[#allocation3 + $0xbc] sm:$0x1]  ;;  %v11165_v56 = vld [vmem:[#allocation3 + $0xc8] sm:$0x1] }
 0x58d   : > { %v11686_v55 = vmul.f32 %v17081_v26, %v11586_v43  ;;  %v11312_v43 = vrot.slane %v11310_v36, 4 }
 0x58f   : > { %v11722_v38 = vadd.f32 %v17087_v41, %v11686_v55  ;;  %v11313_v55 = vrot.slane %v11162_v47, 5  ;;  %v11067_v47 = vadd.f32 %v17124_v54, %v10321_v10 }
 0x591   : > { %v11754_v58 = vmax.f32 %v11722_v38, 0.0  ;;  %v11314_v8 = vsel %vm14094_vm11, %v11312_v43, %v11313_v55 }
 0x592   : > { %v11487_v22 = vpop.f32.mrf.mxu1  ;;  %v11373_v20 = vunpack.c.l.b16 %v11314_v8  ;;  %v11163_v8 = vld [vmem:[#allocation3 + $0xc0] sm:$0xe] }
 0x593   : > { %v11782_v28 = vpack.c.bf16 %v11754_v58, %v11753_v37  ;;  %v11587_v7 = vadd.f32 %v11487_v22, %v11065_v19  ;;  %v17174_v42 = vpop.f32.mrf.mxu0  ;;  %v11311_v37 = vsel %vm14094_vm11, %v13149_v49, %v11310_v36  ;;  %v17181_v19 = vpop.f32.mrf.mxu3  ;;  %v13150_v30 = vrot.slane %v11163_v8, 9 }
 0x594   : > { %v11372_v32 = vunpack.c.l.b16 %v11311_v37 }
 0x595   : > { %11526 = vmatmul.bf16.gmra.mxu1 %v11390_v21  ;;  %11886 = vmatmul.bf16.gmra.mxu2 %v11782_v28  ;;  %v11687_v29 = vmul.f32 %v17081_v26, %v11587_v7  ;;  %v17567_v28 = vld [vmem:[#allocation46_spill] sm:$0xff] }
 0x596   : > { %v9943_v7 = vadd.f32 %v17568_v9, %v17567_v28  ;;  %v11391_v43 = vpack.c.b16 %v11373_v20, %v11372_v32  ;;  %v11167_v32 = vld [vmem:[#allocation3 + $0xd0] sm:$0xf] }
 0x597   : > { %v11723_v12 = vadd.f32 %v17087_v41, %v11687_v29  ;;  %v11317_v29 = vrot.slane %v11164_v4, 5 }
 0x598   : > { %v10322_v51 = vadd.f32 %v17129_v15, %v9943_v7 }
 0x599   : > { %v11755_v22 = vmax.f32 %v11723_v12, 0.0  ;;  %v11319_v55 = vrot.slane %v11317_v29, 4  ;;  %v11318_v20 = vsel %vm14094_vm11, %v13150_v30, %v11317_v29 }
 0x59a   : > { %v11489_v2 = vpop.f32.mrf.mxu1  ;;  %v11068_v49 = vadd.f32 %v17138_v13, %v10322_v51  ;;  %v10323_v13 = vadd.f32 %v17142_v31, %v16870_v62  ;;  %v11374_v28 = vunpack.c.l.b16 %v11318_v20 }
 0x59b   : > { %v11588_v1 = vadd.f32 %v11489_v2, %v11066_v45  ;;  %v17187_v2 = vpop.f32.mrf.mxu0  ;;  %v17191_v37 = vpop.f32.mrf.mxu3 }
 0x59c   : > { %v11069_v51 = vadd.f32 %v17147_v23, %v10323_v13 }
 0x59d   : > { %v11688_v38 = vmul.f32 %v17081_v26, %v11588_v1 }
 0x59f   : > { %v11724_v58 = vadd.f32 %v17087_v41, %v11688_v38  ;;  %v11320_v38 = vrot.slane %v11165_v56, 5  ;;  %v11166_v56 = vld [vmem:[#allocation3 + $0xcc] sm:$0xe] }
 0x5a1   : > { %v11756_v25 = vmax.f32 %v11724_v58, 0.0  ;;  %v11321_v15 = vsel %vm14094_vm11, %v11319_v55, %v11320_v38  ;;  %v11168_v55 = vld [vmem:[#allocation3 + $0xd4] sm:$0x1] }
 0x5a2   : > { %v11492_v21 = vpop.f32.mrf.mxu1 }
 0x5a3   : > { %v11783_v36 = vpack.c.bf16 %v11756_v25, %v11755_v22  ;;  %v11589_v45 = vadd.f32 %v11492_v21, %v11067_v47  ;;  %v11375_v25 = vunpack.c.l.b16 %v11321_v15  ;;  %v10985_v9 = vpop.f32.mrf.mxu0  ;;  %v11324_v47 = vrot.slane %v11167_v32, 5 }
 0x5a5   : > { %11531 = vmatmul.bf16.gmra.mxu1 %v11391_v43  ;;  %11891 = vmatmul.bf16.gmra.mxu2 %v11783_v36  ;;  %v11689_v1 = vmul.f32 %v17081_v26, %v11589_v45  ;;  %v17569_v43 = vld [vmem:[#allocation28_spill] sm:$0xff]  ;;  %v11392_v45 = vpack.c.b16 %v11375_v25, %v11374_v28  ;;  %v11326_v8 = vrot.slane %v11324_v47, 4 }
 0x5a6   : > { %v9945_v36 = vadd.f32 %v16888_v6, %v17569_v43 }
 0x5a7   : > { %v11725_v10 = vadd.f32 %v17087_v41, %v11689_v1  ;;  %v10241_v1 = vpop.f32.mrf.mxu3 }
 0x5a8   : > { %v10324_v62 = vadd.f32 %v17153_v27, %v9945_v36 }
 0x5a9   : > { %v11757_v4 = vmax.f32 %v11725_v10, 0.0 }
 0x5aa   : > { %v11494_v12 = vpop.f32.mrf.mxu1 }
 0x5ab   : > { %v11590_v54 = vadd.f32 %v11494_v12, %v11068_v49  ;;  %v13151_v49 = vrot.slane %v11166_v56, 9  ;;  %v11327_v12 = vrot.slane %v11168_v55, 5  ;;  %v10987_v27 = vpop.f32.mrf.mxu0 }
 0x5ad   : > { %v11690_v58 = vmul.f32 %v17081_v26, %v11590_v54  ;;  %v11070_v54 = vadd.f32 %v17163_v35, %v10324_v62  ;;  %v11325_v23 = vsel %vm14094_vm11, %v13151_v49, %v11324_v47  ;;  %v11328_v30 = vsel %vm14094_vm11, %v11326_v8, %v11327_v12 }
 0x5ae   : > { %v11376_v20 = vunpack.c.l.b16 %v11325_v23  ;;  %v11377_v13 = vunpack.c.l.b16 %v11328_v30 }
 0x5af   : > { %v11726_v22 = vadd.f32 %v17087_v41, %v11690_v58  ;;  %v10244_v25 = vpop.f32.mrf.mxu3 }
 0x5b1   : > { %v11758_v21 = vmax.f32 %v11726_v22, 0.0  ;;  %v10325_v22 = vadd.f32 %v17166_v60, %v16905_v5 }
 0x5b2   : > { %v11497_v7 = vpop.f32.mrf.mxu1 }
 0x5b3   : > { %v11784_v29 = vpack.c.bf16 %v11758_v21, %v11757_v4  ;;  %v11591_v31 = vadd.f32 %v11497_v7, %v11069_v51  ;;  %v11393_v21 = vpack.c.b16 %v11377_v13, %v11376_v20  ;;  %v9947_v7 = vadd.f32 %v16920_v40, %v17570_v48 }
 0x5b4   : > { %v11071_v47 = vadd.f32 %v17174_v42, %v10325_v22  ;;  %v10327_v42 = vadd.f32 %v17191_v37, %v16936_v0 }
 0x5b5   : > { %11536 = vmatmul.bf16.gmra.mxu1 %v11392_v45  ;;  %11896 = vmatmul.bf16.gmra.mxu2 %v11784_v29  ;;  %v11691_v38 = vmul.f32 %v17081_v26, %v11591_v31  ;;  %v10326_v36 = vadd.f32 %v17181_v19, %v9947_v7  ;;  %v10990_v45 = vpop.f32.mrf.mxu0 }
 0x5b7   : > { %v11727_v10 = vadd.f32 %v17087_v41, %v11691_v38  ;;  %v11072_v60 = vadd.f32 %v17187_v2, %v10326_v36  ;;  %v10246_v29 = vpop.f32.mrf.mxu3  ;;  %v17571_v38 = vld [vmem:[#allocation21_spill] sm:$0xff]  ;;  %v11073_v2 = vadd.f32 %v10985_v9, %v10327_v42  ;;  %v17235_v9 = vpop.f32.mrf.mxu2 }
 0x5b9   : > { %v11759_v32 = vmax.f32 %v11727_v10, 0.0 }
 0x5ba   : > { %v11499_v6 = vpop.f32.mrf.mxu1 }
 0x5bb   : > { %v11592_v15 = vadd.f32 %v11499_v6, %v11070_v54  ;;  %v9949_v54 = vadd.f32 %v16951_v18, %v17571_v38 }
 0x5bd   : > { %v11692_v58 = vmul.f32 %v17081_v26, %v11592_v15  ;;  %v10992_v31 = vpop.f32.mrf.mxu0  ;;  %v10328_v30 = vadd.f32 %v10241_v1, %v9949_v54 }
 0x5bf   : > { %v11728_v35 = vadd.f32 %v17087_v41, %v11692_v58  ;;  %v10249_v23 = vpop.f32.mrf.mxu3  ;;  %v11074_v58 = vadd.f32 %v10987_v27, %v10328_v30  ;;  %v9951_v27 = vadd.f32 %v16977_v33, %v16938_v59 }
 0x5c1   : > { %v11760_v4 = vmax.f32 %v11728_v35, 0.0 }
 0x5c2   : > { %v11502_v28 = vpop.f32.mrf.mxu1 }
 0x5c3   : > { %v11785_v43 = vpack.c.bf16 %v11760_v4, %v11759_v32  ;;  %v11593_v51 = vadd.f32 %v11502_v28, %v11071_v47  ;;  %v10329_v32 = vadd.f32 %v10244_v25, %v16967_v63  ;;  %v10330_v47 = vadd.f32 %v10246_v29, %v9951_v27  ;;  %v17242_v63 = vld [vmem:[%s17402_s10] ss:$0 sm:$0xff] }
 0x5c5   : > { %11541 = vmatmul.bf16.gmra.mxu1 %v11393_v21  ;;  %11901 = vmatmul.bf16.gmra.mxu2 %v11785_v43  ;;  %v11693_v5 = vmul.f32 %v17081_v26, %v11593_v51  ;;  %v10995_v20 = vpop.f32.mrf.mxu0  ;;  %v11075_v28 = vadd.f32 %v10990_v45, %v10329_v32 }
 0x5c7   : > { %v11729_v62 = vadd.f32 %v17087_v41, %v11693_v5  ;;  %v10251_v35 = vpop.f32.mrf.mxu3 }
 0x5c9   : > { %v11761_v49 = vmax.f32 %v11729_v62, 0.0 }
 0x5ca   : > { %v11504_v56 = vpop.f32.mrf.mxu1 }
 0x5cb   : > { %v11594_v55 = vadd.f32 %v11504_v56, %v11072_v60  ;;  %v11076_v60 = vadd.f32 %v10992_v31, %v10330_v47 }
 0x5cd   : > { %v11694_v40 = vmul.f32 %v17081_v26, %v11594_v55  ;;  %v10997_v7 = vpop.f32.mrf.mxu0  ;;  %v10331_v55 = vadd.f32 %v10249_v23, %v16990_v34 }
 0x5cf   : > { %v11730_v19 = vadd.f32 %v17087_v41, %v11694_v40  ;;  %v10254_v25 = vpop.f32.mrf.mxu3  ;;  %v11077_v54 = vadd.f32 %v10995_v20, %v10331_v55 }
 0x5d1   : > { %v11762_v8 = vmax.f32 %v11730_v19, 0.0 }
 0x5d2   : > { %v11507_v12 = vpop.f32.mrf.mxu1 }
 0x5d3   : > { %v11786_v6 = vpack.c.bf16 %v11762_v8, %v11761_v49  ;;  %v11595_v15 = vadd.f32 %v11507_v12, %v11073_v2  ;;  %v17572_v12 = vld [vmem:[#allocation32_spill] sm:$0xff] }
 0x5d4   : > { %v9953_v38 = vadd.f32 %v17002_v11, %v17572_v12 }
 0x5d5   : > { %11906 = vmatmul.bf16.gmra.mxu2 %v11786_v6  ;;  %v11695_v10 = vmul.f32 %v17081_v26, %v11595_v15  ;;  %v11000_v29 = vpop.f32.mrf.mxu0 }
 0x5d6   : > { %v10332_v6 = vadd.f32 %v10251_v35, %v9953_v38 }
 0x5d7   : > { %v11731_v13 = vadd.f32 %v17087_v41, %v11695_v10  ;;  %v10256_v49 = vpop.f32.mrf.mxu3 }
 0x5d9   : > { %v11763_v1 = vmax.f32 %v11731_v13, 0.0 }
 0x5da   : > { %v11509_v0 = vpop.f32.mrf.mxu1 }
 0x5db   : > { %v11596_v37 = vadd.f32 %v11509_v0, %v11074_v58  ;;  %v11078_v58 = vadd.f32 %v10997_v7, %v10332_v6 }
 0x5dd   : > { %v11696_v22 = vmul.f32 %v17081_v26, %v11596_v37  ;;  %v11002_v34 = vpop.f32.mrf.mxu0 }
 0x5df   : > { %v11732_v18 = vadd.f32 %v17087_v41, %v11696_v22  ;;  %v10259_v13 = vpop.f32.mrf.mxu3  ;;  %v10333_v22 = vadd.f32 %v10254_v25, %v17015_v24 }
 0x5e1   : > { %v11764_v4 = vmax.f32 %v11732_v18, 0.0 }
 0x5e2   : > { %v11512_v21 = vpop.f32.mrf.mxu1 }
 0x5e3   : > { %v11787_v48 = vpack.c.bf16 %v11764_v4, %v11763_v1  ;;  %v11597_v43 = vadd.f32 %v11512_v21, %v11075_v28  ;;  %v9955_v28 = vadd.f32 %v17025_v61, %v16992_v16 }
 0x5e5   : > { %11911 = vmatmul.bf16.gmra.mxu2 %v11787_v48  ;;  %v11697_v51 = vmul.f32 %v17081_v26, %v11597_v43  ;;  %v11005_v21 = vpop.f32.mrf.mxu0  ;;  %v11079_v48 = vadd.f32 %v11000_v29, %v10333_v22  ;;  %v10334_v47 = vadd.f32 %v10256_v49, %v9955_v28 }
 0x5e7   : > { %v11733_v33 = vadd.f32 %v17087_v41, %v11697_v51  ;;  %v10261_v24 = vpop.f32.mrf.mxu3 }
 0x5e8   : > { %v11872_v36 = vpop.f32.mrf.mxu2 }
 0x5e9   : > { %v11873_v5 = vadd.f32 %v17242_v63, %v11872_v36  ;;  %v11765_v42 = vmax.f32 %v11733_v33, 0.0  ;;  %v10335_v33 = vadd.f32 %v10259_v13, %v17036_v46 }
 0x5ea   : > { %v11514_v56 = vpop.f32.mrf.mxu1 }
 0x5eb   : > { %11952 = vst [vmem:[%s17248_s29] sm:$0xff] %v11873_v5  ;;  %v11598_v59 = vadd.f32 %v11514_v56, %v11076_v60  ;;  %v11080_v5 = vadd.f32 %v11002_v34, %v10334_v47 }
 0x5ed   : > { %v11698_v45 = vmul.f32 %v17081_v26, %v11598_v59  ;;  %v11007_v59 = vpop.f32.mrf.mxu0 }
 0x5ef   : > { %v11734_v62 = vadd.f32 %v17087_v41, %v11698_v45  ;;  %v10264_v29 = vpop.f32.mrf.mxu3 }
 0x5f0   : > { %v11874_v40 = vpop.f32.mrf.mxu2 }
 0x5f1   : > { %v11766_v19 = vmax.f32 %v11734_v62, 0.0  ;;  %v11875_v31 = vadd.f32 %v17242_v63, %v11874_v40 }
 0x5f2   : > { %v11517_v8 = vpop.f32.mrf.mxu1 }
 0x5f3   : > { %11953 = vst [vmem:[%s17248_s29 + $0x8] sm:$0xff] %v11875_v31  ;;  %v11788_v2 = vpack.c.bf16 %v11766_v19, %v11765_v42  ;;  %v11599_v30 = vadd.f32 %v11517_v8, %v11077_v54  ;;  %v17573_v31 = vld [vmem:[#allocation26_spill] sm:$0xff]  ;;  %v11081_v8 = vadd.f32 %v11005_v21, %v10335_v33  ;;  %v9961_v33 = vadd.f32 %v17074_v53, %v17054_v50 }
 0x5f4   : > { %v9957_v49 = vadd.f32 %v17048_v3, %v17573_v31 }
 0x5f5   : > { %11916 = vmatmul.bf16.gmra.mxu2 %v11788_v2  ;;  %v11699_v15 = vmul.f32 %v17081_v26, %v11599_v30  ;;  %v11010_v46 = vpop.f32.mrf.mxu0 }
 0x5f6   : > { %v10336_v38 = vadd.f32 %v10261_v24, %v9957_v49 }
 0x5f7   : > { %v11735_v11 = vadd.f32 %v17087_v41, %v11699_v15 }
 0x5f8   : > { %v11877_v23 = vpop.f32.mrf.mxu2  ;;  %v11082_v34 = vadd.f32 %v11007_v59, %v10336_v38 }
 0x5f9   : > { %v11878_v10 = vadd.f32 %v17242_v63, %v11877_v23  ;;  %v11767_v18 = vmax.f32 %v11735_v11, 0.0  ;;  %v10266_v23 = vpop.f32.mrf.mxu3 }
 0x5fa   : > { %v11519_v0 = vpop.f32.mrf.mxu1 }
 0x5fb   : > { %11954 = vst [vmem:[%s17248_s29 + $0x10] sm:$0xff] %v11878_v10  ;;  %v11600_v37 = vadd.f32 %v11519_v0, %v11078_v58  ;;  %v10337_v0 = vadd.f32 %v10264_v29, %v17052_v52 }
 0x5fd   : > { %v11700_v20 = vmul.f32 %v17081_v26, %v11600_v37  ;;  %v11012_v13 = vpop.f32.mrf.mxu0 }
 0x5ff   : > { %v11736_v35 = vadd.f32 %v17087_v41, %v11700_v20 }
 0x600   : > { %v11879_v32 = vpop.f32.mrf.mxu2 }
 0x601   : > { %v11768_v1 = vmax.f32 %v11736_v35, 0.0  ;;  %v11880_v4 = vadd.f32 %v17242_v63, %v11879_v32  ;;  %v10269_v21 = vpop.f32.mrf.mxu3 }
 0x602   : > { %v11522_v27 = vpop.f32.mrf.mxu1 }
 0x603   : > { %11955 = vst [vmem:[%s17248_s29 + $0x18] sm:$0xff] %v11880_v4  ;;  %v11789_v7 = vpack.c.bf16 %v11768_v1, %v11767_v18  ;;  %v11601_v43 = vadd.f32 %v11522_v27, %v11079_v48  ;;  %v9959_v18 = vadd.f32 %v17062_v17, %v17038_v57  ;;  %v11083_v1 = vadd.f32 %v11010_v46, %v10337_v0 }
 0x605   : > { %11921 = vmatmul.bf16.gmra.mxu2 %v11789_v7  ;;  %v11701_v36 = vmul.f32 %v17081_v26, %v11601_v43  ;;  %v10338_v27 = vadd.f32 %v10266_v23, %v9959_v18  ;;  %v11015_v43 = vpop.f32.mrf.mxu0 }
 0x607   : > { %v11737_v16 = vadd.f32 %v17087_v41, %v11701_v36  ;;  %v11084_v47 = vadd.f32 %v11012_v13, %v10338_v27 }
 0x608   : > { %v11882_v25 = vpop.f32.mrf.mxu2 }
 0x609   : > { %v11883_v51 = vadd.f32 %v17242_v63, %v11882_v25  ;;  %v11769_v62 = vmax.f32 %v11737_v16, 0.0  ;;  %v10271_v36 = vpop.f32.mrf.mxu3 }
 0x60a   : > { %v11524_v60 = vpop.f32.mrf.mxu1 }
 0x60b   : > { %11956 = vst [vmem:[%s17248_s29 + $0x20] sm:$0xff] %v11883_v51  ;;  %v11602_v56 = vadd.f32 %v11524_v60, %v11080_v5  ;;  %v10339_v51 = vadd.f32 %v10269_v21, %v17066_v44 }
 0x60d   : > { %v11702_v61 = vmul.f32 %v17081_v26, %v11602_v56 }
 0x60f   : > { %v11738_v45 = vadd.f32 %v17087_v41, %v11702_v61 }
 0x610   : > { %v11884_v55 = vpop.f32.mrf.mxu2 }
 0x611   : > { %v11770_v40 = vmax.f32 %v11738_v45, 0.0  ;;  %v11885_v42 = vadd.f32 %v17242_v63, %v11884_v55  ;;  %v11085_v45 = vadd.f32 %v11015_v43, %v10339_v51  ;;  %v11017_v55 = vpop.f32.mrf.mxu0  ;;  %v10274_v44 = vpop.f32.mrf.mxu3 }
 0x612   : > { %v11527_v19 = vpop.f32.mrf.mxu1 }
 0x613   : > { %11957 = vst [vmem:[%s17248_s29 + $0x28] sm:$0xff] %v11885_v42  ;;  %v11790_v12 = vpack.c.bf16 %v11770_v40, %v11769_v62  ;;  %v11603_v54 = vadd.f32 %v11527_v19, %v11081_v8  ;;  %v10340_v62 = vadd.f32 %v10271_v36, %v9961_v33 }
 0x615   : > { %11926 = vmatmul.bf16.gmra.mxu2 %v11790_v12  ;;  %v11703_v6 = vmul.f32 %v17081_v26, %v11603_v54  ;;  %v11086_v49 = vadd.f32 %v11017_v55, %v10340_v62  ;;  %v10341_v54 = vadd.f32 %v10274_v44, %v17091_v39 }
 0x617   : > { %v11739_v3 = vadd.f32 %v17087_v41, %v11703_v6 }
 0x618   : > { %v11887_v2 = vpop.f32.mrf.mxu2 }
 0x619   : > { %v11888_v30 = vadd.f32 %v17242_v63, %v11887_v2  ;;  %v11771_v20 = vmax.f32 %v11739_v3, 0.0  ;;  %v11020_v38 = vpop.f32.mrf.mxu0  ;;  %v10276_v23 = vpop.f32.mrf.mxu3 }
 0x61a   : > { %v11529_v15 = vpop.f32.mrf.mxu1  ;;  %v11087_v3 = vadd.f32 %v11020_v38, %v10341_v54 }
 0x61b   : > { %11958 = vst [vmem:[%s17248_s29 + $0x30] sm:$0xff] %v11888_v30  ;;  %v11604_v10 = vadd.f32 %v11529_v15, %v11082_v34 }
 0x61d   : > { %v11704_v58 = vmul.f32 %v17081_v26, %v11604_v10  ;;  %v9963_v10 = vadd.f32 %v17235_v9, %v17068_v14 }
 0x61f   : > { %v11740_v37 = vadd.f32 %v17087_v41, %v11704_v58  ;;  %v10342_v0 = vadd.f32 %v10276_v23, %v9963_v10 }
 0x620   : > { %v11889_v11 = vpop.f32.mrf.mxu2 }
 0x621   : > { %v11772_v22 = vmax.f32 %v11740_v37, 0.0  ;;  %v11890_v35 = vadd.f32 %v17242_v63, %v11889_v11  ;;  %v11022_v39 = vpop.f32.mrf.mxu0 }
 0x622   : > { %v11532_v32 = vpop.f32.mrf.mxu1  ;;  %v11088_v11 = vadd.f32 %v11022_v39, %v10342_v0 }
 0x623   : > { %11959 = vst [vmem:[%s17248_s29 + $0x38] sm:$0xff] %v11890_v35  ;;  %v11791_v4 = vpack.c.bf16 %v11772_v22, %v11771_v20  ;;  %v11605_v28 = vadd.f32 %v11532_v32, %v11083_v1 }
 0x625   : > { %11931 = vmatmul.bf16.gmra.mxu2 %v11791_v4  ;;  %v11705_v48 = vmul.f32 %v17081_v26, %v11605_v28 }
 0x627   : > { %v11741_v57 = vadd.f32 %v17087_v41, %v11705_v48 }
 0x628   : > { %v11892_v52 = vpop.f32.mrf.mxu2 }
 0x629   : > { %v11893_v7 = vadd.f32 %v17242_v63, %v11892_v52  ;;  %v11773_v56 = vmax.f32 %v11741_v57, 0.0 }
 0x62a   : > { %v11534_v24 = vpop.f32.mrf.mxu1 }
 0x62b   : > { %11960 = vst [vmem:[%s17248_s29 + $0x40] sm:$0xff] %v11893_v7  ;;  %v11606_v25 = vadd.f32 %v11534_v24, %v11084_v47 }
 0x62d   : > { %v11706_v17 = vmul.f32 %v17081_v26, %v11606_v25 }
 0x62f   : > { %v11742_v5 = vadd.f32 %v17087_v41, %v11706_v17 }
 0x630   : > { %v11894_v60 = vpop.f32.mrf.mxu2 }
 0x631   : > { %v11774_v59 = vmax.f32 %v11742_v5, 0.0  ;;  %v11895_v16 = vadd.f32 %v17242_v63, %v11894_v60 }
 0x632   : > { %v11537_v61 = vpop.f32.mrf.mxu1 }
 0x633   : > { %11961 = vst [vmem:[%s17248_s29 + $0x48] sm:$0xff] %v11895_v16  ;;  %v11792_v29 = vpack.c.bf16 %v11774_v59, %v11773_v56  ;;  %v11607_v40 = vadd.f32 %v11537_v61, %v11085_v45 }
 0x635   : > { %11936 = vmatmul.bf16.gmra.mxu2 %v11792_v29  ;;  %v11707_v19 = vmul.f32 %v17081_v26, %v11607_v40 }
 0x637   : > { %v11743_v50 = vadd.f32 %v17087_v41, %v11707_v19 }
 0x638   : > { %v11897_v42 = vpop.f32.mrf.mxu2 }
 0x639   : > { %v11898_v31 = vadd.f32 %v17242_v63, %v11897_v42  ;;  %v11775_v6 = vmax.f32 %v11743_v50, 0.0 }
 0x63a   : > { %v11539_v8 = vpop.f32.mrf.mxu1 }
 0x63b   : > { %11962 = vst [vmem:[%s17248_s29 + $0x50] sm:$0xff] %v11898_v31  ;;  %v11608_v12 = vadd.f32 %v11539_v8, %v11086_v49 }
 0x63d   : > { %v11708_v53 = vmul.f32 %v17081_v26, %v11608_v12 }
 0x63f   : > { %v11744_v46 = vadd.f32 %v17087_v41, %v11708_v53 }
 0x640   : > { %v11899_v2 = vpop.f32.mrf.mxu2 }
 0x641   : > { %v11776_v30 = vmax.f32 %v11744_v46, 0.0  ;;  %v11900_v34 = vadd.f32 %v17242_v63, %v11899_v2 }
 0x642   : > { %v11542_v15 = vpop.f32.mrf.mxu1 }
 0x643   : > { %11963 = vst [vmem:[%s17248_s29 + $0x58] sm:$0xff] %v11900_v34  ;;  %v11793_v58 = vpack.c.bf16 %v11776_v30, %v11775_v6  ;;  %v11609_v37 = vadd.f32 %v11542_v15, %v11087_v3 }
 0x645   : > { %11941 = vmatmul.bf16.gmra.mxu2 %v11793_v58  ;;  %v11709_v20 = vmul.f32 %v17081_v26, %v11609_v37 }
 0x647   : > { %v11745_v14 = vadd.f32 %v17087_v41, %v11709_v20 }
 0x648   : > { %v11902_v13 = vpop.f32.mrf.mxu2 }
 0x649   : > { %v11903_v22 = vadd.f32 %v17242_v63, %v11902_v13  ;;  %v11777_v4 = vmax.f32 %v11745_v14, 0.0 }
 0x64a   : > { %v11544_v35 = vpop.f32.mrf.mxu1 }
 0x64b   : > { %11964 = vst [vmem:[%s17248_s29 + $0x60] sm:$0xff] %v11903_v22  ;;  %v11610_v32 = vadd.f32 %v11544_v35, %v11088_v11 }
 0x64d   : > { %v11710_v9 = vmul.f32 %v17081_v26, %v11610_v32 }
 0x64f   : > { %v11746_v18 = vadd.f32 %v17087_v41, %v11710_v9 }
 0x650   : > { %v11904_v1 = vpop.f32.mrf.mxu2 }
 0x651   : > { %v11778_v21 = vmax.f32 %v11746_v18, 0.0  ;;  %v11905_v27 = vadd.f32 %v17242_v63, %v11904_v1 }
 0x653   : > { %11965 = vst [vmem:[%s17248_s29 + $0x68] sm:$0xff] %v11905_v27  ;;  %v11794_v28 = vpack.c.bf16 %v11778_v21, %v11777_v4 }
 0x655   : > { %11946 = vmatmul.bf16.gmra.mxu2 %v11794_v28 }
 0x658   : > { %v11907_v52 = vpop.f32.mrf.mxu2 }
 0x659   : > { %v11908_v48 = vadd.f32 %v17242_v63, %v11907_v52 }
 0x65b   : > { %11966 = vst [vmem:[%s17248_s29 + $0x70] sm:$0xff] %v11908_v48 }
 0x660   : > { %v11909_v7 = vpop.f32.mrf.mxu2 }
 0x661   : > { %v11910_v26 = vadd.f32 %v17242_v63, %v11909_v7 }
 0x663   : > { %11967 = vst [vmem:[%s17248_s29 + $0x78] sm:$0xff] %v11910_v26 }
 0x668   : > { %v11912_v41 = vpop.f32.mrf.mxu2 }
 0x669   : > { %v11913_v47 = vadd.f32 %v17242_v63, %v11912_v41 }
 0x66b   : > { %11968 = vst [vmem:[%s17248_s29 + $0x80] sm:$0xff] %v11913_v47 }
 0x670   : > { %v11914_v43 = vpop.f32.mrf.mxu2 }
 0x671   : > { %v11915_v24 = vadd.f32 %v17242_v63, %v11914_v43 }
 0x673   : > { %11969 = vst [vmem:[%s17248_s29 + $0x88] sm:$0xff] %v11915_v24 }
 0x678   : > { %v11917_v25 = vpop.f32.mrf.mxu2 }
 0x679   : > { %v11918_v57 = vadd.f32 %v17242_v63, %v11917_v25 }
 0x67b   : > { %11970 = vst [vmem:[%s17248_s29 + $0x90] sm:$0xff] %v11918_v57 }
 0x680   : > { %v11919_v17 = vpop.f32.mrf.mxu2 }
 0x681   : > { %v11920_v36 = vadd.f32 %v17242_v63, %v11919_v17 }
 0x683   : > { %11971 = vst [vmem:[%s17248_s29 + $0x98] sm:$0xff] %v11920_v36 }
 0x688   : > { %v11922_v51 = vpop.f32.mrf.mxu2 }
 0x689   : > { %v11923_v5 = vadd.f32 %v17242_v63, %v11922_v51 }
 0x68b   : > { %11972 = vst [vmem:[%s17248_s29 + $0xa0] sm:$0xff] %v11923_v5 }
 0x690   : > { %v11924_v60 = vpop.f32.mrf.mxu2 }
 0x691   : > { %v11925_v56 = vadd.f32 %v17242_v63, %v11924_v60 }
 0x693   : > { %11973 = vst [vmem:[%s17248_s29 + $0xa8] sm:$0xff] %v11925_v56 }
 0x698   : > { %v11927_v59 = vpop.f32.mrf.mxu2 }
 0x699   : > { %v11928_v16 = vadd.f32 %v17242_v63, %v11927_v59 }
 0x69b   : > { %11974 = vst [vmem:[%s17248_s29 + $0xb0] sm:$0xff] %v11928_v16 }
 0x6a0   : > { %v11929_v61 = vpop.f32.mrf.mxu2 }
 0x6a1   : > { %v11930_v33 = vadd.f32 %v17242_v63, %v11929_v61 }
 0x6a3   : > { %11975 = vst [vmem:[%s17248_s29 + $0xb8] sm:$0xff] %v11930_v33 }
 0x6a8   : > { %v11932_v45 = vpop.f32.mrf.mxu2 }
 0x6a9   : > { %v11933_v29 = vadd.f32 %v17242_v63, %v11932_v45 }
 0x6ab   : > { %11976 = vst [vmem:[%s17248_s29 + $0xc0] sm:$0xff] %v11933_v29 }
 0x6b0   : > { %v11934_v55 = vpop.f32.mrf.mxu2 }
 0x6b1   : > { %v11935_v62 = vadd.f32 %v17242_v63, %v11934_v55 }
 0x6b3   : > { %11977 = vst [vmem:[%s17248_s29 + $0xc8] sm:$0xff] %v11935_v62 }
 0x6b8   : > { %v11937_v40 = vpop.f32.mrf.mxu2 }
 0x6b9   : > { %v11938_v44 = vadd.f32 %v17242_v63, %v11937_v40 }
 0x6bb   : > { %11978 = vst [vmem:[%s17248_s29 + $0xd0] sm:$0xff] %v11938_v44 }
 0x6c0   : > { %v11939_v42 = vpop.f32.mrf.mxu2 }
 0x6c1   : > { %v11940_v19 = vadd.f32 %v17242_v63, %v11939_v42 }
 0x6c3   : > { %11979 = vst [vmem:[%s17248_s29 + $0xd8] sm:$0xff] %v11940_v19 }
 0x6c8   : > { %v11942_v31 = vpop.f32.mrf.mxu2 }
 0x6c9   : > { %v11943_v49 = vadd.f32 %v17242_v63, %v11942_v31 }
 0x6cb   : > { %11980 = vst [vmem:[%s17248_s29 + $0xe0] sm:$0xff] %v11943_v49 }
 0x6d0   : > { %v11944_v8 = vpop.f32.mrf.mxu2 }
 0x6d1   : > { %v11945_v12 = vadd.f32 %v17242_v63, %v11944_v8 }
 0x6d3   : > { %11981 = vst [vmem:[%s17248_s29 + $0xe8] sm:$0xff] %v11945_v12 }
 0x6d8   : > { %v11947_v38 = vpop.f32.mrf.mxu2 }
 0x6d9   : > { %v11948_v50 = vadd.f32 %v17242_v63, %v11947_v38 }
 0x6db   : > { %11982 = vst [vmem:[%s17248_s29 + $0xf0] sm:$0xff] %v11948_v50 }
 0x6e0   : > { %v11949_v53 = vpop.f32.mrf.mxu2 }
 0x6e1   : > { %v11950_v54 = vadd.f32 %v17242_v63, %v11949_v53 }
 0x6e3   : > { %11983 = vst [vmem:[%s17248_s29 + $0xf8] sm:$0xff] %v11950_v54 }
 0x6e4   : > { %13781 = shalt.err (!%p13778_p11)
}
 0x6e5   : > { %s13839_s3 = smov 128   ;;  %s13840_s29 = smov 8  }
 0x6e6   : > { %13513 = dma.vmem_to_hbm [thread:$0]  (%p13985_p3), %s11998_s28, 4096, %s12000_s26, %s11985_s22, %s13839_s3, %s13839_s3, %s13840_s29  }
 0x6e7 PF: > { %s12014_s9 = sand.u32 1, %s13816_s17   ;;  %p17574_p12 = scmp.ge.s32.totalorder %s13828_s20, 2 }
 0x6e8   : > { %s12015_s12 = scalar_lea.sflag [#allocation7], %s12014_s9 }
 0x6e9   : > { %p13533_p13 = pnand %p17574_p12, %p13936_p6 }
 0x6eb   : > { %p13534_p0 = pneg %p13533_p13 }
 0x6ed   : > { %13811 = dma.done.wait (%p13534_p0), %s12015_s12, 4096  }
 0x6ee   : > { %13813 = vsyncadd (%p13534_p0), %s12015_s12, 4294963200  ;;  %s17575_s6 = sld [smem:[#allocation19_spill]]  ;;  %p26_p5 = scmp.ge.s32.totalorder %s13975_s15, 4  }
 0x6ef   : > { %s17576_s17 = smov %s13820_s18  ;;  %s17577_s18 = smov %s13824_s19 }
 0x6f0   : > { %s17579_s20 = smov %s13975_s15  ;;  %28 = sbr.rel (!%p26_p5) target bundleno = 12 (0xc), region = 147 }
 0x6f4   : > { %s17578_s19 = smov %s17575_s6 }
 0x6f5   :  { %12021 = vsyncpa [#allocation6], 1 }
 0x6f6   :  { %12023 = vsyncpa [#allocation6 + $0x1], 1 }
 0x6f7   :  { %12024 = vsyncpa [#allocation9], 1 }
 0x6f8   :  { %12025 = vsyncpa [#allocation12], 1 }
 0x6f9   :  { %12026 = vsyncpa [#allocation7], 1 }
 0x6fa   :  { %12028 = vsyncpa [#allocation7 + $0x1], 1 }

</bundles_post_ra>
